<compile_context>
chip_gen: v6e
topology: v6e:2x2x1
jax: 0.10.0
libtpu: 0.0.40
codegen_flags: <defaults>
</compile_context>

<pallas_src>
import jax
import jax.numpy as jnp
from jax.experimental import pallas as pl
from jax.experimental.pallas import tpu as pltpu

LANE = 128
SUBLANE = 8


def _silu(x):
    return x * jax.nn.sigmoid(x)


def _round_up(a, m):
    return (a + m - 1) // m * m


# --------------------------- fused ResBlock kernel ---------------------------
def _make_resblock_kernel(identity_res, W, TH, Wp, use_roll):
    def roll_w(x, shift):
        # circular shift along the width (sublane) axis; wrapped values always
        # come from zero-padding columns, so no masking is needed.
        if use_roll:
            return pltpu.roll(x, shift, axis=1)
        if shift == 1:
            return jnp.concatenate([x[:, -1:, :], x[:, :-1, :]], axis=1)
        return jnp.concatenate([x[:, 1:, :], x[:, :1, :]], axis=1)

    def kernel(x_ref, w1_ref, w2_ref, wr_ref, sc_ref, sh_ref, b2_ref, br_ref,
               o_ref, h_sc):
        # x_ref : (H+4, Wp, Ci)   input, 2 zero rows top/bottom, >=1 zero col each side
        # w1_ref: (3,3,Ci,Co)  w2_ref: (3,3,Co,Co)  wr_ref: (Ci,Co)
        # sc_ref/sh_ref: (1, Co)  per-batch (scale+1) and (shift + b1*(scale+1)), f32
        # o_ref : (TH*Wp, Co)     one padded-width row tile of the output
        # h_sc  : (TH+2, Wp, Co)  VMEM scratch: block1 output incl. 1-row halo
        Ci = x_ref.shape[2]
        Co = h_sc.shape[2]
        cdt = x_ref.dtype
        M1 = (TH + 2) * Wp
        M2 = TH * Wp

        r = pl.program_id(1)
        h0 = r * TH
        if TH % 8 == 0:
            h0 = pl.multiple_of(h0, 8)

        # ---- block1: conv3x3(x), modulation, SiLU on TH+2 rows (halo incl.) ----
        xin = x_ref[pl.ds(h0, TH + 4), :, :]                   # (TH+4, Wp, Ci)
        x_by_kw = (roll_w(xin, 1), xin, roll_w(xin, -1))

        acc1 = None
        for kh in range(3):
            for kw in range(3):
                tap = x_by_kw[kw][kh:kh + TH + 2].reshape(M1, Ci)
                d = jnp.dot(tap, w1_ref[kh, kw],
                            preferred_element_type=jnp.float32)
                acc1 = d if acc1 is None else acc1 + d

        # bias + '+1' already folded into sc/sh in the wrapper
        h1 = _silu(acc1 * sc_ref[...] + sh_ref[...])           # f32 (M1, Co)
        h_sc[...] = h1.reshape(TH + 2, Wp, Co).astype(cdt)

        # h's conv zero-padding: the two halo columns, and the halo rows only on
        # the first / last row tile (cheap, instead of a full-tile mask).
        zcol = jnp.zeros((TH + 2, 1, Co), cdt)
        h_sc[:, 0:1, :] = zcol
        h_sc[:, W + 1:W + 2, :] = zcol
        zrow = jnp.zeros((1, Wp, Co), cdt)

        @pl.when(r == 0)
        def _():
            h_sc[0:1, :, :] = zrow

        @pl.when(r == pl.num_programs(1) - 1)
        def _():
            h_sc[TH + 1:TH + 2, :, :] = zrow

        # ---- block2: conv3x3(h) + b2, SiLU -------------------------------------
        h_all = h_sc[...]                                      # (TH+2, Wp, Co)
        h_by_kw = (roll_w(h_all, 1), h_all, roll_w(h_all, -1))

        acc2 = None
        for kh in range(3):
            for kw in range(3):
                tap = h_by_kw[kw][kh:kh + TH].reshape(M2, Co)
                d = jnp.dot(tap, w2_ref[kh, kw],
                            preferred_element_type=jnp.float32)
                acc2 = d if acc2 is None else acc2 + d
        h2 = _silu(acc2 + b2_ref[...])

        # ---- residual: 1x1 conv (or identity) + add -----------------------------
        x_tile = xin[2:2 + TH].reshape(M2, Ci)
        if identity_res:
            res = x_tile.astype(jnp.float32)
        else:
            res = jnp.dot(x_tile, wr_ref[...],
                          preferred_element_type=jnp.float32) + br_ref[...]

        o_ref[...] = (h2 + res).astype(o_ref.dtype)

    return kernel


# ------------------------------ tile-size choice ------------------------------
def _choose_tile_h(H, Wp, Ci, Co, itemsize, batch, vmem_budget, max_elems=2048):
    divs = [d for d in range(1, H + 1) if H % d == 0]

    def vmem_est(th):
        x_res = (H + 4) * Wp * Ci * itemsize                    # resident image (1-buf)
        wts = (9 * Ci * Co + 9 * Co * Co + Ci * Co) * itemsize  # weights (1-buf)
        out_t = 2 * th * Wp * Co * itemsize                     # double-buffered out
        h_scr = (th + 2) * Wp * Co * itemsize                   # h scratch
        tmp = (3 * (th + 4) * Wp * Ci + 3 * (th + 2) * Wp * Co) * itemsize \
            + ((th + 2) + th) * Wp * Co * 4                     # rolls + f32 accs
        return x_res + wts + out_t + h_scr + tmp

    fits = [d for d in divs if d * Wp <= max_elems and vmem_est(d) <= vmem_budget]
    pool = fits if fits else [min(divs)]
    aligned = [d for d in pool if d % 8 == 0]
    if aligned:
        pool = aligned
    th = max(pool)
    # keep at least 2 total grid steps so both v7x TensorCores get work
    if batch * (H // th) < 2:
        smaller = [d for d in pool if H // d >= 2]
        if smaller:
            th = max(smaller)
    return th


# ------------------------------ public wrapper ------------------------------
def resblock_forward(x_nchw, time_emb, params, tile_h=None):
    """SR3 ResBlock forward.  x: NCHW.  Returns NCHW."""
    x = jnp.transpose(x_nchw, (0, 2, 3, 1))                    # NHWC
    B, H, W, Cin = x.shape
    w1 = params["w1"]                                          # (3,3,Cin,Cout) HWIO
    Cout = w1.shape[-1]
    dtype = x.dtype
    itemsize = jnp.dtype(dtype).itemsize

    Ci = _round_up(Cin, LANE)        # lane-pad channels -> lane-dense VPU/store work
    Co = _round_up(Cout, LANE)
    Wp = _round_up(W + 2, SUBLANE)   # >=1 zero column each side, sublane aligned

    # ---- time-embedding MLP (tiny) in plain JAX; fold b1 and '+1' here --------
    if time_emb is not None and params.get("w_mlp") is not None:
        ss = _silu(time_emb) @ params["w_mlp"] + params["b_mlp"]  # (B, 2*Cout)
        scale, shift = ss[:, :Cout], ss[:, Cout:]
    else:
        scale = jnp.zeros((B, Cout), jnp.float32)
        shift = jnp.zeros((B, Cout), jnp.float32)
    scale1 = scale.astype(jnp.float32) + 1.0                    # (scale + 1)
    shift_e = shift.astype(jnp.float32) + params["b1"].reshape(1, Cout) * scale1
    sc_p = jnp.pad(scale1, ((0, 0), (0, Co - Cout))).reshape(B, 1, Co)
    sh_p = jnp.pad(shift_e, ((0, 0), (0, Co - Cout))).reshape(B, 1, Co)

    # ---- lane/sublane padded operands (pad values are zeros -> results exact) --
    x_pad = jnp.pad(x, ((0, 0), (2, 2), (1, Wp - W - 1), (0, Ci - Cin)))
    w1p = jnp.pad(w1, ((0, 0), (0, 0), (0, Ci - Cin), (0, Co - Cout))).astype(dtype)
    w2p = jnp.pad(params["w2"],
                  ((0, 0), (0, 0), (0, Co - Cout), (0, Co - Cout))).astype(dtype)
    b2p = jnp.pad(params["b2"], (0, Co - Cout)).reshape(1, Co).astype(jnp.float32)

    w_res = params.get("w_res")
    identity_res = w_res is None
    if identity_res:
        assert Cin == Cout, "identity residual requires dim_in == dim_out"
        wrp = jnp.zeros((Ci, Co), dtype)                        # unused
        brp = jnp.zeros((1, Co), jnp.float32)
    else:
        wrp = jnp.pad(w_res, ((0, Ci - Cin), (0, Co - Cout))).astype(dtype)
        brp = jnp.pad(params["b_res"], (0, Co - Cout)).reshape(1, Co).astype(jnp.float32)

    # ---- generation-aware VMEM budget ------------------------------------------
    try:
        vmem_cap = int(pltpu.get_tpu_info().vmem_capacity_bytes)
    except Exception:
        vmem_cap = 128 * 1024 * 1024
    vmem_limit = min(int(vmem_cap * 3 // 4), 100 * 1024 * 1024)  # 48M-class on v7x

    TH = tile_h if tile_h is not None else _choose_tile_h(
        H, Wp, Ci, Co, itemsize, B, int(vmem_limit * 0.8))
    assert H % TH == 0, "tile_h must divide H"

    n_steps = B * (H // TH)
    flops = n_steps * (2 * (TH + 2) * Wp * 9 * Ci * Co
                       + 2 * TH * Wp * 9 * Co * Co
                       + (0 if identity_res else 2 * TH * Wp * Ci * Co))
    cost = pl.CostEstimate(
        flops=int(flops),
        transcendentals=int(n_steps * ((TH + 2) + TH) * Wp * Co),
        bytes_accessed=int((x_pad.size + B * H * Wp * Co) * itemsize
                           + (w1p.size + w2p.size + wrp.size) * itemsize))

    def run(single_buffer, use_roll):
        kernel = _make_resblock_kernel(identity_res, W, TH, Wp, use_roll)
        # single-buffer the batch-resident image / constant weights (their block
        # never changes along the row-tile axis); fall back to default buffering
        # if pipeline_mode is unavailable in this jax build.
        sb = {"pipeline_mode": pl.Buffered(1)} if single_buffer else {}
        in_specs = [
            pl.BlockSpec((None, H + 4, Wp, Ci), lambda b, r: (b, 0, 0, 0), **sb),
            pl.BlockSpec((3, 3, Ci, Co), lambda b, r: (0, 0, 0, 0), **sb),
            pl.BlockSpec((3, 3, Co, Co), lambda b, r: (0, 0, 0, 0), **sb),
            pl.BlockSpec((Ci, Co), lambda b, r: (0, 0), **sb),
            pl.BlockSpec((None, 1, Co), lambda b, r: (b, 0, 0)),
            pl.BlockSpec((None, 1, Co), lambda b, r: (b, 0, 0)),
            pl.BlockSpec((1, Co), lambda b, r: (0, 0)),
            pl.BlockSpec((1, Co), lambda b, r: (0, 0)),
        ]
        return pl.pallas_call(
            kernel,
            out_shape=jax.ShapeDtypeStruct((B, H * Wp, Co), dtype),
            grid=(B, H // TH),
            in_specs=in_specs,
            # lane-dense output: last dim Co is a multiple of 128
            out_specs=pl.BlockSpec((None, TH * Wp, Co), lambda b, r: (b, r, 0)),
            scratch_shapes=[pltpu.VMEM((TH + 2, Wp, Co), dtype)],
            compiler_params=pltpu.CompilerParams(
                dimension_semantics=("parallel", "parallel"),
                vmem_limit_bytes=vmem_limit),
            cost_estimate=cost,
        )(x_pad, w1p, w2p, wrp, sc_p, sh_p, b2p, brp)

    last_err = None
    out_flat = None
    for single_buffer, use_roll in ((True, True), (False, True), (False, False)):
        try:
            out_flat = run(single_buffer, use_roll)
            break
        except Exception as e:          # pragma: no cover - feature fallback
            last_err = e
    if out_flat is None:
        raise last_err

    out = out_flat.reshape(B, H, Wp, Co)[:, :, 1:W + 1, :Cout]
    return jnp.transpose(out, (0, 3, 1, 2))                    # back to NCHW


# ----------------------------- pure-JAX reference -----------------------------
def ref_forward(x_nchw, time_emb, params):
    x = jnp.transpose(x_nchw, (0, 2, 3, 1))
    B = x.shape[0]
    Cout = params["w1"].shape[-1]
    dn = ("NHWC", "HWIO", "NHWC")
    if time_emb is not None and params.get("w_mlp") is not None:
        te = _silu(time_emb) @ params["w_mlp"] + params["b_mlp"]
        scale, shift = te[:, :Cout], te[:, Cout:]
    else:
        scale = jnp.zeros((B, Cout), x.dtype)
        shift = jnp.zeros((B, Cout), x.dtype)
    h = jax.lax.conv_general_dilated(x, params["w1"], (1, 1), "SAME",
                                     dimension_numbers=dn) + params["b1"]
    h = h * (scale[:, None, None, :] + 1.0) + shift[:, None, None, :]
    h = _silu(h)
    h = jax.lax.conv_general_dilated(h, params["w2"], (1, 1), "SAME",
                                     dimension_numbers=dn) + params["b2"]
    h = _silu(h)
    if params.get("w_res") is not None:
        res = jax.lax.conv_general_dilated(
            x, params["w_res"][None, None], (1, 1), "SAME",
            dimension_numbers=dn) + params["b_res"]
    else:
        res = x
    return jnp.transpose(h + res, (0, 3, 1, 2))


if __name__ == "__main__":
    B, C_in, C_out, H, W, T_dim = 2, 4, 8, 16, 16, 8

    key = jax.random.PRNGKey(0)
    kx, kt, k1, k2, k3, k4 = jax.random.split(key, 6)

    x = jax.random.normal(kx, (B, C_in, H, W), jnp.float32)      # NCHW like PyTorch
    time_emb = jax.random.normal(kt, (B, T_dim), jnp.float32)

    params = {
        "w_mlp": 0.1 * jax.random.normal(k1, (T_dim, 2 * C_out), jnp.float32),
        "b_mlp": 0.01 * jnp.arange(2 * C_out, dtype=jnp.float32),
        "w1":    0.1 * jax.random.normal(k2, (3, 3, C_in, C_out), jnp.float32),   # HWIO
        "b1":    0.01 * jnp.arange(C_out, dtype=jnp.float32),
        "w2":    0.1 * jax.random.normal(k3, (3, 3, C_out, C_out), jnp.float32),
        "b2":    0.02 * jnp.arange(C_out, dtype=jnp.float32),
        "w_res": 0.1 * jax.random.normal(k4, (C_in, C_out), jnp.float32),          # 1x1 conv
        "b_res": 0.03 * jnp.arange(C_out, dtype=jnp.float32),
    }

    out = resblock_forward(x, time_emb, params)
    jax.block_until_ready(out)

    ref = ref_forward(x, time_emb, params)
    assert out.shape == (B, C_out, H, W)
    assert jnp.allclose(out, ref, atol=1e-3, rtol=1e-3), "mismatch vs reference"

    print("KERNEL_OK")
</pallas_src>

<mosaic_0001>
module attributes {stable_mosaic.version = 11 : i64} {
  func.func @kernel(%arg0: i32, %arg1: i32, %arg2: memref<1x20x24x128xf32, #tpu.memory_space<vmem>>, %arg3: memref<3x3x128x128xf32, #tpu.memory_space<vmem>>, %arg4: memref<3x3x128x128xf32, #tpu.memory_space<vmem>>, %arg5: memref<128x128xf32, #tpu.memory_space<vmem>>, %arg6: memref<1x1x128xf32, #tpu.memory_space<vmem>>, %arg7: memref<1x1x128xf32, #tpu.memory_space<vmem>>, %arg8: memref<1x128xf32, #tpu.memory_space<vmem>>, %arg9: memref<1x128xf32, #tpu.memory_space<vmem>>, %arg10: memref<1x384x128xf32, #tpu.memory_space<vmem>>, %arg11: memref<18x24x128xf32, #tpu.memory_space<vmem>>) attributes {dimension_semantics = [#tpu.dimension_semantics<parallel>, #tpu.dimension_semantics<parallel>], iteration_bounds = array<i64: 2, 1>, scalar_prefetch = 0 : i64, scratch_operands = 1 : i64, tpu.core_type = #tpu.core_type<tc>, window_params = [{transform_indices = @transform_0, window_bounds = array<i64: 1, 20, 24, 128>}, {pipeline_mode = #tpu.pipeline_mode<synchronous>, transform_indices = @transform_1, window_bounds = array<i64: 3, 3, 128, 128>}, {pipeline_mode = #tpu.pipeline_mode<synchronous>, transform_indices = @transform_2, window_bounds = array<i64: 3, 3, 128, 128>}, {pipeline_mode = #tpu.pipeline_mode<synchronous>, transform_indices = @transform_3, window_bounds = array<i64: 128, 128>}, {transform_indices = @transform_4, window_bounds = array<i64: 1, 1, 128>}, {transform_indices = @transform_5, window_bounds = array<i64: 1, 1, 128>}, {pipeline_mode = #tpu.pipeline_mode<synchronous>, transform_indices = @transform_6, window_bounds = array<i64: 1, 128>}, {pipeline_mode = #tpu.pipeline_mode<synchronous>, transform_indices = @transform_7, window_bounds = array<i64: 1, 128>}, {transform_indices = @transform_8, window_bounds = array<i64: 1, 384, 128>}]} {
    %c16_i32 = arith.constant 16 : i32
    %0 = arith.muli %arg1, %c16_i32 : i32
    %1 = tpu.assume_multiple %0, 8 : i32
    %c0 = arith.constant 0 : index
    %2 = arith.index_cast %1 : i32 to index
    %c0_0 = arith.constant 0 : index
    %c0_1 = arith.constant 0 : index
    %3 = vector.load %arg2[%c0, %2, %c0_0, %c0_1] : memref<1x20x24x128xf32, #tpu.memory_space<vmem>>, vector<1x20x24x128xf32>
    %4 = vector.shape_cast %3 : vector<1x20x24x128xf32> to vector<20x24x128xf32>
    %5 = vector.extract_strided_slice %4 {offsets = [0, 23, 0], sizes = [20, 1, 128], strides = [1, 1, 1]} : vector<20x24x128xf32> to vector<20x1x128xf32>
    %6 = vector.extract_strided_slice %4 {offsets = [0, 0, 0], sizes = [20, 23, 128], strides = [1, 1, 1]} : vector<20x24x128xf32> to vector<20x23x128xf32>
    %7 = tpu.concatenate %5, %6 in 1 : vector<20x1x128xf32>, vector<20x23x128xf32> -> vector<20x24x128xf32>
    %8 = vector.extract_strided_slice %4 {offsets = [0, 1, 0], sizes = [20, 23, 128], strides = [1, 1, 1]} : vector<20x24x128xf32> to vector<20x23x128xf32>
    %9 = vector.extract_strided_slice %4 {offsets = [0, 0, 0], sizes = [20, 1, 128], strides = [1, 1, 1]} : vector<20x24x128xf32> to vector<20x1x128xf32>
    %10 = tpu.concatenate %8, %9 in 1 : vector<20x23x128xf32>, vector<20x1x128xf32> -> vector<20x24x128xf32>
    %11 = vector.extract_strided_slice %7 {offsets = [0, 0, 0], sizes = [18, 24, 128], strides = [1, 1, 1]} : vector<20x24x128xf32> to vector<18x24x128xf32>
    %12 = vector.shape_cast %11 : vector<18x24x128xf32> to vector<432x128xf32>
    %c0_2 = arith.constant 0 : index
    %c0_3 = arith.constant 0 : index
    %c0_4 = arith.constant 0 : index
    %c0_5 = arith.constant 0 : index
    %13 = vector.load %arg3[%c0_2, %c0_3, %c0_4, %c0_5] : memref<3x3x128x128xf32, #tpu.memory_space<vmem>>, vector<1x1x128x128xf32>
    %14 = vector.shape_cast %13 : vector<1x1x128x128xf32> to vector<128x128xf32>
    %cst = arith.constant dense<0.000000e+00> : vector<432x128xf32>
    %15 = tpu.matmul %12, %14, %cst {dimension_numbers = #tpu.dot_dimension_numbers<[1], [0], [0], [1], [0, 0, 1, 1], [], []>} : vector<432x128xf32>, vector<128x128xf32>, vector<432x128xf32> -> vector<432x128xf32>
    %16 = vector.extract_strided_slice %4 {offsets = [0, 0, 0], sizes = [18, 24, 128], strides = [1, 1, 1]} : vector<20x24x128xf32> to vector<18x24x128xf32>
    %17 = vector.shape_cast %16 : vector<18x24x128xf32> to vector<432x128xf32>
    %c0_6 = arith.constant 0 : index
    %c1 = arith.constant 1 : index
    %c0_7 = arith.constant 0 : index
    %c0_8 = arith.constant 0 : index
    %18 = vector.load %arg3[%c0_6, %c1, %c0_7, %c0_8] : memref<3x3x128x128xf32, #tpu.memory_space<vmem>>, vector<1x1x128x128xf32>
    %19 = vector.shape_cast %18 : vector<1x1x128x128xf32> to vector<128x128xf32>
    %cst_9 = arith.constant dense<0.000000e+00> : vector<432x128xf32>
    %20 = tpu.matmul %17, %19, %cst_9 {dimension_numbers = #tpu.dot_dimension_numbers<[1], [0], [0], [1], [0, 0, 1, 1], [], []>} : vector<432x128xf32>, vector<128x128xf32>, vector<432x128xf32> -> vector<432x128xf32>
    %21 = arith.addf %15, %20 : vector<432x128xf32>
    %22 = vector.extract_strided_slice %10 {offsets = [0, 0, 0], sizes = [18, 24, 128], strides = [1, 1, 1]} : vector<20x24x128xf32> to vector<18x24x128xf32>
    %23 = vector.shape_cast %22 : vector<18x24x128xf32> to vector<432x128xf32>
    %c0_10 = arith.constant 0 : index
    %c2 = arith.constant 2 : index
    %c0_11 = arith.constant 0 : index
    %c0_12 = arith.constant 0 : index
    %24 = vector.load %arg3[%c0_10, %c2, %c0_11, %c0_12] : memref<3x3x128x128xf32, #tpu.memory_space<vmem>>, vector<1x1x128x128xf32>
    %25 = vector.shape_cast %24 : vector<1x1x128x128xf32> to vector<128x128xf32>
    %cst_13 = arith.constant dense<0.000000e+00> : vector<432x128xf32>
    %26 = tpu.matmul %23, %25, %cst_13 {dimension_numbers = #tpu.dot_dimension_numbers<[1], [0], [0], [1], [0, 0, 1, 1], [], []>} : vector<432x128xf32>, vector<128x128xf32>, vector<432x128xf32> -> vector<432x128xf32>
    %27 = arith.addf %21, %26 : vector<432x128xf32>
    %28 = vector.extract_strided_slice %7 {offsets = [1, 0, 0], sizes = [18, 24, 128], strides = [1, 1, 1]} : vector<20x24x128xf32> to vector<18x24x128xf32>
    %29 = vector.shape_cast %28 : vector<18x24x128xf32> to vector<432x128xf32>
    %c1_14 = arith.constant 1 : index
    %c0_15 = arith.constant 0 : index
    %c0_16 = arith.constant 0 : index
    %c0_17 = arith.constant 0 : index
    %30 = vector.load %arg3[%c1_14, %c0_15, %c0_16, %c0_17] : memref<3x3x128x128xf32, #tpu.memory_space<vmem>>, vector<1x1x128x128xf32>
    %31 = vector.shape_cast %30 : vector<1x1x128x128xf32> to vector<128x128xf32>
    %cst_18 = arith.constant dense<0.000000e+00> : vector<432x128xf32>
    %32 = tpu.matmul %29, %31, %cst_18 {dimension_numbers = #tpu.dot_dimension_numbers<[1], [0], [0], [1], [0, 0, 1, 1], [], []>} : vector<432x128xf32>, vector<128x128xf32>, vector<432x128xf32> -> vector<432x128xf32>
    %33 = arith.addf %27, %32 : vector<432x128xf32>
    %34 = vector.extract_strided_slice %4 {offsets = [1, 0, 0], sizes = [18, 24, 128], strides = [1, 1, 1]} : vector<20x24x128xf32> to vector<18x24x128xf32>
    %35 = vector.shape_cast %34 : vector<18x24x128xf32> to vector<432x128xf32>
    %c1_19 = arith.constant 1 : index
    %c1_20 = arith.constant 1 : index
    %c0_21 = arith.constant 0 : index
    %c0_22 = arith.constant 0 : index
    %36 = vector.load %arg3[%c1_19, %c1_20, %c0_21, %c0_22] : memref<3x3x128x128xf32, #tpu.memory_space<vmem>>, vector<1x1x128x128xf32>
    %37 = vector.shape_cast %36 : vector<1x1x128x128xf32> to vector<128x128xf32>
    %cst_23 = arith.constant dense<0.000000e+00> : vector<432x128xf32>
    %38 = tpu.matmul %35, %37, %cst_23 {dimension_numbers = #tpu.dot_dimension_numbers<[1], [0], [0], [1], [0, 0, 1, 1], [], []>} : vector<432x128xf32>, vector<128x128xf32>, vector<432x128xf32> -> vector<432x128xf32>
    %39 = arith.addf %33, %38 : vector<432x128xf32>
    %40 = vector.extract_strided_slice %10 {offsets = [1, 0, 0], sizes = [18, 24, 128], strides = [1, 1, 1]} : vector<20x24x128xf32> to vector<18x24x128xf32>
    %41 = vector.shape_cast %40 : vector<18x24x128xf32> to vector<432x128xf32>
    %c1_24 = arith.constant 1 : index
    %c2_25 = arith.constant 2 : index
    %c0_26 = arith.constant 0 : index
    %c0_27 = arith.constant 0 : index
    %42 = vector.load %arg3[%c1_24, %c2_25, %c0_26, %c0_27] : memref<3x3x128x128xf32, #tpu.memory_space<vmem>>, vector<1x1x128x128xf32>
    %43 = vector.shape_cast %42 : vector<1x1x128x128xf32> to vector<128x128xf32>
    %cst_28 = arith.constant dense<0.000000e+00> : vector<432x128xf32>
    %44 = tpu.matmul %41, %43, %cst_28 {dimension_numbers = #tpu.dot_dimension_numbers<[1], [0], [0], [1], [0, 0, 1, 1], [], []>} : vector<432x128xf32>, vector<128x128xf32>, vector<432x128xf32> -> vector<432x128xf32>
    %45 = arith.addf %39, %44 : vector<432x128xf32>
    %46 = vector.extract_strided_slice %7 {offsets = [2, 0, 0], sizes = [18, 24, 128], strides = [1, 1, 1]} : vector<20x24x128xf32> to vector<18x24x128xf32>
    %47 = vector.shape_cast %46 : vector<18x24x128xf32> to vector<432x128xf32>
    %c2_29 = arith.constant 2 : index
    %c0_30 = arith.constant 0 : index
    %c0_31 = arith.constant 0 : index
    %c0_32 = arith.constant 0 : index
    %48 = vector.load %arg3[%c2_29, %c0_30, %c0_31, %c0_32] : memref<3x3x128x128xf32, #tpu.memory_space<vmem>>, vector<1x1x128x128xf32>
    %49 = vector.shape_cast %48 : vector<1x1x128x128xf32> to vector<128x128xf32>
    %cst_33 = arith.constant dense<0.000000e+00> : vector<432x128xf32>
    %50 = tpu.matmul %47, %49, %cst_33 {dimension_numbers = #tpu.dot_dimension_numbers<[1], [0], [0], [1], [0, 0, 1, 1], [], []>} : vector<432x128xf32>, vector<128x128xf32>, vector<432x128xf32> -> vector<432x128xf32>
    %51 = arith.addf %45, %50 : vector<432x128xf32>
    %52 = vector.extract_strided_slice %4 {offsets = [2, 0, 0], sizes = [18, 24, 128], strides = [1, 1, 1]} : vector<20x24x128xf32> to vector<18x24x128xf32>
    %53 = vector.shape_cast %52 : vector<18x24x128xf32> to vector<432x128xf32>
    %c2_34 = arith.constant 2 : index
    %c1_35 = arith.constant 1 : index
    %c0_36 = arith.constant 0 : index
    %c0_37 = arith.constant 0 : index
    %54 = vector.load %arg3[%c2_34, %c1_35, %c0_36, %c0_37] : memref<3x3x128x128xf32, #tpu.memory_space<vmem>>, vector<1x1x128x128xf32>
    %55 = vector.shape_cast %54 : vector<1x1x128x128xf32> to vector<128x128xf32>
    %cst_38 = arith.constant dense<0.000000e+00> : vector<432x128xf32>
    %56 = tpu.matmul %53, %55, %cst_38 {dimension_numbers = #tpu.dot_dimension_numbers<[1], [0], [0], [1], [0, 0, 1, 1], [], []>} : vector<432x128xf32>, vector<128x128xf32>, vector<432x128xf32> -> vector<432x128xf32>
    %57 = arith.addf %51, %56 : vector<432x128xf32>
    %58 = vector.extract_strided_slice %10 {offsets = [2, 0, 0], sizes = [18, 24, 128], strides = [1, 1, 1]} : vector<20x24x128xf32> to vector<18x24x128xf32>
    %59 = vector.shape_cast %58 : vector<18x24x128xf32> to vector<432x128xf32>
    %c2_39 = arith.constant 2 : index
    %c2_40 = arith.constant 2 : index
    %c0_41 = arith.constant 0 : index
    %c0_42 = arith.constant 0 : index
    %60 = vector.load %arg3[%c2_39, %c2_40, %c0_41, %c0_42] : memref<3x3x128x128xf32, #tpu.memory_space<vmem>>, vector<1x1x128x128xf32>
    %61 = vector.shape_cast %60 : vector<1x1x128x128xf32> to vector<128x128xf32>
    %cst_43 = arith.constant dense<0.000000e+00> : vector<432x128xf32>
    %62 = tpu.matmul %59, %61, %cst_43 {dimension_numbers = #tpu.dot_dimension_numbers<[1], [0], [0], [1], [0, 0, 1, 1], [], []>} : vector<432x128xf32>, vector<128x128xf32>, vector<432x128xf32> -> vector<432x128xf32>
    %63 = arith.addf %57, %62 : vector<432x128xf32>
    %c0_44 = arith.constant 0 : index
    %c0_45 = arith.constant 0 : index
    %c0_46 = arith.constant 0 : index
    %64 = vector.load %arg6[%c0_44, %c0_45, %c0_46] : memref<1x1x128xf32, #tpu.memory_space<vmem>>, vector<1x1x128xf32>
    %65 = vector.shape_cast %64 : vector<1x1x128xf32> to vector<1x128xf32>
    %66 = vector.broadcast %65 : vector<1x128xf32> to vector<432x128xf32>
    %67 = arith.mulf %63, %66 : vector<432x128xf32>
    %c0_47 = arith.constant 0 : index
    %c0_48 = arith.constant 0 : index
    %c0_49 = arith.constant 0 : index
    %68 = vector.load %arg7[%c0_47, %c0_48, %c0_49] : memref<1x1x128xf32, #tpu.memory_space<vmem>>, vector<1x1x128xf32>
    %69 = vector.shape_cast %68 : vector<1x1x128xf32> to vector<1x128xf32>
    %70 = vector.broadcast %69 : vector<1x128xf32> to vector<432x128xf32>
    %71 = arith.addf %67, %70 : vector<432x128xf32>
    %72 = arith.negf %71 : vector<432x128xf32>
    %73 = math.exp %72 : vector<432x128xf32>
    %cst_50 = arith.constant 1.000000e+00 : f32
    %74 = vector.broadcast %cst_50 : f32 to vector<432x128xf32>
    %75 = arith.addf %74, %73 : vector<432x128xf32>
    %76 = arith.divf %74, %75 : vector<432x128xf32>
    %77 = arith.mulf %71, %76 : vector<432x128xf32>
    %78 = vector.shape_cast %77 : vector<432x128xf32> to vector<18x24x128xf32>
    %c0_51 = arith.constant 0 : index
    %c0_52 = arith.constant 0 : index
    %c0_53 = arith.constant 0 : index
    %79 = vector.load %arg11[%c0_51, %c0_52, %c0_53] : memref<18x24x128xf32, #tpu.memory_space<vmem>>, vector<18x24x128xf32>
    tpu.vector_store %arg11[%c0_51, %c0_52, %c0_53], %78 {strides = array<i32>} : memref<18x24x128xf32, #tpu.memory_space<vmem>>, vector<18x24x128xf32>,
    %cst_54 = arith.constant 0.000000e+00 : f32
    %80 = vector.broadcast %cst_54 : f32 to vector<18x1x128xf32>
    %c0_55 = arith.constant 0 : index
    %c0_56 = arith.constant 0 : index
    %c0_57 = arith.constant 0 : index
    %81 = vector.load %arg11[%c0_55, %c0_56, %c0_57] : memref<18x24x128xf32, #tpu.memory_space<vmem>>, vector<18x1x128xf32>
    tpu.vector_store %arg11[%c0_55, %c0_56, %c0_57], %80 {strides = array<i32>} : memref<18x24x128xf32, #tpu.memory_space<vmem>>, vector<18x1x128xf32>,
    %c0_58 = arith.constant 0 : index
    %c17 = arith.constant 17 : index
    %c0_59 = arith.constant 0 : index
    %82 = vector.load %arg11[%c0_58, %c17, %c0_59] : memref<18x24x128xf32, #tpu.memory_space<vmem>>, vector<18x1x128xf32>
    tpu.vector_store %arg11[%c0_58, %c17, %c0_59], %80 {strides = array<i32>} : memref<18x24x128xf32, #tpu.memory_space<vmem>>, vector<18x1x128xf32>,
    %cst_60 = arith.constant 0.000000e+00 : f32
    %83 = vector.broadcast %cst_60 : f32 to vector<1x24x128xf32>
    %c0_i32 = arith.constant 0 : i32
    %84 = arith.cmpi eq, %arg1, %c0_i32 : i32
    %85 = arith.extui %84 : i1 to i32
    %c0_i32_61 = arith.constant 0 : i32
    %86 = arith.cmpi ne, %85, %c0_i32_61 : i32
    scf.if %86 {
      %c0_123 = arith.constant 0 : index
      %c0_124 = arith.constant 0 : index
      %c0_125 = arith.constant 0 : index
      %170 = vector.load %arg11[%c0_123, %c0_124, %c0_125] : memref<18x24x128xf32, #tpu.memory_space<vmem>>, vector<1x24x128xf32>
      tpu.vector_store %arg11[%c0_123, %c0_124, %c0_125], %83 {strides = array<i32>} : memref<18x24x128xf32, #tpu.memory_space<vmem>>, vector<1x24x128xf32>,
    } else {
    }
    %c0_i32_62 = arith.constant 0 : i32
    %87 = arith.cmpi eq, %arg1, %c0_i32_62 : i32
    %88 = arith.extui %87 : i1 to i32
    %c0_i32_63 = arith.constant 0 : i32
    %89 = arith.cmpi ne, %88, %c0_i32_63 : i32
    scf.if %89 {
      %c17_123 = arith.constant 17 : index
      %c0_124 = arith.constant 0 : index
      %c0_125 = arith.constant 0 : index
      %170 = vector.load %arg11[%c17_123, %c0_124, %c0_125] : memref<18x24x128xf32, #tpu.memory_space<vmem>>, vector<1x24x128xf32>
      tpu.vector_store %arg11[%c17_123, %c0_124, %c0_125], %83 {strides = array<i32>} : memref<18x24x128xf32, #tpu.memory_space<vmem>>, vector<1x24x128xf32>,
    } else {
    }
    %c0_64 = arith.constant 0 : index
    %c0_65 = arith.constant 0 : index
    %c0_66 = arith.constant 0 : index
    %90 = vector.load %arg11[%c0_64, %c0_65, %c0_66] : memref<18x24x128xf32, #tpu.memory_space<vmem>>, vector<18x24x128xf32>
    %91 = vector.extract_strided_slice %90 {offsets = [0, 23, 0], sizes = [18, 1, 128], strides = [1, 1, 1]} : vector<18x24x128xf32> to vector<18x1x128xf32>
    %92 = vector.extract_strided_slice %90 {offsets = [0, 0, 0], sizes = [18, 23, 128], strides = [1, 1, 1]} : vector<18x24x128xf32> to vector<18x23x128xf32>
    %93 = tpu.concatenate %91, %92 in 1 : vector<18x1x128xf32>, vector<18x23x128xf32> -> vector<18x24x128xf32>
    %94 = vector.extract_strided_slice %90 {offsets = [0, 1, 0], sizes = [18, 23, 128], strides = [1, 1, 1]} : vector<18x24x128xf32> to vector<18x23x128xf32>
    %95 = vector.extract_strided_slice %90 {offsets = [0, 0, 0], sizes = [18, 1, 128], strides = [1, 1, 1]} : vector<18x24x128xf32> to vector<18x1x128xf32>
    %96 = tpu.concatenate %94, %95 in 1 : vector<18x23x128xf32>, vector<18x1x128xf32> -> vector<18x24x128xf32>
    %97 = vector.extract_strided_slice %93 {offsets = [0, 0, 0], sizes = [16, 24, 128], strides = [1, 1, 1]} : vector<18x24x128xf32> to vector<16x24x128xf32>
    %98 = vector.shape_cast %97 : vector<16x24x128xf32> to vector<384x128xf32>
    %c0_67 = arith.constant 0 : index
    %c0_68 = arith.constant 0 : index
    %c0_69 = arith.constant 0 : index
    %c0_70 = arith.constant 0 : index
    %99 = vector.load %arg4[%c0_67, %c0_68, %c0_69, %c0_70] : memref<3x3x128x128xf32, #tpu.memory_space<vmem>>, vector<1x1x128x128xf32>
    %100 = vector.shape_cast %99 : vector<1x1x128x128xf32> to vector<128x128xf32>
    %cst_71 = arith.constant dense<0.000000e+00> : vector<384x128xf32>
    %101 = tpu.matmul %98, %100, %cst_71 {dimension_numbers = #tpu.dot_dimension_numbers<[1], [0], [0], [1], [0, 0, 1, 1], [], []>} : vector<384x128xf32>, vector<128x128xf32>, vector<384x128xf32> -> vector<384x128xf32>
    %102 = vector.extract_strided_slice %90 {offsets = [0, 0, 0], sizes = [16, 24, 128], strides = [1, 1, 1]} : vector<18x24x128xf32> to vector<16x24x128xf32>
    %103 = vector.shape_cast %102 : vector<16x24x128xf32> to vector<384x128xf32>
    %c0_72 = arith.constant 0 : index
    %c1_73 = arith.constant 1 : index
    %c0_74 = arith.constant 0 : index
    %c0_75 = arith.constant 0 : index
    %104 = vector.load %arg4[%c0_72, %c1_73, %c0_74, %c0_75] : memref<3x3x128x128xf32, #tpu.memory_space<vmem>>, vector<1x1x128x128xf32>
    %105 = vector.shape_cast %104 : vector<1x1x128x128xf32> to vector<128x128xf32>
    %cst_76 = arith.constant dense<0.000000e+00> : vector<384x128xf32>
    %106 = tpu.matmul %103, %105, %cst_76 {dimension_numbers = #tpu.dot_dimension_numbers<[1], [0], [0], [1], [0, 0, 1, 1], [], []>} : vector<384x128xf32>, vector<128x128xf32>, vector<384x128xf32> -> vector<384x128xf32>
    %107 = arith.addf %101, %106 : vector<384x128xf32>
    %108 = vector.extract_strided_slice %96 {offsets = [0, 0, 0], sizes = [16, 24, 128], strides = [1, 1, 1]} : vector<18x24x128xf32> to vector<16x24x128xf32>
    %109 = vector.shape_cast %108 : vector<16x24x128xf32> to vector<384x128xf32>
    %c0_77 = arith.constant 0 : index
    %c2_78 = arith.constant 2 : index
    %c0_79 = arith.constant 0 : index
    %c0_80 = arith.constant 0 : index
    %110 = vector.load %arg4[%c0_77, %c2_78, %c0_79, %c0_80] : memref<3x3x128x128xf32, #tpu.memory_space<vmem>>, vector<1x1x128x128xf32>
    %111 = vector.shape_cast %110 : vector<1x1x128x128xf32> to vector<128x128xf32>
    %cst_81 = arith.constant dense<0.000000e+00> : vector<384x128xf32>
    %112 = tpu.matmul %109, %111, %cst_81 {dimension_numbers = #tpu.dot_dimension_numbers<[1], [0], [0], [1], [0, 0, 1, 1], [], []>} : vector<384x128xf32>, vector<128x128xf32>, vector<384x128xf32> -> vector<384x128xf32>
    %113 = arith.addf %107, %112 : vector<384x128xf32>
    %114 = vector.extract_strided_slice %93 {offsets = [1, 0, 0], sizes = [16, 24, 128], strides = [1, 1, 1]} : vector<18x24x128xf32> to vector<16x24x128xf32>
    %115 = vector.shape_cast %114 : vector<16x24x128xf32> to vector<384x128xf32>
    %c1_82 = arith.constant 1 : index
    %c0_83 = arith.constant 0 : index
    %c0_84 = arith.constant 0 : index
    %c0_85 = arith.constant 0 : index
    %116 = vector.load %arg4[%c1_82, %c0_83, %c0_84, %c0_85] : memref<3x3x128x128xf32, #tpu.memory_space<vmem>>, vector<1x1x128x128xf32>
    %117 = vector.shape_cast %116 : vector<1x1x128x128xf32> to vector<128x128xf32>
    %cst_86 = arith.constant dense<0.000000e+00> : vector<384x128xf32>
    %118 = tpu.matmul %115, %117, %cst_86 {dimension_numbers = #tpu.dot_dimension_numbers<[1], [0], [0], [1], [0, 0, 1, 1], [], []>} : vector<384x128xf32>, vector<128x128xf32>, vector<384x128xf32> -> vector<384x128xf32>
    %119 = arith.addf %113, %118 : vector<384x128xf32>
    %120 = vector.extract_strided_slice %90 {offsets = [1, 0, 0], sizes = [16, 24, 128], strides = [1, 1, 1]} : vector<18x24x128xf32> to vector<16x24x128xf32>
    %121 = vector.shape_cast %120 : vector<16x24x128xf32> to vector<384x128xf32>
    %c1_87 = arith.constant 1 : index
    %c1_88 = arith.constant 1 : index
    %c0_89 = arith.constant 0 : index
    %c0_90 = arith.constant 0 : index
    %122 = vector.load %arg4[%c1_87, %c1_88, %c0_89, %c0_90] : memref<3x3x128x128xf32, #tpu.memory_space<vmem>>, vector<1x1x128x128xf32>
    %123 = vector.shape_cast %122 : vector<1x1x128x128xf32> to vector<128x128xf32>
    %cst_91 = arith.constant dense<0.000000e+00> : vector<384x128xf32>
    %124 = tpu.matmul %121, %123, %cst_91 {dimension_numbers = #tpu.dot_dimension_numbers<[1], [0], [0], [1], [0, 0, 1, 1], [], []>} : vector<384x128xf32>, vector<128x128xf32>, vector<384x128xf32> -> vector<384x128xf32>
    %125 = arith.addf %119, %124 : vector<384x128xf32>
    %126 = vector.extract_strided_slice %96 {offsets = [1, 0, 0], sizes = [16, 24, 128], strides = [1, 1, 1]} : vector<18x24x128xf32> to vector<16x24x128xf32>
    %127 = vector.shape_cast %126 : vector<16x24x128xf32> to vector<384x128xf32>
    %c1_92 = arith.constant 1 : index
    %c2_93 = arith.constant 2 : index
    %c0_94 = arith.constant 0 : index
    %c0_95 = arith.constant 0 : index
    %128 = vector.load %arg4[%c1_92, %c2_93, %c0_94, %c0_95] : memref<3x3x128x128xf32, #tpu.memory_space<vmem>>, vector<1x1x128x128xf32>
    %129 = vector.shape_cast %128 : vector<1x1x128x128xf32> to vector<128x128xf32>
    %cst_96 = arith.constant dense<0.000000e+00> : vector<384x128xf32>
    %130 = tpu.matmul %127, %129, %cst_96 {dimension_numbers = #tpu.dot_dimension_numbers<[1], [0], [0], [1], [0, 0, 1, 1], [], []>} : vector<384x128xf32>, vector<128x128xf32>, vector<384x128xf32> -> vector<384x128xf32>
    %131 = arith.addf %125, %130 : vector<384x128xf32>
    %132 = vector.extract_strided_slice %93 {offsets = [2, 0, 0], sizes = [16, 24, 128], strides = [1, 1, 1]} : vector<18x24x128xf32> to vector<16x24x128xf32>
    %133 = vector.shape_cast %132 : vector<16x24x128xf32> to vector<384x128xf32>
    %c2_97 = arith.constant 2 : index
    %c0_98 = arith.constant 0 : index
    %c0_99 = arith.constant 0 : index
    %c0_100 = arith.constant 0 : index
    %134 = vector.load %arg4[%c2_97, %c0_98, %c0_99, %c0_100] : memref<3x3x128x128xf32, #tpu.memory_space<vmem>>, vector<1x1x128x128xf32>
    %135 = vector.shape_cast %134 : vector<1x1x128x128xf32> to vector<128x128xf32>
    %cst_101 = arith.constant dense<0.000000e+00> : vector<384x128xf32>
    %136 = tpu.matmul %133, %135, %cst_101 {dimension_numbers = #tpu.dot_dimension_numbers<[1], [0], [0], [1], [0, 0, 1, 1], [], []>} : vector<384x128xf32>, vector<128x128xf32>, vector<384x128xf32> -> vector<384x128xf32>
    %137 = arith.addf %131, %136 : vector<384x128xf32>
    %138 = vector.extract_strided_slice %90 {offsets = [2, 0, 0], sizes = [16, 24, 128], strides = [1, 1, 1]} : vector<18x24x128xf32> to vector<16x24x128xf32>
    %139 = vector.shape_cast %138 : vector<16x24x128xf32> to vector<384x128xf32>
    %c2_102 = arith.constant 2 : index
    %c1_103 = arith.constant 1 : index
    %c0_104 = arith.constant 0 : index
    %c0_105 = arith.constant 0 : index
    %140 = vector.load %arg4[%c2_102, %c1_103, %c0_104, %c0_105] : memref<3x3x128x128xf32, #tpu.memory_space<vmem>>, vector<1x1x128x128xf32>
    %141 = vector.shape_cast %140 : vector<1x1x128x128xf32> to vector<128x128xf32>
    %cst_106 = arith.constant dense<0.000000e+00> : vector<384x128xf32>
    %142 = tpu.matmul %139, %141, %cst_106 {dimension_numbers = #tpu.dot_dimension_numbers<[1], [0], [0], [1], [0, 0, 1, 1], [], []>} : vector<384x128xf32>, vector<128x128xf32>, vector<384x128xf32> -> vector<384x128xf32>
    %143 = arith.addf %137, %142 : vector<384x128xf32>
    %144 = vector.extract_strided_slice %96 {offsets = [2, 0, 0], sizes = [16, 24, 128], strides = [1, 1, 1]} : vector<18x24x128xf32> to vector<16x24x128xf32>
    %145 = vector.shape_cast %144 : vector<16x24x128xf32> to vector<384x128xf32>
    %c2_107 = arith.constant 2 : index
    %c2_108 = arith.constant 2 : index
    %c0_109 = arith.constant 0 : index
    %c0_110 = arith.constant 0 : index
    %146 = vector.load %arg4[%c2_107, %c2_108, %c0_109, %c0_110] : memref<3x3x128x128xf32, #tpu.memory_space<vmem>>, vector<1x1x128x128xf32>
    %147 = vector.shape_cast %146 : vector<1x1x128x128xf32> to vector<128x128xf32>
    %cst_111 = arith.constant dense<0.000000e+00> : vector<384x128xf32>
    %148 = tpu.matmul %145, %147, %cst_111 {dimension_numbers = #tpu.dot_dimension_numbers<[1], [0], [0], [1], [0, 0, 1, 1], [], []>} : vector<384x128xf32>, vector<128x128xf32>, vector<384x128xf32> -> vector<384x128xf32>
    %149 = arith.addf %143, %148 : vector<384x128xf32>
    %c0_112 = arith.constant 0 : index
    %c0_113 = arith.constant 0 : index
    %150 = vector.load %arg8[%c0_112, %c0_113] : memref<1x128xf32, #tpu.memory_space<vmem>>, vector<1x128xf32>
    %151 = vector.broadcast %150 : vector<1x128xf32> to vector<384x128xf32>
    %152 = arith.addf %149, %151 : vector<384x128xf32>
    %153 = arith.negf %152 : vector<384x128xf32>
    %154 = math.exp %153 : vector<384x128xf32>
    %cst_114 = arith.constant 1.000000e+00 : f32
    %155 = vector.broadcast %cst_114 : f32 to vector<384x128xf32>
    %156 = arith.addf %155, %154 : vector<384x128xf32>
    %157 = arith.divf %155, %156 : vector<384x128xf32>
    %158 = arith.mulf %152, %157 : vector<384x128xf32>
    %159 = vector.extract_strided_slice %4 {offsets = [2, 0, 0], sizes = [16, 24, 128], strides = [1, 1, 1]} : vector<20x24x128xf32> to vector<16x24x128xf32>
    %160 = vector.shape_cast %159 : vector<16x24x128xf32> to vector<384x128xf32>
    %c0_115 = arith.constant 0 : index
    %c0_116 = arith.constant 0 : index
    %161 = vector.load %arg5[%c0_115, %c0_116] : memref<128x128xf32, #tpu.memory_space<vmem>>, vector<128x128xf32>
    %cst_117 = arith.constant dense<0.000000e+00> : vector<384x128xf32>
    %162 = tpu.matmul %160, %161, %cst_117 {dimension_numbers = #tpu.dot_dimension_numbers<[1], [0], [0], [1], [0, 0, 1, 1], [], []>} : vector<384x128xf32>, vector<128x128xf32>, vector<384x128xf32> -> vector<384x128xf32>
    %c0_118 = arith.constant 0 : index
    %c0_119 = arith.constant 0 : index
    %163 = vector.load %arg9[%c0_118, %c0_119] : memref<1x128xf32, #tpu.memory_space<vmem>>, vector<1x128xf32>
    %164 = vector.broadcast %163 : vector<1x128xf32> to vector<384x128xf32>
    %165 = arith.addf %162, %164 : vector<384x128xf32>
    %166 = arith.addf %158, %165 : vector<384x128xf32>
    %c0_120 = arith.constant 0 : index
    %c0_121 = arith.constant 0 : index
    %c0_122 = arith.constant 0 : index
    %167 = vector.load %arg10[%c0_120, %c0_121, %c0_122] : memref<1x384x128xf32, #tpu.memory_space<vmem>>, vector<1x384x128xf32>
    %168 = vector.shape_cast %167 : vector<1x384x128xf32> to vector<384x128xf32>
    %169 = vector.shape_cast %166 : vector<384x128xf32> to vector<1x384x128xf32>
    tpu.vector_store %arg10[%c0_120, %c0_121, %c0_122], %169 {strides = array<i32>} : memref<1x384x128xf32, #tpu.memory_space<vmem>>, vector<1x384x128xf32>,
    return
  }
  func.func @transform_0(%arg0: i32, %arg1: i32) -> (i32, i32, i32, i32) {
    %c0_i32 = arith.constant 0 : i32
    %c0_i32_0 = arith.constant 0 : i32
    %c0_i32_1 = arith.constant 0 : i32
    %c0_i32_2 = arith.constant 0 : i32
    return %arg0, %c0_i32, %c0_i32_0, %c0_i32_1 : i32, i32, i32, i32
  }
  func.func @transform_1(%arg0: i32, %arg1: i32) -> (i32, i32, i32, i32) {
    %c0_i32 = arith.constant 0 : i32
    %c0_i32_0 = arith.constant 0 : i32
    %c0_i32_1 = arith.constant 0 : i32
    %c0_i32_2 = arith.constant 0 : i32
    %c0_i32_3 = arith.constant 0 : i32
    return %c0_i32, %c0_i32_0, %c0_i32_1, %c0_i32_2 : i32, i32, i32, i32
  }
  func.func @transform_2(%arg0: i32, %arg1: i32) -> (i32, i32, i32, i32) {
    %c0_i32 = arith.constant 0 : i32
    %c0_i32_0 = arith.constant 0 : i32
    %c0_i32_1 = arith.constant 0 : i32
    %c0_i32_2 = arith.constant 0 : i32
    %c0_i32_3 = arith.constant 0 : i32
    return %c0_i32, %c0_i32_0, %c0_i32_1, %c0_i32_2 : i32, i32, i32, i32
  }
  func.func @transform_3(%arg0: i32, %arg1: i32) -> (i32, i32) {
    %c0_i32 = arith.constant 0 : i32
    %c0_i32_0 = arith.constant 0 : i32
    %c0_i32_1 = arith.constant 0 : i32
    return %c0_i32, %c0_i32_0 : i32, i32
  }
  func.func @transform_4(%arg0: i32, %arg1: i32) -> (i32, i32, i32) {
    %c0_i32 = arith.constant 0 : i32
    %c0_i32_0 = arith.constant 0 : i32
    %c0_i32_1 = arith.constant 0 : i32
    return %arg0, %c0_i32, %c0_i32_0 : i32, i32, i32
  }
  func.func @transform_5(%arg0: i32, %arg1: i32) -> (i32, i32, i32) {
    %c0_i32 = arith.constant 0 : i32
    %c0_i32_0 = arith.constant 0 : i32
    %c0_i32_1 = arith.constant 0 : i32
    return %arg0, %c0_i32, %c0_i32_0 : i32, i32, i32
  }
  func.func @transform_6(%arg0: i32, %arg1: i32) -> (i32, i32) {
    %c0_i32 = arith.constant 0 : i32
    %c0_i32_0 = arith.constant 0 : i32
    %c0_i32_1 = arith.constant 0 : i32
    return %c0_i32, %c0_i32_0 : i32, i32
  }
  func.func @transform_7(%arg0: i32, %arg1: i32) -> (i32, i32) {
    %c0_i32 = arith.constant 0 : i32
    %c0_i32_0 = arith.constant 0 : i32
    %c0_i32_1 = arith.constant 0 : i32
    return %c0_i32, %c0_i32_0 : i32, i32
  }
  func.func @transform_8(%arg0: i32, %arg1: i32) -> (i32, i32, i32) {
    %c0_i32 = arith.constant 0 : i32
    %c0_i32_0 = arith.constant 0 : i32
    return %arg0, %arg1, %c0_i32 : i32, i32, i32
  }
}

</mosaic_0001>

<bundles_post_ra>
// kernel: tpu_custom_call.1
= control target key start
LH: loop header
LB: loop body
LE: loop exit
PB: predicated region body
PF: predicated region fallthrough
CT: control target
= control target key end

     0   :  { %s20171_s0 = inlined_call_operand.hbm [shape: f32[2,20,24,128], index: 0, kind: input, shape index: {}]   ;;  %s20172_s1 = inlined_call_operand.hbm [shape: f32[3,3,128,128], index: 1, kind: input, shape index: {}]   ;;  %s20173_s2 = inlined_call_operand.hbm [shape: f32[3,3,128,128], index: 2, kind: input, shape index: {}]   ;;  %s20174_s3 = inlined_call_operand.hbm [shape: f32[128,128], index: 3, kind: input, shape index: {}]   ;;  %s20175_s4 = inlined_call_operand.vmem [shape: f32[2,1,128], index: 4, kind: input, shape index: {}]   ;;  %s20176_s5 = inlined_call_operand.vmem [shape: f32[2,1,128], index: 5, kind: input, shape index: {}]   ;;  %s20177_s6 = inlined_call_operand.vmem [shape: f32[1,128], index: 6, kind: input, shape index: {}]   ;;  %s20178_s7 = inlined_call_operand.vmem [shape: f32[1,128], index: 7, kind: input, shape index: {}]   ;;  %s20179_s8 = inlined_call_operand.hbm [shape: f32[2,384,128], index: 8, kind: output, shape index: {}]  }
   0x1   :  { %20452 = sst [smem:[#allocation201_spill]] %s20172_s1 }
   0x2   :  { %20453 = sst [smem:[#allocation202_spill]] %s20173_s2 }
   0x3   :  { %20454 = sst [smem:[#allocation203_spill]] %s20174_s3 }
   0x4   :  { %13 = vsyncpa [#allocation4], 0 }
   0x5   :  { %15 = vsyncpa [#allocation4 + $0x1], 0 }
   0x6   :  { %16 = vsyncpa [#allocation7], 0 }
   0x7   :  { %17 = vsyncpa [#allocation10], 0 }
   0x8   :  { %18 = vsyncpa [#allocation5], 0 }
   0x9   :  { %20 = vsyncpa [#allocation5 + $0x1], 0  ;;  %s14160_s27 = smov 0   ;;  %s14162_s28 = smov 0  }
   0xa   :  { %s14164_s29 = smov 0   ;;  %s14166_s30 = smov 0  }
   0xb   :  { %s14168_s9 = smov 0   ;;  %s14170_s10 = smov 0  }
   0xc LB: > { %20455 = sst [smem:[#allocation16_spill]] %s14099_s9  ;;  %s9747_s11 = sadd.s32 4294967295, %s14103_s10   ;;  %s14103_s10 = sphi %s14170_s10, %s26_s10   ;;  %s14099_s9 = sphi %s14168_s9, %s21769_s9   ;;  %s14095_s30 = sphi %s14166_s30, %s21768_s30   ;;  %s14091_s29 = sphi %s14164_s29, %s21772_s29   ;;  %s14087_s28 = sphi %s14162_s28, %s21771_s28   ;;  %s14083_s27 = sphi %s14160_s27, %s21770_s27  }
   0xd   : > { %20456 = sst [smem:[#allocation17_spill]] %s14103_s10  ;;  %s9748_s12 = sadd.s32 4294967294, %s14103_s10  }
   0xe   : > { %p58_p0 = scmp.ne.s32.totalorder %s14087_s28, %s14083_s27  ;;  %p14194_p1 = scmp.eq.s32.totalorder %s9747_s11, 0 }
   0xf   : > { %p14198_p2 = scmp.eq.s32.totalorder %s9747_s11, 1  ;;  %p247_p3 = scmp.eq.s32.totalorder %s9748_s12, 1 }
  0x10   : > { %p14204_p4 = por %p14194_p1, %p58_p0  ;;  %p9749_p5 = scmp.ge.s32.totalorder %s14103_s10, 1 }
  0x11   : > { %p14209_p6 = por %p247_p3, %p58_p0  ;;  %p254_p7 = scmp.lt.s32.totalorder %s14103_s10, 3 }
  0x12   : > { %s14105_s18 = smov [#allocation6]   ;;  %s14106_s21 = smov [#allocation8]  }
  0x13   : > { %s20460_s16 = scalar_select %p14209_p6, 1, 0 }
  0x14   : > { %p14214_p8 = pnand %p9749_p5, %p254_p7  ;;  %s266_s19 = sshll.u32 %s14105_s18, 4  ;;  %s267_s19 = int_to_ptr.vmem [resolvable:$true] %s266_s19 }
  0x15   : > { %s279_s22 = sshll.u32 %s14106_s21, 4  ;;  %s14107_s23 = smov [#allocation9]   ;;  %s280_s22 = int_to_ptr.vmem [resolvable:$true] %s279_s22 }
  0x16   : > { %p13248_p9 = pneg %p14214_p8  ;;  %s292_s24 = sshll.u32 %s14107_s23, 4  ;;  %s293_s24 = int_to_ptr.vmem [resolvable:$true] %s292_s24 }
  0x17   : > { %s13920_s25 = scalar_lea.vmem %s267_s19, 18432  ;;  %p13928_p5 = scmp.lt.s32.totalorder %s267_s19, %s267_s19 }
  0x18   : > { %p14223_p11 = pnand %p13248_p9, %p14194_p1  ;;  %p13921_p13 = scmp.ne.s32.totalorder %s267_s19, %s13920_s25 }
  0x19   : > { %p13929_p7 = scmp.lt.s32.totalorder %s13920_s25, %s13920_s25 }
  0x1a   : > { %p13911_p12 = pneg %p14223_p11 }
  0x1b   : > { %p13930_p9 = por %p13929_p7, %p13928_p5 }
  0x1c   : > { %p13923_p0 = pnand %p13921_p13, %p13911_p12 }
  0x1e   : > { %p13924_p3 = pneg %p13923_p0 }
  0x20   : > { %p13931_p10 = pnand %p13930_p9, %p13924_p3 }
  0x22   : > { %13934 = shalt.err (!%p13931_p10)
}
  0x23   : > { %s20180_s26 = smov 128   ;;  %s20181_s11 = smov 8  }
  0x24   : > { %s20463_s1 = sld [smem:[#allocation201_spill]]  ;;  %s13946_s21 = scalar_lea.vmem %s280_s22, 18432 }
  0x25   : > { %p13947_p13 = scmp.ne.s32.totalorder %s280_s22, %s13946_s21  ;;  %p13954_p3 = scmp.lt.s32.totalorder %s280_s22, %s280_s22 }
  0x26   : > { %p13955_p10 = scmp.lt.s32.totalorder %s13946_s21, %s13946_s21 }
  0x27   : > { %p13949_p0 = pnand %p13947_p13, %p13911_p12 }
  0x28   : > { %p13956_p7 = por %p13955_p10, %p13954_p3 }
  0x29   : > { %p13950_p5 = pneg %p13949_p0 }
  0x2a   : > { %13251 = dma.hbm_to_vmem [thread:$0]  (!%p14223_p11), %s20463_s1, 18432, %s267_s19, [#allocation7], %s20180_s26, %s20180_s26, %s20181_s11  }
  0x2b   : > { %p13957_p9 = pnand %p13956_p7, %p13950_p5 }
  0x2d   : > { %13960 = shalt.err (!%p13957_p9)
}
  0x2e   : > { %s20464_s2 = sld [smem:[#allocation202_spill]]  ;;  %s13972_s19 = scalar_lea.vmem %s293_s24, 2048 }
  0x2f   : > { %p13973_p6 = scmp.ne.s32.totalorder %s293_s24, %s13972_s19  ;;  %p13980_p3 = scmp.lt.s32.totalorder %s293_s24, %s293_s24 }
  0x30   : > { %p13981_p5 = scmp.lt.s32.totalorder %s13972_s19, %s13972_s19 }
  0x31   : > { %p13975_p13 = pnand %p13973_p6, %p13911_p12 }
  0x32   : > { %p13982_p10 = por %p13981_p5, %p13980_p3 }
  0x33   : > { %p13976_p0 = pneg %p13975_p13 }
  0x34   : > { %13254 = dma.hbm_to_vmem [thread:$0]  (!%p14223_p11), %s20464_s2, 18432, %s280_s22, [#allocation7], %s20180_s26, %s20180_s26, %s20181_s11  }
  0x35   : > { %p13983_p7 = pnand %p13982_p10, %p13976_p0 }
  0x37   : > { %13986 = shalt.err (!%p13983_p7)
}
  0x38   : > { %s20465_s3 = sld [smem:[#allocation203_spill]]  ;;  %s45_s22 = sadd.s32 1, %s14091_s29 }
  0x39   : > { %s38_s20 = sadd.s32 1, %s14099_s9  ;;  %p52_p6 = scmp.ne.s32.totalorder %s14091_s29, %s14087_s28 }
  0x3a   : > { %p40_p12 = scmp.ge.s32.totalorder %s38_s20, 2  ;;  %p53_p9 = scmp.eq.s32.totalorder %s14103_s10, 0 }
  0x3b   : > { %p14269_p13 = por %p14198_p2, %p52_p6  ;;  %p13269_p0 = scmp.lt.s32.totalorder %s14103_s10, 2 }
  0x3c   : > { %s21774_s20 = smov (%p40_p12, %s38_s20), 0  ;;  %p54_p3 = por %p53_p9, %p52_p6 }
  0x3d   : > { %20467 = sst [smem:[#allocation18_spill]] %s21774_s20  ;;  %s312_s23 = sand.u32 1, %s14091_s29  }
  0x3e   : > { %13257 = dma.hbm_to_vmem [thread:$0]  (!%p14223_p11), %s20465_s3, 2048, %s293_s24, [#allocation10], %s20180_s26, %s20180_s26, %s20181_s11  }
  0x3f   : > { %s42_s25 = ssub.s32 %s14099_s9, %s21774_s20  ;;  %s13227_s24 = smul.u32 480, %s312_s23 }
  0x40   : > { %p43_p5 = scmp.eq.s32.totalorder %s42_s25, 0  ;;  %s13228_s19 = smul.u32 7680, %s14099_s9 }
  0x41   : > { %p14280_p11 = pnand %p13269_p0, %p54_p3  ;;  %s316_s1 = scalar_lea.vmem [#allocation3], %s13227_s24 }
  0x42   : > { %s14285_s14 = scalar_select %p43_p5, %s14091_s29, %s45_s22  }
  0x43   : > { %s322_s11 = scalar_lea.hbm %s20171_s0, %s13228_s19  ;;  %s323_s2 = sshll.u32 %s316_s1, 4  ;;  %s324_s2 = int_to_ptr.vmem [resolvable:$true] %s323_s2 }
  0x44   : > { %s313_s3 = scalar_lea.sflag [#allocation4], %s312_s23  ;;  %p13989_p2 = pneg %p14280_p11 }
  0x45   : > { %s14000_s25 = scalar_lea.vmem %s324_s2, 7680  ;;  %s14110_s20 = smov [#allocation3]  }
  0x46   : > { %p14001_p10 = scmp.ne.s32.totalorder %s324_s2, %s14000_s25  ;;  %s14005_s9 = sshll.u32 %s14110_s20, 4  ;;  %s14006_s9 = int_to_ptr.vmem [resolvable:$false] %s14005_s9 }
  0x47   : > { %s14007_s10 = scalar_lea.vmem %s14006_s9, 15360  ;;  %p14008_p12 = scmp.lt.s32.totalorder %s324_s2, %s14006_s9 }
  0x48   : > { %p14003_p7 = pnand %p14001_p10, %p13989_p2  ;;  %p14009_p9 = scmp.lt.s32.totalorder %s14007_s10, %s14000_s25 }
  0x4a   : > { %p14004_p6 = pneg %p14003_p7  ;;  %p14010_p0 = por %p14009_p9, %p14008_p12 }
  0x4c   : > { %p14011_p3 = pnand %p14010_p0, %p14004_p6 }
  0x4e   : > { %14014 = shalt.err (!%p14011_p3)
}
  0x4f   : > { %s20469_s1 = smov 8   ;;  %s20470_s26 = smov 128  }
  0x50   : > { %13261 = dma.hbm_to_vmem [thread:$0]  (!%p14280_p11), %s322_s11, 7680, %s324_s2, %s313_s3, %s20470_s26, %s20470_s26, %s20469_s1  }
  0x51   : > { %347 = sbr.rel (%p14214_p8) target bundleno = 1646 (0x66e), region = 52 }
  0x56   : > { %s14300_s22 = sand.u32 1, %s14087_s28  }
  0x57   : > { %s13229_s9 = smul.u32 480, %s14300_s22  ;;  %s350_s10 = scalar_lea.sflag [#allocation4], %s14300_s22 }
  0x59   : > { %s14304_s20 = scalar_lea.vmem [#allocation3], %s13229_s9 }
  0x5a   : > { %14066 = dma.done.wait (%p14204_p4), %s350_s10, 7680  }
  0x5b   : > { %14068 = vsyncadd (%p14204_p4), %s350_s10, 4294959616 }
  0x5c   : > { %14070 = dma.done.wait (%p14194_p1), [#allocation7], 36864  }
  0x5d   : > { %14072 = vsyncadd (%p14194_p1), [#allocation7], 4294930432 }
  0x5e   : > { %14074 = dma.done.wait (%p14194_p1), [#allocation10], 2048  }
  0x5f   : > { %14076 = vsyncadd (%p14194_p1), [#allocation10], 4294965248  ;;  %v968_v0 = vld [vmem:[#allocation6 + $0xf8] sm:$0xff]  ;;  %v967_v1 = vld [vmem:[#allocation6 + $0xf0] sm:$0xff]  ;;  %vm574_vm0 = vcmask 1040384   ;;  %vm735_vm1 = vcmask 1046528  }
  0x60   : > { %11138 = vmatprep.subr.mxu0 %v968_v0  ;;  %v966_v2 = vld [vmem:[#allocation6 + $0xe8] sm:$0xff]  ;;  %v965_v3 = vld [vmem:[#allocation6 + $0xe0] sm:$0xff]  ;;  %v964_v6 = vld [vmem:[#allocation6 + $0xd8] sm:$0xff]  ;;  %p404_p1 = scmp.lt.s32.totalorder %s14095_s30, 1  ;;  %s13230_s12 = smul.u32 384, %s14300_s22 }
  0x61   : > { %11139 = vmatpush3.msra.mxu0 %v968_v0  ;;  %v14319_v4 = vld [vmem:[%s14304_s20] sm:$0xff]  ;;  %v14322_v5 = vld [vmem:[%s14304_s20 + $0x8] sm:$0xff]  ;;  %v14327_v9 = vld [vmem:[#allocation6 + $0x78] sm:$0xff]  ;;  %s13231_s10 = smul.u32 6144, %s14095_s30  ;;  %s9599_s13 = scalar_lea.sflag [#allocation5], %s14300_s22 }
  0x62   : > { %11140 = vmatprep.subr.mxu0 %v967_v1  ;;  %v575_v7 = vrot.slane %v14319_v4, 7  ;;  %11170 = vmatprep.mubr.f32.mxu0 %v14319_v4  ;;  %v576_v8 = vrot.slane %v14322_v5, 7  ;;  %v14330_v10 = vld [vmem:[%s14304_s20 + $0x10] sm:$0xff]  ;;  %v14338_v14 = vld [vmem:[#allocation6 + $0x68] sm:$0xff]  ;;  %v14344_v17 = vld [vmem:[#allocation6 + $0x60] sm:$0xff]  ;;  %s405_s2 = scalar_select %p404_p1, %s14095_s30, 1 }
  0x63   : > { %11141 = vmatpush3.msra.mxu0 %v967_v1  ;;  %v494_v11 = vrot.slane %v14330_v10, 7  ;;  %v14333_v12 = vld [vmem:[#allocation6 + $0x70] sm:$0xff]  ;;  %13195 = vmatprep.subr.mxu1 %v14327_v9  ;;  %v962_v16 = vld [vmem:[#allocation6 + $0xc8] sm:$0xff]  ;;  %v961_v19 = vld [vmem:[#allocation6 + $0xc0] sm:$0xff]  ;;  %s19804_s1 = scalar_lea.vmem [#allocation11], %s13230_s12  ;;  %s20119_s30 = scalar_lea.hbm %s20179_s8, %s13231_s10 }
  0x64   : > { %11142 = vmatprep.subr.mxu0 %v966_v2  ;;  %v963_v13 = vld [vmem:[#allocation6 + $0xd0] sm:$0xff]  ;;  %13211 = vmatpush3.msra.mxu1 %v14327_v9  ;;  %v14347_v18 = vsel %vm574_vm0, %v575_v7, %v576_v8  ;;  %v14351_v20 = vld [vmem:[#allocation6 + $0x58] sm:$0xff]  ;;  %v14362_v25 = vld [vmem:[#allocation6 + $0x48] sm:$0xff]  ;;  %s16872_s15 = scalar_lea.vmem %s20175_s4, %s405_s2  ;;  %s16901_s23 = scalar_lea.vmem %s20176_s5, %s405_s2 }
  0x65   : > { %11143 = vmatpush3.msra.mxu0 %v966_v2  ;;  %13196 = vmatprep.subr.mxu1 %v14333_v12  ;;  %v14341_v15 = vsel %vm574_vm0, %v494_v11, %v575_v7  ;;  %v960_v21 = vld [vmem:[#allocation6 + $0xb8] sm:$0xff]  ;;  %v14355_v22 = vld [vmem:[#allocation6 + $0x50] sm:$0xff]  ;;  %v14358_v23 = vsel %vm574_vm0, %v576_v8, %v494_v11  ;;  %v958_v26 = vld [vmem:[#allocation6 + $0xa8] sm:$0xff]  ;;  %v736_v2 = vrot.slane %v14319_v4, 1  ;;  %s14112_s17 = smov [#allocation11]  }
  0x66   : > { %11144 = vmatprep.subr.mxu0 %v965_v3  ;;  %13212 = vmatpush3.msra.mxu1 %v14333_v12  ;;  %v959_v24 = vld [vmem:[#allocation6 + $0xb0] sm:$0xff]  ;;  %v14366_v27 = vld [vmem:[#allocation6 + $0x40] sm:$0xff]  ;;  %v14370_v29 = vld [vmem:[#allocation6 + $0x38] sm:$0xff]  ;;  %s14019_s11 = sshll.u32 %s14112_s17, 4  ;;  %s14020_s11 = int_to_ptr.vmem [resolvable:$false] %s14019_s11 }
  0x67   : > { %11145 = vmatpush3.msra.mxu0 %v965_v3  ;;  %13197 = vmatprep.subr.mxu1 %v14338_v14  ;;  %v957_v28 = vld [vmem:[#allocation6 + $0xa0] sm:$0xff]  ;;  %v956_v30 = vld [vmem:[#allocation6 + $0x98] sm:$0xff]  ;;  %v14374_v31 = vld [vmem:[#allocation6 + $0x30] sm:$0xff]  ;;  %v737_v3 = vrot.slane %v14322_v5, 1 }
  0x68   : > { %11146 = vmatprep.subr.mxu0 %v964_v6  ;;  %13213 = vmatpush3.msra.mxu1 %v14338_v14  ;;  %v955_v32 = vld [vmem:[#allocation6 + $0x90] sm:$0xff]  ;;  %v14378_v33 = vld [vmem:[#allocation6 + $0x28] sm:$0xff]  ;;  %v14382_v35 = vld [vmem:[#allocation6 + $0x20] sm:$0xff] }
  0x69   : > { %11147 = vmatpush3.msra.mxu0 %v964_v6  ;;  %13198 = vmatprep.subr.mxu1 %v14344_v17  ;;  %v954_v34 = vld [vmem:[#allocation6 + $0x88] sm:$0xff]  ;;  %v953_v36 = vld [vmem:[#allocation6 + $0x80] sm:$0xff]  ;;  %v14386_v37 = vld [vmem:[#allocation6 + $0x18] sm:$0xff]  ;;  %v739_v6 = vrot.slane %v14330_v10, 1 }
  0x6a   : > { %11148 = vmatprep.subr.mxu0 %v963_v13  ;;  %13214 = vmatpush3.msra.mxu1 %v14344_v17  ;;  %v14392_v38 = vld [vmem:[#allocation6 + $0x10] sm:$0xff]  ;;  %v14399_v39 = vld [vmem:[%s14304_s20 + $0x18] sm:$0xff]  ;;  %v14402_v40 = vld [vmem:[%s14304_s20 + $0x20] sm:$0xff] }
  0x6b   : > { %11149 = vmatpush3.msra.mxu0 %v963_v13  ;;  %13199 = vmatprep.subr.mxu1 %v14351_v20  ;;  %v14407_v41 = vld [vmem:[%s14304_s20 + $0x98] sm:$0xff]  ;;  %v14410_v42 = vld [vmem:[%s14304_s20 + $0xa0] sm:$0xff]  ;;  %v14414_v43 = vld [vmem:[#allocation6 + $0x8] sm:$0xff] }
  0x6c   : > { %11150 = vmatprep.subr.mxu0 %v962_v16  ;;  %13215 = vmatpush3.msra.mxu1 %v14351_v20  ;;  %v14417_v44 = vld [vmem:[%s14304_s20 + $0xa8] sm:$0xff]  ;;  %v14420_v45 = vld [vmem:[%s14304_s20 + $0xb8] sm:$0xff]  ;;  %v14425_v46 = vld [vmem:[%s14304_s20 + $0xb0] sm:$0xff]  ;;  %v20187_v48 = vrot.slane %v14410_v42, 7  ;;  %v20186_v49 = vrot.slane %v14407_v41, 7 }
  0x6d   : > { %11151 = vmatpush3.msra.mxu0 %v962_v16  ;;  %13200 = vmatprep.subr.mxu1 %v14355_v22  ;;  %v14429_v47 = vld [vmem:[%s14304_s20 + $0x28] sm:$0xff]  ;;  %v14435_v50 = vld [vmem:[%s14304_s20 + $0x30] sm:$0xff]  ;;  %v501_v51 = vrot.slane %v14420_v45, 7  ;;  %v603_v52 = vrot.slane %v14417_v44, 7  ;;  %v14443_v53 = vld [vmem:[#allocation6] sm:$0xff]  ;;  %v604_v54 = vrot.slane %v14425_v46, 7  ;;  %v14524_v16 = vsel %vm735_vm1, %v736_v2, %v737_v3 }
  0x6e   : > { %11152 = vmatprep.subr.mxu0 %v961_v19  ;;  %13216 = vmatpush3.msra.mxu1 %v14355_v22  ;;  %v14449_v55 = vld [vmem:[%s14304_s20 + $0xc0] sm:$0xff]  ;;  %v14452_v56 = vld [vmem:[%s14304_s20 + $0xd0] sm:$0xff]  ;;  %v14456_v57 = vld [vmem:[%s14304_s20 + $0x38] sm:$0xff]  ;;  %v14464_v58 = vsel %vm574_vm0, %v20186_v49, %v20187_v48  ;;  %20476 = vst [vmem:[#allocation24_spill] sm:$0xff] %v14524_v16 }
  0x6f   : > { %11153 = vmatpush3.msra.mxu0 %v961_v19  ;;  %13201 = vmatprep.subr.mxu1 %v14362_v25  ;;  %20471 = vst [vmem:[#allocation19_spill] sm:$0xff] %v14464_v58  ;;  %v14467_v59 = vld [vmem:[%s14304_s20 + $0x40] sm:$0xff]  ;;  %v14472_v60 = vsel %vm574_vm0, %v501_v51, %v603_v52  ;;  %v14477_v61 = vsel %vm574_vm0, %v603_v52, %v604_v54  ;;  %v502_v62 = vrot.slane %v14452_v56, 7  ;;  %v607_v63 = vrot.slane %v14449_v55, 7  ;;  %v14482_v0 = vld [vmem:[%s14304_s20 + $0xc8] sm:$0xff]  ;;  %v2061_v1 = vld [vmem:[#allocation6 + $0x1f8] sm:$0xff] }
  0x70   : > { %11154 = vmatprep.subr.mxu0 %v960_v21  ;;  %13217 = vmatpush3.msra.mxu1 %v14362_v25  ;;  %20472 = vst [vmem:[#allocation20_spill] sm:$0xff] %v14472_v60  ;;  %20473 = vst [vmem:[#allocation21_spill] sm:$0xff] %v14477_v61  ;;  %v14491_v7 = vld [vmem:[%s14304_s20 + $0x48] sm:$0xff]  ;;  %v14495_v8 = vld [vmem:[%s14304_s20 + $0x50] sm:$0xff]  ;;  %v14500_v4 = vsel %vm574_vm0, %v604_v54, %v501_v51 }
  0x71   : > { %11155 = vmatpush3.msra.mxu0 %v960_v21  ;;  %13202 = vmatprep.subr.mxu1 %v14366_v27  ;;  %20474 = vst [vmem:[#allocation22_spill] sm:$0xff] %v14500_v4  ;;  %v14511_v11 = vld [vmem:[%s14304_s20 + $0xe8] sm:$0xff]  ;;  %v14520_v13 = vld [vmem:[%s14304_s20 + $0x58] sm:$0xff]  ;;  %v14530_v19 = vld [vmem:[%s14304_s20 + $0x60] sm:$0xff] }
  0x72   : > { %11156 = vmatprep.subr.mxu0 %v959_v24  ;;  %13218 = vmatpush3.msra.mxu1 %v14366_v27  ;;  %v503_v21 = vrot.slane %v14511_v11, 7  ;;  %v14627_v16 = vld [vmem:[%s14304_s20 + $0x120] sm:$0xff] }
  0x73   : > { %11157 = vmatpush3.msra.mxu0 %v959_v24  ;;  %13203 = vmatprep.subr.mxu1 %v14370_v29 }
  0x74   : > { %11158 = vmatprep.subr.mxu0 %v958_v26  ;;  %13219 = vmatpush3.msra.mxu1 %v14370_v29 }
  0x75   : > { %11159 = vmatpush3.msra.mxu0 %v958_v26  ;;  %13204 = vmatprep.subr.mxu1 %v14374_v31  ;;  %v14546_v26 = vld [vmem:[%s14304_s20 + $0xf0] sm:$0xff] }
  0x76   : > { %11160 = vmatprep.subr.mxu0 %v957_v28  ;;  %13220 = vmatpush3.msra.mxu1 %v14374_v31  ;;  %v615_v54 = vrot.slane %v14546_v26, 7 }
  0x77   : > { %11161 = vmatpush3.msra.mxu0 %v957_v28  ;;  %13205 = vmatprep.subr.mxu1 %v14378_v33  ;;  %v14549_v28 = vld [vmem:[%s14304_s20 + $0x100] sm:$0xff] }
  0x78   : > { %11162 = vmatprep.subr.mxu0 %v956_v30  ;;  %13221 = vmatpush3.msra.mxu1 %v14378_v33  ;;  %v504_v52 = vrot.slane %v14549_v28, 7 }
  0x79   : > { %11163 = vmatpush3.msra.mxu0 %v956_v30  ;;  %13206 = vmatprep.subr.mxu1 %v14382_v35  ;;  %v2059_v30 = vld [vmem:[#allocation6 + $0x1e8] sm:$0xff] }
  0x7a   : > { %11164 = vmatprep.subr.mxu0 %v955_v32  ;;  %13222 = vmatpush3.msra.mxu1 %v14382_v35 }
  0x7b   : > { %11165 = vmatpush3.msra.mxu0 %v955_v32  ;;  %13207 = vmatprep.subr.mxu1 %v14386_v37  ;;  %v14557_v32 = vsel %vm735_vm1, %v739_v6, %v736_v2 }
  0x7c   : > { %11166 = vmatprep.subr.mxu0 %v954_v34  ;;  %13223 = vmatpush3.msra.mxu1 %v14386_v37  ;;  %20480 = vst [vmem:[#allocation28_spill] sm:$0xff] %v14557_v32 }
  0x7d   : > { %11167 = vmatpush3.msra.mxu0 %v954_v34  ;;  %13208 = vmatprep.subr.mxu1 %v14392_v38  ;;  %v14560_v34 = vld [vmem:[%s14304_s20 + $0x70] sm:$0xff] }
  0x7e   : > { %11168 = vmatprep.subr.mxu0 %v953_v36  ;;  %13224 = vmatpush3.msra.mxu1 %v14392_v38 }
  0x7f   : > { %11169 = vmatpush3.msra.mxu0 %v953_v36  ;;  %13209 = vmatprep.subr.mxu1 %v14414_v43 }
  0x80   : > { %11171 = vmatmul.mubr.f32.vlgmr.msra.gmra.mxu0 %v14322_v5  ;;  %11251 = vmatprep.subr.mxu0 %v14327_v9  ;;  %v608_v5 = vrot.slane %v14482_v0, 7 }
  0x81   : > { %11252 = vmatpush3.msra.mxu0 %v14327_v9  ;;  %11173 = vmatprep.mubr.f32.mxu0 %v14330_v10  ;;  %v14505_v9 = vsel %vm574_vm0, %v502_v62, %v607_v63  ;;  %v14508_v10 = vld [vmem:[%s14304_s20 + $0xd8] sm:$0xff] }
  0x82   : > { %11253 = vmatprep.subr.mxu0 %v14333_v12  ;;  %13225 = vmatpush3.msra.mxu1 %v14414_v43  ;;  %20475 = vst [vmem:[#allocation23_spill] sm:$0xff] %v14505_v9  ;;  %v14540_v24 = vsel %vm574_vm0, %v608_v5, %v502_v62  ;;  %v14573_v62 = vld [vmem:[%s14304_s20 + $0xf8] sm:$0xff] }
  0x83   : > { %11254 = vmatpush3.msra.mxu0 %v14333_v12  ;;  %13210 = vmatprep.subr.mxu1 %v14443_v53  ;;  %v14516_v12 = vld [vmem:[%s14304_s20 + $0xe0] sm:$0xff]  ;;  %20479 = vst [vmem:[#allocation27_spill] sm:$0xff] %v14540_v24 }
  0x84   : > { %11174 = vmatmul.mubr.f32.gmra.mxu0 %v14399_v39  ;;  %11255 = vmatprep.subr.mxu0 %v14338_v14 }
  0x85   : > { %11176 = vmatprep.mubr.f32.mxu0 %v14402_v40  ;;  %11256 = vmatpush3.msra.mxu0 %v14338_v14  ;;  %v2060_v14 = vld [vmem:[#allocation6 + $0x1f0] sm:$0xff] }
  0x86   : > { %11257 = vmatprep.subr.mxu0 %v14344_v17  ;;  %13226 = vmatpush3.msra.mxu1 %v14443_v53 }
  0x87   : > { %11258 = vmatpush3.msra.mxu0 %v14344_v17  ;;  %11313 = vmatprep.mubr.f32.mxu1 %v14464_v58  ;;  %v14527_v17 = vsel %vm735_vm1, %v737_v3, %v739_v6  ;;  %v616_v3 = vrot.slane %v14573_v62, 7  ;;  %v14592_v6 = vsel %vm574_vm0, %v504_v52, %v615_v54 }
  0x88   : > { %11177 = vmatmul.mubr.f32.gmra.mxu0 %v14429_v47  ;;  %11259 = vmatprep.subr.mxu0 %v14351_v20  ;;  %20477 = vst [vmem:[#allocation25_spill] sm:$0xff] %v14527_v17  ;;  %20484 = vst [vmem:[#allocation32_spill] sm:$0xff] %v14592_v6 }
  0x89   : > { %11179 = vmatprep.mubr.f32.mxu0 %v14435_v50  ;;  %11260 = vmatpush3.msra.mxu0 %v14351_v20  ;;  %v14534_v20 = vsel %vm574_vm0, %v607_v63, %v608_v5  ;;  %v2058_v63 = vld [vmem:[#allocation6 + $0x1e0] sm:$0xff]  ;;  %v14595_v5 = vld [vmem:[%s14304_s20 + $0x108] sm:$0xff]  ;;  %v14621_v32 = vsel %vm574_vm0, %v616_v3, %v504_v52 }
  0x8a   : > { %11261 = vmatprep.subr.mxu0 %v14355_v22  ;;  %11314 = vmatmul.mubr.f32.vlgmr.msra.gmra.mxu1 %v14472_v60  ;;  %20478 = vst [vmem:[#allocation26_spill] sm:$0xff] %v14534_v20  ;;  %v619_v48 = vrot.slane %v14595_v5, 7  ;;  %20486 = vst [vmem:[#allocation34_spill] sm:$0xff] %v14621_v32 }
  0x8b   : > { %11262 = vmatpush3.msra.mxu0 %v14355_v22  ;;  %11316 = vmatprep.mubr.f32.mxu1 %v14477_v61  ;;  %v611_v22 = vrot.slane %v14508_v10, 7 }
  0x8c   : > { %11180 = vmatmul.mubr.f32.gmra.mxu0 %v14456_v57  ;;  %11263 = vmatprep.subr.mxu0 %v14362_v25 }
  0x8d   : > { %11182 = vmatprep.mubr.f32.mxu0 %v14467_v59  ;;  %11264 = vmatpush3.msra.mxu0 %v14362_v25  ;;  %v612_v25 = vrot.slane %v14516_v12, 7  ;;  %v14564_v36 = vsel %vm574_vm0, %v503_v21, %v611_v22 }
  0x8e   : > { %11477 = vmatprep.subr.mxu1 %v2061_v1  ;;  %11265 = vmatprep.subr.mxu0 %v14366_v27  ;;  %20481 = vst [vmem:[#allocation29_spill] sm:$0xff] %v14564_v36 }
  0x8f   : > { %11317 = vmatmul.mubr.f32.gmra.mxu1 %v14500_v4  ;;  %11266 = vmatpush3.msra.mxu0 %v14366_v27  ;;  %v14553_v27 = vld [vmem:[%s14304_s20 + $0x68] sm:$0xff]  ;;  %v14568_v51 = vsel %vm574_vm0, %v611_v22, %v612_v25  ;;  %v14587_v2 = vsel %vm574_vm0, %v612_v25, %v503_v21  ;;  %v14603_v22 = vld [vmem:[%s14304_s20 + $0x110] sm:$0xff]  ;;  %v2057_v21 = vld [vmem:[#allocation6 + $0x1d8] sm:$0xff] }
  0x90   : > { %11183 = vmatmul.mubr.f32.gmra.mxu0 %v14491_v7  ;;  %11319 = vmatprep.mubr.f32.mxu1 %v14505_v9  ;;  %20482 = vst [vmem:[#allocation30_spill] sm:$0xff] %v14568_v51  ;;  %20483 = vst [vmem:[#allocation31_spill] sm:$0xff] %v14587_v2  ;;  %v14611_v25 = vld [vmem:[%s14304_s20 + $0x90] sm:$0xff]  ;;  %v620_v17 = vrot.slane %v14603_v22, 7 }
  0x91   : > { %11185 = vmatprep.mubr.f32.mxu0 %v14495_v8  ;;  %11267 = vmatprep.subr.mxu0 %v14370_v29 }
  0x92   : > { %11478 = vmatpush3.msra.mxu1 %v2061_v1  ;;  %11268 = vmatpush3.msra.mxu0 %v14370_v29  ;;  %v14579_v29 = vld [vmem:[%s14304_s20 + $0x78] sm:$0xff]  ;;  %v14583_v1 = vld [vmem:[%s14304_s20 + $0x80] sm:$0xff] }
  0x93   : > { %11479 = vmatprep.subr.mxu1 %v2060_v14  ;;  %11320 = vmatmul.mubr.f32.gmra.mxu1 %v14534_v20 }
  0x94   : > { %11186 = vmatmul.mubr.f32.gmra.mxu0 %v14520_v13  ;;  %11322 = vmatprep.mubr.f32.mxu1 %v14540_v24 }
  0x95   : > { %11188 = vmatprep.mubr.f32.mxu0 %v14530_v19  ;;  %11269 = vmatprep.subr.mxu0 %v14374_v31 }
  0x96   : > { %11480 = vmatpush3.msra.mxu1 %v2060_v14  ;;  %11270 = vmatpush3.msra.mxu0 %v14374_v31  ;;  %v14598_v14 = vld [vmem:[%s14304_s20 + $0x118] sm:$0xff]  ;;  %v14607_v31 = vld [vmem:[%s14304_s20 + $0x88] sm:$0xff] }
  0x97   : > { %11481 = vmatprep.subr.mxu1 %v2059_v30  ;;  %11323 = vmatmul.mubr.f32.gmra.mxu1 %v14564_v36  ;;  %v505_v49 = vrot.slane %v14598_v14, 7 }
  0x98   : > { %11189 = vmatmul.mubr.f32.gmra.mxu0 %v14553_v27  ;;  %11325 = vmatprep.mubr.f32.mxu1 %v14568_v51  ;;  %v14664_v51 = vld [vmem:[%s14304_s20 + $0x148] sm:$0xff] }
  0x99   : > { %11191 = vmatprep.mubr.f32.mxu0 %v14560_v34  ;;  %11271 = vmatprep.subr.mxu0 %v14378_v33  ;;  %v14636_v52 = vsel %vm574_vm0, %v505_v49, %v619_v48 }
  0x9a   : > { %11482 = vmatpush3.msra.mxu1 %v2059_v30  ;;  %v14615_v30 = vsel %vm574_vm0, %v615_v54, %v616_v3  ;;  %11272 = vmatpush3.msra.mxu0 %v14378_v33  ;;  %v14630_v54 = vld [vmem:[%s14304_s20 + $0x130] sm:$0xff]  ;;  %20487 = vst [vmem:[#allocation35_spill] sm:$0xff] %v14636_v52 }
  0x9b   : > { %11483 = vmatprep.subr.mxu1 %v2058_v63  ;;  %11326 = vmatmul.mubr.f32.gmra.mxu1 %v14587_v2  ;;  %20485 = vst [vmem:[#allocation33_spill] sm:$0xff] %v14615_v30  ;;  %v2056_v33 = vld [vmem:[#allocation6 + $0x1d0] sm:$0xff]  ;;  %v506_v3 = vrot.slane %v14630_v54, 7  ;;  %v14645_v2 = vld [vmem:[%s14304_s20 + $0x128] sm:$0xff] }
  0x9c   : > { %11192 = vmatmul.mubr.f32.gmra.mxu0 %v14579_v29  ;;  %11328 = vmatprep.mubr.f32.mxu1 %v14592_v6  ;;  %v623_v6 = vrot.slane %v14627_v16, 7 }
  0x9d   : > { %11194 = vmatprep.mubr.f32.mxu0 %v14583_v1  ;;  %11273 = vmatprep.subr.mxu0 %v14382_v35 }
  0x9e   : > { %11484 = vmatpush3.msra.mxu1 %v2058_v63  ;;  %11274 = vmatpush3.msra.mxu0 %v14382_v35  ;;  %v14640_v63 = vsel %vm574_vm0, %v619_v48, %v620_v17  ;;  %v2055_v35 = vld [vmem:[#allocation6 + $0x1c8] sm:$0xff]  ;;  %v14653_v48 = vsel %vm574_vm0, %v620_v17, %v505_v49  ;;  %v507_v17 = vrot.slane %v14664_v51, 7 }
  0x9f   : > { %11485 = vmatprep.subr.mxu1 %v2057_v21  ;;  %11329 = vmatmul.mubr.f32.gmra.mxu1 %v14615_v30  ;;  %20488 = vst [vmem:[#allocation36_spill] sm:$0xff] %v14640_v63  ;;  %20489 = vst [vmem:[#allocation37_spill] sm:$0xff] %v14653_v48  ;;  %v14661_v30 = vld [vmem:[%s14304_s20 + $0x138] sm:$0xff] }
  0xa0   : > { %11195 = vmatmul.mubr.f32.gmra.mxu0 %v14607_v31  ;;  %11331 = vmatprep.mubr.f32.mxu1 %v14621_v32  ;;  %v624_v32 = vrot.slane %v14645_v2, 7 }
  0xa1   : > { %11197 = vmatprep.mubr.f32.mxu0 %v14611_v25  ;;  %11275 = vmatprep.subr.mxu0 %v14386_v37 }
  0xa2   : > { %11486 = vmatpush3.msra.mxu1 %v2057_v21  ;;  %11276 = vmatpush3.msra.mxu0 %v14386_v37  ;;  %v14658_v21 = vsel %vm574_vm0, %v506_v3, %v623_v6  ;;  %v2054_v37 = vld [vmem:[#allocation6 + $0x1c0] sm:$0xff]  ;;  %v14675_v49 = vsel %vm574_vm0, %v623_v6, %v624_v32 }
  0xa3   : > { %11487 = vmatprep.subr.mxu1 %v2056_v33  ;;  %11332 = vmatmul.mubr.f32.gmra.mxu1 %v14636_v52  ;;  %20490 = vst [vmem:[#allocation38_spill] sm:$0xff] %v14658_v21  ;;  %20491 = vst [vmem:[#allocation39_spill] sm:$0xff] %v14675_v49  ;;  %v14690_v6 = vld [vmem:[%s14304_s20 + $0x160] sm:$0xff] }
  0xa4   : > { %11198 = vmatmul.mubr.f32.gmra.mxu0 %v14407_v41  ;;  %11334 = vmatprep.mubr.f32.mxu1 %v14640_v63  ;;  %v14669_v63 = vld [vmem:[%s14304_s20 + $0x140] sm:$0xff] }
  0xa5   : > { %11200 = vmatprep.mubr.f32.mxu0 %v14410_v42  ;;  %11277 = vmatprep.subr.mxu0 %v14392_v38  ;;  %v628_v52 = vrot.slane %v14669_v63, 7 }
  0xa6   : > { %11488 = vmatpush3.msra.mxu1 %v2056_v33  ;;  %v627_v33 = vrot.slane %v14661_v30, 7  ;;  %11278 = vmatpush3.msra.mxu0 %v14392_v38  ;;  %v2053_v38 = vld [vmem:[#allocation6 + $0x1b8] sm:$0xff] }
  0xa7   : > { %11489 = vmatprep.subr.mxu1 %v2055_v35  ;;  %11335 = vmatmul.mubr.f32.gmra.mxu1 %v14653_v48 }
  0xa8   : > { %11201 = vmatmul.mubr.f32.gmra.mxu0 %v14417_v44  ;;  %11337 = vmatprep.mubr.f32.mxu1 %v14658_v21  ;;  %v14681_v44 = vsel %vm574_vm0, %v624_v32, %v506_v3  ;;  %v14696_v32 = vsel %vm574_vm0, %v507_v17, %v627_v33  ;;  %v14700_v3 = vsel %vm574_vm0, %v627_v33, %v628_v52  ;;  %v14726_v21 = vld [vmem:[%s14304_s20 + $0x178] sm:$0xff] }
  0xa9   : > { %11203 = vmatprep.mubr.f32.mxu0 %v14425_v46  ;;  %20492 = vst [vmem:[#allocation40_spill] sm:$0xff] %v14681_v44  ;;  %11279 = vmatprep.subr.mxu0 %v14414_v43  ;;  %v14687_v46 = vld [vmem:[%s14304_s20 + $0x150] sm:$0xff]  ;;  %20493 = vst [vmem:[#allocation41_spill] sm:$0xff] %v14696_v32  ;;  %v14715_v33 = vsel %vm574_vm0, %v628_v52, %v507_v17  ;;  %v2051_v52 = vld [vmem:[#allocation6 + $0x1a8] sm:$0xff]  ;;  %v509_v17 = vrot.slane %v14726_v21, 7 }
  0xaa   : > { %11490 = vmatpush3.msra.mxu1 %v2055_v35  ;;  %11280 = vmatpush3.msra.mxu0 %v14414_v43  ;;  %20494 = vst [vmem:[#allocation42_spill] sm:$0xff] %v14700_v3  ;;  %v631_v35 = vrot.slane %v14687_v46, 7  ;;  %v2052_v43 = vld [vmem:[#allocation6 + $0x1b0] sm:$0xff]  ;;  %20495 = vst [vmem:[#allocation43_spill] sm:$0xff] %v14715_v33 }
  0xab   : > { %11491 = vmatprep.subr.mxu1 %v2054_v37  ;;  %11338 = vmatmul.mubr.f32.gmra.mxu1 %v14675_v49 }
  0xac   : > { %11204 = vmatmul.mubr.f32.gmra.mxu0 %v14420_v45  ;;  %11340 = vmatprep.mubr.f32.mxu1 %v14681_v44  ;;  %v508_v45 = vrot.slane %v14690_v6, 7  ;;  %v14709_v44 = vld [vmem:[#allocation6 + $0x178] sm:$0xff] }
  0xad   : > { %11206 = vmatprep.mubr.f32.mxu0 %v14449_v55  ;;  %v14705_v55 = vld [vmem:[%s14304_s20 + $0x158] sm:$0xff]  ;;  %11281 = vmatprep.subr.mxu0 %v14443_v53 }
  0xae   : > { %11492 = vmatpush3.msra.mxu1 %v2054_v37  ;;  %v632_v49 = vrot.slane %v14705_v55, 7  ;;  %11282 = vmatpush3.msra.mxu0 %v14443_v53  ;;  %v14723_v37 = vld [vmem:[%s14304_s20 + $0x168] sm:$0xff] }
  0xaf   : > { %11493 = vmatprep.subr.mxu1 %v2053_v38  ;;  %11341 = vmatmul.mubr.f32.gmra.mxu1 %v14696_v32  ;;  %v2047_v32 = vld [vmem:[#allocation6 + $0x188] sm:$0xff] }
  0xb0   : > { %11207 = vmatmul.mubr.f32.gmra.mxu0 %v14482_v0  ;;  %11343 = vmatprep.mubr.f32.mxu1 %v14700_v3  ;;  %v14720_v0 = vsel %vm574_vm0, %v508_v45, %v631_v35  ;;  %v14737_v53 = vsel %vm574_vm0, %v631_v35, %v632_v49  ;;  %v2049_v35 = vld [vmem:[#allocation6 + $0x198] sm:$0xff] }
  0xb1   : > { %11209 = vmatprep.mubr.f32.mxu0 %v14452_v56  ;;  %20496 = vst [vmem:[#allocation44_spill] sm:$0xff] %v14720_v0  ;;  %11364 = vmatprep.subr.mxu0 %v14709_v44  ;;  %v14731_v56 = vld [vmem:[%s14304_s20 + $0x170] sm:$0xff]  ;;  %20497 = vst [vmem:[#allocation45_spill] sm:$0xff] %v14737_v53 }
  0xb2   : > { %11494 = vmatpush3.msra.mxu1 %v2053_v38  ;;  %v635_v38 = vrot.slane %v14723_v37, 7  ;;  %v636_v3 = vrot.slane %v14731_v56, 7 }
  0xb3   : > { %11495 = vmatprep.subr.mxu1 %v2052_v43  ;;  %11344 = vmatmul.mubr.f32.gmra.mxu1 %v14715_v33  ;;  %v14747_v33 = vld [vmem:[%s14304_s20 + $0x180] sm:$0xff] }
  0xb4   : > { %11210 = vmatmul.mubr.f32.gmra.mxu0 %v14508_v10  ;;  %11346 = vmatprep.mubr.f32.mxu1 %v14720_v0  ;;  %v14742_v10 = vsel %vm574_vm0, %v632_v49, %v508_v45  ;;  %v14750_v0 = vld [vmem:[%s14304_s20 + $0x190] sm:$0xff]  ;;  %v14756_v49 = vsel %vm574_vm0, %v509_v17, %v635_v38  ;;  %v14759_v45 = vsel %vm574_vm0, %v635_v38, %v636_v3 }
  0xb5   : > { %11212 = vmatprep.mubr.f32.mxu0 %v14516_v12  ;;  %11496 = vmatpush3.msra.mxu1 %v2052_v43  ;;  %20498 = vst [vmem:[#allocation46_spill] sm:$0xff] %v14742_v10  ;;  %v2050_v12 = vld [vmem:[#allocation6 + $0x1a0] sm:$0xff]  ;;  %20499 = vst [vmem:[#allocation47_spill] sm:$0xff] %v14756_v49  ;;  %v639_v43 = vrot.slane %v14747_v33, 7  ;;  %v14771_v38 = vsel %vm574_vm0, %v636_v3, %v509_v17 }
  0xb6   : > { %11497 = vmatprep.subr.mxu1 %v2051_v52  ;;  %20500 = vst [vmem:[#allocation48_spill] sm:$0xff] %v14759_v45  ;;  %20501 = vst [vmem:[#allocation49_spill] sm:$0xff] %v14771_v38  ;;  %v2046_v3 = vld [vmem:[#allocation6 + $0x180] sm:$0xff] }
  0xb7   : > { %11498 = vmatpush3.msra.mxu1 %v2051_v52  ;;  %v14764_v52 = vld [vmem:[%s14304_s20 + $0x188] sm:$0xff] }
  0xb8   : > { %11213 = vmatmul.mubr.f32.gmra.mxu0 %v14511_v11  ;;  %11347 = vmatmul.mubr.f32.gmra.mxu1 %v14737_v53  ;;  %v510_v11 = vrot.slane %v14750_v0, 7 }
  0xb9   : > { %11215 = vmatprep.mubr.f32.mxu0 %v14546_v26  ;;  %11349 = vmatprep.mubr.f32.mxu1 %v14742_v10  ;;  %v2048_v26 = vld [vmem:[#allocation6 + $0x190] sm:$0xff]  ;;  %v640_v10 = vrot.slane %v14764_v52, 7 }
  0xba   : > { %11499 = vmatprep.subr.mxu1 %v2050_v12  ;;  %v14775_v53 = vsel %vm574_vm0, %v510_v11, %v639_v43 }
  0xbb   : > { %11500 = vmatpush3.msra.mxu1 %v2050_v12  ;;  %20502 = vst [vmem:[#allocation50_spill] sm:$0xff] %v14775_v53  ;;  %v14778_v12 = vld [vmem:[%s14304_s20 + $0x198] sm:$0xff]  ;;  %v14791_v17 = vsel %vm574_vm0, %v639_v43, %v640_v10 }
  0xbc   : > { %11216 = vmatmul.mubr.f32.gmra.mxu0 %v14573_v62  ;;  %11501 = vmatprep.subr.mxu1 %v2049_v35  ;;  %v14781_v62 = vld [vmem:[%s14304_s20 + $0x1a8] sm:$0xff]  ;;  %20503 = vst [vmem:[#allocation51_spill] sm:$0xff] %v14791_v17 }
  0xbd   : > { %11218 = vmatprep.mubr.f32.mxu0 %v14549_v28  ;;  %11350 = vmatmul.mubr.f32.gmra.mxu1 %v14756_v49  ;;  %v14785_v28 = vld [vmem:[%s14304_s20 + $0x1a0] sm:$0xff] }
  0xbe   : > { %11352 = vmatprep.mubr.f32.mxu1 %v14759_v45  ;;  %11502 = vmatpush3.msra.mxu1 %v2049_v35  ;;  %v511_v35 = vrot.slane %v14781_v62, 7  ;;  %v643_v45 = vrot.slane %v14778_v12, 7 }
  0xbf   : > { %11503 = vmatprep.subr.mxu1 %v2048_v26 }
  0xc0   : > { %11219 = vmatmul.mubr.f32.gmra.mxu0 %v14595_v5  ;;  %11504 = vmatpush3.msra.mxu1 %v2048_v26  ;;  %v14796_v5 = vsel %vm574_vm0, %v640_v10, %v510_v11  ;;  %v644_v26 = vrot.slane %v14785_v28, 7  ;;  %v580_v10 = vrot.slane %v14402_v40, 7  ;;  %v584_v11 = vrot.slane %v14456_v57, 7 }
  0xc1   : > { %11221 = vmatprep.mubr.f32.mxu0 %v14603_v22  ;;  %11353 = vmatmul.mubr.f32.gmra.mxu1 %v14771_v38  ;;  %20504 = vst [vmem:[#allocation52_spill] sm:$0xff] %v14796_v5  ;;  %v14804_v22 = vsel %vm574_vm0, %v511_v35, %v643_v45 }
  0xc2   : > { %11355 = vmatprep.mubr.f32.mxu1 %v14775_v53  ;;  %11505 = vmatprep.subr.mxu1 %v2047_v32  ;;  %20505 = vst [vmem:[#allocation53_spill] sm:$0xff] %v14804_v22  ;;  %v14807_v43 = vsel %vm574_vm0, %v643_v45, %v644_v26  ;;  %v496_v45 = vrot.slane %v14467_v59, 7 }
  0xc3   : > { %11506 = vmatpush3.msra.mxu1 %v2047_v32  ;;  %20506 = vst [vmem:[#allocation54_spill] sm:$0xff] %v14807_v43  ;;  %v14816_v32 = vsel %vm574_vm0, %v644_v26, %v511_v35  ;;  %v587_v35 = vrot.slane %v14491_v7, 7  ;;  %v588_v26 = vrot.slane %v14495_v8, 7 }
  0xc4   : > { %11222 = vmatmul.mubr.f32.gmra.mxu0 %v14598_v14  ;;  %11507 = vmatprep.subr.mxu1 %v2046_v3  ;;  %v495_v14 = vrot.slane %v14429_v47, 7  ;;  %20507 = vst [vmem:[#allocation55_spill] sm:$0xff] %v14816_v32 }
  0xc5   : > { %11224 = vmatprep.mubr.f32.mxu0 %v14627_v16  ;;  %11356 = vmatmul.mubr.f32.gmra.mxu1 %v14791_v17  ;;  %v579_v16 = vrot.slane %v14399_v39, 7 }
  0xc6   : > { %11358 = vmatprep.mubr.f32.mxu1 %v14796_v5  ;;  %11508 = vmatpush3.msra.mxu1 %v2046_v3 }
  0xc8   : > { %11225 = vmatmul.mubr.f32.gmra.mxu0 %v14645_v2  ;;  %v14823_v2 = vsel %vm574_vm0, %v495_v14, %v579_v16 }
  0xc9   : > { %11227 = vmatprep.mubr.f32.mxu0 %v14630_v54  ;;  %11359 = vmatmul.mubr.f32.gmra.mxu1 %v14804_v22  ;;  %v14828_v54 = vsel %vm574_vm0, %v579_v16, %v580_v10  ;;  %v591_v16 = vrot.slane %v14530_v19, 7 }
  0xca   : > { %11361 = vmatprep.mubr.f32.mxu1 %v14807_v43 }
  0xcc   : > { %11228 = vmatmul.mubr.f32.gmra.mxu0 %v14661_v30  ;;  %v583_v30 = vrot.slane %v14435_v50, 7 }
  0xcd   : > { %11230 = vmatprep.mubr.f32.mxu0 %v14669_v63  ;;  %11362 = vmatmul.mubr.f32.gmra.mxu1 %v14816_v32  ;;  %v14834_v63 = vsel %vm574_vm0, %v580_v10, %v495_v14  ;;  %v14864_v14 = vsel %vm574_vm0, %v587_v35, %v588_v26  ;;  %v592_v10 = vrot.slane %v14553_v27, 7 }
  0xce   : > { %11509 = vmatprep.mubr.f32.mxu1 %v14823_v2  ;;  %v14845_v3 = vsel %vm574_vm0, %v583_v30, %v584_v11  ;;  %20512 = vst [vmem:[#allocation60_spill] sm:$0xff] %v14864_v14 }
  0xcf   : > { %20509 = vst [vmem:[#allocation57_spill] sm:$0xff] %v14845_v3 }
  0xd0   : > { %11231 = vmatmul.mubr.f32.gmra.mxu0 %v14664_v51  ;;  %v14841_v51 = vsel %vm574_vm0, %v496_v45, %v583_v30  ;;  %v595_v30 = vrot.slane %v14579_v29, 7 }
  0xd1   : > { %11233 = vmatprep.mubr.f32.mxu0 %v14687_v46  ;;  %11510 = vmatmul.mubr.f32.vlgmr.msra.gmra.mxu1 %v14828_v54  ;;  %20508 = vst [vmem:[#allocation56_spill] sm:$0xff] %v14841_v51  ;;  %v497_v46 = vrot.slane %v14520_v13, 7 }
  0xd2   : > { %11512 = vmatprep.mubr.f32.mxu1 %v14834_v63 }
  0xd4   : > { %11234 = vmatmul.mubr.f32.gmra.mxu0 %v14705_v55  ;;  %v14853_v55 = vsel %vm574_vm0, %v584_v11, %v496_v45  ;;  %v14881_v45 = vsel %vm574_vm0, %v591_v16, %v592_v10  ;;  %v2873_v11 = vld [vmem:[#allocation6 + $0x2f8] sm:$0xff] }
  0xd5   : > { %11236 = vmatprep.mubr.f32.mxu0 %v14690_v6  ;;  %11513 = vmatmul.mubr.f32.gmra.mxu1 %v14841_v51  ;;  %20510 = vst [vmem:[#allocation58_spill] sm:$0xff] %v14853_v55  ;;  %v14858_v6 = vsel %vm574_vm0, %v497_v46, %v587_v35  ;;  %20515 = vst [vmem:[#allocation63_spill] sm:$0xff] %v14881_v45 }
  0xd6   : > { %11515 = vmatprep.mubr.f32.mxu1 %v14845_v3  ;;  %20511 = vst [vmem:[#allocation59_spill] sm:$0xff] %v14858_v6  ;;  %11703 = vmatprep.subr.mxu1 %v2873_v11 }
  0xd7   : > { %11704 = vmatpush3.msra.mxu1 %v2873_v11  ;;  %v1654_v11 = vld [vmem:[#allocation6 + $0x170] sm:$0xff] }
  0xd8   : > { %11237 = vmatmul.mubr.f32.gmra.mxu0 %v14723_v37  ;;  %v498_v37 = vrot.slane %v14560_v34, 7 }
  0xd9   : > { %11239 = vmatprep.mubr.f32.mxu0 %v14731_v56  ;;  %11516 = vmatmul.mubr.f32.gmra.mxu1 %v14853_v55  ;;  %v14870_v56 = vsel %vm574_vm0, %v588_v26, %v497_v46  ;;  %v2871_v26 = vld [vmem:[#allocation6 + $0x2e8] sm:$0xff] }
  0xda   : > { %11518 = vmatprep.mubr.f32.mxu1 %v14858_v6  ;;  %20513 = vst [vmem:[#allocation61_spill] sm:$0xff] %v14870_v56  ;;  %v14889_v46 = vsel %vm574_vm0, %v592_v10, %v498_v37  ;;  %v14908_v10 = vld [vmem:[#allocation6 + $0x2d8] sm:$0xff] }
  0xdb   : > { %20516 = vst [vmem:[#allocation64_spill] sm:$0xff] %v14889_v46 }
  0xdc   : > { %11240 = vmatmul.mubr.f32.gmra.mxu0 %v14726_v21  ;;  %v14877_v21 = vsel %vm574_vm0, %v498_v37, %v591_v16  ;;  %v2870_v16 = vld [vmem:[#allocation6 + $0x2e0] sm:$0xff]  ;;  %v599_v37 = vrot.slane %v14611_v25, 7 }
  0xdd   : > { %11242 = vmatprep.mubr.f32.mxu0 %v14747_v33  ;;  %11519 = vmatmul.mubr.f32.gmra.mxu1 %v14864_v14  ;;  %20514 = vst [vmem:[#allocation62_spill] sm:$0xff] %v14877_v21  ;;  %v499_v33 = vrot.slane %v14607_v31, 7 }
  0xde   : > { %11521 = vmatprep.mubr.f32.mxu1 %v14870_v56 }
  0xdf   : > { %v14894_v35 = vsel %vm574_vm0, %v499_v33, %v595_v30 }
  0xe0   : > { %11243 = vmatmul.mubr.f32.gmra.mxu0 %v14764_v52  ;;  %v2872_v52 = vld [vmem:[#allocation6 + $0x2f0] sm:$0xff]  ;;  %20517 = vst [vmem:[#allocation65_spill] sm:$0xff] %v14894_v35 }
  0xe1   : > { %11245 = vmatprep.mubr.f32.mxu0 %v14750_v0  ;;  %11522 = vmatmul.mubr.f32.gmra.mxu1 %v14877_v21  ;;  %v596_v0 = vrot.slane %v14583_v1, 7 }
  0xe2   : > { %11524 = vmatprep.mubr.f32.mxu1 %v14881_v45  ;;  %11705 = vmatprep.subr.mxu1 %v2872_v52 }
  0xe3   : > { %11706 = vmatpush3.msra.mxu1 %v2872_v52 }
  0xe4   : > { %11246 = vmatmul.mubr.f32.gmra.mxu0 %v14778_v12  ;;  %11707 = vmatprep.subr.mxu1 %v2871_v26  ;;  %v14900_v12 = vsel %vm574_vm0, %v595_v30, %v596_v0  ;;  %v20522_v30 = vrot.slane %v14407_v41, 7  ;;  %v1650_v41 = vld [vmem:[#allocation6 + $0x150] sm:$0xff] }
  0xe5   : > { %11248 = vmatprep.mubr.f32.mxu0 %v14785_v28  ;;  %11525 = vmatmul.mubr.f32.gmra.mxu1 %v14889_v46  ;;  %20518 = vst [vmem:[#allocation66_spill] sm:$0xff] %v14900_v12  ;;  %v14904_v28 = vsel %vm574_vm0, %v596_v0, %v499_v33  ;;  %v1644_v0 = vld [vmem:[#allocation6 + $0x120] sm:$0xff] }
  0xe6   : > { %11527 = vmatprep.mubr.f32.mxu1 %v14894_v35  ;;  %11708 = vmatpush3.msra.mxu1 %v2871_v26  ;;  %20519 = vst [vmem:[#allocation67_spill] sm:$0xff] %v14904_v28  ;;  %v14923_v52 = vsel %vm574_vm0, %v599_v37, %v20522_v30  ;;  %v1643_v26 = vld [vmem:[#allocation6 + $0x118] sm:$0xff]  ;;  %v1640_v30 = vld [vmem:[#allocation6 + $0x100] sm:$0xff] }
  0xe7   : > { %11709 = vmatprep.subr.mxu1 %v2870_v16  ;;  %20523 = vst [vmem:[#allocation69_spill] sm:$0xff] %v14923_v52 }
  0xe8   : > { %11249 = vmatmul.mubr.f32.gmra.mxu0 %v14781_v62  ;;  %11710 = vmatpush3.msra.mxu1 %v2870_v16  ;;  %v20520_v62 = vrot.slane %v14410_v42, 7  ;;  %v1649_v42 = vld [vmem:[#allocation6 + $0x148] sm:$0xff]  ;;  %v20524_v16 = vld [vmem:[#allocation30_spill] sm:$0xff] }
  0xe9   : > { %11283 = vmatprep.mubr.f32.mxu0 %v14341_v15  ;;  %11528 = vmatmul.mubr.f32.gmra.mxu1 %v14900_v12  ;;  %v1653_v15 = vld [vmem:[#allocation6 + $0x168] sm:$0xff] }
  0xea   : > { %11530 = vmatprep.mubr.f32.mxu1 %v14904_v28  ;;  %11711 = vmatprep.subr.mxu1 %v14908_v10  ;;  %v14918_v33 = vsel %vm574_vm0, %v20520_v62, %v599_v37  ;;  %v1642_v37 = vld [vmem:[#allocation6 + $0x110] sm:$0xff]  ;;  %v20526_v62 = vld [vmem:[#allocation32_spill] sm:$0xff] }
  0xeb   : > { %20521 = vst [vmem:[#allocation68_spill] sm:$0xff] %v14918_v33  ;;  %11712 = vmatpush3.msra.mxu1 %v14908_v10  ;;  %v744_v10 = vrot.slane %v14429_v47, 1 }
  0xec   : > { %11284 = vmatmul.mubr.f32.vlgmr.msra.gmra.mxu0 %v14347_v18  ;;  %v1652_v18 = vld [vmem:[#allocation6 + $0x160] sm:$0xff] }
  0xed   : > { %11365 = vmatpush3.msra.mxu0 %v14709_v44  ;;  %11286 = vmatprep.mubr.f32.mxu0 %v14358_v23  ;;  %v1651_v23 = vld [vmem:[#allocation6 + $0x158] sm:$0xff]  ;;  %v1648_v44 = vld [vmem:[#allocation6 + $0x140] sm:$0xff] }
  0xee   : > { %11366 = vmatprep.subr.mxu0 %v1654_v11  ;;  %11531 = vmatmul.mubr.f32.gmra.mxu1 %v14918_v33 }
  0xef   : > { %11367 = vmatpush3.msra.mxu0 %v1654_v11  ;;  %11533 = vmatprep.mubr.f32.mxu1 %v14923_v52  ;;  %v20525_v11 = vld [vmem:[#allocation31_spill] sm:$0xff] }
  0xf0   : > { %11287 = vmatmul.mubr.f32.gmra.mxu0 %v14823_v2  ;;  %11368 = vmatprep.subr.mxu0 %v1653_v15  ;;  %v1647_v2 = vld [vmem:[#allocation6 + $0x138] sm:$0xff] }
  0xf1   : > { %11369 = vmatpush3.msra.mxu0 %v1653_v15  ;;  %11289 = vmatprep.mubr.f32.mxu0 %v14828_v54  ;;  %v1646_v54 = vld [vmem:[#allocation6 + $0x130] sm:$0xff]  ;;  %v1641_v15 = vld [vmem:[#allocation6 + $0x108] sm:$0xff] }
  0xf2   : > { %11370 = vmatprep.subr.mxu0 %v1652_v18  ;;  %11534 = vmatmul.mubr.f32.gmra.mxu1 %v14464_v58  ;;  %v15202_v58 = vld [vmem:[%s14304_s20 + $0x100] sm:$0xff] }
  0xf3   : > { %11371 = vmatpush3.msra.mxu0 %v1652_v18  ;;  %11536 = vmatprep.mubr.f32.mxu1 %v14472_v60  ;;  %v20527_v18 = vld [vmem:[#allocation33_spill] sm:$0xff]  ;;  %20577 = vst [vmem:[#allocation100_spill] sm:$0xff] %v15202_v58 }
  0xf4   : > { %11290 = vmatmul.mubr.f32.gmra.mxu0 %v14834_v63  ;;  %11372 = vmatprep.subr.mxu0 %v1651_v23  ;;  %v1645_v63 = vld [vmem:[#allocation6 + $0x128] sm:$0xff] }
  0xf5   : > { %11292 = vmatprep.mubr.f32.mxu0 %v14841_v51  ;;  %11373 = vmatpush3.msra.mxu0 %v1651_v23  ;;  %v2467_v23 = vld [vmem:[#allocation6 + $0x278] sm:$0xff]  ;;  %v15261_v51 = vld [vmem:[%s14304_s20 + $0x128] sm:$0xff] }
  0xf6   : > { %11374 = vmatprep.subr.mxu0 %v1650_v41  ;;  %11537 = vmatmul.mubr.f32.gmra.mxu1 %v14477_v61  ;;  %20592 = vst [vmem:[#allocation115_spill] sm:$0xff] %v15261_v51 }
  0xf7   : > { %11375 = vmatpush3.msra.mxu0 %v1650_v41  ;;  %11539 = vmatprep.mubr.f32.mxu1 %v14500_v4  ;;  %v20528_v41 = vld [vmem:[#allocation34_spill] sm:$0xff]  ;;  %v15185_v4 = vld [vmem:[%s14304_s20 + $0xf0] sm:$0xff] }
  0xf8   : > { %11293 = vmatmul.mubr.f32.gmra.mxu0 %v14845_v3  ;;  %11376 = vmatprep.subr.mxu0 %v1649_v42  ;;  %20573 = vst [vmem:[#allocation96_spill] sm:$0xff] %v15185_v4 }
  0xf9   : > { %11295 = vmatprep.mubr.f32.mxu0 %v14853_v55  ;;  %11377 = vmatpush3.msra.mxu0 %v1649_v42  ;;  %v20529_v42 = vld [vmem:[#allocation35_spill] sm:$0xff] }
  0xfa   : > { %11378 = vmatprep.subr.mxu0 %v1648_v44  ;;  %11540 = vmatmul.mubr.f32.gmra.mxu1 %v14505_v9 }
  0xfb   : > { %11379 = vmatpush3.msra.mxu0 %v1648_v44  ;;  %11542 = vmatprep.mubr.f32.mxu1 %v14534_v20  ;;  %v2868_v44 = vld [vmem:[#allocation6 + $0x2d0] sm:$0xff]  ;;  %v15167_v20 = vld [vmem:[%s14304_s20 + $0xe8] sm:$0xff] }
  0xfc   : > { %11296 = vmatmul.mubr.f32.gmra.mxu0 %v14858_v6  ;;  %11380 = vmatprep.subr.mxu0 %v1647_v2 }
  0xfd   : > { %11298 = vmatprep.mubr.f32.mxu0 %v14864_v14  ;;  %11381 = vmatpush3.msra.mxu0 %v1647_v2  ;;  %v2867_v2 = vld [vmem:[#allocation6 + $0x2c8] sm:$0xff]  ;;  %v3684_v14 = vld [vmem:[#allocation6 + $0x3f0] sm:$0xff] }
  0xfe   : > { %11382 = vmatprep.subr.mxu0 %v1646_v54  ;;  %11543 = vmatmul.mubr.f32.gmra.mxu1 %v14540_v24  ;;  %v15140_v24 = vld [vmem:[%s14304_s20 + $0xd0] sm:$0xff] }
  0xff   : > { %11383 = vmatpush3.msra.mxu0 %v1646_v54  ;;  %11545 = vmatprep.mubr.f32.mxu1 %v14564_v36  ;;  %v20530_v54 = vld [vmem:[#allocation36_spill] sm:$0xff] }
 0x100   : > { %11299 = vmatmul.mubr.f32.gmra.mxu0 %v14870_v56  ;;  %11384 = vmatprep.subr.mxu0 %v1645_v63 }
 0x101   : > { %11301 = vmatprep.mubr.f32.mxu0 %v14877_v21  ;;  %11385 = vmatpush3.msra.mxu0 %v1645_v63  ;;  %v2866_v63 = vld [vmem:[#allocation6 + $0x2c0] sm:$0xff]  ;;  %v15235_v21 = vld [vmem:[%s14304_s20 + $0x118] sm:$0xff] }
 0x102   : > { %11386 = vmatprep.subr.mxu0 %v1644_v0  ;;  %11546 = vmatmul.mubr.f32.gmra.mxu1 %v20524_v16  ;;  %v15126_v16 = vld [vmem:[%s14304_s20 + $0xc8] sm:$0xff]  ;;  %20586 = vst [vmem:[#allocation109_spill] sm:$0xff] %v15235_v21 }
 0x103   : > { %11387 = vmatpush3.msra.mxu0 %v1644_v0  ;;  %11548 = vmatprep.mubr.f32.mxu1 %v20525_v11  ;;  %v20531_v0 = vld [vmem:[#allocation24_spill] sm:$0xff] }
 0x104   : > { %11302 = vmatmul.mubr.f32.gmra.mxu0 %v14881_v45  ;;  %11388 = vmatprep.subr.mxu0 %v1643_v26 }
 0x105   : > { %11304 = vmatprep.mubr.f32.mxu0 %v14889_v46  ;;  %11389 = vmatpush3.msra.mxu0 %v1643_v26  ;;  %v741_v26 = vrot.slane %v14399_v39, 1  ;;  %v20535_v39 = vld [vmem:[#allocation28_spill] sm:$0xff] }
 0x106   : > { %11390 = vmatprep.subr.mxu0 %v1642_v37  ;;  %11549 = vmatmul.mubr.f32.gmra.mxu1 %v20526_v62  ;;  %v2861_v62 = vld [vmem:[#allocation6 + $0x298] sm:$0xff] }
 0x107   : > { %11391 = vmatpush3.msra.mxu0 %v1642_v37  ;;  %11551 = vmatprep.mubr.f32.mxu1 %v20527_v18  ;;  %v742_v37 = vrot.slane %v14402_v40, 1  ;;  %v15100_v18 = vld [vmem:[%s14304_s20 + $0xb8] sm:$0xff] }
 0x108   : > { %11305 = vmatmul.mubr.f32.gmra.mxu0 %v14894_v35  ;;  %11392 = vmatprep.subr.mxu0 %v1641_v15 }
 0x109   : > { %11307 = vmatprep.mubr.f32.mxu0 %v14900_v12  ;;  %11393 = vmatpush3.msra.mxu0 %v1641_v15  ;;  %v14964_v15 = vld [vmem:[#allocation6 + $0x2b8] sm:$0xff]  ;;  %v14973_v40 = vsel %vm735_vm1, %v741_v26, %v742_v37  ;;  %v14976_v47 = vsel %vm735_vm1, %v742_v37, %v744_v10  ;;  %v749_v37 = vrot.slane %v14467_v59, 1  ;;  %v751_v59 = vrot.slane %v14491_v7, 1  ;;  %v15224_v12 = vld [vmem:[%s14304_s20 + $0x110] sm:$0xff] }
 0x10a   : > { %11394 = vmatprep.subr.mxu0 %v1640_v30  ;;  %11552 = vmatmul.mubr.f32.gmra.mxu1 %v20528_v41  ;;  %20583 = vst [vmem:[#allocation106_spill] sm:$0xff] %v15224_v12  ;;  %v792_v35 = vrot.slane %v15224_v12, 1 }
 0x10b   : > { %11395 = vmatpush3.msra.mxu0 %v1640_v30  ;;  %11554 = vmatprep.mubr.f32.mxu1 %v20529_v42  ;;  %v20532_v30 = vld [vmem:[#allocation38_spill] sm:$0xff]  ;;  %v20544_v42 = vld [vmem:[#allocation45_spill] sm:$0xff] }
 0x10c   : > { %11308 = vmatmul.mubr.f32.gmra.mxu0 %v14904_v28  ;;  %11590 = vmatprep.subr.mxu0 %v2467_v23 }
 0x10d   : > { %11310 = vmatprep.mubr.f32.mxu0 %v14918_v33  ;;  %11713 = vmatprep.subr.mxu1 %v2868_v44 }
 0x10e   : > { %11555 = vmatmul.mubr.f32.gmra.mxu1 %v20530_v54  ;;  %v20534_v54 = vld [vmem:[#allocation25_spill] sm:$0xff] }
 0x10f   : > { %11557 = vmatprep.mubr.f32.mxu1 %v14653_v48  ;;  %11714 = vmatpush3.msra.mxu1 %v2868_v44  ;;  %v2466_v48 = vld [vmem:[#allocation6 + $0x270] sm:$0xff]  ;;  %v20533_v44 = vld [vmem:[#allocation39_spill] sm:$0xff] }
 0x110   : > { %11311 = vmatmul.mubr.f32.gmra.mxu0 %v14923_v52  ;;  %11715 = vmatprep.subr.mxu1 %v2867_v2  ;;  %v789_v52 = vrot.slane %v15202_v58, 1  ;;  %v15391_v58 = vld [vmem:[%s14304_s20 + $0x178] sm:$0xff] }
 0x111   : > { %11396 = vmatprep.mubr.f32.mxu0 %v20531_v0  ;;  %11716 = vmatpush3.msra.mxu1 %v2867_v2  ;;  %v2465_v2 = vld [vmem:[#allocation6 + $0x268] sm:$0xff]  ;;  %v746_v0 = vrot.slane %v14435_v50, 1  ;;  %v2463_v50 = vld [vmem:[#allocation6 + $0x258] sm:$0xff]  ;;  %20622 = vst [vmem:[#allocation145_spill] sm:$0xff] %v15391_v58 }
 0x112   : > { %11558 = vmatmul.mubr.f32.gmra.mxu1 %v20532_v30  ;;  %11717 = vmatprep.subr.mxu1 %v2866_v63  ;;  %v20537_v30 = vld [vmem:[#allocation41_spill] sm:$0xff] }
 0x113   : > { %11560 = vmatprep.mubr.f32.mxu1 %v20533_v44  ;;  %11718 = vmatpush3.msra.mxu1 %v2866_v63  ;;  %v747_v44 = vrot.slane %v14456_v57, 1  ;;  %v20536_v63 = vld [vmem:[#allocation40_spill] sm:$0xff] }
 0x114   : > { %11397 = vmatmul.mubr.f32.vlgmr.msra.gmra.mxu0 %v20534_v54  ;;  %11719 = vmatprep.subr.mxu1 %v14964_v15  ;;  %v2464_v54 = vld [vmem:[#allocation6 + $0x260] sm:$0xff] }
 0x115   : > { %11591 = vmatpush3.msra.mxu0 %v2467_v23  ;;  %11399 = vmatprep.mubr.f32.mxu0 %v20535_v39  ;;  %v14985_v23 = vsel %vm735_vm1, %v744_v10, %v741_v26  ;;  %v14989_v57 = vsel %vm735_vm1, %v746_v0, %v747_v44  ;;  %v2462_v39 = vld [vmem:[#allocation6 + $0x250] sm:$0xff]  ;;  %v14996_v26 = vsel %vm735_vm1, %v747_v44, %v749_v37  ;;  %v752_v10 = vrot.slane %v14495_v8, 1  ;;  %v2459_v8 = vld [vmem:[#allocation6 + $0x238] sm:$0xff] }
 0x116   : > { %11592 = vmatprep.subr.mxu0 %v2466_v48  ;;  %11561 = vmatmul.mubr.f32.gmra.mxu1 %v20536_v63  ;;  %20538 = vst [vmem:[#allocation24_spill] sm:$0xff] %v14989_v57  ;;  %20541 = vst [vmem:[#allocation25_spill] sm:$0xff] %v14996_v26  ;;  %v2460_v63 = vld [vmem:[#allocation6 + $0x240] sm:$0xff] }
 0x117   : > { %11593 = vmatpush3.msra.mxu0 %v2466_v48  ;;  %11563 = vmatprep.mubr.f32.mxu1 %v20537_v30  ;;  %v20539_v48 = vld [vmem:[#allocation42_spill] sm:$0xff]  ;;  %v20540_v30 = vld [vmem:[#allocation43_spill] sm:$0xff]  ;;  %v15009_v7 = vsel %vm735_vm1, %v751_v59, %v752_v10 }
 0x118   : > { %11400 = vmatmul.mubr.f32.gmra.mxu0 %v14973_v40  ;;  %11594 = vmatprep.subr.mxu0 %v2465_v2  ;;  %20545 = vst [vmem:[#allocation70_spill] sm:$0xff] %v15009_v7 }
 0x119   : > { %11402 = vmatprep.mubr.f32.mxu0 %v14976_v47  ;;  %11595 = vmatpush3.msra.mxu0 %v2465_v2  ;;  %v2461_v2 = vld [vmem:[#allocation6 + $0x248] sm:$0xff] }
 0x11a   : > { %11596 = vmatprep.subr.mxu0 %v2464_v54  ;;  %11564 = vmatmul.mubr.f32.gmra.mxu1 %v20539_v48  ;;  %v15001_v48 = vsel %vm735_vm1, %v749_v37, %v746_v0  ;;  %v757_v0 = vrot.slane %v14553_v27, 1  ;;  %v20547_v37 = vld [vmem:[#allocation46_spill] sm:$0xff] }
 0x11b   : > { %11597 = vmatpush3.msra.mxu0 %v2464_v54  ;;  %11566 = vmatprep.mubr.f32.mxu1 %v20540_v30  ;;  %20542 = vst [vmem:[#allocation28_spill] sm:$0xff] %v15001_v48  ;;  %v754_v54 = vrot.slane %v14520_v13, 1  ;;  %v20543_v30 = vld [vmem:[#allocation44_spill] sm:$0xff]  ;;  %v756_v13 = vrot.slane %v14530_v19, 1 }
 0x11c   : > { %11403 = vmatmul.mubr.f32.gmra.mxu0 %v14985_v23  ;;  %11598 = vmatprep.subr.mxu0 %v2463_v50  ;;  %v2457_v19 = vld [vmem:[#allocation6 + $0x228] sm:$0xff] }
 0x11d   : > { %11405 = vmatprep.mubr.f32.mxu0 %v14989_v57  ;;  %11599 = vmatpush3.msra.mxu0 %v2463_v50  ;;  %v15012_v44 = vsel %vm735_vm1, %v752_v10, %v754_v54  ;;  %v2458_v50 = vld [vmem:[#allocation6 + $0x230] sm:$0xff]  ;;  %v759_v10 = vrot.slane %v14560_v34, 1  ;;  %v15025_v27 = vsel %vm735_vm1, %v756_v13, %v757_v0  ;;  %v761_v34 = vrot.slane %v14579_v29, 1 }
 0x11e   : > { %11600 = vmatprep.subr.mxu0 %v2462_v39  ;;  %11567 = vmatmul.mubr.f32.gmra.mxu1 %v20543_v30  ;;  %20546 = vst [vmem:[#allocation71_spill] sm:$0xff] %v15012_v44  ;;  %20549 = vst [vmem:[#allocation73_spill] sm:$0xff] %v15025_v27  ;;  %v15093_v30 = vld [vmem:[%s14304_s20 + $0xb0] sm:$0xff] }
 0x11f   : > { %11601 = vmatpush3.msra.mxu0 %v2462_v39  ;;  %11569 = vmatprep.mubr.f32.mxu1 %v20544_v42  ;;  %v15021_v39 = vsel %vm735_vm1, %v754_v54, %v751_v59  ;;  %v15032_v59 = vsel %vm735_vm1, %v757_v0, %v759_v10  ;;  %v762_v54 = vrot.slane %v14583_v1, 1  ;;  %v2453_v1 = vld [vmem:[#allocation6 + $0x208] sm:$0xff]  ;;  %v15052_v0 = vld [vmem:[%s14304_s20 + $0x98] sm:$0xff] }
 0x120   : > { %11406 = vmatmul.mubr.f32.gmra.mxu0 %v14996_v26  ;;  %11602 = vmatprep.subr.mxu0 %v2461_v2  ;;  %20548 = vst [vmem:[#allocation72_spill] sm:$0xff] %v15021_v39  ;;  %20551 = vst [vmem:[#allocation74_spill] sm:$0xff] %v15032_v59 }
 0x121   : > { %11408 = vmatprep.mubr.f32.mxu0 %v15001_v48  ;;  %11603 = vmatpush3.msra.mxu0 %v2461_v2  ;;  %v2456_v2 = vld [vmem:[#allocation6 + $0x220] sm:$0xff]  ;;  %v15045_v29 = vsel %vm735_vm1, %v761_v34, %v762_v54 }
 0x122   : > { %11604 = vmatprep.subr.mxu0 %v2460_v63  ;;  %11570 = vmatmul.mubr.f32.gmra.mxu1 %v20547_v37  ;;  %20553 = vst [vmem:[#allocation76_spill] sm:$0xff] %v15045_v29 }
 0x123   : > { %11605 = vmatpush3.msra.mxu0 %v2460_v63  ;;  %11572 = vmatprep.mubr.f32.mxu1 %v14756_v49  ;;  %v20550_v63 = vld [vmem:[#allocation48_spill] sm:$0xff] }
 0x124   : > { %11409 = vmatmul.mubr.f32.gmra.mxu0 %v15009_v7  ;;  %11606 = vmatprep.subr.mxu0 %v2459_v8 }
 0x125   : > { %11411 = vmatprep.mubr.f32.mxu0 %v15012_v44  ;;  %11607 = vmatpush3.msra.mxu0 %v2459_v8  ;;  %v2455_v8 = vld [vmem:[#allocation6 + $0x218] sm:$0xff] }
 0x126   : > { %11608 = vmatprep.subr.mxu0 %v2458_v50  ;;  %11573 = vmatmul.mubr.f32.gmra.mxu1 %v20550_v63  ;;  %v2454_v63 = vld [vmem:[#allocation6 + $0x210] sm:$0xff] }
 0x127   : > { %11609 = vmatpush3.msra.mxu0 %v2458_v50  ;;  %11575 = vmatprep.mubr.f32.mxu1 %v14771_v38  ;;  %v15037_v50 = vsel %vm735_vm1, %v759_v10, %v756_v13  ;;  %v764_v38 = vrot.slane %v14607_v31, 1  ;;  %v766_v13 = vrot.slane %v14611_v25, 1  ;;  %v767_v10 = vrot.slane %v15052_v0, 1  ;;  %v2452_v25 = vld [vmem:[#allocation6 + $0x200] sm:$0xff] }
 0x128   : > { %11412 = vmatmul.mubr.f32.gmra.mxu0 %v15021_v39  ;;  %11610 = vmatprep.subr.mxu0 %v2457_v19  ;;  %20552 = vst [vmem:[#allocation75_spill] sm:$0xff] %v15037_v50 }
 0x129   : > { %11414 = vmatprep.mubr.f32.mxu0 %v15025_v27  ;;  %11611 = vmatpush3.msra.mxu0 %v2457_v19  ;;  %v15048_v31 = vsel %vm735_vm1, %v762_v54, %v764_v38  ;;  %v2864_v19 = vld [vmem:[#allocation6 + $0x2b0] sm:$0xff]  ;;  %v15065_v54 = vld [vmem:[%s14304_s20 + $0x1b8] sm:$0xff] }
 0x12a   : > { %11612 = vmatprep.subr.mxu0 %v2456_v2  ;;  %11576 = vmatmul.mubr.f32.gmra.mxu1 %v14775_v53  ;;  %20554 = vst [vmem:[#allocation77_spill] sm:$0xff] %v15048_v31  ;;  %v2863_v53 = vld [vmem:[#allocation6 + $0x2a8] sm:$0xff] }
 0x12b   : > { %11613 = vmatpush3.msra.mxu0 %v2456_v2  ;;  %11578 = vmatprep.mubr.f32.mxu1 %v14791_v17  ;;  %v15058_v2 = vld [vmem:[%s14304_s20 + $0x1b0] sm:$0xff]  ;;  %v15069_v17 = vsel %vm735_vm1, %v764_v38, %v761_v34  ;;  %v648_v34 = vrot.slane %v15065_v54, 7 }
 0x12c   : > { %11415 = vmatmul.mubr.f32.gmra.mxu0 %v15032_v59  ;;  %11614 = vmatprep.subr.mxu0 %v2455_v8  ;;  %20555 = vst [vmem:[#allocation78_spill] sm:$0xff] %v15069_v17  ;;  %v647_v38 = vrot.slane %v15058_v2, 7 }
 0x12d   : > { %11417 = vmatprep.mubr.f32.mxu0 %v15037_v50  ;;  %11615 = vmatpush3.msra.mxu0 %v2455_v8  ;;  %v15061_v8 = vld [vmem:[%s14304_s20 + $0x1c0] sm:$0xff] }
 0x12e   : > { %11616 = vmatprep.subr.mxu0 %v2454_v63  ;;  %11579 = vmatmul.mubr.f32.gmra.mxu1 %v14796_v5  ;;  %v15072_v5 = vld [vmem:[%s14304_s20 + $0xa0] sm:$0xff]  ;;  %v512_v49 = vrot.slane %v15061_v8, 7  ;;  %v15108_v11 = vsel %vm574_vm0, %v647_v38, %v648_v34 }
 0x12f   : > { %11617 = vmatpush3.msra.mxu0 %v2454_v63  ;;  %11720 = vmatpush3.msra.mxu1 %v14964_v15  ;;  %v769_v15 = vrot.slane %v15072_v5, 1  ;;  %v15076_v63 = vsel %vm735_vm1, %v766_v13, %v767_v10  ;;  %20560 = vst [vmem:[#allocation83_spill] sm:$0xff] %v15108_v11 }
 0x130   : > { %11418 = vmatmul.mubr.f32.gmra.mxu0 %v15045_v29  ;;  %11618 = vmatprep.subr.mxu0 %v2453_v1  ;;  %20556 = vst [vmem:[#allocation79_spill] sm:$0xff] %v15076_v63  ;;  %v15131_v36 = vsel %vm574_vm0, %v648_v34, %v512_v49 }
 0x131   : > { %11420 = vmatprep.mubr.f32.mxu0 %v15048_v31  ;;  %11619 = vmatpush3.msra.mxu0 %v2453_v1  ;;  %v2862_v1 = vld [vmem:[#allocation6 + $0x2a0] sm:$0xff]  ;;  %v15086_v37 = vsel %vm735_vm1, %v767_v10, %v769_v15  ;;  %v15097_v41 = vsel %vm735_vm1, %v769_v15, %v766_v13  ;;  %v15105_v10 = vsel %vm574_vm0, %v512_v49, %v647_v38  ;;  %v15111_v13 = vld [vmem:[#allocation6 + $0x378] sm:$0xff]  ;;  %v2860_v15 = vld [vmem:[#allocation6 + $0x290] sm:$0xff] }
 0x132   : > { %11721 = vmatprep.subr.mxu1 %v2864_v19  ;;  %11581 = vmatprep.mubr.f32.mxu1 %v14804_v22  ;;  %20557 = vst [vmem:[#allocation80_spill] sm:$0xff] %v15086_v37  ;;  %v15089_v22 = vld [vmem:[%s14304_s20 + $0xa8] sm:$0xff]  ;;  %20558 = vst [vmem:[#allocation81_spill] sm:$0xff] %v15097_v41  ;;  %v2858_v49 = vld [vmem:[#allocation6 + $0x280] sm:$0xff] }
 0x133   : > { %11722 = vmatpush3.msra.mxu1 %v2864_v19  ;;  %11620 = vmatprep.subr.mxu0 %v2452_v25  ;;  %v771_v42 = vrot.slane %v15089_v22, 1  ;;  %v772_v19 = vrot.slane %v15093_v30, 1  ;;  %20559 = vst [vmem:[#allocation82_spill] sm:$0xff] %v15105_v10  ;;  %20563 = vst [vmem:[#allocation86_spill] sm:$0xff] %v15131_v36 }
 0x134   : > { %11421 = vmatmul.mubr.f32.gmra.mxu0 %v15069_v17  ;;  %11582 = vmatmul.mubr.f32.gmra.mxu1 %v14807_v43  ;;  %v774_v43 = vrot.slane %v15100_v18, 1 }
 0x135   : > { %11423 = vmatprep.mubr.f32.mxu0 %v15076_v63  ;;  %11723 = vmatprep.subr.mxu1 %v2863_v53 }
 0x136   : > { %11724 = vmatpush3.msra.mxu1 %v2863_v53  ;;  %11584 = vmatprep.mubr.f32.mxu1 %v14816_v32  ;;  %v15115_v53 = vsel %vm735_vm1, %v771_v42, %v772_v19  ;;  %v15119_v32 = vsel %vm735_vm1, %v772_v19, %v774_v43  ;;  %v15137_v19 = vsel %vm735_vm1, %v774_v43, %v771_v42  ;;  %v15154_v42 = vld [vmem:[%s14304_s20 + $0xd8] sm:$0xff] }
 0x137   : > { %11725 = vmatprep.subr.mxu1 %v2862_v1  ;;  %11621 = vmatpush3.msra.mxu0 %v2452_v25  ;;  %20561 = vst [vmem:[#allocation84_spill] sm:$0xff] %v15115_v53  ;;  %20562 = vst [vmem:[#allocation85_spill] sm:$0xff] %v15119_v32  ;;  %v15122_v25 = vld [vmem:[%s14304_s20 + $0xc0] sm:$0xff] }
 0x138   : > { %11424 = vmatmul.mubr.f32.gmra.mxu0 %v15086_v37  ;;  %11726 = vmatpush3.msra.mxu1 %v2862_v1  ;;  %v776_v38 = vrot.slane %v15122_v25, 1  ;;  %v777_v1 = vrot.slane %v15126_v16, 1  ;;  %20564 = vst [vmem:[#allocation87_spill] sm:$0xff] %v15137_v19 }
 0x139   : > { %11426 = vmatprep.mubr.f32.mxu0 %v15097_v41  ;;  %11585 = vmatmul.mubr.f32.gmra.mxu1 %v15105_v10  ;;  %v2859_v10 = vld [vmem:[#allocation6 + $0x288] sm:$0xff] }
 0x13a   : > { %11727 = vmatprep.subr.mxu1 %v2861_v62  ;;  %11587 = vmatprep.mubr.f32.mxu1 %v15108_v11  ;;  %v15144_v34 = vsel %vm735_vm1, %v776_v38, %v777_v1 }
 0x13b   : > { %11728 = vmatpush3.msra.mxu1 %v2861_v62  ;;  %11816 = vmatprep.subr.mxu0 %v15111_v13  ;;  %v779_v62 = vrot.slane %v15140_v24, 1  ;;  %20565 = vst [vmem:[#allocation88_spill] sm:$0xff] %v15144_v34 }
 0x13c   : > { %11427 = vmatmul.mubr.f32.gmra.mxu0 %v15115_v53  ;;  %11729 = vmatprep.subr.mxu1 %v2860_v15 }
 0x13d   : > { %11429 = vmatprep.mubr.f32.mxu0 %v15119_v32  ;;  %11730 = vmatpush3.msra.mxu1 %v2860_v15  ;;  %v15151_v43 = vsel %vm735_vm1, %v777_v1, %v779_v62  ;;  %v781_v15 = vrot.slane %v15154_v42, 1  ;;  %v784_v1 = vrot.slane %v15167_v20, 1 }
 0x13e   : > { %11588 = vmatmul.mubr.f32.gmra.mxu1 %v15131_v36  ;;  %11731 = vmatprep.subr.mxu1 %v2859_v10  ;;  %20566 = vst [vmem:[#allocation89_spill] sm:$0xff] %v15151_v43  ;;  %v15158_v36 = vld [vmem:[%s14304_s20 + $0xe0] sm:$0xff] }
 0x13f   : > { %11732 = vmatpush3.msra.mxu1 %v2859_v10  ;;  %11735 = vmatprep.mubr.f32.mxu1 %v14973_v40  ;;  %v782_v10 = vrot.slane %v15158_v36, 1  ;;  %v15164_v40 = vsel %vm735_vm1, %v779_v62, %v776_v38 }
 0x140   : > { %v11172_v11 = vpop.f32.mrf.mxu0  ;;  %11430 = vmatmul.mubr.f32.gmra.mxu0 %v15137_v19  ;;  %11733 = vmatprep.subr.mxu1 %v2858_v49  ;;  %20568 = vst [vmem:[#allocation91_spill] sm:$0xff] %v15164_v40 }
 0x141   : > { %11432 = vmatprep.mubr.f32.mxu0 %v15144_v34  ;;  %11734 = vmatpush3.msra.mxu1 %v2858_v49  ;;  %v15177_v49 = vsel %vm735_vm1, %v781_v15, %v782_v10  ;;  %v15182_v62 = vsel %vm735_vm1, %v782_v10, %v784_v1  ;;  %v15199_v10 = vsel %vm735_vm1, %v784_v1, %v781_v15  ;;  %v15220_v1 = vld [vmem:[%s14304_s20 + $0x108] sm:$0xff] }
 0x142   : > { %v15161_v11 = vpop.f32.mrf.mxu0  ;;  %11736 = vmatmul.mubr.f32.vlgmr.msra.gmra.mxu1 %v14976_v47  ;;  %20570 = vst [vmem:[#allocation93_spill] sm:$0xff] %v15177_v49  ;;  %20572 = vst [vmem:[#allocation95_spill] sm:$0xff] %v15182_v62  ;;  %v786_v47 = vrot.slane %v15185_v4, 1  ;;  %v791_v28 = vrot.slane %v15220_v1, 1 }
 0x143   : > { %20567 = vst [vmem:[#allocation90_spill] sm:$0xff] %v15161_v11  ;;  %11738 = vmatprep.mubr.f32.mxu1 %v14985_v23  ;;  %v15189_v23 = vld [vmem:[%s14304_s20 + $0xf8] sm:$0xff]  ;;  %20576 = vst [vmem:[#allocation99_spill] sm:$0xff] %v15199_v10 }
 0x144   : > { %v15172_v9 = vpop.f32.mrf.mxu0  ;;  %11433 = vmatmul.mubr.f32.gmra.mxu0 %v15151_v43  ;;  %20574 = vst [vmem:[#allocation97_spill] sm:$0xff] %v15189_v23  ;;  %v787_v61 = vrot.slane %v15189_v23, 1  ;;  %20582 = vst [vmem:[#allocation105_spill] sm:$0xff] %v15220_v1  ;;  %v15232_v45 = vsel %vm735_vm1, %v789_v52, %v786_v47 }
 0x145   : > { %20569 = vst [vmem:[#allocation92_spill] sm:$0xff] %v15172_v9  ;;  %11435 = vmatprep.mubr.f32.mxu0 %v15164_v40  ;;  %20585 = vst [vmem:[#allocation108_spill] sm:$0xff] %v15232_v45 }
 0x146   : > { %v15179_v38 = vpop.f32.mrf.mxu0  ;;  %11739 = vmatmul.mubr.f32.gmra.mxu1 %v14989_v57  ;;  %v15208_v57 = vsel %vm735_vm1, %v786_v47, %v787_v61  ;;  %v15217_v15 = vsel %vm735_vm1, %v787_v61, %v789_v52  ;;  %v794_v61 = vrot.slane %v15235_v21, 1  ;;  %v15247_v52 = vsel %vm735_vm1, %v791_v28, %v792_v35  ;;  %v15380_v21 = vld [vmem:[%s14304_s20 + $0x170] sm:$0xff] }
 0x147   : > { %20571 = vst [vmem:[#allocation94_spill] sm:$0xff] %v15179_v38  ;;  %11741 = vmatprep.mubr.f32.mxu1 %v14996_v26  ;;  %20579 = vst [vmem:[#allocation102_spill] sm:$0xff] %v15208_v57  ;;  %v15302_v38 = vld [vmem:[%s14304_s20 + $0x140] sm:$0xff] }
 0x148   : > { %v15194_v60 = vpop.f32.mrf.mxu0  ;;  %11436 = vmatmul.mubr.f32.gmra.mxu0 %v15177_v49  ;;  %20581 = vst [vmem:[#allocation104_spill] sm:$0xff] %v15217_v15  ;;  %20588 = vst [vmem:[#allocation111_spill] sm:$0xff] %v15247_v52 }
 0x149   : > { %20575 = vst [vmem:[#allocation98_spill] sm:$0xff] %v15194_v60  ;;  %11438 = vmatprep.mubr.f32.mxu0 %v15182_v62  ;;  %20601 = vst [vmem:[#allocation124_spill] sm:$0xff] %v15302_v38 }
 0x14a   : > { %v15205_v33 = vpop.f32.mrf.mxu0  ;;  %11742 = vmatmul.mubr.f32.gmra.mxu1 %v15001_v48  ;;  %v15227_v48 = vpop.f32.mrf.mxu1  ;;  %20619 = vst [vmem:[#allocation142_spill] sm:$0xff] %v15380_v21 }
 0x14b   : > { %20578 = vst [vmem:[#allocation101_spill] sm:$0xff] %v15205_v33  ;;  %11744 = vmatprep.mubr.f32.mxu1 %v15009_v7  ;;  %v3685_v7 = vld [vmem:[#allocation6 + $0x3f8] sm:$0xff] }
 0x14c   : > { %v15212_v26 = vpop.f32.mrf.mxu0  ;;  %11439 = vmatmul.mubr.f32.gmra.mxu0 %v15199_v10  ;;  %11929 = vmatprep.subr.mxu1 %v3685_v7  ;;  %v15239_v56 = vpop.f32.mrf.mxu1 }
 0x14d   : > { %20580 = vst [vmem:[#allocation103_spill] sm:$0xff] %v15212_v26  ;;  %11441 = vmatprep.mubr.f32.mxu0 %v15208_v57  ;;  %11930 = vmatpush3.msra.mxu1 %v3685_v7  ;;  %v15257_v7 = vld [vmem:[%s14304_s20 + $0x120] sm:$0xff]  ;;  %v15276_v26 = vld [vmem:[%s14304_s20 + $0x130] sm:$0xff] }
 0x14e   : > { %v15229_v46 = vpop.f32.mrf.mxu0  ;;  %11745 = vmatmul.mubr.f32.gmra.mxu1 %v15012_v44  ;;  %11931 = vmatprep.subr.mxu1 %v3684_v14  ;;  %v3683_v44 = vld [vmem:[#allocation6 + $0x3e8] sm:$0xff]  ;;  %20591 = vst [vmem:[#allocation114_spill] sm:$0xff] %v15257_v7  ;;  %v796_v3 = vrot.slane %v15257_v7, 1  ;;  %20595 = vst [vmem:[#allocation118_spill] sm:$0xff] %v15276_v26 }
 0x14f   : > { %20584 = vst [vmem:[#allocation107_spill] sm:$0xff] %v15229_v46  ;;  %11747 = vmatprep.mubr.f32.mxu1 %v15021_v39  ;;  %v15249_v47 = vpop.f32.mrf.mxu1  ;;  %11932 = vmatpush3.msra.mxu1 %v3684_v14  ;;  %v15254_v39 = vsel %vm735_vm1, %v792_v35, %v794_v61  ;;  %v3682_v14 = vld [vmem:[#allocation6 + $0x3e0] sm:$0xff] }
 0x150   : > { %v15242_v6 = vpop.f32.mrf.mxu0  ;;  %11442 = vmatmul.mubr.f32.gmra.mxu0 %v15217_v15  ;;  %20590 = vst [vmem:[#allocation113_spill] sm:$0xff] %v15254_v39  ;;  %11933 = vmatprep.subr.mxu1 %v3683_v44 }
 0x151   : > { %20587 = vst [vmem:[#allocation110_spill] sm:$0xff] %v15242_v6  ;;  %11444 = vmatprep.mubr.f32.mxu0 %v15232_v45  ;;  %v797_v6 = vrot.slane %v15261_v51, 1  ;;  %v15265_v46 = vpop.f32.mrf.mxu1  ;;  %11934 = vmatpush3.msra.mxu1 %v3683_v44  ;;  %v3681_v44 = vld [vmem:[#allocation6 + $0x3d8] sm:$0xff] }
 0x152   : > { %v15251_v55 = vpop.f32.mrf.mxu0  ;;  %11748 = vmatmul.mubr.f32.gmra.mxu1 %v15025_v27  ;;  %11935 = vmatprep.subr.mxu1 %v3682_v14  ;;  %v799_v27 = vrot.slane %v15276_v26, 1  ;;  %v15313_v26 = vld [vmem:[%s14304_s20 + $0x148] sm:$0xff] }
 0x153   : > { %20589 = vst [vmem:[#allocation112_spill] sm:$0xff] %v15251_v55  ;;  %11750 = vmatprep.mubr.f32.mxu1 %v15032_v59  ;;  %v15273_v55 = vsel %vm735_vm1, %v794_v61, %v791_v28  ;;  %v15279_v33 = vpop.f32.mrf.mxu1  ;;  %11936 = vmatpush3.msra.mxu1 %v3682_v14  ;;  %v3680_v61 = vld [vmem:[#allocation6 + $0x3d0] sm:$0xff]  ;;  %20604 = vst [vmem:[#allocation127_spill] sm:$0xff] %v15313_v26 }
 0x154   : > { %v15268_v35 = vpop.f32.mrf.mxu0  ;;  %11445 = vmatmul.mubr.f32.gmra.mxu0 %v15247_v52  ;;  %20594 = vst [vmem:[#allocation117_spill] sm:$0xff] %v15273_v55  ;;  %11937 = vmatprep.subr.mxu1 %v3681_v44  ;;  %v15295_v14 = vsel %vm735_vm1, %v797_v6, %v799_v27  ;;  %v15310_v11 = vsel %vm735_vm1, %v799_v27, %v796_v3 }
 0x155   : > { %20593 = vst [vmem:[#allocation116_spill] sm:$0xff] %v15268_v35  ;;  %11447 = vmatprep.mubr.f32.mxu0 %v15254_v39  ;;  %v15284_v35 = vsel %vm735_vm1, %v796_v3, %v797_v6  ;;  %v15287_v28 = vpop.f32.mrf.mxu1  ;;  %11938 = vmatpush3.msra.mxu1 %v3681_v44  ;;  %20599 = vst [vmem:[#allocation122_spill] sm:$0xff] %v15295_v14  ;;  %v802_v44 = vrot.slane %v15302_v38, 1  ;;  %v804_v6 = vrot.slane %v15313_v26, 1  ;;  %v15339_v26 = vld [vmem:[%s14304_s20 + $0x158] sm:$0xff] }
 0x156   : > { %v15281_v59 = vpop.f32.mrf.mxu0  ;;  %20597 = vst [vmem:[#allocation120_spill] sm:$0xff] %v15284_v35  ;;  %11751 = vmatmul.mubr.f32.gmra.mxu1 %v15037_v50  ;;  %11939 = vmatprep.subr.mxu1 %v3680_v61  ;;  %20603 = vst [vmem:[#allocation126_spill] sm:$0xff] %v15310_v11  ;;  %v807_v51 = vrot.slane %v15339_v26, 1 }
 0x157   : > { %20596 = vst [vmem:[#allocation119_spill] sm:$0xff] %v15281_v59  ;;  %11753 = vmatprep.mubr.f32.mxu1 %v15045_v29  ;;  %v15298_v59 = vld [vmem:[%s14304_s20 + $0x138] sm:$0xff]  ;;  %v15305_v29 = vpop.f32.mrf.mxu1  ;;  %11940 = vmatpush3.msra.mxu1 %v3680_v61  ;;  %v3678_v61 = vld [vmem:[#allocation6 + $0x3c0] sm:$0xff]  ;;  %20610 = vst [vmem:[#allocation133_spill] sm:$0xff] %v15339_v26 }
 0x158   : > { %v15290_v60 = vpop.f32.mrf.mxu0  ;;  %11448 = vmatmul.mubr.f32.gmra.mxu0 %v15273_v55  ;;  %20600 = vst [vmem:[#allocation123_spill] sm:$0xff] %v15298_v59  ;;  %v801_v50 = vrot.slane %v15298_v59, 1  ;;  %v15354_v26 = vld [vmem:[%s14304_s20 + $0x160] sm:$0xff] }
 0x159   : > { %20598 = vst [vmem:[#allocation121_spill] sm:$0xff] %v15290_v60  ;;  %11450 = vmatprep.mubr.f32.mxu0 %v15284_v35  ;;  %v3679_v60 = vld [vmem:[#allocation6 + $0x3c8] sm:$0xff]  ;;  %v15317_v59 = vpop.f32.mrf.mxu1  ;;  %20613 = vst [vmem:[#allocation136_spill] sm:$0xff] %v15354_v26 }
 0x15a   : > { %v15307_v9 = vpop.f32.mrf.mxu0  ;;  %11754 = vmatmul.mubr.f32.gmra.mxu1 %v15048_v31  ;;  %11941 = vmatprep.subr.mxu1 %v3679_v60  ;;  %v15325_v3 = vsel %vm735_vm1, %v801_v50, %v802_v44  ;;  %v3677_v31 = vld [vmem:[#allocation6 + $0x3b8] sm:$0xff] }
 0x15b   : > { %20602 = vst [vmem:[#allocation125_spill] sm:$0xff] %v15307_v9  ;;  %11756 = vmatprep.mubr.f32.mxu1 %v15069_v17  ;;  %11942 = vmatpush3.msra.mxu1 %v3679_v60  ;;  %20606 = vst [vmem:[#allocation129_spill] sm:$0xff] %v15325_v3  ;;  %v15327_v27 = vpop.f32.mrf.mxu1  ;;  %v15332_v17 = vsel %vm735_vm1, %v802_v44, %v804_v6  ;;  %v15335_v60 = vld [vmem:[%s14304_s20 + $0x150] sm:$0xff] }
 0x15c   : > { %v15320_v38 = vpop.f32.mrf.mxu0  ;;  %11451 = vmatmul.mubr.f32.gmra.mxu0 %v15295_v14  ;;  %11943 = vmatprep.subr.mxu1 %v3678_v61  ;;  %20608 = vst [vmem:[#allocation131_spill] sm:$0xff] %v15332_v17  ;;  %20609 = vst [vmem:[#allocation132_spill] sm:$0xff] %v15335_v60 }
 0x15d   : > { %20605 = vst [vmem:[#allocation128_spill] sm:$0xff] %v15320_v38  ;;  %11453 = vmatprep.mubr.f32.mxu0 %v15310_v11  ;;  %11944 = vmatpush3.msra.mxu1 %v3678_v61  ;;  %v806_v38 = vrot.slane %v15335_v60, 1  ;;  %v15343_v7 = vpop.f32.mrf.mxu1  ;;  %v3676_v61 = vld [vmem:[#allocation6 + $0x3b0] sm:$0xff] }
 0x15e   : > { %v15329_v9 = vpop.f32.mrf.mxu0  ;;  %11757 = vmatmul.mubr.f32.gmra.mxu1 %v15076_v63  ;;  %11945 = vmatprep.subr.mxu1 %v3677_v31  ;;  %v809_v63 = vrot.slane %v15354_v26, 1 }
 0x15f   : > { %20607 = vst [vmem:[#allocation130_spill] sm:$0xff] %v15329_v9  ;;  %11759 = vmatprep.mubr.f32.mxu1 %v15086_v37  ;;  %11946 = vmatpush3.msra.mxu1 %v3677_v31  ;;  %v15351_v9 = vsel %vm735_vm1, %v804_v6, %v801_v50  ;;  %v15357_v60 = vpop.f32.mrf.mxu1  ;;  %v3675_v31 = vld [vmem:[#allocation6 + $0x3a8] sm:$0xff]  ;;  %v3674_v6 = vld [vmem:[#allocation6 + $0x3a0] sm:$0xff] }
 0x160   : > { %v15346_v44 = vpop.f32.mrf.mxu0  ;;  %11454 = vmatmul.mubr.f32.gmra.mxu0 %v15325_v3  ;;  %11947 = vmatprep.subr.mxu1 %v3676_v61  ;;  %20612 = vst [vmem:[#allocation135_spill] sm:$0xff] %v15351_v9  ;;  %v15388_v1 = vsel %vm735_vm1, %v809_v63, %v806_v38 }
 0x161   : > { %20611 = vst [vmem:[#allocation134_spill] sm:$0xff] %v15346_v44  ;;  %11456 = vmatprep.mubr.f32.mxu0 %v15332_v17  ;;  %11948 = vmatpush3.msra.mxu1 %v3676_v61  ;;  %v15362_v44 = vsel %vm735_vm1, %v806_v38, %v807_v51  ;;  %v15365_v50 = vpop.f32.mrf.mxu1  ;;  %v15373_v61 = vsel %vm735_vm1, %v807_v51, %v809_v63  ;;  %20621 = vst [vmem:[#allocation144_spill] sm:$0xff] %v15388_v1  ;;  %v814_v51 = vrot.slane %v15391_v58, 1  ;;  %v15412_v58 = vld [vmem:[%s14304_s20 + $0x180] sm:$0xff] }
 0x162   : > { %v15359_v37 = vpop.f32.mrf.mxu0  ;;  %20615 = vst [vmem:[#allocation138_spill] sm:$0xff] %v15362_v44  ;;  %11760 = vmatmul.mubr.f32.gmra.mxu1 %v15097_v41  ;;  %11949 = vmatprep.subr.mxu1 %v3675_v31  ;;  %20617 = vst [vmem:[#allocation140_spill] sm:$0xff] %v15373_v61  ;;  %v816_v23 = vrot.slane %v15412_v58, 1 }
 0x163   : > { %20614 = vst [vmem:[#allocation137_spill] sm:$0xff] %v15359_v37  ;;  %11762 = vmatprep.mubr.f32.mxu1 %v15115_v53  ;;  %11950 = vmatpush3.msra.mxu1 %v3675_v31  ;;  %v15376_v37 = vld [vmem:[%s14304_s20 + $0x168] sm:$0xff]  ;;  %v812_v31 = vrot.slane %v15380_v21, 1  ;;  %v15383_v53 = vpop.f32.mrf.mxu1  ;;  %20626 = vst [vmem:[#allocation149_spill] sm:$0xff] %v15412_v58 }
 0x164   : > { %v15368_v26 = vpop.f32.mrf.mxu0  ;;  %11457 = vmatmul.mubr.f32.gmra.mxu0 %v15351_v9  ;;  %11951 = vmatprep.subr.mxu1 %v3674_v6  ;;  %20618 = vst [vmem:[#allocation141_spill] sm:$0xff] %v15376_v37  ;;  %v811_v41 = vrot.slane %v15376_v37, 1 }
 0x165   : > { %20616 = vst [vmem:[#allocation139_spill] sm:$0xff] %v15368_v26  ;;  %11459 = vmatprep.mubr.f32.mxu0 %v15362_v44  ;;  %11952 = vmatpush3.msra.mxu1 %v3674_v6  ;;  %v3673_v26 = vld [vmem:[#allocation6 + $0x398] sm:$0xff]  ;;  %v15395_v37 = vpop.f32.mrf.mxu1  ;;  %v3672_v6 = vld [vmem:[#allocation6 + $0x390] sm:$0xff] }
 0x166   : > { %v15385_v12 = vpop.f32.mrf.mxu0  ;;  %11763 = vmatmul.mubr.f32.gmra.mxu1 %v15119_v32  ;;  %11953 = vmatprep.subr.mxu1 %v3673_v26  ;;  %v15404_v38 = vsel %vm735_vm1, %v811_v41, %v812_v31 }
 0x167   : > { %20620 = vst [vmem:[#allocation143_spill] sm:$0xff] %v15385_v12  ;;  %11765 = vmatprep.mubr.f32.mxu1 %v15137_v19  ;;  %11954 = vmatpush3.msra.mxu1 %v3673_v26  ;;  %20624 = vst [vmem:[#allocation147_spill] sm:$0xff] %v15404_v38  ;;  %v15406_v32 = vpop.f32.mrf.mxu1  ;;  %v3671_v12 = vld [vmem:[#allocation6 + $0x388] sm:$0xff]  ;;  %v15409_v26 = vsel %vm735_vm1, %v812_v31, %v814_v51  ;;  %v3670_v31 = vld [vmem:[#allocation6 + $0x380] sm:$0xff] }
 0x168   : > { %v11202_v21 = vpop.f32.mrf.mxu0  ;;  %11460 = vmatmul.mubr.f32.gmra.mxu0 %v15373_v61  ;;  %11955 = vmatprep.subr.mxu1 %v3672_v6  ;;  %20625 = vst [vmem:[#allocation148_spill] sm:$0xff] %v15409_v26 }
 0x169   : > { %v15400_v63 = vadd.f32 %v15227_v48, %v11202_v21  ;;  %11462 = vmatprep.mubr.f32.mxu0 %v15388_v1  ;;  %11956 = vmatpush3.msra.mxu1 %v3672_v6  ;;  %v15416_v21 = vld [vmem:[%s14304_s20 + $0x188] sm:$0xff]  ;;  %v15423_v6 = vpop.f32.mrf.mxu1 }
 0x16a   : > { %v1135_v19 = vpop.f32.mrf.mxu0  ;;  %v817_v48 = vrot.slane %v15416_v21, 1  ;;  %11766 = vmatmul.mubr.f32.gmra.mxu1 %v15144_v34  ;;  %11957 = vmatprep.subr.mxu1 %v3671_v12  ;;  %v15432_v34 = vsel %vm735_vm1, %v814_v51, %v811_v41 }
 0x16b   : > { %20623 = vst [vmem:[#allocation146_spill] sm:$0xff] %v15400_v63  ;;  %v15421_v63 = vadd.f32 %v15239_v56, %v1135_v19  ;;  %11768 = vmatprep.mubr.f32.mxu1 %v15151_v43  ;;  %11958 = vmatpush3.msra.mxu1 %v3671_v12  ;;  %20629 = vst [vmem:[#allocation152_spill] sm:$0xff] %v15432_v34  ;;  %v15435_v56 = vld [vmem:[%s14304_s20 + $0x190] sm:$0xff]  ;;  %v15438_v12 = vpop.f32.mrf.mxu1 }
 0x16c   : > { %v11205_v4 = vpop.f32.mrf.mxu0  ;;  %11463 = vmatmul.mubr.f32.gmra.mxu0 %v15404_v38  ;;  %11959 = vmatprep.subr.mxu1 %v3670_v31  ;;  %20630 = vst [vmem:[#allocation153_spill] sm:$0xff] %v15435_v56  ;;  %v819_v19 = vrot.slane %v15435_v56, 1 }
 0x16d   : > { %20627 = vst [vmem:[#allocation150_spill] sm:$0xff] %v15421_v63  ;;  %v15428_v58 = vadd.f32 %v15249_v47, %v11205_v4  ;;  %11465 = vmatprep.mubr.f32.mxu0 %v15409_v26  ;;  %11960 = vmatpush3.msra.mxu1 %v3670_v31  ;;  %v15441_v63 = vsel %vm735_vm1, %v816_v23, %v817_v48  ;;  %v15447_v41 = vpop.f32.mrf.mxu1 }
 0x16e   : > { %v1145_v43 = vpop.f32.mrf.mxu0  ;;  %20631 = vst [vmem:[#allocation154_spill] sm:$0xff] %v15441_v63  ;;  %11769 = vmatmul.mubr.f32.gmra.mxu1 %v15164_v40  ;;  %v15456_v31 = vsel %vm735_vm1, %v817_v48, %v819_v19  ;;  %v15459_v40 = vld [vmem:[%s14304_s20 + $0x198] sm:$0xff]  ;;  %v15469_v56 = vsel %vm735_vm1, %v819_v19, %v816_v23 }
 0x16f   : > { %20628 = vst [vmem:[#allocation151_spill] sm:$0xff] %v15428_v58  ;;  %v15445_v4 = vadd.f32 %v15265_v46, %v1145_v43  ;;  %11771 = vmatprep.mubr.f32.mxu1 %v15177_v49  ;;  %20634 = vst [vmem:[#allocation157_spill] sm:$0xff] %v15456_v31  ;;  %v821_v46 = vrot.slane %v15459_v40, 1  ;;  %v15463_v43 = vld [vmem:[%s14304_s20 + $0x1a0] sm:$0xff]  ;;  %v15466_v49 = vpop.f32.mrf.mxu1 }
 0x170   : > { %v11208_v47 = vpop.f32.mrf.mxu0  ;;  %11466 = vmatmul.mubr.f32.gmra.mxu0 %v15432_v34  ;;  %20635 = vst [vmem:[#allocation158_spill] sm:$0xff] %v15459_v40  ;;  %20636 = vst [vmem:[#allocation159_spill] sm:$0xff] %v15463_v43 }
 0x171   : > { %20632 = vst [vmem:[#allocation155_spill] sm:$0xff] %v15445_v4  ;;  %v15452_v51 = vadd.f32 %v15279_v33, %v11208_v47  ;;  %11468 = vmatprep.mubr.f32.mxu0 %v15441_v63  ;;  %v822_v4 = vrot.slane %v15463_v43, 1  ;;  %20637 = vst [vmem:[#allocation160_spill] sm:$0xff] %v15469_v56  ;;  %v15472_v33 = vld [vmem:[%s14304_s20 + $0x1a8] sm:$0xff] }
 0x172   : > { %v1155_v58 = vpop.f32.mrf.mxu0  ;;  %v824_v47 = vrot.slane %v15472_v33, 1  ;;  %11772 = vmatmul.mubr.f32.gmra.mxu1 %v15182_v62 }
 0x173   : > { %20633 = vst [vmem:[#allocation156_spill] sm:$0xff] %v15452_v51  ;;  %v15477_v48 = vadd.f32 %v15287_v28, %v1155_v58  ;;  %v15479_v51 = vpop.f32.mrf.mxu1  ;;  %11774 = vmatprep.mubr.f32.mxu1 %v15199_v10  ;;  %v15488_v23 = vsel %vm735_vm1, %v821_v46, %v822_v4 }
 0x174   : > { %v11211_v43 = vpop.f32.mrf.mxu0  ;;  %11469 = vmatmul.mubr.f32.gmra.mxu0 %v15456_v31  ;;  %20638 = vst [vmem:[#allocation161_spill] sm:$0xff] %v15488_v23  ;;  %v15493_v58 = vsel %vm735_vm1, %v822_v4, %v824_v47  ;;  %v15508_v4 = vsel %vm735_vm1, %v824_v47, %v821_v46  ;;  %v13765_v47 = vld [vmem:[%s14304_s20 + $0x18] sm:$0xff] }
 0x175   : > { %v15484_v40 = vadd.f32 %v15305_v29, %v11211_v43  ;;  %11471 = vmatprep.mubr.f32.mxu0 %v15469_v56  ;;  %v15490_v19 = vpop.f32.mrf.mxu1  ;;  %20639 = vst [vmem:[#allocation162_spill] sm:$0xff] %v15493_v58  ;;  %20641 = vst [vmem:[#allocation164_spill] sm:$0xff] %v15508_v4 }
 0x176   : > { %v1165_v62 = vpop.f32.mrf.mxu0  ;;  %11775 = vmatmul.mubr.f32.gmra.mxu1 %v15208_v57 }
 0x177   : > { %v15497_v28 = vadd.f32 %v15317_v59, %v1165_v62  ;;  %v15499_v10 = vpop.f32.mrf.mxu1  ;;  %11777 = vmatprep.mubr.f32.mxu1 %v15217_v15 }
 0x178   : > { %v11214_v29 = vpop.f32.mrf.mxu0  ;;  %11472 = vmatmul.mubr.f32.gmra.mxu0 %v15488_v23 }
 0x179   : > { %v15504_v43 = vadd.f32 %v15327_v27, %v11214_v29  ;;  %11474 = vmatprep.mubr.f32.mxu0 %v15493_v58  ;;  %v15510_v57 = vpop.f32.mrf.mxu1 }
 0x17a   : > { %v1175_v59 = vpop.f32.mrf.mxu0  ;;  %11778 = vmatmul.mubr.f32.gmra.mxu1 %v15232_v45 }
 0x17b   : > { %20640 = vst [vmem:[#allocation163_spill] sm:$0xff] %v15504_v43  ;;  %v15514_v62 = vadd.f32 %v15343_v7, %v1175_v59  ;;  %v15516_v15 = vpop.f32.mrf.mxu1  ;;  %11780 = vmatprep.mubr.f32.mxu1 %v15247_v52  ;;  %v3278_v59 = vld [vmem:[#allocation6 + $0x370] sm:$0xff]  ;;  %v13766_v43 = vld [vmem:[%s14304_s20 + $0x20] sm:$0xff] }
 0x17c   : > { %v11217_v27 = vpop.f32.mrf.mxu0  ;;  %11475 = vmatmul.mubr.f32.gmra.mxu0 %v15508_v4 }
 0x17d   : > { %20642 = vst [vmem:[#allocation165_spill] sm:$0xff] %v15514_v62  ;;  %v15521_v46 = vadd.f32 %v15357_v60, %v11217_v27  ;;  %11622 = vmatprep.mubr.f32.mxu0 %v13765_v47  ;;  %v15524_v29 = vpop.f32.mrf.mxu1  ;;  %v13767_v27 = vld [vmem:[%s14304_s20 + $0x28] sm:$0xff] }
 0x17e   : > { %v1185_v45 = vpop.f32.mrf.mxu0  ;;  %11781 = vmatmul.mubr.f32.gmra.mxu1 %v15254_v39  ;;  %v3277_v47 = vld [vmem:[#allocation6 + $0x368] sm:$0xff] }
 0x17f   : > { %v15528_v7 = vadd.f32 %v15365_v50, %v1185_v45  ;;  %v15530_v62 = vpop.f32.mrf.mxu1  ;;  %11783 = vmatprep.mubr.f32.mxu1 %v15273_v55 }
 0x180   : > { %v11220_v52 = vpop.f32.mrf.mxu0  ;;  %11623 = vmatmul.mubr.f32.vlgmr.msra.gmra.mxu0 %v13766_v43  ;;  %v3276_v43 = vld [vmem:[#allocation6 + $0x360] sm:$0xff] }
 0x181   : > { %v15535_v60 = vadd.f32 %v15383_v53, %v11220_v52  ;;  %11817 = vmatpush3.msra.mxu0 %v15111_v13  ;;  %11625 = vmatprep.mubr.f32.mxu0 %v13767_v27  ;;  %v15539_v45 = vpop.f32.mrf.mxu1  ;;  %v15549_v53 = vld [vmem:[%s14304_s20 + $0x30] sm:$0xff]  ;;  %v15556_v27 = vld [vmem:[%s14304_s20 + $0x38] sm:$0xff] }
 0x182   : > { %v1195_v50 = vpop.f32.mrf.mxu0  ;;  %11818 = vmatprep.subr.mxu0 %v3278_v59  ;;  %11784 = vmatmul.mubr.f32.gmra.mxu1 %v15284_v35 }
 0x183   : > { %v15543_v55 = vadd.f32 %v15395_v37, %v1195_v50  ;;  %11819 = vmatpush3.msra.mxu0 %v3278_v59  ;;  %v15545_v39 = vpop.f32.mrf.mxu1  ;;  %11786 = vmatprep.mubr.f32.mxu1 %v15295_v14  ;;  %v3275_v37 = vld [vmem:[#allocation6 + $0x358] sm:$0xff] }
 0x184   : > { %v11223_v13 = vpop.f32.mrf.mxu0  ;;  %11626 = vmatmul.mubr.f32.gmra.mxu0 %v15549_v53  ;;  %11820 = vmatprep.subr.mxu0 %v3277_v47 }
 0x185   : > { %20643 = vst [vmem:[#allocation166_spill] sm:$0xff] %v15543_v55  ;;  %v15553_v52 = vadd.f32 %v15406_v32, %v11223_v13  ;;  %11628 = vmatprep.mubr.f32.mxu0 %v15556_v27  ;;  %11821 = vmatpush3.msra.mxu0 %v3277_v47  ;;  %v15559_v59 = vpop.f32.mrf.mxu1  ;;  %v3274_v32 = vld [vmem:[#allocation6 + $0x350] sm:$0xff]  ;;  %v15614_v55 = vld [vmem:[%s14304_s20 + $0x68] sm:$0xff] }
 0x186   : > { %v1205_v50 = vpop.f32.mrf.mxu0  ;;  %11822 = vmatprep.subr.mxu0 %v3276_v43  ;;  %11787 = vmatmul.mubr.f32.gmra.mxu1 %v15310_v11  ;;  %v15576_v11 = vld [vmem:[%s14304_s20 + $0x48] sm:$0xff] }
 0x187   : > { %20644 = vst [vmem:[#allocation167_spill] sm:$0xff] %v15553_v52  ;;  %v15563_v14 = vadd.f32 %v15423_v6, %v1205_v50  ;;  %11823 = vmatpush3.msra.mxu0 %v3276_v43  ;;  %v15565_v35 = vpop.f32.mrf.mxu1  ;;  %11789 = vmatprep.mubr.f32.mxu1 %v15325_v3  ;;  %v15569_v52 = vld [vmem:[%s14304_s20 + $0x40] sm:$0xff]  ;;  %v3273_v43 = vld [vmem:[#allocation6 + $0x348] sm:$0xff] }
 0x188   : > { %v11226_v13 = vpop.f32.mrf.mxu0  ;;  %11629 = vmatmul.mubr.f32.gmra.mxu0 %v15569_v52  ;;  %11824 = vmatprep.subr.mxu0 %v3275_v37 }
 0x189   : > { %20645 = vst [vmem:[#allocation168_spill] sm:$0xff] %v15563_v14  ;;  %v15573_v47 = vadd.f32 %v15438_v12, %v11226_v13  ;;  %11631 = vmatprep.mubr.f32.mxu0 %v15576_v11  ;;  %11825 = vmatpush3.msra.mxu0 %v3275_v37  ;;  %v15579_v6 = vpop.f32.mrf.mxu1  ;;  %v3272_v12 = vld [vmem:[#allocation6 + $0x340] sm:$0xff] }
 0x18a   : > { %v1215_v50 = vpop.f32.mrf.mxu0  ;;  %11826 = vmatprep.subr.mxu0 %v3274_v32  ;;  %11790 = vmatmul.mubr.f32.gmra.mxu1 %v15332_v17  ;;  %v15596_v17 = vld [vmem:[%s14304_s20 + $0x58] sm:$0xff] }
 0x18b   : > { %20646 = vst [vmem:[#allocation169_spill] sm:$0xff] %v15573_v47  ;;  %v15583_v3 = vadd.f32 %v15447_v41, %v1215_v50  ;;  %11827 = vmatpush3.msra.mxu0 %v3274_v32  ;;  %v15585_v14 = vpop.f32.mrf.mxu1  ;;  %11792 = vmatprep.mubr.f32.mxu1 %v15351_v9  ;;  %v15589_v47 = vld [vmem:[%s14304_s20 + $0x50] sm:$0xff]  ;;  %v3271_v32 = vld [vmem:[#allocation6 + $0x338] sm:$0xff] }
 0x18c   : > { %v11229_v13 = vpop.f32.mrf.mxu0  ;;  %11632 = vmatmul.mubr.f32.gmra.mxu0 %v15589_v47  ;;  %11828 = vmatprep.subr.mxu0 %v3273_v43 }
 0x18d   : > { %20647 = vst [vmem:[#allocation170_spill] sm:$0xff] %v15583_v3  ;;  %v15593_v37 = vadd.f32 %v15466_v49, %v11229_v13  ;;  %11634 = vmatprep.mubr.f32.mxu0 %v15596_v17  ;;  %v15599_v41 = vpop.f32.mrf.mxu1  ;;  %11829 = vmatpush3.msra.mxu0 %v3273_v43  ;;  %v3270_v49 = vld [vmem:[#allocation6 + $0x330] sm:$0xff] }
 0x18e   : > { %v1225_v50 = vpop.f32.mrf.mxu0  ;;  %11830 = vmatprep.subr.mxu0 %v3272_v12  ;;  %11793 = vmatmul.mubr.f32.gmra.mxu1 %v15362_v44  ;;  %v15625_v44 = vld [vmem:[%s14304_s20 + $0x70] sm:$0xff] }
 0x18f   : > { %20648 = vst [vmem:[#allocation171_spill] sm:$0xff] %v15593_v37  ;;  %v15603_v9 = vadd.f32 %v15479_v51, %v1225_v50  ;;  %v1630_v3 = vpop.f32.mrf.mxu1  ;;  %11831 = vmatpush3.msra.mxu0 %v3272_v12  ;;  %11795 = vmatprep.mubr.f32.mxu1 %v15373_v61  ;;  %v15607_v37 = vld [vmem:[%s14304_s20 + $0x60] sm:$0xff] }
 0x190   : > { %v11232_v13 = vpop.f32.mrf.mxu0  ;;  %11635 = vmatmul.mubr.f32.gmra.mxu0 %v15607_v37  ;;  %11832 = vmatprep.subr.mxu0 %v3271_v32  ;;  %v3269_v3 = vld [vmem:[#allocation6 + $0x328] sm:$0xff]  ;;  %v3268_v61 = vld [vmem:[#allocation6 + $0x320] sm:$0xff] }
 0x191   : > { %v15611_v43 = vadd.f32 %v15490_v19, %v11232_v13  ;;  %11637 = vmatprep.mubr.f32.mxu0 %v15614_v55  ;;  %11833 = vmatpush3.msra.mxu0 %v3271_v32  ;;  %v11511_v51 = vpop.f32.mrf.mxu1 }
 0x192   : > { %v1235_v12 = vpop.f32.mrf.mxu0  ;;  %11834 = vmatprep.subr.mxu0 %v3270_v49  ;;  %11796 = vmatmul.mubr.f32.gmra.mxu1 %v15388_v1  ;;  %v15632_v51 = vld [vmem:[%s14304_s20 + $0x78] sm:$0xff]  ;;  %v3266_v1 = vld [vmem:[#allocation6 + $0x310] sm:$0xff] }
 0x193   : > { %v15619_v50 = vadd.f32 %v15499_v10, %v1235_v12  ;;  %11835 = vmatpush3.msra.mxu0 %v3270_v49  ;;  %11798 = vmatprep.mubr.f32.mxu1 %v15404_v38  ;;  %v15622_v19 = vpop.f32.mrf.mxu1  ;;  %v3267_v10 = vld [vmem:[#allocation6 + $0x318] sm:$0xff] }
 0x194   : > { %20649 = vst [vmem:[#allocation172_spill] sm:$0xff] %v15622_v19  ;;  %v11235_v13 = vpop.f32.mrf.mxu0  ;;  %11638 = vmatmul.mubr.f32.gmra.mxu0 %v15625_v44  ;;  %11836 = vmatprep.subr.mxu0 %v3269_v3  ;;  %v15645_v19 = vld [vmem:[%s14304_s20 + $0x80] sm:$0xff] }
 0x195   : > { %v15629_v32 = vadd.f32 %v15510_v57, %v11235_v13  ;;  %11640 = vmatprep.mubr.f32.mxu0 %v15632_v51  ;;  %11837 = vmatpush3.msra.mxu0 %v3269_v3  ;;  %v15635_v49 = vpop.f32.mrf.mxu1 }
 0x196   : > { %20650 = vst [vmem:[#allocation173_spill] sm:$0xff] %v15635_v49  ;;  %v1245_v12 = vpop.f32.mrf.mxu0  ;;  %11838 = vmatprep.subr.mxu0 %v3268_v61  ;;  %11799 = vmatmul.mubr.f32.gmra.mxu1 %v15409_v26  ;;  %v15652_v26 = vld [vmem:[%s14304_s20 + $0x88] sm:$0xff]  ;;  %v15665_v49 = vld [vmem:[%s14304_s20 + $0x90] sm:$0xff] }
 0x197   : > { %v15639_v38 = vadd.f32 %v15516_v15, %v1245_v12  ;;  %11839 = vmatpush3.msra.mxu0 %v3268_v61  ;;  %11801 = vmatprep.mubr.f32.mxu1 %v15432_v34  ;;  %v15642_v57 = vpop.f32.mrf.mxu1  ;;  %v3265_v61 = vld [vmem:[#allocation6 + $0x308] sm:$0xff] }
 0x198   : > { %20652 = vst [vmem:[#allocation175_spill] sm:$0xff] %v15642_v57  ;;  %v11238_v13 = vpop.f32.mrf.mxu0  ;;  %11641 = vmatmul.mubr.f32.gmra.mxu0 %v15645_v19  ;;  %11840 = vmatprep.subr.mxu0 %v3267_v10 }
 0x199   : > { %20651 = vst [vmem:[#allocation174_spill] sm:$0xff] %v15639_v38  ;;  %v15649_v3 = vadd.f32 %v15524_v29, %v11238_v13  ;;  %11643 = vmatprep.mubr.f32.mxu0 %v15652_v26  ;;  %11841 = vmatpush3.msra.mxu0 %v3267_v10  ;;  %v15655_v15 = vpop.f32.mrf.mxu1  ;;  %v3264_v13 = vld [vmem:[#allocation6 + $0x300] sm:$0xff] }
 0x19a   : > { %20654 = vst [vmem:[#allocation177_spill] sm:$0xff] %v15655_v15  ;;  %v1255_v12 = vpop.f32.mrf.mxu0  ;;  %11842 = vmatprep.subr.mxu0 %v3266_v1  ;;  %11802 = vmatmul.mubr.f32.gmra.mxu1 %v15441_v63 }
 0x19b   : > { %20653 = vst [vmem:[#allocation176_spill] sm:$0xff] %v15649_v3  ;;  %v15659_v34 = vadd.f32 %v15530_v62, %v1255_v12  ;;  %11843 = vmatpush3.msra.mxu0 %v3266_v1  ;;  %11804 = vmatprep.mubr.f32.mxu1 %v15456_v31  ;;  %v15662_v29 = vpop.f32.mrf.mxu1  ;;  %v15674_v1 = vld [vmem:[#allocation6 + $0x478] sm:$0xff] }
 0x19c   : > { %20656 = vst [vmem:[#allocation179_spill] sm:$0xff] %v15662_v29  ;;  %v11241_v57 = vpop.f32.mrf.mxu0  ;;  %11644 = vmatmul.mubr.f32.gmra.mxu0 %v15665_v49  ;;  %11844 = vmatprep.subr.mxu0 %v3265_v61  ;;  %v20700_v29 = vld [vmem:[#allocation127_spill] sm:$0xff] }
 0x19d   : > { %20655 = vst [vmem:[#allocation178_spill] sm:$0xff] %v15659_v34  ;;  %v15669_v10 = vadd.f32 %v15539_v45, %v11241_v57  ;;  %11646 = vmatprep.mubr.f32.mxu0 %v15052_v0  ;;  %11845 = vmatpush3.msra.mxu0 %v3265_v61  ;;  %v15672_v62 = vpop.f32.mrf.mxu1  ;;  %v826_v45 = vrot.slane %v15058_v2, 1  ;;  %v827_v0 = vrot.slane %v15065_v54, 1  ;;  %v829_v61 = vrot.slane %v15061_v8, 1 }
 0x19e   : > { %20658 = vst [vmem:[#allocation181_spill] sm:$0xff] %v15672_v62  ;;  %v1265_v12 = vpop.f32.mrf.mxu0  ;;  %11805 = vmatmul.mubr.f32.gmra.mxu1 %v15469_v56  ;;  %11846 = vmatprep.subr.mxu0 %v3264_v13  ;;  %v13782_v62 = vld [vmem:[%s14304_s20 + $0xa0] sm:$0xff] }
 0x19f   : > { %20657 = vst [vmem:[#allocation180_spill] sm:$0xff] %v15669_v10  ;;  %v15678_v31 = vadd.f32 %v15545_v39, %v1265_v12  ;;  %11807 = vmatprep.mubr.f32.mxu1 %v15488_v23  ;;  %v15681_v63 = vpop.f32.mrf.mxu1  ;;  %11847 = vmatpush3.msra.mxu0 %v3264_v13  ;;  %v20713_v10 = vld [vmem:[#allocation145_spill] sm:$0xff] }
 0x1a0   : > { %20660 = vst [vmem:[#allocation183_spill] sm:$0xff] %v15681_v63  ;;  %v11244_v57 = vpop.f32.mrf.mxu0  ;;  %11647 = vmatmul.mubr.f32.gmra.mxu0 %v15072_v5  ;;  %12042 = vmatprep.subr.mxu0 %v15674_v1  ;;  %v15700_v5 = vsel %vm735_vm1, %v826_v45, %v827_v0 }
 0x1a1   : > { %20659 = vst [vmem:[#allocation182_spill] sm:$0xff] %v15678_v31  ;;  %v15689_v56 = vadd.f32 %v15559_v59, %v11244_v57  ;;  %11649 = vmatprep.mubr.f32.mxu0 %v15089_v22  ;;  %v15692_v39 = vpop.f32.mrf.mxu1  ;;  %20664 = vst [vmem:[#allocation187_spill] sm:$0xff] %v15700_v5  ;;  %v15706_v59 = vsel %vm735_vm1, %v827_v0, %v829_v61 }
 0x1a2   : > { %20662 = vst [vmem:[#allocation185_spill] sm:$0xff] %v15692_v39  ;;  %v1275_v12 = vpop.f32.mrf.mxu0  ;;  %11808 = vmatmul.mubr.f32.gmra.mxu1 %v15493_v58  ;;  %20666 = vst [vmem:[#allocation189_spill] sm:$0xff] %v15706_v59 }
 0x1a3   : > { %20661 = vst [vmem:[#allocation184_spill] sm:$0xff] %v15689_v56  ;;  %v15696_v2 = vadd.f32 %v15565_v35, %v1275_v12  ;;  %11810 = vmatprep.mubr.f32.mxu1 %v15508_v4  ;;  %v15702_v8 = vpop.f32.mrf.mxu1  ;;  %v15720_v4 = vsel %vm735_vm1, %v829_v61, %v826_v45  ;;  %v20712_v56 = vld [vmem:[#allocation90_spill] sm:$0xff] }
 0x1a4   : > { %20665 = vst [vmem:[#allocation188_spill] sm:$0xff] %v15702_v8  ;;  %v11247_v54 = vpop.f32.mrf.mxu0  ;;  %11650 = vmatmul.mubr.f32.gmra.mxu0 %v15093_v30  ;;  %20670 = vst [vmem:[#allocation193_spill] sm:$0xff] %v15720_v4  ;;  %v20696_v8 = vld [vmem:[#allocation123_spill] sm:$0xff] }
 0x1a5   : > { %20663 = vst [vmem:[#allocation186_spill] sm:$0xff] %v15696_v2  ;;  %v15709_v13 = vadd.f32 %v15579_v6, %v11247_v54  ;;  %11652 = vmatprep.mubr.f32.mxu0 %v15100_v18  ;;  %v15712_v35 = vpop.f32.mrf.mxu1 }
 0x1a6   : > { %20668 = vst [vmem:[#allocation191_spill] sm:$0xff] %v15712_v35  ;;  %v1285_v57 = vpop.f32.mrf.mxu0  ;;  %11811 = vmatmul.mubr.f32.gmra.mxu1 %v15700_v5 }
 0x1a7   : > { %20667 = vst [vmem:[#allocation190_spill] sm:$0xff] %v15709_v13  ;;  %v15716_v12 = vadd.f32 %v15585_v14, %v1285_v57  ;;  %11813 = vmatprep.mubr.f32.mxu1 %v15706_v59  ;;  %v15722_v0 = vpop.f32.mrf.mxu1  ;;  %v20708_v13 = vld [vmem:[#allocation141_spill] sm:$0xff] }
 0x1a8   : > { %20671 = vst [vmem:[#allocation194_spill] sm:$0xff] %v15722_v0  ;;  %v11250_v58 = vpop.f32.mrf.mxu0  ;;  %11653 = vmatmul.mubr.f32.gmra.mxu0 %v15122_v25  ;;  %v20692_v0 = vld [vmem:[#allocation115_spill] sm:$0xff] }
 0x1a9   : > { %20669 = vst [vmem:[#allocation192_spill] sm:$0xff] %v15716_v12  ;;  %v15726_v6 = vadd.f32 %v15599_v41, %v11250_v58  ;;  %11655 = vmatprep.mubr.f32.mxu0 %v15126_v16  ;;  %v15729_v54 = vpop.f32.mrf.mxu1 }
 0x1aa   : > { %20673 = vst [vmem:[#allocation196_spill] sm:$0xff] %v15729_v54  ;;  %v1295_v5 = vpop.f32.mrf.mxu0  ;;  %11814 = vmatmul.mubr.f32.gmra.mxu1 %v15720_v4  ;;  %v20680_v4 = vld [vmem:[#allocation97_spill] sm:$0xff] }
 0x1ab   : > { %20672 = vst [vmem:[#allocation195_spill] sm:$0xff] %v15726_v6  ;;  %11961 = vmatprep.mubr.f32.mxu1 %v15549_v53  ;;  %v15733_v14 = vpop.f32.mrf.mxu1  ;;  %v20704_v6 = vld [vmem:[#allocation133_spill] sm:$0xff] }
 0x1ac   : > { %20674 = vst [vmem:[#allocation197_spill] sm:$0xff] %v15733_v14  ;;  %v11285_v45 = vpop.f32.mrf.mxu0  ;;  %11656 = vmatmul.mubr.f32.gmra.mxu0 %v15140_v24  ;;  %v20688_v14 = vld [vmem:[#allocation109_spill] sm:$0xff] }
 0x1ad   : > { %11658 = vmatprep.mubr.f32.mxu0 %v15154_v42  ;;  %v20678_v45 = vld [vmem:[#allocation96_spill] sm:$0xff] }
 0x1ae   : > { %v15737_v61 = vpop.f32.mrf.mxu0  ;;  %11962 = vmatmul.mubr.f32.vlgmr.msra.gmra.mxu1 %v15556_v27  ;;  %v15740_v58 = vpop.f32.mrf.mxu1 }
 0x1af   : > { %20675 = vst [vmem:[#allocation198_spill] sm:$0xff] %v15740_v58  ;;  %11964 = vmatprep.mubr.f32.mxu1 %v15569_v52  ;;  %v1371_v31 = vadd.f32 %v15737_v61, %v20712_v56  ;;  %v20718_v56 = vld [vmem:[#allocation94_spill] sm:$0xff] }
 0x1b0   : > { %v15743_v41 = vpop.f32.mrf.mxu0  ;;  %11659 = vmatmul.mubr.f32.gmra.mxu0 %v15158_v36  ;;  %v15746_v53 = vpop.f32.mrf.mxu1 }
 0x1b1   : > { %20676 = vst [vmem:[#allocation199_spill] sm:$0xff] %v15746_v53  ;;  %11661 = vmatprep.mubr.f32.mxu0 %v15167_v20  ;;  %v20684_v53 = vld [vmem:[#allocation105_spill] sm:$0xff] }
 0x1b2   : > { %v15749_v5 = vpop.f32.mrf.mxu0  ;;  %11965 = vmatmul.mubr.f32.gmra.mxu1 %v15576_v11  ;;  %v15752_v57 = vpop.f32.mrf.mxu1 }
 0x1b3   : > { %20677 = vst [vmem:[#allocation200_spill] sm:$0xff] %v15752_v57  ;;  %11967 = vmatprep.mubr.f32.mxu1 %v15589_v47  ;;  %v20682_v57 = vld [vmem:[#allocation100_spill] sm:$0xff]  ;;  %v1381_v61 = vadd.f32 %v15749_v5, %v20718_v56 }
 0x1b4   : > { %v15755_v27 = vpop.f32.mrf.mxu0  ;;  %11662 = vmatmul.mubr.f32.gmra.mxu0 %v20678_v45  ;;  %v15758_v52 = vpop.f32.mrf.mxu1 }
 0x1b5   : > { %20679 = vst [vmem:[#allocation96_spill] sm:$0xff] %v15758_v52  ;;  %11664 = vmatprep.mubr.f32.mxu0 %v20680_v4 }
 0x1b6   : > { %v15761_v59 = vpop.f32.mrf.mxu0  ;;  %11968 = vmatmul.mubr.f32.gmra.mxu1 %v15596_v17  ;;  %v15764_v23 = vpop.f32.mrf.mxu1 }
 0x1b7   : > { %20681 = vst [vmem:[#allocation97_spill] sm:$0xff] %v15764_v23  ;;  %11970 = vmatprep.mubr.f32.mxu1 %v15607_v37  ;;  %v20686_v23 = vld [vmem:[#allocation106_spill] sm:$0xff] }
 0x1b8   : > { %v15767_v11 = vpop.f32.mrf.mxu0  ;;  %11665 = vmatmul.mubr.f32.gmra.mxu0 %v20682_v57  ;;  %v15770_v47 = vpop.f32.mrf.mxu1 }
 0x1b9   : > { %20683 = vst [vmem:[#allocation100_spill] sm:$0xff] %v15770_v47  ;;  %11667 = vmatprep.mubr.f32.mxu0 %v20684_v53 }
 0x1ba   : > { %v15773_v58 = vpop.f32.mrf.mxu0  ;;  %11971 = vmatmul.mubr.f32.gmra.mxu1 %v15614_v55  ;;  %v15776_v52 = vpop.f32.mrf.mxu1 }
 0x1bb   : > { %20685 = vst [vmem:[#allocation105_spill] sm:$0xff] %v15776_v52  ;;  %11973 = vmatprep.mubr.f32.mxu1 %v15625_v44  ;;  %v20690_v44 = vld [vmem:[#allocation114_spill] sm:$0xff] }
 0x1bc   : > { %v15779_v17 = vpop.f32.mrf.mxu0  ;;  %11668 = vmatmul.mubr.f32.gmra.mxu0 %v20686_v23  ;;  %v15782_v37 = vpop.f32.mrf.mxu1 }
 0x1bd   : > { %20687 = vst [vmem:[#allocation106_spill] sm:$0xff] %v15782_v37  ;;  %11670 = vmatprep.mubr.f32.mxu0 %v20688_v14 }
 0x1be   : > { %v15785_v54 = vpop.f32.mrf.mxu0  ;;  %11974 = vmatmul.mubr.f32.gmra.mxu1 %v15632_v51  ;;  %v15788_v47 = vpop.f32.mrf.mxu1 }
 0x1bf   : > { %20689 = vst [vmem:[#allocation109_spill] sm:$0xff] %v15788_v47  ;;  %11976 = vmatprep.mubr.f32.mxu1 %v15645_v19  ;;  %v20694_v19 = vld [vmem:[#allocation118_spill] sm:$0xff] }
 0x1c0   : > { %v15791_v55 = vpop.f32.mrf.mxu0  ;;  %11671 = vmatmul.mubr.f32.gmra.mxu0 %v20690_v44  ;;  %v15794_v52 = vpop.f32.mrf.mxu1 }
 0x1c1   : > { %20691 = vst [vmem:[#allocation114_spill] sm:$0xff] %v15794_v52  ;;  %11673 = vmatprep.mubr.f32.mxu0 %v20692_v0  ;;  %v13781_v52 = vld [vmem:[%s14304_s20 + $0x98] sm:$0xff] }
 0x1c2   : > { %v15797_v37 = vpop.f32.mrf.mxu0  ;;  %11977 = vmatmul.mubr.f32.gmra.mxu1 %v15652_v26  ;;  %v15800_v35 = vpop.f32.mrf.mxu1 }
 0x1c3   : > { %20693 = vst [vmem:[#allocation115_spill] sm:$0xff] %v15800_v35  ;;  %11979 = vmatprep.mubr.f32.mxu1 %v15665_v49  ;;  %v20698_v35 = vld [vmem:[#allocation124_spill] sm:$0xff] }
 0x1c4   : > { %v15803_v51 = vpop.f32.mrf.mxu0  ;;  %11674 = vmatmul.mubr.f32.gmra.mxu0 %v20694_v19  ;;  %v15806_v47 = vpop.f32.mrf.mxu1 }
 0x1c5   : > { %20695 = vst [vmem:[#allocation118_spill] sm:$0xff] %v15806_v47  ;;  %11676 = vmatprep.mubr.f32.mxu0 %v20696_v8 }
 0x1c6   : > { %v15809_v39 = vpop.f32.mrf.mxu0  ;;  %11980 = vmatmul.mubr.f32.gmra.mxu1 %v13781_v52  ;;  %v15812_v63 = vpop.f32.mrf.mxu1 }
 0x1c7   : > { %20697 = vst [vmem:[#allocation123_spill] sm:$0xff] %v15812_v63  ;;  %11982 = vmatprep.mubr.f32.mxu1 %v13782_v62  ;;  %v20702_v63 = vld [vmem:[#allocation132_spill] sm:$0xff] }
 0x1c8   : > { %v15815_v26 = vpop.f32.mrf.mxu0  ;;  %11677 = vmatmul.mubr.f32.gmra.mxu0 %v20698_v35  ;;  %v15818_v49 = vpop.f32.mrf.mxu1 }
 0x1c9   : > { %20699 = vst [vmem:[#allocation124_spill] sm:$0xff] %v15818_v49  ;;  %11679 = vmatprep.mubr.f32.mxu0 %v20700_v29 }
 0x1ca   : > { %v15821_v15 = vpop.f32.mrf.mxu0  ;;  %11983 = vmatmul.mubr.f32.gmra.mxu1 %v15089_v22  ;;  %v15824_v47 = vpop.f32.mrf.mxu1 }
 0x1cb   : > { %20701 = vst [vmem:[#allocation127_spill] sm:$0xff] %v15824_v47  ;;  %11985 = vmatprep.mubr.f32.mxu1 %v15093_v30  ;;  %v20706_v47 = vld [vmem:[#allocation136_spill] sm:$0xff] }
 0x1cc   : > { %v15827_v52 = vpop.f32.mrf.mxu0  ;;  %11680 = vmatmul.mubr.f32.gmra.mxu0 %v20702_v63  ;;  %v15830_v62 = vpop.f32.mrf.mxu1 }
 0x1cd   : > { %20703 = vst [vmem:[#allocation132_spill] sm:$0xff] %v15830_v62  ;;  %11682 = vmatprep.mubr.f32.mxu0 %v20704_v6 }
 0x1ce   : > { %v15833_v12 = vpop.f32.mrf.mxu0  ;;  %11986 = vmatmul.mubr.f32.gmra.mxu1 %v15100_v18  ;;  %v15836_v49 = vpop.f32.mrf.mxu1 }
 0x1cf   : > { %20705 = vst [vmem:[#allocation133_spill] sm:$0xff] %v15836_v49  ;;  %11988 = vmatprep.mubr.f32.mxu1 %v15122_v25  ;;  %v20710_v49 = vld [vmem:[#allocation142_spill] sm:$0xff] }
 0x1d0   : > { %v15839_v22 = vpop.f32.mrf.mxu0  ;;  %11683 = vmatmul.mubr.f32.gmra.mxu0 %v20706_v47  ;;  %v15842_v30 = vpop.f32.mrf.mxu1 }
 0x1d1   : > { %20707 = vst [vmem:[#allocation136_spill] sm:$0xff] %v15842_v30  ;;  %11685 = vmatprep.mubr.f32.mxu0 %v20708_v13 }
 0x1d2   : > { %v15845_v2 = vpop.f32.mrf.mxu0  ;;  %11989 = vmatmul.mubr.f32.gmra.mxu1 %v15126_v16  ;;  %v15848_v62 = vpop.f32.mrf.mxu1  ;;  %v20715_v16 = vld [vmem:[#allocation92_spill] sm:$0xff] }
 0x1d3   : > { %20709 = vst [vmem:[#allocation141_spill] sm:$0xff] %v15848_v62  ;;  %11991 = vmatprep.mubr.f32.mxu1 %v15140_v24  ;;  %v1386_v62 = vadd.f32 %v15743_v41, %v20715_v16 }
 0x1d4   : > { %v11398_v18 = vpop.f32.mrf.mxu0  ;;  %11686 = vmatmul.mubr.f32.gmra.mxu0 %v20710_v49  ;;  %v15852_v25 = vpop.f32.mrf.mxu1 }
 0x1d5   : > { %20711 = vst [vmem:[#allocation142_spill] sm:$0xff] %v15852_v25  ;;  %11688 = vmatprep.mubr.f32.mxu0 %v20713_v10  ;;  %v20716_v18 = vld [vmem:[#allocation149_spill] sm:$0xff] }
 0x1d6   : > { %v1722_v30 = vpop.f32.mrf.mxu0  ;;  %11992 = vmatmul.mubr.f32.gmra.mxu1 %v15154_v42  ;;  %v15858_v34 = vpop.f32.mrf.mxu1 }
 0x1d7   : > { %20714 = vst [vmem:[#allocation90_spill] sm:$0xff] %v15858_v34  ;;  %v15862_v3 = vadd.f32 %v1722_v30, %v1371_v31  ;;  %11994 = vmatprep.mubr.f32.mxu1 %v15158_v36  ;;  %v20720_v31 = vld [vmem:[#allocation98_spill] sm:$0xff] }
 0x1d8   : > { %v11401_v24 = vpop.f32.mrf.mxu0  ;;  %11689 = vmatmul.mubr.f32.gmra.mxu0 %v20716_v18  ;;  %v15866_v25 = vpop.f32.mrf.mxu1  ;;  %v1396_v36 = vadd.f32 %v15755_v27, %v20720_v31 }
 0x1d9   : > { %20717 = vst [vmem:[#allocation145_spill] sm:$0xff] %v15866_v25  ;;  %v15870_v38 = vadd.f32 %v11401_v24, %v1386_v62  ;;  %11691 = vmatprep.mubr.f32.mxu0 %v15416_v21  ;;  %v20721_v25 = vld [vmem:[#allocation153_spill] sm:$0xff] }
 0x1da   : > { %v1732_v42 = vpop.f32.mrf.mxu0  ;;  %11995 = vmatmul.mubr.f32.gmra.mxu1 %v15167_v20  ;;  %v15874_v41 = vpop.f32.mrf.mxu1  ;;  %v20723_v62 = vld [vmem:[#allocation101_spill] sm:$0xff]  ;;  %v20724_v20 = vld [vmem:[#allocation158_spill] sm:$0xff] }
 0x1db   : > { %20719 = vst [vmem:[#allocation92_spill] sm:$0xff] %v15874_v41  ;;  %v15878_v30 = vadd.f32 %v1732_v42, %v1381_v61  ;;  %11997 = vmatprep.mubr.f32.mxu1 %v20678_v45  ;;  %v1391_v24 = vadd.f32 %v15761_v59, %v20723_v62  ;;  %v20726_v61 = vld [vmem:[#allocation103_spill] sm:$0xff] }
 0x1dc   : > { %v11404_v16 = vpop.f32.mrf.mxu0  ;;  %11692 = vmatmul.mubr.f32.gmra.mxu0 %v20721_v25  ;;  %v15882_v5 = vpop.f32.mrf.mxu1  ;;  %v1406_v45 = vadd.f32 %v15767_v11, %v20726_v61 }
 0x1dd   : > { %20722 = vst [vmem:[#allocation149_spill] sm:$0xff] %v15882_v5  ;;  %v15886_v56 = vadd.f32 %v11404_v16, %v1396_v36  ;;  %11694 = vmatprep.mubr.f32.mxu0 %v20724_v20  ;;  %v20727_v5 = vld [vmem:[#allocation159_spill] sm:$0xff] }
 0x1de   : > { %v1742_v41 = vpop.f32.mrf.mxu0  ;;  %11998 = vmatmul.mubr.f32.gmra.mxu1 %v20680_v4  ;;  %v15890_v27 = vpop.f32.mrf.mxu1  ;;  %v20729_v36 = vld [vmem:[#allocation107_spill] sm:$0xff] }
 0x1df   : > { %20725 = vst [vmem:[#allocation94_spill] sm:$0xff] %v15890_v27  ;;  %v15894_v42 = vadd.f32 %v1742_v41, %v1391_v24  ;;  %12000 = vmatprep.mubr.f32.mxu1 %v20682_v57  ;;  %v1401_v16 = vadd.f32 %v15773_v58, %v20729_v36  ;;  %v20731_v41 = vld [vmem:[#allocation110_spill] sm:$0xff]  ;;  %v20741_v27 = vld [vmem:[#allocation57_spill] sm:$0xff] }
 0x1e0   : > { %v11407_v31 = vpop.f32.mrf.mxu0  ;;  %11695 = vmatmul.mubr.f32.gmra.mxu0 %v20727_v5  ;;  %v15898_v59 = vpop.f32.mrf.mxu1  ;;  %v1416_v57 = vadd.f32 %v15779_v17, %v20731_v41  ;;  %v15924_v36 = vld [vmem:[%s14304_s20 + $0x1b8] sm:$0xff] }
 0x1e1   : > { %20728 = vst [vmem:[#allocation98_spill] sm:$0xff] %v15898_v59  ;;  %v15902_v4 = vadd.f32 %v11407_v31, %v1406_v45  ;;  %11697 = vmatprep.mubr.f32.mxu0 %v15472_v33  ;;  %v15914_v59 = vld [vmem:[%s14304_s20 + $0x1b0] sm:$0xff]  ;;  %v20733_v45 = vld [vmem:[#allocation112_spill] sm:$0xff] }
 0x1e2   : > { %v1752_v62 = vpop.f32.mrf.mxu0  ;;  %12001 = vmatmul.mubr.f32.gmra.mxu1 %v20684_v53  ;;  %v15906_v11 = vpop.f32.mrf.mxu1  ;;  %v1411_v53 = vadd.f32 %v15785_v54, %v20733_v45  ;;  %v15936_v54 = vld [vmem:[%s14304_s20 + $0x1c0] sm:$0xff] }
 0x1e3   : > { %20730 = vst [vmem:[#allocation153_spill] sm:$0xff] %v15906_v11  ;;  %v15910_v24 = vadd.f32 %v1752_v62, %v1401_v16  ;;  %12003 = vmatprep.mubr.f32.mxu1 %v20686_v23  ;;  %v20735_v16 = vld [vmem:[#allocation116_spill] sm:$0xff] }
 0x1e4   : > { %v11410_v61 = vpop.f32.mrf.mxu0  ;;  %11698 = vmatmul.mubr.f32.gmra.mxu0 %v15914_v59  ;;  %v15917_v58 = vpop.f32.mrf.mxu1  ;;  %v1426_v62 = vadd.f32 %v15791_v55, %v20735_v16  ;;  %v4090_v16 = vld [vmem:[#allocation6 + $0x470] sm:$0xff] }
 0x1e5   : > { %20732 = vst [vmem:[#allocation101_spill] sm:$0xff] %v15917_v58  ;;  %v15921_v31 = vadd.f32 %v11410_v61, %v1416_v57  ;;  %11700 = vmatprep.mubr.f32.mxu0 %v15924_v36  ;;  %v20737_v61 = vld [vmem:[#allocation119_spill] sm:$0xff] }
 0x1e6   : > { %v1762_v17 = vpop.f32.mrf.mxu0  ;;  %12004 = vmatmul.mubr.f32.gmra.mxu1 %v20688_v14  ;;  %v15928_v23 = vpop.f32.mrf.mxu1  ;;  %v1421_v45 = vadd.f32 %v15797_v37, %v20737_v61  ;;  %v20746_v61 = vld [vmem:[#allocation128_spill] sm:$0xff] }
 0x1e7   : > { %20734 = vst [vmem:[#allocation158_spill] sm:$0xff] %v15928_v23  ;;  %v15932_v41 = vadd.f32 %v1762_v17, %v1411_v53  ;;  %12006 = vmatprep.mubr.f32.mxu1 %v20690_v44  ;;  %v20738_v23 = vld [vmem:[#allocation56_spill] sm:$0xff]  ;;  %v20740_v44 = vld [vmem:[#allocation121_spill] sm:$0xff] }
 0x1e8   : > { %v11413_v58 = vpop.f32.mrf.mxu0  ;;  %11701 = vmatmul.mubr.f32.gmra.mxu0 %v15936_v54  ;;  %v15939_v57 = vpop.f32.mrf.mxu1  ;;  %v1436_v53 = vadd.f32 %v15803_v51, %v20740_v44  ;;  %v4089_v51 = vld [vmem:[#allocation6 + $0x468] sm:$0xff] }
 0x1e9   : > { %20736 = vst [vmem:[#allocation103_spill] sm:$0xff] %v15939_v57  ;;  %v15943_v14 = vadd.f32 %v11413_v58, %v1426_v62  ;;  %11848 = vmatprep.mubr.f32.mxu0 %v20738_v23  ;;  %v20743_v58 = vld [vmem:[#allocation125_spill] sm:$0xff] }
 0x1ea   : > { %v1772_v11 = vpop.f32.mrf.mxu0  ;;  %12007 = vmatmul.mubr.f32.gmra.mxu1 %v20692_v0  ;;  %v15947_v55 = vpop.f32.mrf.mxu1  ;;  %v1431_v23 = vadd.f32 %v15809_v39, %v20743_v58  ;;  %v20744_v0 = vld [vmem:[#allocation58_spill] sm:$0xff]  ;;  %v4088_v39 = vld [vmem:[#allocation6 + $0x460] sm:$0xff] }
 0x1eb   : > { %20739 = vst [vmem:[#allocation159_spill] sm:$0xff] %v15947_v55  ;;  %v15951_v17 = vadd.f32 %v1772_v11, %v1421_v45  ;;  %12009 = vmatprep.mubr.f32.mxu1 %v20694_v19 }
 0x1ec   : > { %v11416_v57 = vpop.f32.mrf.mxu0  ;;  %11849 = vmatmul.mubr.f32.vlgmr.msra.gmra.mxu0 %v20741_v27  ;;  %v15955_v37 = vpop.f32.mrf.mxu1  ;;  %v1446_v27 = vadd.f32 %v15815_v26, %v20746_v61  ;;  %v4087_v26 = vld [vmem:[#allocation6 + $0x458] sm:$0xff]  ;;  %v4086_v61 = vld [vmem:[#allocation6 + $0x450] sm:$0xff] }
 0x1ed   : > { %20742 = vst [vmem:[#allocation107_spill] sm:$0xff] %v15955_v37  ;;  %v15959_v62 = vadd.f32 %v11416_v57, %v1436_v53  ;;  %12043 = vmatpush3.msra.mxu0 %v15674_v1  ;;  %11851 = vmatprep.mubr.f32.mxu0 %v20744_v0  ;;  %v20747_v1 = vld [vmem:[#allocation59_spill] sm:$0xff]  ;;  %v20749_v53 = vld [vmem:[#allocation130_spill] sm:$0xff]  ;;  %v20750_v0 = vld [vmem:[#allocation60_spill] sm:$0xff] }
 0x1ee   : > { %v1782_v11 = vpop.f32.mrf.mxu0  ;;  %12044 = vmatprep.subr.mxu0 %v4090_v16  ;;  %12010 = vmatmul.mubr.f32.gmra.mxu1 %v20696_v8  ;;  %v15964_v19 = vpop.f32.mrf.mxu1  ;;  %v1441_v8 = vadd.f32 %v15821_v15, %v20749_v53  ;;  %v20798_v37 = vld [vmem:[#allocation33_spill] sm:$0xff] }
 0x1ef   : > { %20745 = vst [vmem:[#allocation110_spill] sm:$0xff] %v15964_v19  ;;  %v15968_v45 = vadd.f32 %v1782_v11, %v1431_v23  ;;  %12045 = vmatpush3.msra.mxu0 %v4090_v16  ;;  %12012 = vmatprep.mubr.f32.mxu1 %v20698_v35  ;;  %v20751_v35 = vld [vmem:[#allocation134_spill] sm:$0xff] }
 0x1f0   : > { %v11419_v57 = vpop.f32.mrf.mxu0  ;;  %11852 = vmatmul.mubr.f32.gmra.mxu0 %v20747_v1  ;;  %12046 = vmatprep.subr.mxu0 %v4089_v51  ;;  %v15972_v44 = vpop.f32.mrf.mxu1  ;;  %v1456_v16 = vadd.f32 %v15827_v52, %v20751_v35  ;;  %v4085_v52 = vld [vmem:[#allocation6 + $0x448] sm:$0xff]  ;;  %v4084_v35 = vld [vmem:[#allocation6 + $0x440] sm:$0xff] }
 0x1f1   : > { %20748 = vst [vmem:[#allocation112_spill] sm:$0xff] %v15972_v44  ;;  %v15976_v58 = vadd.f32 %v11419_v57, %v1446_v27  ;;  %11854 = vmatprep.mubr.f32.mxu0 %v20750_v0  ;;  %12047 = vmatpush3.msra.mxu0 %v4089_v51  ;;  %v20752_v27 = vld [vmem:[#allocation61_spill] sm:$0xff] }
 0x1f2   : > { %v1792_v23 = vpop.f32.mrf.mxu0  ;;  %12048 = vmatprep.subr.mxu0 %v4088_v39  ;;  %12013 = vmatmul.mubr.f32.gmra.mxu1 %v20700_v29  ;;  %v20754_v51 = vld [vmem:[#allocation137_spill] sm:$0xff]  ;;  %v20755_v29 = vld [vmem:[#allocation62_spill] sm:$0xff] }
 0x1f3   : > { %v15982_v11 = vadd.f32 %v1792_v23, %v1441_v8  ;;  %12049 = vmatpush3.msra.mxu0 %v4088_v39  ;;  %12015 = vmatprep.mubr.f32.mxu1 %v20702_v63  ;;  %v1451_v1 = vadd.f32 %v15833_v12, %v20754_v51  ;;  %v20756_v39 = vld [vmem:[#allocation139_spill] sm:$0xff]  ;;  %v4083_v51 = vld [vmem:[#allocation6 + $0x438] sm:$0xff] }
 0x1f4   : > { %v11422_v15 = vpop.f32.mrf.mxu0  ;;  %11855 = vmatmul.mubr.f32.gmra.mxu0 %v20752_v27  ;;  %12050 = vmatprep.subr.mxu0 %v4087_v26  ;;  %v15986_v57 = vpop.f32.mrf.mxu1  ;;  %v1466_v0 = vadd.f32 %v15839_v22, %v20756_v39 }
 0x1f5   : > { %20753 = vst [vmem:[#allocation116_spill] sm:$0xff] %v15986_v57  ;;  %v15990_v53 = vadd.f32 %v11422_v15, %v1456_v16  ;;  %11857 = vmatprep.mubr.f32.mxu0 %v20755_v29  ;;  %12051 = vmatpush3.msra.mxu0 %v4087_v26  ;;  %v20757_v16 = vld [vmem:[#allocation63_spill] sm:$0xff]  ;;  %v20796_v57 = vld [vmem:[#allocation168_spill] sm:$0xff] }
 0x1f6   : > { %v1802_v8 = vpop.f32.mrf.mxu0  ;;  %12052 = vmatprep.subr.mxu0 %v4086_v61  ;;  %12016 = vmatmul.mubr.f32.gmra.mxu1 %v20704_v6  ;;  %v15994_v63 = vpop.f32.mrf.mxu1  ;;  %v20758_v26 = vld [vmem:[#allocation143_spill] sm:$0xff]  ;;  %v20759_v6 = vld [vmem:[#allocation64_spill] sm:$0xff] }
 0x1f7   : > { %v15998_v23 = vadd.f32 %v1802_v8, %v1451_v1  ;;  %12053 = vmatpush3.msra.mxu0 %v4086_v61  ;;  %12018 = vmatprep.mubr.f32.mxu1 %v20706_v47  ;;  %v1461_v15 = vadd.f32 %v15845_v2, %v20758_v26  ;;  %v4082_v61 = vld [vmem:[#allocation6 + $0x430] sm:$0xff] }
 0x1f8   : > { %v11425_v12 = vpop.f32.mrf.mxu0  ;;  %11858 = vmatmul.mubr.f32.gmra.mxu0 %v20757_v16  ;;  %12054 = vmatprep.subr.mxu0 %v4085_v52  ;;  %v20761_v8 = vld [vmem:[#allocation65_spill] sm:$0xff] }
 0x1f9   : > { %v16004_v27 = vadd.f32 %v11425_v12, %v1466_v0  ;;  %11860 = vmatprep.mubr.f32.mxu0 %v20759_v6  ;;  %12055 = vmatpush3.msra.mxu0 %v4085_v52  ;;  %v16007_v22 = vpop.f32.mrf.mxu1  ;;  %v20762_v52 = vld [vmem:[#allocation146_spill] sm:$0xff]  ;;  %v4081_v12 = vld [vmem:[#allocation6 + $0x428] sm:$0xff]  ;;  %v20765_v6 = vld [vmem:[#allocation67_spill] sm:$0xff] }
 0x1fa   : > { %v1812_v1 = vpop.f32.mrf.mxu0  ;;  %12056 = vmatprep.subr.mxu0 %v4084_v35  ;;  %12019 = vmatmul.mubr.f32.gmra.mxu1 %v20708_v13  ;;  %v20763_v0 = vld [vmem:[#allocation66_spill] sm:$0xff] }
 0x1fb   : > { %v16010_v47 = vadd.f32 %v1812_v1, %v1461_v15  ;;  %12057 = vmatpush3.msra.mxu0 %v4084_v35  ;;  %v16012_v29 = vpop.f32.mrf.mxu1  ;;  %12021 = vmatprep.mubr.f32.mxu1 %v20710_v49  ;;  %v20764_v35 = vld [vmem:[#allocation150_spill] sm:$0xff]  ;;  %v4080_v49 = vld [vmem:[#allocation6 + $0x420] sm:$0xff] }
 0x1fc   : > { %20760 = vst [vmem:[#allocation119_spill] sm:$0xff] %v16012_v29  ;;  %v11428_v2 = vpop.f32.mrf.mxu0  ;;  %11861 = vmatmul.mubr.f32.gmra.mxu0 %v20761_v8  ;;  %12058 = vmatprep.subr.mxu0 %v4083_v51  ;;  %v20767_v8 = vld [vmem:[#allocation68_spill] sm:$0xff] }
 0x1fd   : > { %v16017_v39 = vadd.f32 %v11428_v2, %v20762_v52  ;;  %11863 = vmatprep.mubr.f32.mxu0 %v20763_v0  ;;  %12059 = vmatpush3.msra.mxu0 %v4083_v51  ;;  %v20766_v51 = vld [vmem:[#allocation151_spill] sm:$0xff]  ;;  %v4079_v52 = vld [vmem:[#allocation6 + $0x418] sm:$0xff] }
 0x1fe   : > { %v1822_v13 = vpop.f32.mrf.mxu0  ;;  %12060 = vmatprep.subr.mxu0 %v4082_v61  ;;  %v16020_v16 = vpop.f32.mrf.mxu1  ;;  %12022 = vmatmul.mubr.f32.gmra.mxu1 %v20713_v10 }
 0x1ff   : > { %v16024_v26 = vadd.f32 %v1822_v13, %v20764_v35  ;;  %12061 = vmatpush3.msra.mxu0 %v4082_v61  ;;  %12024 = vmatprep.mubr.f32.mxu1 %v20716_v18  ;;  %v20768_v61 = vld [vmem:[#allocation155_spill] sm:$0xff]  ;;  %v4078_v18 = vld [vmem:[#allocation6 + $0x410] sm:$0xff] }
 0x200   : > { %v11431_v15 = vpop.f32.mrf.mxu0  ;;  %11864 = vmatmul.mubr.f32.gmra.mxu0 %v20765_v6  ;;  %12062 = vmatprep.subr.mxu0 %v4081_v12  ;;  %v2388_v1 = vpop.f32.mrf.mxu1  ;;  %v20769_v6 = vld [vmem:[#allocation69_spill] sm:$0xff] }
 0x201   : > { %v16029_v2 = vadd.f32 %v11431_v15, %v20766_v51  ;;  %11866 = vmatprep.mubr.f32.mxu0 %v20767_v8  ;;  %12063 = vmatpush3.msra.mxu0 %v4081_v12  ;;  %v20771_v12 = vld [vmem:[#allocation156_spill] sm:$0xff]  ;;  %v20772_v51 = vld [vmem:[#allocation19_spill] sm:$0xff] }
 0x202   : > { %v1832_v10 = vpop.f32.mrf.mxu0  ;;  %12064 = vmatprep.subr.mxu0 %v4080_v49  ;;  %v11737_v0 = vpop.f32.mrf.mxu1  ;;  %12025 = vmatmul.mubr.f32.gmra.mxu1 %v15416_v21  ;;  %v4077_v21 = vld [vmem:[#allocation6 + $0x408] sm:$0xff] }
 0x203   : > { %v16034_v13 = vadd.f32 %v1832_v10, %v20768_v61  ;;  %12065 = vmatpush3.msra.mxu0 %v4080_v49  ;;  %12027 = vmatprep.mubr.f32.mxu1 %v20721_v25  ;;  %v4076_v49 = vld [vmem:[#allocation6 + $0x400] sm:$0xff]  ;;  %v20773_v61 = vld [vmem:[#allocation20_spill] sm:$0xff] }
 0x204   : > { %v11434_v35 = vpop.f32.mrf.mxu0  ;;  %11867 = vmatmul.mubr.f32.gmra.mxu0 %v20769_v6  ;;  %12066 = vmatprep.subr.mxu0 %v4079_v52  ;;  %v16038_v15 = vpop.f32.mrf.mxu1  ;;  %v20775_v6 = vld [vmem:[#allocation21_spill] sm:$0xff] }
 0x205   : > { %20770 = vst [vmem:[#allocation56_spill] sm:$0xff] %v16038_v15  ;;  %v16041_v1 = vadd.f32 %v11434_v35, %v20771_v12  ;;  %11869 = vmatprep.mubr.f32.mxu0 %v20772_v51  ;;  %12067 = vmatpush3.msra.mxu0 %v4079_v52  ;;  %v20778_v51 = vld [vmem:[#allocation163_spill] sm:$0xff] }
 0x206   : > { %v1842_v8 = vpop.f32.mrf.mxu0  ;;  %12068 = vmatprep.subr.mxu0 %v4078_v18  ;;  %v16044_v10 = vpop.f32.mrf.mxu1  ;;  %12028 = vmatmul.mubr.f32.gmra.mxu1 %v20724_v20  ;;  %v20791_v15 = vld [vmem:[#allocation31_spill] sm:$0xff] }
 0x207   : > { %v16048_v25 = vadd.f32 %v1842_v8, %v15477_v48  ;;  %12069 = vmatpush3.msra.mxu0 %v4078_v18  ;;  %12030 = vmatprep.mubr.f32.mxu1 %v20727_v5  ;;  %v20776_v18 = vld [vmem:[#allocation22_spill] sm:$0xff]  ;;  %v20779_v8 = vld [vmem:[#allocation23_spill] sm:$0xff] }
 0x208   : > { %v11437_v0 = vpop.f32.mrf.mxu0  ;;  %11870 = vmatmul.mubr.f32.gmra.mxu0 %v20773_v61  ;;  %v16052_v35 = vpop.f32.mrf.mxu1  ;;  %12070 = vmatprep.subr.mxu0 %v4077_v21  ;;  %v20781_v61 = vld [vmem:[#allocation26_spill] sm:$0xff] }
 0x209   : > { %20774 = vst [vmem:[#allocation121_spill] sm:$0xff] %v16052_v35  ;;  %v16055_v52 = vadd.f32 %v11437_v0, %v15484_v40  ;;  %11872 = vmatprep.mubr.f32.mxu0 %v20775_v6  ;;  %12071 = vmatpush3.msra.mxu0 %v4077_v21 }
 0x20a   : > { %v1852_v20 = vpop.f32.mrf.mxu0  ;;  %v16058_v12 = vpop.f32.mrf.mxu1  ;;  %12031 = vmatmul.mubr.f32.gmra.mxu1 %v15472_v33  ;;  %12072 = vmatprep.subr.mxu0 %v4076_v49 }
 0x20b   : > { %v16062_v48 = vadd.f32 %v1852_v20, %v15497_v28  ;;  %12033 = vmatprep.mubr.f32.mxu1 %v15914_v59  ;;  %12073 = vmatpush3.msra.mxu0 %v4076_v49  ;;  %v20780_v28 = vld [vmem:[#allocation165_spill] sm:$0xff] }
 0x20c   : > { %v11440_v5 = vpop.f32.mrf.mxu0  ;;  %11873 = vmatmul.mubr.f32.gmra.mxu0 %v20776_v18  ;;  %v16066_v40 = vpop.f32.mrf.mxu1  ;;  %v16087_v18 = vld [vmem:[%s14304_s20 + $0x1c8] sm:$0xff] }
 0x20d   : > { %20777 = vst [vmem:[#allocation57_spill] sm:$0xff] %v16066_v40  ;;  %v16069_v21 = vadd.f32 %v11440_v5, %v20778_v51  ;;  %11875 = vmatprep.mubr.f32.mxu0 %v20779_v8  ;;  %v20783_v5 = vld [vmem:[#allocation27_spill] sm:$0xff]  ;;  %v16093_v8 = vld [vmem:[%s14304_s20 + $0x1d0] sm:$0xff] }
 0x20e   : > { %v1862_v33 = vpop.f32.mrf.mxu0  ;;  %v16072_v0 = vpop.f32.mrf.mxu1  ;;  %12034 = vmatmul.mubr.f32.gmra.mxu1 %v15924_v36 }
 0x20f   : > { %v16076_v59 = vadd.f32 %v1862_v33, %v20780_v28  ;;  %12036 = vmatprep.mubr.f32.mxu1 %v15936_v54  ;;  %v20784_v28 = vld [vmem:[#allocation29_spill] sm:$0xff] }
 0x210   : > { %v11443_v49 = vpop.f32.mrf.mxu0  ;;  %11876 = vmatmul.mubr.f32.gmra.mxu0 %v20781_v61  ;;  %v16080_v6 = vpop.f32.mrf.mxu1  ;;  %v20787_v61 = vld [vmem:[#allocation30_spill] sm:$0xff] }
 0x211   : > { %20782 = vst [vmem:[#allocation125_spill] sm:$0xff] %v16080_v6  ;;  %v16083_v20 = vadd.f32 %v11443_v49, %v15521_v46  ;;  %11878 = vmatprep.mubr.f32.mxu0 %v20783_v5  ;;  %v16107_v5 = vld [vmem:[%s14304_s20 + $0x1d8] sm:$0xff] }
 0x212   : > { %v1872_v51 = vpop.f32.mrf.mxu0  ;;  %v16089_v36 = vpop.f32.mrf.mxu1  ;;  %12037 = vmatmul.mubr.f32.gmra.mxu1 %v16087_v18  ;;  %20788 = vst [vmem:[#allocation59_spill] sm:$0xff] %v16107_v5 }
 0x213   : > { %v16096_v54 = vadd.f32 %v1872_v51, %v15528_v7  ;;  %12039 = vmatprep.mubr.f32.mxu1 %v16093_v8  ;;  %v20789_v7 = vld [vmem:[#allocation166_spill] sm:$0xff] }
 0x214   : > { %v11446_v33 = vpop.f32.mrf.mxu0  ;;  %11879 = vmatmul.mubr.f32.gmra.mxu0 %v20784_v28  ;;  %v16100_v46 = vpop.f32.mrf.mxu1 }
 0x215   : > { %20785 = vst [vmem:[#allocation58_spill] sm:$0xff] %v16100_v46  ;;  %v16103_v49 = vadd.f32 %v11446_v33, %v15535_v60  ;;  %11881 = vmatprep.mubr.f32.mxu0 %v20787_v61  ;;  %v20793_v46 = vld [vmem:[#allocation167_spill] sm:$0xff]  ;;  %v20795_v33 = vld [vmem:[#allocation32_spill] sm:$0xff] }
 0x216   : > { %v1882_v6 = vpop.f32.mrf.mxu0  ;;  %v16109_v40 = vpop.f32.mrf.mxu1  ;;  %12040 = vmatmul.mubr.f32.gmra.mxu1 %v16107_v5 }
 0x217   : > { %20786 = vst [vmem:[#allocation128_spill] sm:$0xff] %v16103_v49  ;;  %v16113_v51 = vadd.f32 %v1882_v6, %v20789_v7  ;;  %v20800_v7 = vld [vmem:[#allocation169_spill] sm:$0xff]  ;;  %v20842_v49 = vld [vmem:[#allocation47_spill] sm:$0xff] }
 0x218   : > { %v11449_v35 = vpop.f32.mrf.mxu0  ;;  %11882 = vmatmul.mubr.f32.gmra.mxu0 %v20791_v15  ;;  %v16116_v28 = vpop.f32.mrf.mxu1 }
 0x219   : > { %20790 = vst [vmem:[#allocation130_spill] sm:$0xff] %v16113_v51  ;;  %20792 = vst [vmem:[#allocation60_spill] sm:$0xff] %v16116_v28  ;;  %v16119_v60 = vadd.f32 %v11449_v35, %v20793_v46  ;;  %11884 = vmatprep.mubr.f32.mxu0 %v20795_v33  ;;  %v20802_v28 = vld [vmem:[#allocation34_spill] sm:$0xff]  ;;  %v20836_v51 = vld [vmem:[#allocation45_spill] sm:$0xff] }
 0x21a   : > { %v1892_v61 = vpop.f32.mrf.mxu0  ;;  %v16122_v29 = vpop.f32.mrf.mxu1  ;;  %v20803_v33 = vld [vmem:[#allocation170_spill] sm:$0xff] }
 0x21b   : > { %20794 = vst [vmem:[#allocation134_spill] sm:$0xff] %v16119_v60  ;;  %v16125_v44 = vadd.f32 %v1892_v61, %v20796_v57  ;;  %v20805_v60 = vld [vmem:[#allocation35_spill] sm:$0xff] }
 0x21c   : > { %v11452_v19 = vpop.f32.mrf.mxu0  ;;  %11885 = vmatmul.mubr.f32.gmra.mxu0 %v20798_v37  ;;  %v16128_v6 = vpop.f32.mrf.mxu1  ;;  %v20807_v61 = vld [vmem:[#allocation171_spill] sm:$0xff] }
 0x21d   : > { %20797 = vst [vmem:[#allocation61_spill] sm:$0xff] %v16125_v44  ;;  %20799 = vst [vmem:[#allocation137_spill] sm:$0xff] %v16128_v6  ;;  %v16131_v15 = vadd.f32 %v11452_v19, %v20800_v7  ;;  %11887 = vmatprep.mubr.f32.mxu0 %v20802_v28  ;;  %v20809_v6 = vld [vmem:[#allocation36_spill] sm:$0xff]  ;;  %v20811_v44 = vld [vmem:[#allocation37_spill] sm:$0xff] }
 0x21e   : > { %v1902_v35 = vpop.f32.mrf.mxu0  ;;  %v16134_v46 = vpop.f32.mrf.mxu1 }
 0x21f   : > { %20801 = vst [vmem:[#allocation62_spill] sm:$0xff] %v16131_v15  ;;  %v16137_v55 = vadd.f32 %v1902_v35, %v20803_v33  ;;  %v20814_v33 = vld [vmem:[#allocation38_spill] sm:$0xff] }
 0x220   : > { %v11455_v34 = vpop.f32.mrf.mxu0  ;;  %11888 = vmatmul.mubr.f32.gmra.mxu0 %v20805_v60  ;;  %v16140_v57 = vpop.f32.mrf.mxu1 }
 0x221   : > { %20804 = vst [vmem:[#allocation139_spill] sm:$0xff] %v16137_v55  ;;  %20806 = vst [vmem:[#allocation63_spill] sm:$0xff] %v16140_v57  ;;  %v16143_v37 = vadd.f32 %v11455_v34, %v20807_v61  ;;  %11890 = vmatprep.mubr.f32.mxu0 %v20809_v6  ;;  %v20829_v55 = vld [vmem:[#allocation43_spill] sm:$0xff] }
 0x222   : > { %v1912_v19 = vpop.f32.mrf.mxu0  ;;  %v16146_v7 = vpop.f32.mrf.mxu1 }
 0x223   : > { %20808 = vst [vmem:[#allocation143_spill] sm:$0xff] %v16143_v37  ;;  %v16149_v28 = vadd.f32 %v1912_v19, %v15603_v9  ;;  %v20816_v37 = vld [vmem:[#allocation39_spill] sm:$0xff]  ;;  %v20819_v19 = vld [vmem:[#allocation40_spill] sm:$0xff] }
 0x224   : > { %v11458_v15 = vpop.f32.mrf.mxu0  ;;  %11891 = vmatmul.mubr.f32.gmra.mxu0 %v20811_v44  ;;  %v16152_v35 = vpop.f32.mrf.mxu1 }
 0x225   : > { %20810 = vst [vmem:[#allocation64_spill] sm:$0xff] %v16149_v28  ;;  %20812 = vst [vmem:[#allocation65_spill] sm:$0xff] %v16152_v35  ;;  %v16155_v60 = vadd.f32 %v11458_v15, %v15611_v43  ;;  %11893 = vmatprep.mubr.f32.mxu0 %v20814_v33  ;;  %v20820_v33 = vld [vmem:[#allocation174_spill] sm:$0xff]  ;;  %v20822_v28 = vld [vmem:[#allocation41_spill] sm:$0xff] }
 0x226   : > { %v1922_v34 = vpop.f32.mrf.mxu0  ;;  %v16158_v61 = vpop.f32.mrf.mxu1 }
 0x227   : > { %20813 = vst [vmem:[#allocation146_spill] sm:$0xff] %v16155_v60  ;;  %v16161_v6 = vadd.f32 %v1922_v34, %v15619_v50  ;;  %v20824_v34 = vld [vmem:[#allocation176_spill] sm:$0xff] }
 0x228   : > { %v11461_v57 = vpop.f32.mrf.mxu0  ;;  %11894 = vmatmul.mubr.f32.gmra.mxu0 %v20816_v37  ;;  %v16164_v9 = vpop.f32.mrf.mxu1 }
 0x229   : > { %20815 = vst [vmem:[#allocation66_spill] sm:$0xff] %v16161_v6  ;;  %20817 = vst [vmem:[#allocation150_spill] sm:$0xff] %v16164_v9  ;;  %v16167_v44 = vadd.f32 %v11461_v57, %v15629_v32  ;;  %11896 = vmatprep.mubr.f32.mxu0 %v20819_v19  ;;  %v20826_v9 = vld [vmem:[#allocation42_spill] sm:$0xff] }
 0x22a   : > { %v1932_v43 = vpop.f32.mrf.mxu0  ;;  %v16170_v15 = vpop.f32.mrf.mxu1  ;;  %v20827_v19 = vld [vmem:[#allocation178_spill] sm:$0xff] }
 0x22b   : > { %20818 = vst [vmem:[#allocation67_spill] sm:$0xff] %v16167_v44  ;;  %v16173_v35 = vadd.f32 %v1932_v43, %v20820_v33  ;;  %v20831_v33 = vld [vmem:[#allocation180_spill] sm:$0xff] }
 0x22c   : > { %v11464_v60 = vpop.f32.mrf.mxu0  ;;  %11897 = vmatmul.mubr.f32.gmra.mxu0 %v20822_v28  ;;  %v16176_v50 = vpop.f32.mrf.mxu1 }
 0x22d   : > { %20821 = vst [vmem:[#allocation151_spill] sm:$0xff] %v16173_v35  ;;  %20823 = vst [vmem:[#allocation68_spill] sm:$0xff] %v16176_v50  ;;  %v16179_v37 = vadd.f32 %v11464_v60, %v20824_v34  ;;  %11899 = vmatprep.mubr.f32.mxu0 %v20826_v9  ;;  %v20833_v50 = vld [vmem:[#allocation44_spill] sm:$0xff]  ;;  %v20834_v9 = vld [vmem:[#allocation182_spill] sm:$0xff] }
 0x22e   : > { %v1942_v32 = vpop.f32.mrf.mxu0  ;;  %v16182_v57 = vpop.f32.mrf.mxu1 }
 0x22f   : > { %20825 = vst [vmem:[#allocation155_spill] sm:$0xff] %v16179_v37  ;;  %v16185_v44 = vadd.f32 %v1942_v32, %v20827_v19  ;;  %v20838_v19 = vld [vmem:[#allocation184_spill] sm:$0xff] }
 0x230   : > { %v11467_v6 = vpop.f32.mrf.mxu0  ;;  %11900 = vmatmul.mubr.f32.gmra.mxu0 %v20829_v55  ;;  %v16188_v43 = vpop.f32.mrf.mxu1 }
 0x231   : > { %20828 = vst [vmem:[#allocation69_spill] sm:$0xff] %v16185_v44  ;;  %20830 = vst [vmem:[#allocation156_spill] sm:$0xff] %v16188_v43  ;;  %v16191_v28 = vadd.f32 %v11467_v6, %v20831_v33  ;;  %11902 = vmatprep.mubr.f32.mxu0 %v20833_v50  ;;  %v20840_v43 = vld [vmem:[#allocation46_spill] sm:$0xff] }
 0x232   : > { %v1952_v60 = vpop.f32.mrf.mxu0  ;;  %v16194_v34 = vpop.f32.mrf.mxu1  ;;  %v20841_v50 = vld [vmem:[#allocation186_spill] sm:$0xff] }
 0x233   : > { %20832 = vst [vmem:[#allocation19_spill] sm:$0xff] %v16191_v28  ;;  %v16197_v37 = vadd.f32 %v1952_v60, %v20834_v9  ;;  %v20844_v9 = vld [vmem:[#allocation190_spill] sm:$0xff] }
 0x234   : > { %v11470_v35 = vpop.f32.mrf.mxu0  ;;  %11903 = vmatmul.mubr.f32.gmra.mxu0 %v20836_v51  ;;  %v16200_v32 = vpop.f32.mrf.mxu1 }
 0x235   : > { %20835 = vst [vmem:[#allocation20_spill] sm:$0xff] %v16197_v37  ;;  %20837 = vst [vmem:[#allocation21_spill] sm:$0xff] %v16200_v32  ;;  %v16203_v55 = vadd.f32 %v11470_v35, %v20838_v19  ;;  %11905 = vmatprep.mubr.f32.mxu0 %v20840_v43  ;;  %v20846_v32 = vld [vmem:[#allocation48_spill] sm:$0xff] }
 0x236   : > { %v1962_v6 = vpop.f32.mrf.mxu0  ;;  %v16206_v33 = vpop.f32.mrf.mxu1  ;;  %v20847_v43 = vld [vmem:[#allocation192_spill] sm:$0xff] }
 0x237   : > { %20839 = vst [vmem:[#allocation22_spill] sm:$0xff] %v16203_v55  ;;  %v2039_v28 = vadd.f32 %v1962_v6, %v20841_v50 }
 0x238   : > { %v11473_v44 = vpop.f32.mrf.mxu0  ;;  %11906 = vmatmul.mubr.f32.gmra.mxu0 %v20842_v49  ;;  %v16210_v60 = vpop.f32.mrf.mxu1  ;;  %v20850_v49 = vld [vmem:[#allocation49_spill] sm:$0xff] }
 0x239   : > { %20843 = vst [vmem:[#allocation163_spill] sm:$0xff] %v16210_v60  ;;  %v2042_v37 = vadd.f32 %v11473_v44, %v20844_v9  ;;  %v16214_v51 = vadd.f32 %v15994_v63, %v2039_v28  ;;  %11908 = vmatprep.mubr.f32.mxu0 %v20846_v32  ;;  %v20852_v44 = vld [vmem:[#allocation195_spill] sm:$0xff]  ;;  %v20853_v63 = vld [vmem:[#allocation50_spill] sm:$0xff] }
 0x23a   : > { %v1972_v35 = vpop.f32.mrf.mxu0  ;;  %v16217_v19 = vpop.f32.mrf.mxu1 }
 0x23b   : > { %20845 = vst [vmem:[#allocation23_spill] sm:$0xff] %v16214_v51  ;;  %v16220_v55 = vadd.f32 %v1972_v35, %v20847_v43  ;;  %v16223_v6 = vadd.f32 %v16007_v22, %v2042_v37  ;;  %v20855_v43 = vld [vmem:[#allocation51_spill] sm:$0xff]  ;;  %v20857_v37 = vld [vmem:[#allocation172_spill] sm:$0xff] }
 0x23c   : > { %v11476_v50 = vpop.f32.mrf.mxu0  ;;  %11909 = vmatmul.mubr.f32.gmra.mxu0 %v20850_v49  ;;  %v16226_v60 = vpop.f32.mrf.mxu1  ;;  %v2397_v49 = vadd.f32 %v20857_v37, %v15862_v3  ;;  %v20865_v3 = vld [vmem:[#allocation54_spill] sm:$0xff] }
 0x23d   : > { %20848 = vst [vmem:[#allocation165_spill] sm:$0xff] %v16220_v55  ;;  %20849 = vst [vmem:[#allocation26_spill] sm:$0xff] %v16223_v6  ;;  %v2044_v9 = vadd.f32 %v11476_v50, %v20852_v44  ;;  %11911 = vmatprep.mubr.f32.mxu0 %v20853_v63  ;;  %v20858_v6 = vld [vmem:[#allocation52_spill] sm:$0xff]  ;;  %v20860_v44 = vld [vmem:[#allocation173_spill] sm:$0xff] }
 0x23e   : > { %20851 = vst [vmem:[#allocation27_spill] sm:$0xff] %v16226_v60  ;;  %v1982_v28 = vpop.f32.mrf.mxu0  ;;  %v16230_v32 = vpop.f32.mrf.mxu1  ;;  %v2400_v63 = vadd.f32 %v20860_v44, %v15870_v38  ;;  %v20866_v55 = vld [vmem:[#allocation177_spill] sm:$0xff]  ;;  %v20868_v44 = vld [vmem:[#allocation55_spill] sm:$0xff] }
 0x23f   : > { %v16233_v51 = vadd.f32 %v16020_v16, %v2044_v9  ;;  %v20862_v9 = vld [vmem:[#allocation53_spill] sm:$0xff] }
 0x240   : > { %v11624_v35 = vpop.f32.mrf.mxu0  ;;  %11912 = vmatmul.mubr.f32.gmra.mxu0 %v20855_v43  ;;  %v16236_v22 = vpop.f32.mrf.mxu1  ;;  %v20864_v43 = vld [vmem:[#allocation175_spill] sm:$0xff] }
 0x241   : > { %20854 = vst [vmem:[#allocation29_spill] sm:$0xff] %v16233_v51  ;;  %20856 = vst [vmem:[#allocation30_spill] sm:$0xff] %v16236_v22  ;;  %11914 = vmatprep.mubr.f32.mxu0 %v20858_v6  ;;  %v2399_v22 = vadd.f32 %v20864_v43, %v15878_v30  ;;  %v20870_v30 = vld [vmem:[#allocation179_spill] sm:$0xff]  ;;  %v20871_v43 = vld [vmem:[#allocation82_spill] sm:$0xff] }
 0x242   : > { %v2534_v60 = vpop.f32.mrf.mxu0  ;;  %v16241_v50 = vpop.f32.mrf.mxu1 }
 0x243   : > { %20859 = vst [vmem:[#allocation166_spill] sm:$0xff] %v16241_v50  ;;  %v16245_v28 = vadd.f32 %v2534_v60, %v2397_v49  ;;  %v2402_v50 = vadd.f32 %v20866_v55, %v15886_v56  ;;  %v651_v56 = vrot.slane %v16087_v18, 7 }
 0x244   : > { %v11627_v16 = vpop.f32.mrf.mxu0  ;;  %11915 = vmatmul.mubr.f32.gmra.mxu0 %v20862_v9  ;;  %v16248_v35 = vpop.f32.mrf.mxu1 }
 0x245   : > { %20861 = vst [vmem:[#allocation31_spill] sm:$0xff] %v16245_v28  ;;  %20863 = vst [vmem:[#allocation167_spill] sm:$0xff] %v16248_v35  ;;  %v2806_v51 = vadd.f32 %v11627_v16, %v2400_v63  ;;  %11917 = vmatprep.mubr.f32.mxu0 %v20865_v3  ;;  %v2401_v63 = vadd.f32 %v20870_v30, %v15894_v42  ;;  %v513_v3 = vrot.slane %v16107_v5, 7  ;;  %v20875_v30 = vld [vmem:[#allocation183_spill] sm:$0xff] }
 0x246   : > { %v2544_v6 = vpop.f32.mrf.mxu0  ;;  %v16253_v37 = vpop.f32.mrf.mxu1 }
 0x247   : > { %v16257_v38 = vadd.f32 %v2544_v6, %v2399_v22  ;;  %v16260_v60 = vadd.f32 %v16044_v10, %v2806_v51  ;;  %v652_v22 = vrot.slane %v16093_v8, 7  ;;  %v20872_v51 = vld [vmem:[#allocation181_spill] sm:$0xff]  ;;  %v734_v28 = vsel %vm574_vm0, %v513_v3, %v651_v56 }
 0x248   : > { %v11630_v49 = vpop.f32.mrf.mxu0  ;;  %11918 = vmatmul.mubr.f32.gmra.mxu0 %v20868_v44  ;;  %v16263_v9 = vpop.f32.mrf.mxu1  ;;  %v2404_v6 = vadd.f32 %v20872_v51, %v15902_v4 }
 0x249   : > { %20867 = vst [vmem:[#allocation32_spill] sm:$0xff] %v16257_v38  ;;  %20869 = vst [vmem:[#allocation168_spill] sm:$0xff] %v16263_v9  ;;  %v2808_v16 = vadd.f32 %v11630_v49, %v2402_v50  ;;  %11920 = vmatprep.mubr.f32.mxu0 %v20871_v43  ;;  %v20873_v50 = vld [vmem:[#allocation83_spill] sm:$0xff]  ;;  %v2403_v43 = vadd.f32 %v20875_v30, %v15910_v24  ;;  %v20876_v38 = vld [vmem:[#allocation86_spill] sm:$0xff]  ;;  %v653_v4 = vsel %vm574_vm0, %v651_v56, %v652_v22 }
 0x24a   : > { %v2554_v55 = vpop.f32.mrf.mxu0  ;;  %v16271_v10 = vpop.f32.mrf.mxu1  ;;  %v654_v56 = vsel %vm574_vm0, %v652_v22, %v513_v3  ;;  %v20883_v3 = vld [vmem:[#allocation24_spill] sm:$0xff] }
 0x24b   : > { %v16275_v44 = vadd.f32 %v2554_v55, %v2401_v63  ;;  %v16278_v9 = vadd.f32 %v16058_v12, %v2808_v16  ;;  %v20877_v12 = vld [vmem:[#allocation185_spill] sm:$0xff] }
 0x24c   : > { %v11633_v42 = vpop.f32.mrf.mxu0  ;;  %11921 = vmatmul.mubr.f32.gmra.mxu0 %v20873_v50  ;;  %v16281_v49 = vpop.f32.mrf.mxu1  ;;  %v2406_v16 = vadd.f32 %v20877_v12, %v15921_v31  ;;  %v20880_v31 = vld [vmem:[#allocation191_spill] sm:$0xff] }
 0x24d   : > { %20874 = vst [vmem:[#allocation33_spill] sm:$0xff] %v16281_v49  ;;  %v2810_v35 = vadd.f32 %v11633_v42, %v2404_v6  ;;  %11923 = vmatprep.mubr.f32.mxu0 %v20876_v38  ;;  %v20879_v38 = vld [vmem:[#allocation188_spill] sm:$0xff] }
 0x24e   : > { %v2564_v5 = vpop.f32.mrf.mxu0  ;;  %v16288_v63 = vpop.f32.mrf.mxu1  ;;  %v2405_v6 = vadd.f32 %v20879_v38, %v15932_v41  ;;  %v20882_v41 = vld [vmem:[#allocation194_spill] sm:$0xff] }
 0x24f   : > { %v16292_v55 = vadd.f32 %v2564_v5, %v2403_v43  ;;  %v16295_v51 = vadd.f32 %v16072_v0, %v2810_v35  ;;  %v2408_v5 = vadd.f32 %v20880_v31, %v15943_v14  ;;  %v20884_v14 = vld [vmem:[#allocation196_spill] sm:$0xff] }
 0x250   : > { %v11636_v50 = vpop.f32.mrf.mxu0  ;;  %11924 = vmatmul.mubr.f32.gmra.mxu0 %v734_v28  ;;  %v16297_v24 = vpop.f32.mrf.mxu1 }
 0x251   : > { %20878 = vst [vmem:[#allocation169_spill] sm:$0xff] %v16297_v24  ;;  %v2812_v42 = vadd.f32 %v11636_v50, %v2406_v16  ;;  %11926 = vmatprep.mubr.f32.mxu0 %v653_v4  ;;  %v2407_v4 = vadd.f32 %v20882_v41, %v15951_v17  ;;  %v2410_v50 = vadd.f32 %v20884_v14, %v15959_v62  ;;  %v20887_v17 = vld [vmem:[#allocation197_spill] sm:$0xff]  ;;  %v20889_v62 = vld [vmem:[#allocation198_spill] sm:$0xff] }
 0x252   : > { %v2574_v30 = vpop.f32.mrf.mxu0  ;;  %v16302_v49 = vpop.f32.mrf.mxu1 }
 0x253   : > { %v16306_v43 = vadd.f32 %v2574_v30, %v2405_v6  ;;  %v16309_v0 = vadd.f32 %v16089_v36, %v2812_v42  ;;  %v20885_v42 = vld [vmem:[#allocation25_spill] sm:$0xff]  ;;  %v2409_v30 = vadd.f32 %v20887_v17, %v15968_v45  ;;  %v20892_v45 = vld [vmem:[#allocation199_spill] sm:$0xff] }
 0x254   : > { %v11639_v28 = vpop.f32.mrf.mxu0  ;;  %11927 = vmatmul.mubr.f32.gmra.mxu0 %v654_v56  ;;  %v16311_v35 = vpop.f32.mrf.mxu1 }
 0x255   : > { %20881 = vst [vmem:[#allocation34_spill] sm:$0xff] %v16311_v35  ;;  %v2814_v12 = vadd.f32 %v11639_v28, %v2408_v5  ;;  %12074 = vmatprep.mubr.f32.mxu0 %v20883_v3  ;;  %v20888_v5 = vld [vmem:[#allocation28_spill] sm:$0xff] }
 0x256   : > { %v2584_v22 = vpop.f32.mrf.mxu0  ;;  %v16316_v16 = vpop.f32.mrf.mxu1 }
 0x257   : > { %v16320_v38 = vadd.f32 %v2584_v22, %v2407_v4  ;;  %v16323_v36 = vadd.f32 %v16109_v40, %v2814_v12  ;;  %v2412_v4 = vadd.f32 %v20889_v62, %v15976_v58  ;;  %v20890_v22 = vld [vmem:[#allocation70_spill] sm:$0xff]  ;;  %v20894_v58 = vld [vmem:[#allocation200_spill] sm:$0xff] }
 0x258   : > { %v11642_v6 = vpop.f32.mrf.mxu0  ;;  %12075 = vmatmul.mubr.f32.vlgmr.msra.gmra.mxu0 %v20885_v42  ;;  %v16326_v56 = vpop.f32.mrf.mxu1  ;;  %v20893_v42 = vld [vmem:[#allocation71_spill] sm:$0xff]  ;;  %v20895_v62 = vld [vmem:[#allocation72_spill] sm:$0xff] }
 0x259   : > { %20886 = vst [vmem:[#allocation170_spill] sm:$0xff] %v16326_v56  ;;  %v2816_v31 = vadd.f32 %v11642_v6, %v2410_v50  ;;  %12077 = vmatprep.mubr.f32.mxu0 %v20888_v5  ;;  %v2411_v50 = vadd.f32 %v20892_v45, %v15982_v11  ;;  %v20897_v11 = vld [vmem:[#allocation96_spill] sm:$0xff]  ;;  %v20898_v45 = vld [vmem:[#allocation73_spill] sm:$0xff] }
 0x25a   : > { %v2594_v28 = vpop.f32.mrf.mxu0  ;;  %v16331_v41 = vpop.f32.mrf.mxu1 }
 0x25b   : > { %v16335_v3 = vadd.f32 %v2594_v28, %v2409_v30  ;;  %v16338_v40 = vadd.f32 %v16122_v29, %v2816_v31  ;;  %v2414_v30 = vadd.f32 %v20894_v58, %v15990_v53  ;;  %v20899_v53 = vld [vmem:[#allocation97_spill] sm:$0xff] }
 0x25c   : > { %v11645_v12 = vpop.f32.mrf.mxu0  ;;  %12078 = vmatmul.mubr.f32.gmra.mxu0 %v20890_v22  ;;  %v16341_v14 = vpop.f32.mrf.mxu1 }
 0x25d   : > { %20891 = vst [vmem:[#allocation35_spill] sm:$0xff] %v16341_v14  ;;  %v2818_v6 = vadd.f32 %v11645_v12, %v2412_v4  ;;  %12080 = vmatprep.mubr.f32.mxu0 %v20893_v42  ;;  %v2413_v4 = vadd.f32 %v20897_v11, %v15998_v23  ;;  %v20902_v23 = vld [vmem:[#allocation100_spill] sm:$0xff]  ;;  %v20903_v11 = vld [vmem:[#allocation75_spill] sm:$0xff] }
 0x25e   : > { %v2604_v17 = vpop.f32.mrf.mxu0  ;;  %v16346_v5 = vpop.f32.mrf.mxu1 }
 0x25f   : > { %v16350_v28 = vadd.f32 %v2604_v17, %v2411_v50  ;;  %v16353_v29 = vadd.f32 %v16134_v46, %v2818_v6  ;;  %v2416_v50 = vadd.f32 %v20899_v53, %v16004_v27  ;;  %v5582_v6 = vld [vmem:[#allocation8 + $0xf8] sm:$0xff] }
 0x260   : > { %v11648_v31 = vpop.f32.mrf.mxu0  ;;  %12081 = vmatmul.mubr.f32.gmra.mxu0 %v20895_v62  ;;  %v16356_v22 = vpop.f32.mrf.mxu1  ;;  %v20900_v62 = vld [vmem:[#allocation74_spill] sm:$0xff]  ;;  %12155 = vmatprep.subr.mxu1 %v5582_v6 }
 0x261   : > { %20896 = vst [vmem:[#allocation171_spill] sm:$0xff] %v16356_v22  ;;  %v2820_v12 = vadd.f32 %v11648_v31, %v2414_v30  ;;  %12083 = vmatprep.mubr.f32.mxu0 %v20898_v45  ;;  %v2415_v30 = vadd.f32 %v20902_v23, %v16010_v47  ;;  %12156 = vmatpush3.msra.mxu1 %v5582_v6  ;;  %v20908_v47 = vld [vmem:[#allocation106_spill] sm:$0xff]  ;;  %v5581_v23 = vld [vmem:[#allocation8 + $0xf0] sm:$0xff] }
 0x262   : > { %v2614_v42 = vpop.f32.mrf.mxu0  ;;  %v16361_v14 = vpop.f32.mrf.mxu1  ;;  %12157 = vmatprep.subr.mxu1 %v5581_v23 }
 0x263   : > { %v16365_v17 = vadd.f32 %v2614_v42, %v2413_v4  ;;  %v16368_v46 = vadd.f32 %v16146_v7, %v2820_v12  ;;  %v20904_v7 = vld [vmem:[#allocation105_spill] sm:$0xff]  ;;  %12158 = vmatpush3.msra.mxu1 %v5581_v23  ;;  %v20917_v23 = vld [vmem:[#allocation80_spill] sm:$0xff] }
 0x264   : > { %v11651_v58 = vpop.f32.mrf.mxu0  ;;  %12084 = vmatmul.mubr.f32.gmra.mxu0 %v20900_v62  ;;  %v16371_v22 = vpop.f32.mrf.mxu1  ;;  %v2418_v12 = vadd.f32 %v20904_v7, %v16017_v39  ;;  %v20906_v62 = vld [vmem:[#allocation76_spill] sm:$0xff]  ;;  %v20910_v39 = vld [vmem:[#allocation109_spill] sm:$0xff]  ;;  %v20912_v7 = vld [vmem:[#allocation78_spill] sm:$0xff] }
 0x265   : > { %20901 = vst [vmem:[#allocation36_spill] sm:$0xff] %v16371_v22  ;;  %v2822_v31 = vadd.f32 %v11651_v58, %v2416_v50  ;;  %12086 = vmatprep.mubr.f32.mxu0 %v20903_v11  ;;  %v2417_v50 = vadd.f32 %v20908_v47, %v16024_v26  ;;  %v20909_v58 = vld [vmem:[#allocation77_spill] sm:$0xff]  ;;  %v20914_v47 = vld [vmem:[#allocation79_spill] sm:$0xff] }
 0x266   : > { %v2624_v27 = vpop.f32.mrf.mxu0  ;;  %v16376_v4 = vpop.f32.mrf.mxu1 }
 0x267   : > { %v16380_v45 = vadd.f32 %v2624_v27, %v2415_v30  ;;  %v16383_v42 = vadd.f32 %v16158_v61, %v2822_v31  ;;  %v2420_v61 = vadd.f32 %v20910_v39, %v16029_v2  ;;  %v20915_v2 = vld [vmem:[#allocation115_spill] sm:$0xff] }
 0x268   : > { %v11654_v53 = vpop.f32.mrf.mxu0  ;;  %12087 = vmatmul.mubr.f32.gmra.mxu0 %v20906_v62  ;;  %v16386_v22 = vpop.f32.mrf.mxu1 }
 0x269   : > { %20905 = vst [vmem:[#allocation37_spill] sm:$0xff] %v16380_v45  ;;  %20907 = vst [vmem:[#allocation38_spill] sm:$0xff] %v16386_v22  ;;  %v2824_v6 = vadd.f32 %v11654_v53, %v2418_v12  ;;  %12089 = vmatprep.mubr.f32.mxu0 %v20909_v58  ;;  %v20913_v12 = vld [vmem:[#allocation114_spill] sm:$0xff] }
 0x26a   : > { %v2634_v11 = vpop.f32.mrf.mxu0  ;;  %v16391_v56 = vpop.f32.mrf.mxu1  ;;  %v2419_v53 = vadd.f32 %v20913_v12, %v16034_v13  ;;  %v20919_v13 = vld [vmem:[#allocation118_spill] sm:$0xff] }
 0x26b   : > { %v16395_v30 = vadd.f32 %v2634_v11, %v2417_v50  ;;  %v16398_v31 = vadd.f32 %v16170_v15, %v2824_v6  ;;  %v2422_v50 = vadd.f32 %v20915_v2, %v16041_v1  ;;  %v20921_v1 = vld [vmem:[#allocation123_spill] sm:$0xff]  ;;  %v20925_v2 = vld [vmem:[#allocation124_spill] sm:$0xff] }
 0x26c   : > { %v11657_v27 = vpop.f32.mrf.mxu0  ;;  %12090 = vmatmul.mubr.f32.gmra.mxu0 %v20912_v7  ;;  %v3200_v26 = vpop.f32.mrf.mxu1  ;;  %v20920_v7 = vld [vmem:[#allocation81_spill] sm:$0xff] }
 0x26d   : > { %20911 = vst [vmem:[#allocation39_spill] sm:$0xff] %v16395_v30  ;;  %v2826_v62 = vadd.f32 %v11657_v27, %v2420_v61  ;;  %12092 = vmatprep.mubr.f32.mxu0 %v20914_v47  ;;  %v2421_v61 = vadd.f32 %v20919_v13, %v16048_v25  ;;  %v20352_v30 = vmov 0.0  }
 0x26e   : > { %v2644_v58 = vpop.f32.mrf.mxu0  ;;  %v11963_v22 = vpop.f32.mrf.mxu1  ;;  %5076 = vst [vmem:[#allocation2 + $0x8] sm:$0xff] %v20352_v30  ;;  %12187 = vmatprep.mubr.f32.mxu1 %v20352_v30 }
 0x26f   : > { %v16406_v11 = vadd.f32 %v2644_v58, %v2419_v53  ;;  %v16409_v15 = vadd.f32 %v16182_v57, %v2826_v62  ;;  %v5580_v22 = vld [vmem:[#allocation8 + $0xe8] sm:$0xff]  ;;  %v2424_v57 = vadd.f32 %v20921_v1, %v16055_v52  ;;  %v20927_v52 = vld [vmem:[#allocation127_spill] sm:$0xff] }
 0x270   : > { %v11660_v6 = vpop.f32.mrf.mxu0  ;;  %12093 = vmatmul.mubr.f32.gmra.mxu0 %v20917_v23  ;;  %v16412_v39 = vpop.f32.mrf.mxu1  ;;  %12159 = vmatprep.subr.mxu1 %v5580_v22  ;;  %v20923_v58 = vld [vmem:[#allocation84_spill] sm:$0xff]  ;;  %v20926_v23 = vld [vmem:[#allocation85_spill] sm:$0xff]  ;;  %v20929_v1 = vld [vmem:[#allocation87_spill] sm:$0xff] }
 0x271   : > { %20916 = vst [vmem:[#allocation40_spill] sm:$0xff] %v16406_v11  ;;  %20918 = vst [vmem:[#allocation174_spill] sm:$0xff] %v16412_v39  ;;  %v2828_v27 = vadd.f32 %v11660_v6, %v2422_v50  ;;  %12095 = vmatprep.mubr.f32.mxu0 %v20920_v7  ;;  %12160 = vmatpush3.msra.mxu1 %v5580_v22  ;;  %v2423_v50 = vadd.f32 %v20925_v2, %v16062_v48  ;;  %v5579_v22 = vld [vmem:[#allocation8 + $0xe0] sm:$0xff]  ;;  %v20931_v48 = vld [vmem:[#allocation132_spill] sm:$0xff] }
 0x272   : > { %v2654_v26 = vpop.f32.mrf.mxu0  ;;  %v16417_v12 = vpop.f32.mrf.mxu1  ;;  %12161 = vmatprep.subr.mxu1 %v5579_v22  ;;  %v20932_v2 = vld [vmem:[#allocation88_spill] sm:$0xff]  ;;  %v5577_v39 = vld [vmem:[#allocation8 + $0xd0] sm:$0xff] }
 0x273   : > { %v16421_v53 = vadd.f32 %v2654_v26, %v2421_v61  ;;  %v16424_v62 = vadd.f32 %v16194_v34, %v2828_v27  ;;  %v2426_v61 = vadd.f32 %v20927_v52, %v16069_v21  ;;  %12162 = vmatpush3.msra.mxu1 %v5579_v22 }
 0x274   : > { %v11663_v47 = vpop.f32.mrf.mxu0  ;;  %12096 = vmatmul.mubr.f32.gmra.mxu0 %v20923_v58  ;;  %v16427_v25 = vpop.f32.mrf.mxu1 }
 0x275   : > { %20922 = vst [vmem:[#allocation41_spill] sm:$0xff] %v16421_v53  ;;  %20924 = vst [vmem:[#allocation176_spill] sm:$0xff] %v16427_v25  ;;  %v2830_v6 = vadd.f32 %v11663_v47, %v2424_v57  ;;  %12098 = vmatprep.mubr.f32.mxu0 %v20926_v23  ;;  %v2425_v57 = vadd.f32 %v20931_v48, %v16076_v59  ;;  %v20937_v59 = vld [vmem:[#allocation136_spill] sm:$0xff]  ;;  %v5578_v48 = vld [vmem:[#allocation8 + $0xd8] sm:$0xff] }
 0x276   : > { %v2664_v13 = vpop.f32.mrf.mxu0  ;;  %v16432_v7 = vpop.f32.mrf.mxu1  ;;  %12163 = vmatprep.subr.mxu1 %v5578_v48 }
 0x277   : > { %v16436_v34 = vadd.f32 %v2664_v13, %v2423_v50  ;;  %v16439_v27 = vadd.f32 %v16206_v33, %v2830_v6  ;;  %v20933_v33 = vld [vmem:[#allocation133_spill] sm:$0xff]  ;;  %12164 = vmatpush3.msra.mxu1 %v5578_v48 }
 0x278   : > { %v11666_v26 = vpop.f32.mrf.mxu0  ;;  %12099 = vmatmul.mubr.f32.gmra.mxu0 %v20929_v1  ;;  %v16442_v58 = vpop.f32.mrf.mxu1  ;;  %v2428_v6 = vadd.f32 %v20933_v33, %v16083_v20  ;;  %v20935_v1 = vld [vmem:[#allocation89_spill] sm:$0xff]  ;;  %v20939_v20 = vld [vmem:[#allocation128_spill] sm:$0xff]  ;;  %12165 = vmatprep.subr.mxu1 %v5577_v39 }
 0x279   : > { %20928 = vst [vmem:[#allocation42_spill] sm:$0xff] %v16436_v34  ;;  %20930 = vst [vmem:[#allocation178_spill] sm:$0xff] %v16442_v58  ;;  %v2832_v47 = vadd.f32 %v11666_v26, %v2426_v61  ;;  %12101 = vmatprep.mubr.f32.mxu0 %v20932_v2  ;;  %v2427_v61 = vadd.f32 %v20937_v59, %v16096_v54  ;;  %v20938_v26 = vld [vmem:[#allocation91_spill] sm:$0xff]  ;;  %12166 = vmatpush3.msra.mxu1 %v5577_v39 }
 0x27a   : > { %v2674_v21 = vpop.f32.mrf.mxu0  ;;  %v16447_v50 = vpop.f32.mrf.mxu1 }
 0x27b   : > { %v16451_v23 = vadd.f32 %v2674_v21, %v2425_v57  ;;  %v16454_v13 = vadd.f32 %v16217_v19, %v2832_v47  ;;  %v20940_v57 = vld [vmem:[#allocation141_spill] sm:$0xff] }
 0x27c   : > { %v11669_v52 = vpop.f32.mrf.mxu0  ;;  %12102 = vmatmul.mubr.f32.gmra.mxu0 %v20935_v1  ;;  %v16457_v58 = vpop.f32.mrf.mxu1  ;;  %v2430_v19 = vadd.f32 %v20940_v57, %v20939_v20  ;;  %v20942_v1 = vld [vmem:[#allocation93_spill] sm:$0xff] }
 0x27d   : > { %20934 = vst [vmem:[#allocation43_spill] sm:$0xff] %v16451_v23  ;;  %20936 = vst [vmem:[#allocation180_spill] sm:$0xff] %v16457_v58  ;;  %v2834_v22 = vadd.f32 %v11669_v52, %v2428_v6  ;;  %12104 = vmatprep.mubr.f32.mxu0 %v20938_v26  ;;  %v20944_v6 = vld [vmem:[#allocation130_spill] sm:$0xff]  ;;  %v20946_v58 = vld [vmem:[#allocation95_spill] sm:$0xff] }
 0x27e   : > { %v2684_v2 = vpop.f32.mrf.mxu0  ;;  %v16462_v25 = vpop.f32.mrf.mxu1  ;;  %v20945_v52 = vld [vmem:[#allocation142_spill] sm:$0xff] }
 0x27f   : > { %v16466_v47 = vadd.f32 %v2684_v2, %v2427_v61  ;;  %v16469_v21 = vadd.f32 %v16230_v32, %v2834_v22  ;;  %v2429_v59 = vadd.f32 %v20945_v52, %v20944_v6  ;;  %v20947_v61 = vld [vmem:[#allocation134_spill] sm:$0xff]  ;;  %v20953_v6 = vld [vmem:[#allocation61_spill] sm:$0xff] }
 0x280   : > { %v11672_v33 = vpop.f32.mrf.mxu0  ;;  %12105 = vmatmul.mubr.f32.gmra.mxu0 %v20942_v1  ;;  %v16472_v54 = vpop.f32.mrf.mxu1  ;;  %v20948_v2 = vld [vmem:[#allocation90_spill] sm:$0xff]  ;;  %v20951_v1 = vld [vmem:[#allocation99_spill] sm:$0xff] }
 0x281   : > { %20941 = vst [vmem:[#allocation44_spill] sm:$0xff] %v16466_v47  ;;  %20943 = vst [vmem:[#allocation182_spill] sm:$0xff] %v16472_v54  ;;  %v2836_v26 = vadd.f32 %v11672_v33, %v2430_v19  ;;  %12107 = vmatprep.mubr.f32.mxu0 %v20946_v58  ;;  %v2432_v20 = vadd.f32 %v20948_v2, %v20947_v61  ;;  %v20950_v22 = vld [vmem:[#allocation166_spill] sm:$0xff]  ;;  %v20954_v19 = vld [vmem:[#allocation145_spill] sm:$0xff] }
 0x282   : > { %v2694_v35 = vpop.f32.mrf.mxu0  ;;  %v16477_v24 = vpop.f32.mrf.mxu1  ;;  %v2431_v33 = vadd.f32 %v20954_v19, %v20953_v6  ;;  %v20955_v52 = vld [vmem:[#allocation102_spill] sm:$0xff]  ;;  %v20962_v6 = vld [vmem:[#allocation149_spill] sm:$0xff] }
 0x283   : > { %v16481_v32 = vadd.f32 %v2694_v35, %v2429_v59  ;;  %v16484_v48 = vadd.f32 %v20950_v22, %v2836_v26  ;;  %v20956_v35 = vld [vmem:[#allocation62_spill] sm:$0xff]  ;;  %v20957_v59 = vld [vmem:[#allocation92_spill] sm:$0xff] }
 0x284   : > { %v11675_v57 = vpop.f32.mrf.mxu0  ;;  %12108 = vmatmul.mubr.f32.gmra.mxu0 %v20951_v1  ;;  %v16487_v54 = vpop.f32.mrf.mxu1  ;;  %v2434_v26 = vadd.f32 %v20957_v59, %v20956_v35  ;;  %v20959_v1 = vld [vmem:[#allocation104_spill] sm:$0xff] }
 0x285   : > { %20949 = vst [vmem:[#allocation45_spill] sm:$0xff] %v16481_v32  ;;  %20952 = vst [vmem:[#allocation184_spill] sm:$0xff] %v16487_v54  ;;  %v2838_v58 = vadd.f32 %v11675_v57, %v2432_v20  ;;  %12110 = vmatprep.mubr.f32.mxu0 %v20955_v52  ;;  %v20961_v57 = vld [vmem:[#allocation139_spill] sm:$0xff]  ;;  %v20963_v54 = vld [vmem:[#allocation108_spill] sm:$0xff] }
 0x286   : > { %v2704_v47 = vpop.f32.mrf.mxu0  ;;  %v16492_v23 = vpop.f32.mrf.mxu1  ;;  %v2433_v19 = vadd.f32 %v20962_v6, %v20961_v57  ;;  %v20971_v6 = vld [vmem:[#allocation113_spill] sm:$0xff] }
 0x287   : > { %v16496_v61 = vadd.f32 %v2704_v47, %v2431_v33  ;;  %v16499_v2 = vadd.f32 %v16253_v37, %v2838_v58  ;;  %v20964_v47 = vld [vmem:[#allocation143_spill] sm:$0xff]  ;;  %v20965_v33 = vld [vmem:[#allocation94_spill] sm:$0xff]  ;;  %v5576_v58 = vld [vmem:[#allocation8 + $0xc8] sm:$0xff] }
 0x288   : > { %v11678_v22 = vpop.f32.mrf.mxu0  ;;  %12111 = vmatmul.mubr.f32.gmra.mxu0 %v20959_v1  ;;  %v16502_v20 = vpop.f32.mrf.mxu1  ;;  %v2436_v35 = vadd.f32 %v20965_v33, %v20964_v47  ;;  %v20967_v1 = vld [vmem:[#allocation111_spill] sm:$0xff]  ;;  %12167 = vmatprep.subr.mxu1 %v5576_v58 }
 0x289   : > { %20958 = vst [vmem:[#allocation46_spill] sm:$0xff] %v16496_v61  ;;  %20960 = vst [vmem:[#allocation186_spill] sm:$0xff] %v16502_v20  ;;  %v2840_v52 = vadd.f32 %v11678_v22, %v2434_v26  ;;  %12113 = vmatprep.mubr.f32.mxu0 %v20963_v54  ;;  %v20969_v26 = vld [vmem:[#allocation64_spill] sm:$0xff]  ;;  %v20970_v54 = vld [vmem:[#allocation98_spill] sm:$0xff]  ;;  %12168 = vmatpush3.msra.mxu1 %v5576_v58 }
 0x28a   : > { %v2714_v32 = vpop.f32.mrf.mxu0  ;;  %v16507_v34 = vpop.f32.mrf.mxu1  ;;  %v2435_v22 = vadd.f32 %v20970_v54, %v20969_v26  ;;  %v20979_v54 = vld [vmem:[#allocation120_spill] sm:$0xff] }
 0x28b   : > { %v16511_v37 = vadd.f32 %v2714_v32, %v2433_v19  ;;  %v16514_v39 = vadd.f32 %v16271_v10, %v2840_v52  ;;  %v20972_v19 = vld [vmem:[#allocation146_spill] sm:$0xff]  ;;  %v20973_v10 = vld [vmem:[#allocation153_spill] sm:$0xff] }
 0x28c   : > { %v11681_v59 = vpop.f32.mrf.mxu0  ;;  %12114 = vmatmul.mubr.f32.gmra.mxu0 %v20967_v1  ;;  %v16517_v20 = vpop.f32.mrf.mxu1  ;;  %v2438_v52 = vadd.f32 %v20973_v10, %v20972_v19  ;;  %v20980_v19 = vld [vmem:[#allocation67_spill] sm:$0xff] }
 0x28d   : > { %20966 = vst [vmem:[#allocation47_spill] sm:$0xff] %v16511_v37  ;;  %20968 = vst [vmem:[#allocation190_spill] sm:$0xff] %v16517_v20  ;;  %v2842_v57 = vadd.f32 %v11681_v59, %v2436_v35  ;;  %12116 = vmatprep.mubr.f32.mxu0 %v20971_v6  ;;  %v20975_v37 = vld [vmem:[#allocation117_spill] sm:$0xff]  ;;  %v20977_v35 = vld [vmem:[#allocation66_spill] sm:$0xff] }
 0x28e   : > { %v2724_v47 = vpop.f32.mrf.mxu0  ;;  %v16522_v32 = vpop.f32.mrf.mxu1  ;;  %v20978_v59 = vld [vmem:[#allocation101_spill] sm:$0xff] }
 0x28f   : > { %v16526_v33 = vadd.f32 %v2724_v47, %v2435_v22  ;;  %v16529_v1 = vadd.f32 %v16288_v63, %v2842_v57  ;;  %v2437_v26 = vadd.f32 %v20978_v59, %v20977_v35  ;;  %v20981_v22 = vld [vmem:[#allocation158_spill] sm:$0xff] }
 0x290   : > { %v11684_v20 = vpop.f32.mrf.mxu0  ;;  %12117 = vmatmul.mubr.f32.gmra.mxu0 %v20975_v37  ;;  %v16532_v61 = vpop.f32.mrf.mxu1  ;;  %v2440_v47 = vadd.f32 %v20981_v22, %v20980_v19  ;;  %v5575_v37 = vld [vmem:[#allocation8 + $0xc0] sm:$0xff] }
 0x291   : > { %20974 = vst [vmem:[#allocation48_spill] sm:$0xff] %v16526_v33  ;;  %20976 = vst [vmem:[#allocation192_spill] sm:$0xff] %v16532_v61  ;;  %v2844_v58 = vadd.f32 %v11684_v20, %v2438_v52  ;;  %12119 = vmatprep.mubr.f32.mxu0 %v20979_v54  ;;  %v20983_v61 = vld [vmem:[#allocation122_spill] sm:$0xff]  ;;  %12169 = vmatprep.subr.mxu1 %v5575_v37  ;;  %v20985_v20 = vld [vmem:[#allocation151_spill] sm:$0xff] }
 0x292   : > { %v2734_v6 = vpop.f32.mrf.mxu0  ;;  %v16537_v53 = vpop.f32.mrf.mxu1  ;;  %v20986_v52 = vld [vmem:[#allocation103_spill] sm:$0xff]  ;;  %v20987_v54 = vld [vmem:[#allocation126_spill] sm:$0xff]  ;;  %12170 = vmatpush3.msra.mxu1 %v5575_v37 }
 0x293   : > { %v16541_v10 = vadd.f32 %v2734_v6, %v2437_v26  ;;  %v16544_v63 = vadd.f32 %v16302_v49, %v2844_v58  ;;  %v2439_v35 = vadd.f32 %v20986_v52, %v20985_v20  ;;  %v20988_v6 = vld [vmem:[#allocation155_spill] sm:$0xff] }
 0x294   : > { %v11687_v57 = vpop.f32.mrf.mxu0  ;;  %12120 = vmatmul.mubr.f32.gmra.mxu0 %v20983_v61  ;;  %v16547_v33 = vpop.f32.mrf.mxu1  ;;  %v20989_v49 = vld [vmem:[#allocation159_spill] sm:$0xff] }
 0x295   : > { %20982 = vst [vmem:[#allocation49_spill] sm:$0xff] %v16541_v10  ;;  %20984 = vst [vmem:[#allocation195_spill] sm:$0xff] %v16547_v33  ;;  %v2846_v59 = vadd.f32 %v11687_v57, %v2440_v47  ;;  %12122 = vmatprep.mubr.f32.mxu0 %v20987_v54  ;;  %v2442_v58 = vadd.f32 %v20989_v49, %v20988_v6  ;;  %v20991_v10 = vld [vmem:[#allocation129_spill] sm:$0xff]  ;;  %v5574_v47 = vld [vmem:[#allocation8 + $0xb8] sm:$0xff] }
 0x296   : > { %v2744_v19 = vpop.f32.mrf.mxu0  ;;  %v16552_v26 = vpop.f32.mrf.mxu1  ;;  %v20993_v57 = vld [vmem:[#allocation69_spill] sm:$0xff]  ;;  %v20994_v20 = vld [vmem:[#allocation107_spill] sm:$0xff]  ;;  %12171 = vmatprep.subr.mxu1 %v5574_v47 }
 0x297   : > { %v16556_v22 = vadd.f32 %v2744_v19, %v2439_v35  ;;  %v16559_v61 = vadd.f32 %v16316_v16, %v2846_v59  ;;  %v2441_v37 = vadd.f32 %v20994_v20, %v20993_v57  ;;  %v20995_v54 = vld [vmem:[#allocation131_spill] sm:$0xff]  ;;  %12172 = vmatpush3.msra.mxu1 %v5574_v47  ;;  %v21001_v20 = vld [vmem:[#allocation20_spill] sm:$0xff]  ;;  %v21003_v47 = vld [vmem:[#allocation138_spill] sm:$0xff] }
 0x298   : > { %v11690_v33 = vpop.f32.mrf.mxu0  ;;  %12123 = vmatmul.mubr.f32.gmra.mxu0 %v20991_v10  ;;  %v16562_v11 = vpop.f32.mrf.mxu1  ;;  %v20996_v16 = vld [vmem:[#allocation19_spill] sm:$0xff]  ;;  %v20997_v10 = vld [vmem:[#allocation110_spill] sm:$0xff] }
 0x299   : > { %20990 = vst [vmem:[#allocation50_spill] sm:$0xff] %v16556_v22  ;;  %20992 = vst [vmem:[#allocation51_spill] sm:$0xff] %v16562_v11  ;;  %v2848_v52 = vadd.f32 %v11690_v33, %v2442_v58  ;;  %12125 = vmatprep.mubr.f32.mxu0 %v20995_v54  ;;  %v2444_v59 = vadd.f32 %v20997_v10, %v20996_v16  ;;  %v20999_v58 = vld [vmem:[#allocation135_spill] sm:$0xff]  ;;  %v21002_v54 = vld [vmem:[#allocation112_spill] sm:$0xff] }
 0x29a   : > { %v2754_v35 = vpop.f32.mrf.mxu0  ;;  %v16568_v19 = vpop.f32.mrf.mxu1  ;;  %v2443_v11 = vadd.f32 %v21002_v54, %v21001_v20  ;;  %v21004_v16 = vld [vmem:[#allocation22_spill] sm:$0xff] }
 0x29b   : > { %v16573_v6 = vadd.f32 %v2754_v35, %v2441_v37  ;;  %v16576_v49 = vadd.f32 %v16331_v41, %v2848_v52  ;;  %v21005_v37 = vld [vmem:[#allocation116_spill] sm:$0xff] }
 0x29c   : > { %v11693_v33 = vpop.f32.mrf.mxu0  ;;  %12126 = vmatmul.mubr.f32.gmra.mxu0 %v20999_v58  ;;  %v16579_v57 = vpop.f32.mrf.mxu1  ;;  %v2446_v35 = vadd.f32 %v21005_v37, %v21004_v16  ;;  %v21007_v58 = vld [vmem:[#allocation140_spill] sm:$0xff]  ;;  %v21014_v16 = vld [vmem:[#allocation165_spill] sm:$0xff]  ;;  %v21015_v37 = vld [vmem:[#allocation119_spill] sm:$0xff] }
 0x29d   : > { %20998 = vst [vmem:[#allocation172_spill] sm:$0xff] %v16573_v6  ;;  %21000 = vst [vmem:[#allocation52_spill] sm:$0xff] %v16579_v57  ;;  %v2850_v22 = vadd.f32 %v11693_v33, %v2444_v59  ;;  %12128 = vmatprep.mubr.f32.mxu0 %v21003_v47  ;;  %v21009_v59 = vld [vmem:[#allocation144_spill] sm:$0xff]  ;;  %v21010_v47 = vld [vmem:[#allocation23_spill] sm:$0xff] }
 0x29e   : > { %v2764_v30 = vpop.f32.mrf.mxu0  ;;  %v16584_v45 = vpop.f32.mrf.mxu1 }
 0x29f   : > { %v16588_v10 = vadd.f32 %v2764_v30, %v2443_v11  ;;  %v16591_v41 = vadd.f32 %v16346_v5, %v2850_v22  ;;  %v21012_v5 = vld [vmem:[#allocation147_spill] sm:$0xff] }
 0x2a0   : > { %v11696_v52 = vpop.f32.mrf.mxu0  ;;  %12129 = vmatmul.mubr.f32.gmra.mxu0 %v21007_v58  ;;  %v16594_v57 = vpop.f32.mrf.mxu1  ;;  %v2447_v58 = vadd.f32 %v21015_v37, %v21014_v16  ;;  %v21022_v16 = vld [vmem:[#allocation154_spill] sm:$0xff] }
 0x2a1   : > { %21006 = vst [vmem:[#allocation173_spill] sm:$0xff] %v16588_v10  ;;  %21008 = vst [vmem:[#allocation53_spill] sm:$0xff] %v16594_v57  ;;  %v2852_v20 = vadd.f32 %v11696_v52, %v2446_v35  ;;  %12131 = vmatprep.mubr.f32.mxu0 %v21009_v59  ;;  %v21016_v35 = vld [vmem:[#allocation26_spill] sm:$0xff]  ;;  %v21017_v59 = vld [vmem:[#allocation148_spill] sm:$0xff] }
 0x2a2   : > { %v2774_v33 = vpop.f32.mrf.mxu0  ;;  %v16597_v54 = vpop.f32.mrf.mxu1 }
 0x2a3   : > { %v16600_v6 = vadd.f32 %v2774_v33, %v21010_v47  ;;  %v16603_v30 = vadd.f32 %v16361_v14, %v2852_v20  ;;  %v21019_v47 = vld [vmem:[#allocation152_spill] sm:$0xff] }
 0x2a4   : > { %v11699_v11 = vpop.f32.mrf.mxu0  ;;  %12132 = vmatmul.mubr.f32.gmra.mxu0 %v21012_v5  ;;  %v16606_v22 = vpop.f32.mrf.mxu1 }
 0x2a5   : > { %21011 = vst [vmem:[#allocation175_spill] sm:$0xff] %v16600_v6  ;;  %21013 = vst [vmem:[#allocation54_spill] sm:$0xff] %v16606_v22  ;;  %v2854_v52 = vadd.f32 %v11699_v11, %v21016_v35  ;;  %12134 = vmatprep.mubr.f32.mxu0 %v21017_v59  ;;  %v21021_v22 = vld [vmem:[#allocation29_spill] sm:$0xff]  ;;  %v6209_v59 = vld [vmem:[#allocation8 + $0x178] sm:$0xff] }
 0x2a6   : > { %v2784_v57 = vpop.f32.mrf.mxu0  ;;  %v16612_v10 = vpop.f32.mrf.mxu1  ;;  %12363 = vmatprep.subr.mxu0 %v6209_v59 }
 0x2a7   : > { %v16614_v33 = vadd.f32 %v2784_v57, %v2447_v58  ;;  %v16617_v14 = vadd.f32 %v16376_v4, %v2854_v52  ;;  %v21023_v58 = vld [vmem:[#allocation157_spill] sm:$0xff]  ;;  %v21025_v52 = vld [vmem:[#allocation160_spill] sm:$0xff]  ;;  %12364 = vmatpush3.msra.mxu0 %v6209_v59 }
 0x2a8   : > { %v11702_v20 = vpop.f32.mrf.mxu0  ;;  %12135 = vmatmul.mubr.f32.gmra.mxu0 %v21019_v47  ;;  %v16620_v5 = vpop.f32.mrf.mxu1 }
 0x2a9   : > { %21018 = vst [vmem:[#allocation177_spill] sm:$0xff] %v16614_v33  ;;  %21020 = vst [vmem:[#allocation55_spill] sm:$0xff] %v16620_v5  ;;  %v2856_v6 = vadd.f32 %v11702_v20, %v21021_v22  ;;  %12137 = vmatprep.mubr.f32.mxu0 %v21022_v16  ;;  %v6208_v22 = vld [vmem:[#allocation8 + $0x170] sm:$0xff]  ;;  %v6206_v33 = vld [vmem:[#allocation8 + $0x160] sm:$0xff] }
 0x2aa   : > { %v2794_v11 = vpop.f32.mrf.mxu0  ;;  %v16624_v37 = vpop.f32.mrf.mxu1  ;;  %v21026_v16 = vld [vmem:[#allocation161_spill] sm:$0xff]  ;;  %12365 = vmatprep.subr.mxu0 %v6208_v22 }
 0x2ab   : > { %v16627_v35 = vadd.f32 %v16391_v56, %v2856_v6  ;;  %v21028_v11 = vld [vmem:[#allocation162_spill] sm:$0xff]  ;;  %12366 = vmatpush3.msra.mxu0 %v6208_v22  ;;  %v831_v22 = vrot.slane %v16087_v18, 1  ;;  %v6204_v18 = vld [vmem:[#allocation8 + $0x150] sm:$0xff] }
 0x2ac   : > { %v11850_v57 = vpop.f32.mrf.mxu0  ;;  %12138 = vmatmul.mubr.f32.gmra.mxu0 %v21023_v58  ;;  %v16630_v4 = vpop.f32.mrf.mxu1 }
 0x2ad   : > { %21024 = vst [vmem:[#allocation179_spill] sm:$0xff] %v16630_v4  ;;  %12140 = vmatprep.mubr.f32.mxu0 %v21025_v52  ;;  %v6207_v57 = vld [vmem:[#allocation8 + $0x168] sm:$0xff] }
 0x2ae   : > { %v16633_v47 = vpop.f32.mrf.mxu0  ;;  %v16635_v5 = vpop.f32.mrf.mxu1  ;;  %12367 = vmatprep.subr.mxu0 %v6207_v57 }
 0x2af   : > { %12368 = vmatpush3.msra.mxu0 %v6207_v57 }
 0x2b0   : > { %v11853_v20 = vpop.f32.mrf.mxu0  ;;  %12141 = vmatmul.mubr.f32.gmra.mxu0 %v21026_v16  ;;  %v16638_v56 = vpop.f32.mrf.mxu1  ;;  %v21031_v16 = vld [vmem:[#allocation164_spill] sm:$0xff]  ;;  %12369 = vmatprep.subr.mxu0 %v6206_v33 }
 0x2b1   : > { %21027 = vst [vmem:[#allocation82_spill] sm:$0xff] %v16638_v56  ;;  %v3618_v6 = vadd.f32 %v11853_v20, %v16260_v60  ;;  %12143 = vmatprep.mubr.f32.mxu0 %v21028_v11  ;;  %v21033_v20 = vld [vmem:[#allocation187_spill] sm:$0xff]  ;;  %v832_v11 = vrot.slane %v16093_v8, 1  ;;  %12370 = vmatpush3.msra.mxu0 %v6206_v33 }
 0x2b2   : > { %v16642_v58 = vpop.f32.mrf.mxu0  ;;  %v16644_v52 = vpop.f32.mrf.mxu1 }
 0x2b3   : > { %21029 = vst [vmem:[#allocation181_spill] sm:$0xff] %v16642_v58  ;;  %v16647_v59 = vadd.f32 %v16417_v12, %v3618_v6  ;;  %v21035_v12 = vld [vmem:[#allocation59_spill] sm:$0xff] }
 0x2b4   : > { %v11856_v4 = vpop.f32.mrf.mxu0  ;;  %12144 = vmatmul.mubr.f32.gmra.mxu0 %v21031_v16  ;;  %v16650_v56 = vpop.f32.mrf.mxu1  ;;  %v834_v6 = vrot.slane %v21035_v12, 1  ;;  %v6205_v16 = vld [vmem:[#allocation8 + $0x158] sm:$0xff]  ;;  %v833_v12 = vsel %vm735_vm1, %v831_v22, %v832_v11 }
 0x2b5   : > { %21030 = vst [vmem:[#allocation83_spill] sm:$0xff] %v16647_v59  ;;  %21032 = vst [vmem:[#allocation183_spill] sm:$0xff] %v16650_v56  ;;  %v3620_v60 = vadd.f32 %v11856_v4, %v16278_v9  ;;  %12146 = vmatprep.mubr.f32.mxu0 %v21033_v20  ;;  %12371 = vmatprep.subr.mxu0 %v6205_v16  ;;  %v21037_v4 = vld [vmem:[#allocation189_spill] sm:$0xff] }
 0x2b6   : > { %v16656_v58 = vpop.f32.mrf.mxu0  ;;  %v16659_v57 = vpop.f32.mrf.mxu1  ;;  %v21039_v59 = vld [vmem:[#allocation193_spill] sm:$0xff]  ;;  %12372 = vmatpush3.msra.mxu0 %v6205_v16  ;;  %v835_v33 = vsel %vm735_vm1, %v832_v11, %v834_v6  ;;  %v935_v16 = vsel %vm735_vm1, %v834_v6, %v831_v22 }
 0x2b7   : > { %21034 = vst [vmem:[#allocation86_spill] sm:$0xff] %v16656_v58  ;;  %v16662_v56 = vadd.f32 %v16432_v7, %v3620_v60  ;;  %12373 = vmatprep.subr.mxu0 %v6204_v18 }
 0x2b8   : > { %v11859_v9 = vpop.f32.mrf.mxu0  ;;  %12147 = vmatmul.mubr.f32.gmra.mxu0 %v21037_v4  ;;  %v16665_v20 = vpop.f32.mrf.mxu1  ;;  %v5573_v4 = vld [vmem:[#allocation8 + $0xb0] sm:$0xff] }
 0x2b9   : > { %21036 = vst [vmem:[#allocation185_spill] sm:$0xff] %v16662_v56  ;;  %21038 = vst [vmem:[#allocation188_spill] sm:$0xff] %v16665_v20  ;;  %v3622_v8 = vadd.f32 %v11859_v9, %v16295_v51  ;;  %12149 = vmatprep.mubr.f32.mxu0 %v21039_v59  ;;  %12374 = vmatpush3.msra.mxu0 %v6204_v18  ;;  %v6203_v20 = vld [vmem:[#allocation8 + $0x148] sm:$0xff] }
 0x2ba   : > { %v16670_v58 = vpop.f32.mrf.mxu0  ;;  %v16673_v7 = vpop.f32.mrf.mxu1  ;;  %12173 = vmatprep.subr.mxu1 %v5573_v4  ;;  %12375 = vmatprep.subr.mxu0 %v6203_v20 }
 0x2bb   : > { %v16676_v60 = vadd.f32 %v16447_v50, %v3622_v8  ;;  %12174 = vmatpush3.msra.mxu1 %v5573_v4  ;;  %v5572_v50 = vld [vmem:[#allocation8 + $0xa8] sm:$0xff]  ;;  %v6202_v8 = vld [vmem:[#allocation8 + $0x140] sm:$0xff]  ;;  %12376 = vmatpush3.msra.mxu0 %v6203_v20  ;;  %v6200_v4 = vld [vmem:[#allocation8 + $0x130] sm:$0xff] }
 0x2bc   : > { %v11862_v56 = vpop.f32.mrf.mxu0  ;;  %12150 = vmatmul.mubr.f32.gmra.mxu0 %v833_v12  ;;  %v16678_v51 = vpop.f32.mrf.mxu1  ;;  %12175 = vmatprep.subr.mxu1 %v5572_v50 }
 0x2bd   : > { %21040 = vst [vmem:[#allocation191_spill] sm:$0xff] %v16678_v51  ;;  %v3624_v59 = vadd.f32 %v11862_v56, %v16309_v0  ;;  %12152 = vmatprep.mubr.f32.mxu0 %v835_v33  ;;  %12176 = vmatpush3.msra.mxu1 %v5572_v50  ;;  %v5571_v0 = vld [vmem:[#allocation8 + $0xa0] sm:$0xff]  ;;  %v6201_v56 = vld [vmem:[#allocation8 + $0x138] sm:$0xff] }
 0x2be   : > { %v16682_v11 = vpop.f32.mrf.mxu0  ;;  %v16684_v9 = vpop.f32.mrf.mxu1  ;;  %12177 = vmatprep.subr.mxu1 %v5571_v0  ;;  %12377 = vmatprep.subr.mxu0 %v6202_v8 }
 0x2bf   : > { %v16687_v18 = vadd.f32 %v16462_v25, %v3624_v59  ;;  %12178 = vmatpush3.msra.mxu1 %v5571_v0  ;;  %v5570_v25 = vld [vmem:[#allocation8 + $0x98] sm:$0xff]  ;;  %12378 = vmatpush3.msra.mxu0 %v6202_v8 }
 0x2c0   : > { %v11865_v12 = vpop.f32.mrf.mxu0  ;;  %12153 = vmatmul.mubr.f32.gmra.mxu0 %v935_v16  ;;  %v16689_v51 = vpop.f32.mrf.mxu1  ;;  %12179 = vmatprep.subr.mxu1 %v5570_v25 }
 0x2c1   : > { %21041 = vst [vmem:[#allocation194_spill] sm:$0xff] %v16689_v51  ;;  %v3626_v22 = vadd.f32 %v11865_v12, %v16323_v36  ;;  %12379 = vmatprep.subr.mxu0 %v6201_v56  ;;  %12180 = vmatpush3.msra.mxu1 %v5570_v25  ;;  %v6199_v36 = vld [vmem:[#allocation8 + $0x128] sm:$0xff]  ;;  %v5569_v12 = vld [vmem:[#allocation8 + $0x90] sm:$0xff] }
 0x2c2   : > { %v16692_v6 = vpop.f32.mrf.mxu0  ;;  %v16694_v33 = vpop.f32.mrf.mxu1  ;;  %12380 = vmatpush3.msra.mxu0 %v6201_v56  ;;  %12181 = vmatprep.subr.mxu1 %v5569_v12  ;;  %v5568_v56 = vld [vmem:[#allocation8 + $0x88] sm:$0xff] }
 0x2c3   : > { %v16697_v20 = vadd.f32 %v16477_v24, %v3626_v22  ;;  %12381 = vmatprep.subr.mxu0 %v6200_v4  ;;  %v6198_v24 = vld [vmem:[#allocation8 + $0x120] sm:$0xff]  ;;  %12182 = vmatpush3.msra.mxu1 %v5569_v12 }
 0x2c4   : > { %v11868_v59 = vpop.f32.mrf.mxu0  ;;  %v16699_v16 = vpop.f32.mrf.mxu1  ;;  %12382 = vmatpush3.msra.mxu0 %v6200_v4  ;;  %12183 = vmatprep.subr.mxu1 %v5568_v56  ;;  %v5567_v4 = vld [vmem:[#allocation8 + $0x80] sm:$0xff] }
 0x2c5   : > { %21042 = vst [vmem:[#allocation24_spill] sm:$0xff] %v16697_v20  ;;  %21043 = vst [vmem:[#allocation196_spill] sm:$0xff] %v16699_v16  ;;  %v3628_v50 = vadd.f32 %v11868_v59, %v16338_v40  ;;  %12383 = vmatprep.subr.mxu0 %v6199_v36  ;;  %v6197_v40 = vld [vmem:[#allocation8 + $0x118] sm:$0xff]  ;;  %12184 = vmatpush3.msra.mxu1 %v5568_v56 }
 0x2c6   : > { %v16702_v51 = vpop.f32.mrf.mxu0  ;;  %v16704_v0 = vpop.f32.mrf.mxu1  ;;  %12384 = vmatpush3.msra.mxu0 %v6199_v36  ;;  %12185 = vmatprep.subr.mxu1 %v5567_v4 }
 0x2c7   : > { %v16707_v8 = vadd.f32 %v16492_v23, %v3628_v50  ;;  %12385 = vmatprep.subr.mxu0 %v6198_v24  ;;  %v6196_v23 = vld [vmem:[#allocation8 + $0x110] sm:$0xff]  ;;  %12186 = vmatpush3.msra.mxu1 %v5567_v4 }
 0x2c8   : > { %v11871_v22 = vpop.f32.mrf.mxu0  ;;  %v16709_v25 = vpop.f32.mrf.mxu1  ;;  %12386 = vmatpush3.msra.mxu0 %v6198_v24 }
 0x2c9   : > { %21044 = vst [vmem:[#allocation25_spill] sm:$0xff] %v16707_v8  ;;  %21045 = vst [vmem:[#allocation197_spill] sm:$0xff] %v16709_v25  ;;  %v3630_v59 = vadd.f32 %v11871_v22, %v16353_v29  ;;  %12387 = vmatprep.subr.mxu0 %v6197_v40  ;;  %v6195_v29 = vld [vmem:[#allocation8 + $0x108] sm:$0xff]  ;;  %v21048_v25 = vmov 0.0  }
 0x2ca   : > { %v16712_v16 = vpop.f32.mrf.mxu0  ;;  %v16714_v20 = vpop.f32.mrf.mxu1  ;;  %12388 = vmatpush3.msra.mxu0 %v6197_v40  ;;  %12188 = vmatmul.mubr.f32.vlgmr.msra.gmra.mxu1 %v21048_v25 }
 0x2cb   : > { %v16717_v50 = vadd.f32 %v16507_v34, %v3630_v59  ;;  %12389 = vmatprep.subr.mxu0 %v6196_v23  ;;  %12190 = vmatprep.mubr.f32.mxu1 %v21048_v25 }
 0x2cc   : > { %v11874_v12 = vpop.f32.mrf.mxu0  ;;  %v16719_v36 = vpop.f32.mrf.mxu1  ;;  %12390 = vmatpush3.msra.mxu0 %v6196_v23  ;;  %v5370_v23 = vrot.slane %v21048_v25, 1 }
 0x2cd   : > { %21046 = vst [vmem:[#allocation28_spill] sm:$0xff] %v16717_v50  ;;  %21047 = vst [vmem:[#allocation198_spill] sm:$0xff] %v16719_v36  ;;  %v3632_v22 = vadd.f32 %v11874_v12, %v16368_v46  ;;  %12391 = vmatprep.subr.mxu0 %v6195_v29  ;;  %v6194_v36 = vld [vmem:[#allocation8 + $0x100] sm:$0xff] }
 0x2ce   : > { %v16723_v56 = vpop.f32.mrf.mxu0  ;;  %v16725_v24 = vpop.f32.mrf.mxu1  ;;  %12392 = vmatpush3.msra.mxu0 %v6195_v29  ;;  %12395 = vmatprep.mubr.f32.mxu0 %v5370_v23 }
 0x2cf   : > { %v16729_v34 = vadd.f32 %v16522_v32, %v3632_v22  ;;  %12393 = vmatprep.subr.mxu0 %v6194_v36 }
 0x2d0   : > { %v11877_v59 = vpop.f32.mrf.mxu0  ;;  %v16731_v4 = vpop.f32.mrf.mxu1  ;;  %12394 = vmatpush3.msra.mxu0 %v6194_v36 }
 0x2d1   : > { %21049 = vst [vmem:[#allocation70_spill] sm:$0xff] %v16729_v34  ;;  %21050 = vst [vmem:[#allocation199_spill] sm:$0xff] %v16731_v4  ;;  %v3634_v46 = vadd.f32 %v11877_v59, %v16383_v42  ;;  %12396 = vmatmul.mubr.f32.vlgmr.msra.gmra.mxu0 %v5370_v23 }
 0x2d2   : > { %v16734_v40 = vpop.f32.mrf.mxu0  ;;  %v16736_v12 = vpop.f32.mrf.mxu1  ;;  %12398 = vmatprep.mubr.f32.mxu0 %v5370_v23 }
 0x2d3   : > { %v16739_v50 = vadd.f32 %v16537_v53, %v3634_v46 }
 0x2d4   : > { %v11880_v32 = vpop.f32.mrf.mxu0  ;;  %v16742_v22 = vpop.f32.mrf.mxu1 }
 0x2d5   : > { %21051 = vst [vmem:[#allocation71_spill] sm:$0xff] %v16742_v22  ;;  %v3636_v4 = vadd.f32 %v11880_v32, %v16398_v31 }
 0x2d6   : > { %v16745_v29 = vpop.f32.mrf.mxu0  ;;  %v16747_v42 = vpop.f32.mrf.mxu1 }
 0x2d7   : > { %v16750_v59 = vadd.f32 %v16552_v26, %v3636_v4 }
 0x2d8   : > { %v11883_v34 = vpop.f32.mrf.mxu0  ;;  %v4012_v8 = vpop.f32.mrf.mxu1 }
 0x2d9   : > { %21052 = vst [vmem:[#allocation200_spill] sm:$0xff] %v16750_v59  ;;  %v3638_v53 = vadd.f32 %v11883_v34, %v16409_v15  ;;  %v21113_v59 = vld [vmem:[#allocation173_spill] sm:$0xff] }
 0x2da   : > { %v16753_v25 = vpop.f32.mrf.mxu0 }
 0x2db   : > { %v16756_v36 = vadd.f32 %v16568_v19, %v3638_v53 }
 0x2dc   : > { %v11886_v31 = vpop.f32.mrf.mxu0 }
 0x2dd   : > { %21053 = vst [vmem:[#allocation72_spill] sm:$0xff] %v16756_v36  ;;  %v3640_v46 = vadd.f32 %v11886_v31, %v16424_v62 }
 0x2de   : > { %v16759_v32 = vpop.f32.mrf.mxu0 }
 0x2df   : > { %v16762_v26 = vadd.f32 %v16584_v45, %v3640_v46 }
 0x2e0   : > { %v11889_v4 = vpop.f32.mrf.mxu0 }
 0x2e1   : > { %21054 = vst [vmem:[#allocation96_spill] sm:$0xff] %v16762_v26  ;;  %v3642_v8 = vadd.f32 %v11889_v4, %v16439_v27 }
 0x2e2   : > { %v16765_v22 = vpop.f32.mrf.mxu0 }
 0x2e3   : > { %v16768_v15 = vadd.f32 %v16597_v54, %v3642_v8 }
 0x2e4   : > { %v11892_v34 = vpop.f32.mrf.mxu0 }
 0x2e5   : > { %21055 = vst [vmem:[#allocation73_spill] sm:$0xff] %v16768_v15  ;;  %v3644_v19 = vadd.f32 %v11892_v34, %v16454_v13  ;;  %v21112_v15 = vld [vmem:[#allocation35_spill] sm:$0xff] }
 0x2e6   : > { %v16771_v23 = vpop.f32.mrf.mxu0 }
 0x2e7   : > { %v16774_v62 = vadd.f32 %v16612_v10, %v3644_v19 }
 0x2e8   : > { %v11895_v53 = vpop.f32.mrf.mxu0 }
 0x2e9   : > { %21056 = vst [vmem:[#allocation97_spill] sm:$0xff] %v16774_v62  ;;  %v3646_v45 = vadd.f32 %v11895_v53, %v16469_v21  ;;  %v21109_v62 = vld [vmem:[#allocation170_spill] sm:$0xff] }
 0x2ea   : > { %v16777_v31 = vpop.f32.mrf.mxu0 }
 0x2eb   : > { %v16780_v27 = vadd.f32 %v16624_v37, %v3646_v45 }
 0x2ec   : > { %v11898_v46 = vpop.f32.mrf.mxu0 }
 0x2ed   : > { %21057 = vst [vmem:[#allocation74_spill] sm:$0xff] %v16780_v27  ;;  %v3648_v54 = vadd.f32 %v11898_v46, %v16484_v48  ;;  %v5565_v46 = vld [vmem:[#allocation8 + $0x78] sm:$0xff] }
 0x2ee   : > { %v16783_v4 = vpop.f32.mrf.mxu0  ;;  %12259 = vmatprep.subr.mxu1 %v5565_v46  ;;  %v21108_v27 = vld [vmem:[#allocation50_spill] sm:$0xff] }
 0x2ef   : > { %v16786_v13 = vadd.f32 %v16635_v5, %v3648_v54  ;;  %12260 = vmatpush3.msra.mxu1 %v5565_v46 }
 0x2f0   : > { %v11901_v8 = vpop.f32.mrf.mxu0 }
 0x2f1   : > { %21058 = vst [vmem:[#allocation100_spill] sm:$0xff] %v16786_v13  ;;  %v3650_v10 = vadd.f32 %v11901_v8, %v16499_v2  ;;  %v21106_v13 = vld [vmem:[#allocation49_spill] sm:$0xff] }
 0x2f2   : > { %v16789_v34 = vpop.f32.mrf.mxu0 }
 0x2f3   : > { %v16792_v21 = vadd.f32 %v16644_v52, %v3650_v10 }
 0x2f4   : > { %v11904_v19 = vpop.f32.mrf.mxu0 }
 0x2f5   : > { %21059 = vst [vmem:[#allocation75_spill] sm:$0xff] %v16792_v21  ;;  %v3652_v37 = vadd.f32 %v11904_v19, %v16514_v39  ;;  %v5564_v19 = vld [vmem:[#allocation8 + $0x70] sm:$0xff] }
 0x2f6   : > { %v16795_v53 = vpop.f32.mrf.mxu0  ;;  %12261 = vmatprep.subr.mxu1 %v5564_v19 }
 0x2f7   : > { %v16798_v48 = vadd.f32 %v16659_v57, %v3652_v37  ;;  %12262 = vmatpush3.msra.mxu1 %v5564_v19 }
 0x2f8   : > { %v11907_v45 = vpop.f32.mrf.mxu0 }
 0x2f9   : > { %21060 = vst [vmem:[#allocation105_spill] sm:$0xff] %v16798_v48  ;;  %v3654_v5 = vadd.f32 %v11907_v45, %v16529_v1  ;;  %v16920_v48 = vld [vmem:[%s16872_s15] ss:$0 sm:$0xff] }
 0x2fa   : > { %v16801_v54 = vpop.f32.mrf.mxu0 }
 0x2fb   : > { %v16804_v2 = vadd.f32 %v16673_v7, %v3654_v5 }
 0x2fc   : > { %v11910_v52 = vpop.f32.mrf.mxu0 }
 0x2fd   : > { %21061 = vst [vmem:[#allocation76_spill] sm:$0xff] %v16804_v2  ;;  %v3656_v8 = vadd.f32 %v11910_v52, %v16544_v63 }
 0x2fe   : > { %v16807_v39 = vpop.f32.mrf.mxu0 }
 0x2ff   : > { %v16810_v10 = vadd.f32 %v16684_v9, %v3656_v8  ;;  %v5563_v8 = vld [vmem:[#allocation8 + $0x68] sm:$0xff] }
 0x300   : > { %v11913_v57 = vpop.f32.mrf.mxu0  ;;  %12263 = vmatprep.subr.mxu1 %v5563_v8 }
 0x301   : > { %21062 = vst [vmem:[#allocation106_spill] sm:$0xff] %v16810_v10  ;;  %v3658_v1 = vadd.f32 %v11913_v57, %v16559_v61  ;;  %12264 = vmatpush3.msra.mxu1 %v5563_v8  ;;  %v21095_v10 = vld [vmem:[#allocation30_spill] sm:$0xff] }
 0x302   : > { %v16813_v37 = vpop.f32.mrf.mxu0 }
 0x303   : > { %v16816_v7 = vadd.f32 %v16694_v33, %v3658_v1  ;;  %v5562_v1 = vld [vmem:[#allocation8 + $0x60] sm:$0xff] }
 0x304   : > { %v11916_v45 = vpop.f32.mrf.mxu0  ;;  %12265 = vmatprep.subr.mxu1 %v5562_v1 }
 0x305   : > { %21063 = vst [vmem:[#allocation77_spill] sm:$0xff] %v16816_v7  ;;  %v3660_v63 = vadd.f32 %v11916_v45, %v16576_v49  ;;  %12266 = vmatpush3.msra.mxu1 %v5562_v1  ;;  %v21075_v1 = vld [vmem:[#allocation125_spill] sm:$0xff] }
 0x306   : > { %v16819_v5 = vpop.f32.mrf.mxu0 }
 0x307   : > { %v16822_v9 = vadd.f32 %v16704_v0, %v3660_v63  ;;  %v21069_v63 = vld [vmem:[#allocation31_spill] sm:$0xff] }
 0x308   : > { %v11919_v46 = vpop.f32.mrf.mxu0 }
 0x309   : > { %21064 = vst [vmem:[#allocation109_spill] sm:$0xff] %v16822_v9  ;;  %v3662_v52 = vadd.f32 %v11919_v46, %v16591_v41  ;;  %v21070_v46 = vld [vmem:[#allocation56_spill] sm:$0xff] }
 0x30a   : > { %v16825_v61 = vpop.f32.mrf.mxu0 }
 0x30b   : > { %v16828_v57 = vadd.f32 %v16714_v20, %v3662_v52  ;;  %v3209_v52 = vadd.f32 %v21070_v46, %v21069_v63  ;;  %v21076_v63 = vld [vmem:[#allocation58_spill] sm:$0xff] }
 0x30c   : > { %v11922_v33 = vpop.f32.mrf.mxu0  ;;  %v3217_v46 = vadd.f32 %v21076_v63, %v16306_v43  ;;  %v21084_v43 = vld [vmem:[#allocation39_spill] sm:$0xff]  ;;  %v21089_v63 = vld [vmem:[#allocation21_spill] sm:$0xff] }
 0x30d   : > { %21065 = vst [vmem:[#allocation78_spill] sm:$0xff] %v16828_v57  ;;  %v3664_v49 = vadd.f32 %v11922_v33, %v16603_v30  ;;  %v21072_v33 = vld [vmem:[#allocation32_spill] sm:$0xff]  ;;  %v3615_v9 = vadd.f32 %v16633_v47, %v3209_v52  ;;  %v21080_v47 = vld [vmem:[#allocation65_spill] sm:$0xff]  ;;  %v21082_v52 = vld [vmem:[#allocation150_spill] sm:$0xff] }
 0x30e   : > { %v16831_v19 = vpop.f32.mrf.mxu0  ;;  %v3623_v26 = vadd.f32 %v16682_v11, %v3217_v46  ;;  %v21120_v11 = vld [vmem:[#allocation177_spill] sm:$0xff] }
 0x30f   : > { %21066 = vst [vmem:[#allocation114_spill] sm:$0xff] %v16831_v19  ;;  %v16834_v0 = vadd.f32 %v16725_v24, %v3664_v49  ;;  %v21073_v24 = vld [vmem:[#allocation121_spill] sm:$0xff]  ;;  %v21122_v19 = vld [vmem:[#allocation178_spill] sm:$0xff] }
 0x310   : > { %v11925_v41 = vpop.f32.mrf.mxu0  ;;  %v3211_v49 = vadd.f32 %v21073_v24, %v21072_v33  ;;  %v21079_v24 = vld [vmem:[#allocation63_spill] sm:$0xff] }
 0x311   : > { %21067 = vst [vmem:[#allocation79_spill] sm:$0xff] %v16834_v0  ;;  %v3666_v45 = vadd.f32 %v11925_v41, %v16617_v14  ;;  %v21074_v0 = vld [vmem:[#allocation57_spill] sm:$0xff]  ;;  %v3215_v41 = vadd.f32 %v21075_v1, %v16292_v55 }
 0x312   : > { %v16838_v20 = vpop.f32.mrf.mxu0  ;;  %v3213_v57 = vadd.f32 %v21074_v0, %v16275_v44  ;;  %v3223_v44 = vadd.f32 %v21079_v24, %v16350_v28  ;;  %v3225_v0 = vadd.f32 %v21080_v47, %v16365_v17  ;;  %v21087_v28 = vld [vmem:[#allocation156_spill] sm:$0xff]  ;;  %v21088_v17 = vld [vmem:[#allocation41_spill] sm:$0xff]  ;;  %v21092_v47 = vld [vmem:[#allocation43_spill] sm:$0xff] }
 0x313   : > { %21068 = vst [vmem:[#allocation115_spill] sm:$0xff] %v16838_v20  ;;  %v16843_v8 = vadd.f32 %v16736_v12, %v3666_v45  ;;  %v21077_v12 = vld [vmem:[#allocation60_spill] sm:$0xff] }
 0x314   : > { %v11928_v30 = vpop.f32.mrf.mxu0  ;;  %v3219_v45 = vadd.f32 %v21077_v12, %v16320_v38  ;;  %v21085_v38 = vld [vmem:[#allocation68_spill] sm:$0xff]  ;;  %v16882_v12 = vadd.f32 %v21089_v63, %v21088_v17  ;;  %v5561_v17 = vld [vmem:[#allocation8 + $0x58] sm:$0xff]  ;;  %v21098_v63 = vld [vmem:[#allocation45_spill] sm:$0xff] }
 0x315   : > { %21071 = vst [vmem:[#allocation80_spill] sm:$0xff] %v16843_v8  ;;  %v3668_v14 = vadd.f32 %v11928_v30, %v16627_v35  ;;  %v21078_v8 = vld [vmem:[#allocation137_spill] sm:$0xff]  ;;  %12267 = vmatprep.subr.mxu1 %v5561_v17 }
 0x316   : > { %v3221_v7 = vadd.f32 %v21078_v8, %v16335_v3  ;;  %v3606_v33 = vpop.f32.mrf.mxu0  ;;  %v21081_v35 = vld [vmem:[#allocation37_spill] sm:$0xff]  ;;  %v3229_v3 = vadd.f32 %v21085_v38, %v21084_v43  ;;  %v21086_v8 = vld [vmem:[#allocation40_spill] sm:$0xff]  ;;  %v21096_v38 = vld [vmem:[#allocation174_spill] sm:$0xff]  ;;  %12268 = vmatpush3.msra.mxu1 %v5561_v17  ;;  %v3625_v36 = vadd.f32 %v16692_v6, %v3219_v45  ;;  %v3629_v45 = vadd.f32 %v16712_v16, %v3223_v44 }
 0x317   : > { %v3227_v30 = vadd.f32 %v21082_v52, %v21081_v35  ;;  %v16867_v55 = vadd.f32 %v16747_v42, %v3668_v14  ;;  %v16878_v1 = vadd.f32 %v21087_v28, %v21086_v8  ;;  %v21090_v33 = vld [vmem:[#allocation42_spill] sm:$0xff]  ;;  %v21091_v42 = vld [vmem:[#allocation163_spill] sm:$0xff]  ;;  %v4021_v8 = vadd.f32 %v21096_v38, %v3615_v9  ;;  %v21097_v28 = vld [vmem:[#allocation181_spill] sm:$0xff] }
 0x318   : > { %v16886_v14 = vadd.f32 %v21091_v42, %v21090_v33  ;;  %v12076_v24 = vpop.f32.mrf.mxu0  ;;  %v21093_v35 = vld [vmem:[#allocation27_spill] sm:$0xff]  ;;  %v3617_v2 = vadd.f32 %v21097_v28, %v3211_v49  ;;  %v21104_v49 = vld [vmem:[#allocation48_spill] sm:$0xff]  ;;  %v21105_v38 = vld [vmem:[#allocation169_spill] sm:$0xff]  ;;  %v3627_v46 = vadd.f32 %v16702_v51, %v3221_v7  ;;  %v3631_v51 = vadd.f32 %v16723_v56, %v3225_v0 }
 0x319   : > { %21083 = vst [vmem:[#allocation118_spill] sm:$0xff] %v16867_v55  ;;  %v16890_v52 = vadd.f32 %v21093_v35, %v21092_v47  ;;  %v21094_v55 = vld [vmem:[#allocation44_spill] sm:$0xff]  ;;  %v21099_v33 = vld [vmem:[#allocation167_spill] sm:$0xff]  ;;  %v21100_v24 = vld [vmem:[#allocation46_spill] sm:$0xff]  ;;  %v16917_v28 = vadd.f32 %v21105_v38, %v21104_v49  ;;  %v3621_v38 = vadd.f32 %v16670_v58, %v3215_v41  ;;  %v3635_v56 = vadd.f32 %v16745_v29, %v3229_v3 }
 0x31a   : > { %v16894_v43 = vadd.f32 %v21095_v10, %v21094_v55  ;;  %v16905_v42 = vadd.f32 %v21099_v33, %v21098_v63  ;;  %v21101_v47 = vld [vmem:[#allocation168_spill] sm:$0xff]  ;;  %v21102_v10 = vld [vmem:[#allocation47_spill] sm:$0xff]  ;;  %v21103_v55 = vld [vmem:[#allocation33_spill] sm:$0xff]  ;;  %v4158_v21 = vpop.f32.mrf.mxu0 }
 0x31b   : > { %v16909_v35 = vadd.f32 %v21101_v47, %v21100_v24  ;;  %v16913_v9 = vadd.f32 %v21103_v55, %v21102_v10  ;;  %v21107_v63 = vld [vmem:[#allocation34_spill] sm:$0xff]  ;;  %v16928_v24 = vadd.f32 %v21109_v62, %v21108_v27  ;;  %v4427_v10 = vadd.f32 %v4158_v21, %v4021_v8  ;;  %v21111_v55 = vld [vmem:[#allocation172_spill] sm:$0xff]  ;;  %v21114_v62 = vld [vmem:[#allocation171_spill] sm:$0xff] }
 0x31c   : > { %v16924_v33 = vadd.f32 %v21107_v63, %v21106_v13  ;;  %v21110_v47 = vld [vmem:[#allocation86_spill] sm:$0xff]  ;;  %v16933_v49 = vadd.f32 %v21112_v15, %v21111_v55  ;;  %v16939_v13 = vld [vmem:[%s16901_s23] ss:$0 sm:$0xff]  ;;  %v12079_v63 = vpop.f32.mrf.mxu0  ;;  %v16943_v27 = vadd.f32 %v21114_v62, %v21113_v59  ;;  %v21116_v17 = vld [vmem:[#allocation83_spill] sm:$0xff] }
 0x31d   : > { %v3619_v20 = vadd.f32 %v21110_v47, %v3213_v57  ;;  %v21115_v57 = vld [vmem:[#allocation176_spill] sm:$0xff]  ;;  %v4488_v8 = vmul.f32 %v16920_v48, %v4427_v10  ;;  %v4430_v15 = vadd.f32 %v12079_v63, %v21116_v17  ;;  %v21117_v47 = vld [vmem:[#allocation175_spill] sm:$0xff]  ;;  %v21121_v41 = vld [vmem:[#allocation38_spill] sm:$0xff] }
 0x31e   : > { %v4023_v21 = vadd.f32 %v21115_v57, %v3617_v2  ;;  %v21118_v55 = vld [vmem:[#allocation36_spill] sm:$0xff]  ;;  %v16954_v6 = vadd.f32 %v21121_v41, %v21120_v11  ;;  %v4168_v59 = vpop.f32.mrf.mxu0  ;;  %v5560_v62 = vld [vmem:[#allocation8 + $0x50] sm:$0xff] }
 0x31f   : > { %v16950_v58 = vadd.f32 %v21118_v55, %v21117_v47  ;;  %v4025_v2 = vadd.f32 %v21122_v19, %v3619_v20  ;;  %v4549_v10 = vadd.f32 %v16939_v13, %v4488_v8  ;;  %v4491_v63 = vmul.f32 %v16920_v48, %v4430_v15  ;;  %12269 = vmatprep.subr.mxu1 %v5560_v62  ;;  %v21123_v17 = vld [vmem:[#allocation180_spill] sm:$0xff]  ;;  %v21124_v55 = vld [vmem:[#allocation182_spill] sm:$0xff]  ;;  %v21126_v44 = vld [vmem:[#allocation185_spill] sm:$0xff] }
 0x320   : > { %v4429_v57 = vadd.f32 %v4168_v59, %v4023_v21  ;;  %v4027_v47 = vadd.f32 %v21123_v17, %v3621_v38  ;;  %v21125_v11 = vld [vmem:[#allocation184_spill] sm:$0xff]  ;;  %v12082_v16 = vpop.f32.mrf.mxu0  ;;  %12270 = vmatpush3.msra.mxu1 %v5560_v62  ;;  %v21127_v8 = vld [vmem:[#allocation186_spill] sm:$0xff] }
 0x321   : > { %21119 = vst [vmem:[#allocation81_spill] sm:$0xff] %v16950_v58  ;;  %v4029_v58 = vadd.f32 %v21124_v55, %v3623_v26  ;;  %v16964_v41 = vadd.f32 %v21125_v11, %v3625_v36  ;;  %v9761_v7 = vmul.f32 -1.442695, %v4549_v10  ;;  %v16968_v19 = vadd.f32 %v16939_v13, %v4491_v63  ;;  %v21128_v38 = vld [vmem:[#allocation190_spill] sm:$0xff]  ;;  %v21129_v63 = vld [vmem:[#allocation192_spill] sm:$0xff]  ;;  %v21130_v55 = vld [vmem:[#allocation195_spill] sm:$0xff] }
 0x322   : > { %v4490_v20 = vmul.f32 %v16920_v48, %v4429_v57  ;;  %v4432_v21 = vadd.f32 %v12082_v16, %v21126_v44  ;;  %v16973_v15 = vadd.f32 %v21127_v8, %v3627_v46  ;;  %v16976_v26 = vadd.f32 %v21128_v38, %v3629_v45  ;;  %v4178_v0 = vpop.f32.mrf.mxu0  ;;  %v21133_v44 = vld [vmem:[#allocation53_spill] sm:$0xff] }
 0x323   : > { %v3633_v36 = vadd.f32 %v16734_v40, %v3227_v30  ;;  %13330 = vpow2.f32 %v9761_v7  ;;  %v9764_v59 = vmul.f32 -1.442695, %v16968_v19  ;;  %v16984_v57 = vadd.f32 %v21129_v63, %v3631_v51  ;;  %v21131_v51 = vld [vmem:[#allocation51_spill] sm:$0xff] }
 0x324   : > { %v4551_v62 = vadd.f32 %v16939_v13, %v4490_v20  ;;  %v4493_v10 = vmul.f32 %v16920_v48, %v4432_v21  ;;  %v3637_v46 = vadd.f32 %v16753_v25, %v16878_v1  ;;  %v3639_v45 = vadd.f32 %v16759_v32, %v16882_v12  ;;  %v12085_v30 = vpop.f32.mrf.mxu0  ;;  %v21132_v20 = vld [vmem:[#allocation52_spill] sm:$0xff] }
 0x325   : > { %v4431_v40 = vadd.f32 %v4178_v0, %v4025_v2  ;;  %13332 = vpow2.f32 %v9764_v59  ;;  %v4434_v17 = vadd.f32 %v12085_v30, %v16676_v60  ;;  %v16995_v11 = vadd.f32 %v21130_v55, %v3633_v36 }
 0x326   : > { %v9763_v29 = vmul.f32 -1.442695, %v4551_v62  ;;  %v16991_v3 = vadd.f32 %v16939_v13, %v4493_v10  ;;  %v16998_v16 = vadd.f32 %v21131_v51, %v3635_v56  ;;  %v3641_v25 = vadd.f32 %v16765_v22, %v16886_v14  ;;  %v4188_v1 = vpop.f32.mrf.mxu0  ;;  %v21134_v56 = vld [vmem:[#allocation54_spill] sm:$0xff]  ;;  %v5559_v10 = vld [vmem:[#allocation8 + $0x48] sm:$0xff] }
 0x327   : > { %v4492_v32 = vmul.f32 %v16920_v48, %v4431_v40  ;;  %v4495_v2 = vmul.f32 %v16920_v48, %v4434_v17  ;;  %v4433_v7 = vadd.f32 %v4188_v1, %v4027_v47  ;;  %v17006_v60 = vadd.f32 %v21132_v20, %v3637_v46  ;;  %12271 = vmatprep.subr.mxu1 %v5559_v10  ;;  %v21135_v40 = vld [vmem:[#allocation55_spill] sm:$0xff]  ;;  %v21137_v51 = vld [vmem:[#allocation82_spill] sm:$0xff] }
 0x328   : > { %13334 = vpow2.f32 %v9763_v29  ;;  %v9766_v12 = vmul.f32 -1.442695, %v16991_v3  ;;  %v17009_v21 = vadd.f32 %v21133_v44, %v3639_v45  ;;  %v3643_v8 = vadd.f32 %v16771_v23, %v16890_v52  ;;  %v12088_v14 = vpop.f32.mrf.mxu0  ;;  %12272 = vmatpush3.msra.mxu1 %v5559_v10  ;;  %v21136_v17 = vld [vmem:[#allocation179_spill] sm:$0xff] }
 0x329   : > { %v17014_v22 = vadd.f32 %v16939_v13, %v4492_v32  ;;  %v17017_v38 = vadd.f32 %v16939_v13, %v4495_v2  ;;  %v4494_v36 = vmul.f32 %v16920_v48, %v4433_v7  ;;  %v4436_v47 = vadd.f32 %v12088_v14, %v16687_v18  ;;  %v5558_v2 = vld [vmem:[#allocation8 + $0x40] sm:$0xff] }
 0x32a   : > { %13336 = vpow2.f32 %v9766_v12  ;;  %v17022_v0 = vadd.f32 %v21134_v56, %v3641_v25  ;;  %v3645_v59 = vadd.f32 %v16777_v31, %v16894_v43  ;;  %v3647_v23 = vadd.f32 %v16783_v4, %v16905_v42  ;;  %v4198_v62 = vpop.f32.mrf.mxu0  ;;  %v21139_v20 = vld [vmem:[#allocation183_spill] sm:$0xff]  ;;  %12273 = vmatprep.subr.mxu1 %v5558_v2 }
 0x32b   : > { %v9765_v52 = vmul.f32 -1.442695, %v17014_v22  ;;  %v9768_v63 = vmul.f32 -1.442695, %v17017_v38  ;;  %v17031_v46 = vadd.f32 %v16939_v13, %v4494_v36  ;;  %v4497_v18 = vmul.f32 %v16920_v48, %v4436_v47  ;;  %12274 = vmatpush3.msra.mxu1 %v5558_v2 }
 0x32c   : > { %v4435_v45 = vadd.f32 %v4198_v62, %v4029_v58  ;;  %v17035_v30 = vadd.f32 %v21135_v40, %v3643_v8  ;;  %v3649_v31 = vadd.f32 %v16789_v34, %v16909_v35  ;;  %v3651_v4 = vadd.f32 %v16795_v53, %v16913_v9  ;;  %v12091_v43 = vpop.f32.mrf.mxu0  ;;  %v21138_v53 = vld [vmem:[#allocation24_spill] sm:$0xff] }
 0x32d   : > { %13338 = vpow2.f32 %v9765_v52  ;;  %v9767_v42 = vmul.f32 -1.442695, %v17031_v46  ;;  %v17043_v29 = vadd.f32 %v16939_v13, %v4497_v18  ;;  %v17047_v55 = vadd.f32 %v21136_v17, %v3645_v59  ;;  %v21140_v8 = vld [vmem:[#allocation188_spill] sm:$0xff]  ;;  %v6949_v18 = vld [vmem:[#allocation8 + $0x278] sm:$0xff]  ;;  %v6948_v17 = vld [vmem:[#allocation8 + $0x270] sm:$0xff] }
 0x32e   : > { %13340 = vpow2.f32 %v9768_v63  ;;  %v4496_v58 = vmul.f32 %v16920_v48, %v4435_v45  ;;  %v17050_v25 = vadd.f32 %v21137_v51, %v3647_v23  ;;  %v3653_v34 = vadd.f32 %v16801_v54, %v16917_v28  ;;  %v4208_v9 = vpop.f32.mrf.mxu0  ;;  %v21141_v23 = vld [vmem:[#allocation191_spill] sm:$0xff]  ;;  %12571 = vmatprep.subr.mxu0 %v6949_v18 }
 0x32f   : > { %v4438_v35 = vadd.f32 %v12091_v43, %v21138_v53  ;;  %13342 = vpow2.f32 %v9767_v42  ;;  %v9770_v32 = vmul.f32 -1.442695, %v17043_v29  ;;  %v4437_v12 = vadd.f32 %v4208_v9, %v16964_v41  ;;  %v21143_v43 = vld [vmem:[#allocation194_spill] sm:$0xff]  ;;  %12572 = vmatpush3.msra.mxu0 %v6949_v18  ;;  %v5556_v18 = vld [vmem:[#allocation8 + $0x30] sm:$0xff] }
 0x330   : > { %v17057_v1 = vadd.f32 %v16939_v13, %v4496_v58  ;;  %v13331_v7 = vpop.eup %13330  ;;  %v17061_v44 = vadd.f32 %v21139_v20, %v3649_v31  ;;  %v17064_v14 = vadd.f32 %v21140_v8, %v3651_v4  ;;  %v3655_v54 = vadd.f32 %v16807_v39, %v16924_v33  ;;  %v12094_v36 = vpop.f32.mrf.mxu0  ;;  %v21142_v33 = vld [vmem:[#allocation25_spill] sm:$0xff]  ;;  %12573 = vmatprep.subr.mxu0 %v6948_v17  ;;  %v6947_v20 = vld [vmem:[#allocation8 + $0x268] sm:$0xff] }
 0x331   : > { %v4499_v28 = vmul.f32 %v16920_v48, %v4438_v35  ;;  %v4765_v47 = vadd.f32 1.0, %v13331_v7  ;;  %13344 = vpow2.f32 %v9770_v32  ;;  %v4498_v41 = vmul.f32 %v16920_v48, %v4437_v12  ;;  %v21144_v35 = vld [vmem:[#allocation196_spill] sm:$0xff]  ;;  %12574 = vmatpush3.msra.mxu0 %v6948_v17 }
 0x332   : > { %v9769_v56 = vmul.f32 -1.442695, %v17057_v1  ;;  %v13333_v59 = vpop.eup %13332  ;;  %v17072_v52 = vadd.f32 %v21141_v23, %v3653_v34  ;;  %v3657_v62 = vadd.f32 %v16813_v37, %v16928_v24  ;;  %v4440_v10 = vadd.f32 %v12094_v36, %v21142_v33  ;;  %v4218_v63 = vpop.f32.mrf.mxu0  ;;  %v21145_v12 = vld [vmem:[#allocation28_spill] sm:$0xff]  ;;  %v5557_v36 = vld [vmem:[#allocation8 + $0x38] sm:$0xff]  ;;  %12575 = vmatprep.subr.mxu0 %v6947_v20  ;;  %v6946_v23 = vld [vmem:[#allocation8 + $0x260] sm:$0xff] }
 0x333   : > { %v17077_v39 = vadd.f32 %v16939_v13, %v4499_v28  ;;  %13346 = vrcp.f32 %v4765_v47  ;;  %v4768_v45 = vadd.f32 1.0, %v13333_v59  ;;  %v17081_v40 = vadd.f32 %v16939_v13, %v4498_v41  ;;  %12275 = vmatprep.subr.mxu1 %v5557_v36  ;;  %12576 = vmatpush3.msra.mxu0 %v6947_v20 }
 0x334   : > { %v4439_v31 = vadd.f32 %v4218_v63, %v16973_v15  ;;  %v17085_v42 = vadd.f32 %v21143_v43, %v3655_v54  ;;  %13348 = vpow2.f32 %v9769_v56  ;;  %v4501_v24 = vmul.f32 %v16920_v48, %v4440_v10  ;;  %v12097_v58 = vpop.f32.mrf.mxu0  ;;  %v21146_v10 = vld [vmem:[#allocation70_spill] sm:$0xff]  ;;  %12276 = vmatpush3.msra.mxu1 %v5557_v36  ;;  %12577 = vmatprep.subr.mxu0 %v6946_v23 }
 0x335   : > { %v13335_v4 = vpop.eup %13334  ;;  %v9772_v37 = vmul.f32 -1.442695, %v17077_v39  ;;  %13350 = vrcp.f32 %v4768_v45  ;;  %v9771_v34 = vmul.f32 -1.442695, %v17081_v40  ;;  %v17092_v9 = vadd.f32 %v21144_v35, %v3657_v62  ;;  %12277 = vmatprep.subr.mxu1 %v5556_v18  ;;  %12578 = vmatpush3.msra.mxu0 %v6946_v23  ;;  %v6942_v23 = vld [vmem:[#allocation8 + $0x240] sm:$0xff] }
 0x336   : > { %v4767_v51 = vadd.f32 1.0, %v13335_v4  ;;  %v4500_v53 = vmul.f32 %v16920_v48, %v4439_v31  ;;  %v17095_v32 = vadd.f32 %v16939_v13, %v4501_v24  ;;  %v4442_v2 = vadd.f32 %v12097_v58, %v21145_v12  ;;  %v4228_v7 = vpop.f32.mrf.mxu0  ;;  %12278 = vmatpush3.msra.mxu1 %v5556_v18  ;;  %v21149_v18 = vld [vmem:[#allocation81_spill] sm:$0xff] }
 0x337   : > { %v13337_v15 = vpop.eup %13336  ;;  %13352 = vpow2.f32 %v9772_v37  ;;  %v4441_v28 = vadd.f32 %v4228_v7, %v16976_v26  ;;  %v3659_v47 = vadd.f32 %v16819_v5, %v16933_v49  ;;  %v5555_v5 = vld [vmem:[#allocation8 + $0x28] sm:$0xff]  ;;  %v3661_v45 = vadd.f32 %v16825_v61, %v16943_v27  ;;  %v6945_v37 = vld [vmem:[#allocation8 + $0x258] sm:$0xff]  ;;  %v6944_v61 = vld [vmem:[#allocation8 + $0x250] sm:$0xff] }
 0x338   : > { %13354 = vrcp.f32 %v4767_v51  ;;  %v4770_v8 = vadd.f32 1.0, %v13337_v15  ;;  %v17099_v54 = vadd.f32 %v16939_v13, %v4500_v53  ;;  %v9774_v56 = vmul.f32 -1.442695, %v17095_v32  ;;  %v12100_v59 = vpop.f32.mrf.mxu0  ;;  %v5554_v51 = vld [vmem:[#allocation8 + $0x20] sm:$0xff]  ;;  %12579 = vmatprep.subr.mxu0 %v6945_v37  ;;  %12279 = vmatprep.subr.mxu1 %v5555_v5 }
 0x339   : > { %13356 = vpow2.f32 %v9771_v34  ;;  %v4503_v41 = vmul.f32 %v16920_v48, %v4442_v2  ;;  %v4502_v26 = vmul.f32 %v16920_v48, %v4441_v28  ;;  %v4444_v63 = vadd.f32 %v12100_v59, %v21146_v10  ;;  %v21147_v34 = vld [vmem:[#allocation197_spill] sm:$0xff]  ;;  %12580 = vmatpush3.msra.mxu0 %v6945_v37  ;;  %v6943_v2 = vld [vmem:[#allocation8 + $0x248] sm:$0xff]  ;;  %12280 = vmatpush3.msra.mxu1 %v5555_v5  ;;  %v5553_v28 = vld [vmem:[#allocation8 + $0x18] sm:$0xff] }
 0x33a   : > { %v13339_v62 = vpop.eup %13338  ;;  %13358 = vrcp.f32 %v4770_v8  ;;  %v9773_v33 = vmul.f32 -1.442695, %v17099_v54  ;;  %v4238_v43 = vpop.f32.mrf.mxu0  ;;  %v17119_v53 = vadd.f32 %v21147_v34, %v3659_v47  ;;  %12581 = vmatprep.subr.mxu0 %v6944_v61  ;;  %v21148_v47 = vld [vmem:[#allocation198_spill] sm:$0xff]  ;;  %12281 = vmatprep.subr.mxu1 %v5554_v51  ;;  %v5552_v10 = vld [vmem:[#allocation8 + $0x10] sm:$0xff]  ;;  %v21151_v37 = vld [vmem:[#allocation200_spill] sm:$0xff] }
 0x33b   : > { %v13341_v49 = vpop.eup %13340  ;;  %v4769_v31 = vadd.f32 1.0, %v13339_v62  ;;  %13360 = vpow2.f32 %v9774_v56  ;;  %v17112_v4 = vadd.f32 %v16939_v13, %v4503_v41  ;;  %v17115_v58 = vadd.f32 %v16939_v13, %v4502_v26  ;;  %12582 = vmatpush3.msra.mxu0 %v6944_v61  ;;  %12282 = vmatpush3.msra.mxu1 %v5554_v51  ;;  %v21150_v5 = vld [vmem:[#allocation114_spill] sm:$0xff] }
 0x33c   : > { %v4772_v24 = vadd.f32 1.0, %v13341_v49  ;;  %13362 = vpow2.f32 %v9773_v33  ;;  %v4505_v17 = vmul.f32 %v16920_v48, %v4444_v63  ;;  %v13343_v27 = vpop.eup %13342  ;;  %v4443_v35 = vadd.f32 %v4238_v43, %v16984_v57  ;;  %v12103_v12 = vpop.f32.mrf.mxu0  ;;  %12583 = vmatprep.subr.mxu0 %v6943_v2  ;;  %12283 = vmatprep.subr.mxu1 %v5553_v28  ;;  %v6941_v51 = vld [vmem:[#allocation8 + $0x238] sm:$0xff] }
 0x33d   : > { %13364 = vrcp.f32 %v4769_v31  ;;  %v9776_v15 = vmul.f32 -1.442695, %v17112_v4  ;;  %v4771_v7 = vadd.f32 1.0, %v13343_v27  ;;  %v9775_v20 = vmul.f32 -1.442695, %v17115_v58  ;;  %12584 = vmatpush3.msra.mxu0 %v6943_v2  ;;  %12284 = vmatpush3.msra.mxu1 %v5553_v28 }
 0x33e   : > { %13366 = vrcp.f32 %v4772_v24  ;;  %v17125_v8 = vadd.f32 %v16939_v13, %v4505_v17  ;;  %v13345_v36 = vpop.eup %13344  ;;  %v17128_v56 = vadd.f32 %v21148_v47, %v3661_v45  ;;  %v4504_v57 = vmul.f32 %v16920_v48, %v4443_v35  ;;  %v4248_v59 = vpop.f32.mrf.mxu0  ;;  %v5551_v17 = vld [vmem:[#allocation8 + $0x8] sm:$0xff]  ;;  %12585 = vmatprep.subr.mxu0 %v6942_v23  ;;  %12285 = vmatprep.subr.mxu1 %v5552_v10  ;;  %v5550_v47 = vld [vmem:[#allocation8] sm:$0xff] }
 0x33f   : > { %13368 = vpow2.f32 %v9776_v15  ;;  %v4446_v41 = vadd.f32 %v12103_v12, %v16739_v50  ;;  %v4774_v62 = vadd.f32 1.0, %v13345_v36  ;;  %v4445_v26 = vadd.f32 %v4248_v59, %v16995_v11  ;;  %12586 = vmatpush3.msra.mxu0 %v6942_v23  ;;  %12286 = vmatpush3.msra.mxu1 %v5552_v10  ;;  %v6940_v36 = vld [vmem:[#allocation8 + $0x230] sm:$0xff] }
 0x340   : > { %13370 = vrcp.f32 %v4771_v7  ;;  %v9778_v33 = vmul.f32 -1.442695, %v17125_v8  ;;  %v13347_v63 = vpop.eup %13346  ;;  %v3663_v49 = vadd.f32 %v21150_v5, %v21149_v18  ;;  %v17137_v50 = vadd.f32 %v16939_v13, %v4504_v57  ;;  %v12106_v31 = vpop.f32.mrf.mxu0  ;;  %12287 = vmatprep.subr.mxu1 %v5551_v17  ;;  %12587 = vmatprep.subr.mxu0 %v6941_v51  ;;  %v6579_v18 = vld [vmem:[#allocation8 + $0x1f8] sm:$0xff] }
 0x341   : > { %13372 = vpow2.f32 %v9775_v20  ;;  %v4507_v45 = vmul.f32 %v16920_v48, %v4446_v41  ;;  %v13349_v43 = vpop.eup %13348  ;;  %v4506_v11 = vmul.f32 %v16920_v48, %v4445_v26  ;;  %v4448_v24 = vadd.f32 %v12106_v31, %v21151_v37  ;;  %v21152_v41 = vld [vmem:[#allocation199_spill] sm:$0xff]  ;;  %12288 = vmatpush3.msra.mxu1 %v5551_v17  ;;  %12588 = vmatpush3.msra.mxu0 %v6941_v51  ;;  %v6939_v63 = vld [vmem:[#allocation8 + $0x228] sm:$0xff] }
 0x342   : > { %13374 = vrcp.f32 %v4774_v62  ;;  %v13351_v61 = vpop.eup %13350  ;;  %v4773_v27 = vadd.f32 1.0, %v13349_v43  ;;  %v9777_v34 = vmul.f32 -1.442695, %v17137_v50  ;;  %v4258_v35 = vpop.f32.mrf.mxu0  ;;  %v17153_v59 = vadd.f32 %v21152_v41, %v3663_v49  ;;  %v17155_v62 = vld [vmem:[#allocation2 + $0x8] sm:$0xff]  ;;  %v21153_v31 = vld [vmem:[#allocation72_spill] sm:$0xff]  ;;  %12589 = vmatprep.subr.mxu0 %v6940_v36  ;;  %12289 = vmatprep.subr.mxu1 %v5550_v47 }
 0x343   : > { %13376 = vpow2.f32 %v9778_v33  ;;  %v17144_v15 = vadd.f32 %v16939_v13, %v4507_v45  ;;  %v4930_v2 = vmul.f32 %v13351_v61, %v16968_v19  ;;  %v17148_v7 = vadd.f32 %v16939_v13, %v4506_v11  ;;  %12590 = vmatpush3.msra.mxu0 %v6940_v36  ;;  %12290 = vmatpush3.msra.mxu1 %v5550_v47  ;;  %v6938_v61 = vld [vmem:[#allocation8 + $0x220] sm:$0xff]  ;;  %v6937_v47 = vld [vmem:[#allocation8 + $0x218] sm:$0xff] }
 0x344   : > { %v13353_v12 = vpop.eup %13352  ;;  %v4509_v20 = vmul.f32 %v16920_v48, %v4448_v24  ;;  %v4447_v28 = vadd.f32 %v4258_v35, %v16998_v16  ;;  %13378 = vrcp.f32 %v4773_v27  ;;  %v12109_v33 = vpop.f32.mrf.mxu0  ;;  %12591 = vmatprep.subr.mxu0 %v6939_v63  ;;  %12467 = vmatprep.subr.mxu1 %v6579_v18 }
 0x345   : > { %v13355_v57 = vpop.eup %13354  ;;  %v4776_v23 = vadd.f32 1.0, %v13353_v12  ;;  %v9780_v19 = vmul.f32 -1.442695, %v17144_v15  ;;  %4984 = vst [vmem:[#allocation2 + $0x18] sm:$0xff] %v4930_v2  ;;  %13380 = vpow2.f32 %v9777_v34  ;;  %v9779_v16 = vmul.f32 -1.442695, %v17148_v7  ;;  %12592 = vmatpush3.msra.mxu0 %v6939_v63 }
 0x346   : > { %v13357_v26 = vpop.eup %13356  ;;  %v17160_v10 = vadd.f32 %v16939_v13, %v4509_v20  ;;  %5036 = vst [vmem:[#allocation2 + $0x18] sm:$0x1] %v17155_v62  ;;  %v4508_v45 = vmul.f32 %v16920_v48, %v4447_v28  ;;  %v4450_v43 = vadd.f32 %v12109_v33, %v21153_v31  ;;  %v4268_v11 = vpop.f32.mrf.mxu0  ;;  %v21154_v28 = vld [vmem:[#allocation96_spill] sm:$0xff]  ;;  %12593 = vmatprep.subr.mxu0 %v6938_v61 }
 0x347   : > { %v13359_v5 = vpop.eup %13358  ;;  %13382 = vrcp.f32 %v4776_v23  ;;  %v4775_v49 = vadd.f32 1.0, %v13357_v26  ;;  %v4449_v51 = vadd.f32 %v4268_v11, %v17006_v60  ;;  %12594 = vmatpush3.msra.mxu0 %v6938_v61 }
 0x348   : > { %v13361_v37 = vpop.eup %13360  ;;  %v4932_v24 = vmul.f32 %v13359_v5, %v16991_v3  ;;  %13384 = vpow2.f32 %v9780_v19  ;;  %v9782_v17 = vmul.f32 -1.442695, %v17160_v10  ;;  %v17169_v35 = vadd.f32 %v16939_v13, %v4508_v45  ;;  %v12112_v2 = vpop.f32.mrf.mxu0  ;;  %12595 = vmatprep.subr.mxu0 %v6937_v47 }
 0x349   : > { %v13363_v27 = vpop.eup %13362  ;;  %13386 = vrcp.f32 %v4775_v49  ;;  %v4778_v34 = vadd.f32 1.0, %v13361_v37  ;;  %v4511_v12 = vmul.f32 %v16920_v48, %v4450_v43  ;;  %v4510_v60 = vmul.f32 %v16920_v48, %v4449_v51  ;;  %12596 = vmatpush3.msra.mxu0 %v6937_v47 }
 0x34a   : > { %v13365_v3 = vpop.eup %13364  ;;  %4986 = vst [vmem:[#allocation2 + $0x28] sm:$0xff] %v4932_v24  ;;  %v4777_v20 = vadd.f32 1.0, %v13363_v27  ;;  %13388 = vpow2.f32 %v9779_v16  ;;  %v4452_v36 = vadd.f32 %v12112_v2, %v21154_v28  ;;  %v9781_v23 = vmul.f32 -1.442695, %v17169_v35  ;;  %v4278_v33 = vpop.f32.mrf.mxu0  ;;  %v6934_v28 = vld [vmem:[#allocation8 + $0x200] sm:$0xff] }
 0x34b   : > { %v13367_v57 = vpop.eup %13366  ;;  %5054 = vst [vmem:[#allocation2 + $0x29] sm:$0x1] %v17155_v62  ;;  %v17176_v41 = vmul.f32 %v13365_v3, %v17014_v22  ;;  %13390 = vrcp.f32 %v4778_v34  ;;  %v17180_v19 = vadd.f32 %v16939_v13, %v4511_v12  ;;  %v17186_v63 = vadd.f32 %v16939_v13, %v4510_v60  ;;  %v6936_v22 = vld [vmem:[#allocation8 + $0x210] sm:$0xff] }
 0x34c   : > { %v13369_v26 = vpop.eup %13368  ;;  %v17183_v16 = vmul.f32 %v13367_v57, %v17017_v38  ;;  %13392 = vrcp.f32 %v4777_v20  ;;  %v4513_v18 = vmul.f32 %v16920_v48, %v4452_v36  ;;  %v4451_v31 = vadd.f32 %v4278_v33, %v17009_v21  ;;  %v12115_v43 = vpop.f32.mrf.mxu0  ;;  %v21155_v34 = vld [vmem:[#allocation73_spill] sm:$0xff]  ;;  %12597 = vmatprep.subr.mxu0 %v6936_v22  ;;  %v21156_v33 = vld [vmem:[#allocation115_spill] sm:$0xff] }
 0x34d   : > { %v13371_v5 = vpop.eup %13370  ;;  %4985 = vst [vmem:[#allocation2 + $0x20] sm:$0xff] %v17176_v41  ;;  %v4780_v49 = vadd.f32 1.0, %v13369_v26  ;;  %13394 = vpow2.f32 %v9782_v17  ;;  %v9784_v45 = vmul.f32 -1.442695, %v17180_v19  ;;  %v9783_v37 = vmul.f32 -1.442695, %v17186_v63  ;;  %12598 = vmatpush3.msra.mxu0 %v6936_v22 }
 0x34e   : > { %v13373_v38 = vpop.eup %13372  ;;  %4988 = vst [vmem:[#allocation2 + $0x38] sm:$0xff] %v17183_v16  ;;  %v4933_v11 = vmul.f32 %v13371_v5, %v17031_v46  ;;  %13396 = vpow2.f32 %v9781_v23  ;;  %v17196_v24 = vadd.f32 %v16939_v13, %v4513_v18  ;;  %v17198_v51 = vld [vmem:[#allocation2 + $0x18] sm:$0xff]  ;;  %v4512_v27 = vmul.f32 %v16920_v48, %v4451_v31  ;;  %v4288_v2 = vpop.f32.mrf.mxu0  ;;  %v21157_v18 = vld [vmem:[#allocation97_spill] sm:$0xff] }
 0x34f   : > { %v6935_v17 = vld [vmem:[#allocation8 + $0x208] sm:$0xff]  ;;  %v13375_v61 = vpop.eup %13374  ;;  %13398 = vrcp.f32 %v4780_v49  ;;  %v4779_v21 = vadd.f32 1.0, %v13373_v38  ;;  %v4454_v12 = vadd.f32 %v12115_v43, %v21155_v34  ;;  %12191 = vmatmul.mubr.f32.gmra.mxu1 %v17198_v51  ;;  %v4453_v60 = vadd.f32 %v4288_v2, %v17022_v0 }
 0x350   : > { %v13377_v46 = vpop.eup %13376  ;;  %4987 = vst [vmem:[#allocation2 + $0x30] sm:$0xff] %v4933_v11  ;;  %v4936_v3 = vmul.f32 %v13375_v61, %v17043_v29  ;;  %13400 = vpow2.f32 %v9784_v45  ;;  %v9786_v20 = vmul.f32 -1.442695, %v17196_v24  ;;  %12193 = vmatprep.mubr.f32.mxu1 %v17176_v41  ;;  %v17209_v47 = vadd.f32 %v16939_v13, %v4512_v27  ;;  %v12118_v23 = vpop.f32.mrf.mxu0  ;;  %12599 = vmatprep.subr.mxu0 %v6935_v17 }
 0x351   : > { %5037 = vst [vmem:[#allocation2 + $0x30] sm:$0x1] %v17155_v62  ;;  %13402 = vrcp.f32 %v4779_v21  ;;  %v4782_v36 = vadd.f32 1.0, %v13377_v46  ;;  %v4515_v57 = vmul.f32 %v16920_v48, %v4454_v12  ;;  %v13379_v29 = vpop.eup %13378  ;;  %v3665_v26 = vadd.f32 %v21156_v33, %v16954_v6  ;;  %12600 = vmatpush3.msra.mxu0 %v6935_v17 }
 0x352   : > { %4990 = vst [vmem:[#allocation2 + $0x48] sm:$0xff] %v4936_v3  ;;  %13404 = vpow2.f32 %v9783_v37  ;;  %v4514_v0 = vmul.f32 %v16920_v48, %v4453_v60  ;;  %v4456_v22 = vadd.f32 %v12118_v23, %v21157_v18  ;;  %v17216_v5 = vld [vmem:[#allocation2 + $0x28] sm:$0xff]  ;;  %v13381_v49 = vpop.eup %13380  ;;  %v4935_v45 = vmul.f32 %v13379_v29, %v17057_v1  ;;  %v4298_v6 = vpop.f32.mrf.mxu0  ;;  %12601 = vmatprep.subr.mxu0 %v6934_v28  ;;  %v21158_v60 = vld [vmem:[#allocation71_spill] sm:$0xff] }
 0x353   : > { %5038 = vst [vmem:[#allocation2 + $0x48] sm:$0x1] %v17155_v62  ;;  %13406 = vrcp.f32 %v4782_v36  ;;  %v9785_v31 = vmul.f32 -1.442695, %v17209_v47  ;;  %v17222_v43 = vadd.f32 %v16939_v13, %v4515_v57  ;;  %12194 = vmatmul.mubr.f32.gmra.mxu1 %v17216_v5  ;;  %v4781_v11 = vadd.f32 1.0, %v13381_v49  ;;  %12602 = vmatpush3.msra.mxu0 %v6934_v28 }
 0x354   : > { %v13383_v38 = vpop.eup %13382  ;;  %13408 = vpow2.f32 %v9786_v20  ;;  %v17226_v37 = vadd.f32 %v16939_v13, %v4514_v0  ;;  %v4517_v17 = vmul.f32 %v16920_v48, %v4456_v22  ;;  %4989 = vst [vmem:[#allocation2 + $0x40] sm:$0xff] %v4935_v45  ;;  %v4455_v27 = vadd.f32 %v4298_v6, %v17035_v30  ;;  %v12121_v34 = vpop.f32.mrf.mxu0  ;;  %v21159_v22 = vld [vmem:[#allocation74_spill] sm:$0xff] }
 0x355   : > { %v13385_v1 = vpop.eup %13384  ;;  %v4938_v61 = vmul.f32 %v13383_v38, %v17077_v39  ;;  %13410 = vpow2.f32 %v9785_v31  ;;  %v9788_v21 = vmul.f32 -1.442695, %v17222_v43  ;;  %5055 = vst [vmem:[#allocation2 + $0x41] sm:$0x1] %v17155_v62  ;;  %v17238_v28 = vadd.f32 %v21158_v60, %v3665_v26 }
 0x356   : > { %v13387_v12 = vpop.eup %13386  ;;  %13412 = vrcp.f32 %v4781_v11  ;;  %v4784_v2 = vadd.f32 1.0, %v13385_v1  ;;  %v9787_v46 = vmul.f32 -1.442695, %v17226_v37  ;;  %v17235_v3 = vadd.f32 %v16939_v13, %v4517_v17  ;;  %v4308_v36 = vpop.f32.mrf.mxu0 }
 0x357   : > { %v13389_v20 = vpop.eup %13388  ;;  %4992 = vst [vmem:[#allocation2 + $0x58] sm:$0xff] %v4938_v61  ;;  %v17241_v39 = vmul.f32 %v13387_v12, %v17081_v40  ;;  %13414 = vpow2.f32 %v9788_v21  ;;  %v4516_v30 = vmul.f32 %v16920_v48, %v4455_v27  ;;  %v5375_v33 = vrot.slane %v17198_v51, 1 }
 0x358   : > { %v13391_v57 = vpop.eup %13390  ;;  %5056 = vst [vmem:[#allocation2 + $0x59] sm:$0x1] %v17155_v62  ;;  %13416 = vrcp.f32 %v4784_v2  ;;  %v4783_v23 = vadd.f32 1.0, %v13389_v20  ;;  %v9790_v29 = vmul.f32 -1.442695, %v17235_v3  ;;  %v17247_v0 = vld [vmem:[#allocation2 + $0x30] sm:$0xff]  ;;  %v4458_v49 = vadd.f32 %v12121_v34, %v21159_v22  ;;  %v12124_v45 = vpop.f32.mrf.mxu0 }
 0x359   : > { %v13393_v26 = vpop.eup %13392  ;;  %4991 = vst [vmem:[#allocation2 + $0x50] sm:$0xff] %v17241_v39  ;;  %v17251_v40 = vmul.f32 %v13391_v57, %v17095_v32  ;;  %13418 = vpow2.f32 %v9787_v46  ;;  %v17254_v18 = vadd.f32 %v16939_v13, %v4516_v30  ;;  %12196 = vmatprep.mubr.f32.mxu1 %v17247_v0  ;;  %v5376_v38 = vrot.slane %v17176_v41, 1  ;;  %v21160_v41 = vld [vmem:[#allocation100_spill] sm:$0xff] }
 0x35a   : > { %v13395_v31 = vpop.eup %13394  ;;  %v4939_v6 = vmul.f32 %v13393_v26, %v17099_v54  ;;  %13420 = vrcp.f32 %v4783_v23  ;;  %v4457_v11 = vadd.f32 %v4308_v36, %v17047_v55  ;;  %12197 = vmatmul.mubr.f32.gmra.mxu1 %v17183_v16  ;;  %v4519_v61 = vmul.f32 %v16920_v48, %v4458_v49  ;;  %v4318_v21 = vpop.f32.mrf.mxu0 }
 0x35b   : > { %v13397_v32 = vpop.eup %13396  ;;  %4994 = vst [vmem:[#allocation2 + $0x68] sm:$0xff] %v17251_v40  ;;  %v4786_v17 = vadd.f32 1.0, %v13395_v31  ;;  %13422 = vpow2.f32 %v9790_v29  ;;  %v9789_v1 = vmul.f32 -1.442695, %v17254_v18  ;;  %v4460_v12 = vadd.f32 %v12124_v45, %v21160_v41 }
 0x35c   : > { %v13399_v27 = vpop.eup %13398  ;;  %4993 = vst [vmem:[#allocation2 + $0x60] sm:$0xff] %v4939_v6  ;;  %v4785_v54 = vadd.f32 1.0, %v13397_v32  ;;  %v4518_v34 = vmul.f32 %v16920_v48, %v4457_v11  ;;  %v17270_v55 = vsel %vm735_vm1, %v5375_v33, %v5376_v38  ;;  %v17275_v20 = vadd.f32 %v16939_v13, %v4519_v61  ;;  %v12127_v30 = vpop.f32.mrf.mxu0  ;;  %v17279_v36 = vld [vmem:[#allocation2 + $0x40] sm:$0xff]  ;;  %v21161_v61 = vld [vmem:[#allocation75_spill] sm:$0xff] }
 0x35d   : > { %v13401_v2 = vpop.eup %13400  ;;  %5039 = vst [vmem:[#allocation2 + $0x60] sm:$0x1] %v17155_v62  ;;  %v4942_v46 = vmul.f32 %v13399_v27, %v17112_v4  ;;  %13424 = vrcp.f32 %v4786_v17  ;;  %12399 = vmatmul.mubr.f32.gmra.mxu0 %v17270_v55  ;;  %v5378_v60 = vrot.slane %v17216_v5, 1  ;;  %v4521_v26 = vmul.f32 %v16920_v48, %v4460_v12  ;;  %12199 = vmatprep.mubr.f32.mxu1 %v17279_v36  ;;  %v17286_v4 = vld [vmem:[#allocation2 + $0x48] sm:$0xff] }
 0x35e   : > { %v13403_v57 = vpop.eup %13402  ;;  %13426 = vrcp.f32 %v4785_v54  ;;  %v4788_v23 = vadd.f32 1.0, %v13401_v2  ;;  %v17282_v29 = vadd.f32 %v16939_v13, %v4518_v34  ;;  %v9792_v5 = vmul.f32 -1.442695, %v17275_v20  ;;  %v4328_v31 = vpop.f32.mrf.mxu0  ;;  %12200 = vmatmul.mubr.f32.gmra.mxu1 %v17286_v4 }
 0x35f   : > { %v13405_v22 = vpop.eup %13404  ;;  %4996 = vst [vmem:[#allocation2 + $0x78] sm:$0xff] %v4942_v46  ;;  %v4941_v49 = vmul.f32 %v13403_v57, %v17115_v58  ;;  %13428 = vpow2.f32 %v9789_v1  ;;  %v17291_v45 = vsel %vm735_vm1, %v5376_v38, %v5378_v60  ;;  %v17297_v17 = vadd.f32 %v16939_v13, %v4521_v26  ;;  %12202 = vmatprep.mubr.f32.mxu1 %v17241_v39  ;;  %v17311_v46 = vld [vmem:[#allocation2 + $0x58] sm:$0xff] }
 0x360   : > { %v13407_v6 = vpop.eup %13406  ;;  %5040 = vst [vmem:[#allocation2 + $0x78] sm:$0x1] %v17155_v62  ;;  %13430 = vrcp.f32 %v4788_v23  ;;  %v4787_v11 = vadd.f32 1.0, %v13405_v22  ;;  %v9791_v32 = vmul.f32 -1.442695, %v17282_v29  ;;  %12401 = vmatprep.mubr.f32.mxu0 %v17291_v45  ;;  %v4459_v1 = vadd.f32 %v4318_v21, %v17050_v25  ;;  %v12130_v54 = vpop.f32.mrf.mxu0 }
 0x361   : > { %v13409_v58 = vpop.eup %13408  ;;  %4995 = vst [vmem:[#allocation2 + $0x70] sm:$0xff] %v4941_v49  ;;  %v4944_v38 = vmul.f32 %v13407_v6, %v17125_v8  ;;  %13432 = vpow2.f32 %v9792_v5  ;;  %v4462_v27 = vadd.f32 %v12127_v30, %v21161_v61  ;;  %v9794_v12 = vmul.f32 -1.442695, %v17297_v17 }
 0x362   : > { %v13411_v34 = vpop.eup %13410  ;;  %5057 = vst [vmem:[#allocation2 + $0x71] sm:$0x1] %v17155_v62  ;;  %13434 = vrcp.f32 %v4787_v11  ;;  %v4790_v41 = vadd.f32 1.0, %v13409_v58  ;;  %v17309_v2 = vsel %vm735_vm1, %v5378_v60, %v5375_v33  ;;  %v4520_v21 = vmul.f32 %v16920_v48, %v4459_v1  ;;  %v4338_v57 = vpop.f32.mrf.mxu0  ;;  %12203 = vmatmul.mubr.f32.gmra.mxu1 %v17311_v46 }
 0x363   : > { %v13413_v8 = vpop.eup %13412  ;;  %4998 = vst [vmem:[#allocation2 + $0x88] sm:$0xff] %v4944_v38  ;;  %v4789_v25 = vadd.f32 1.0, %v13411_v34  ;;  %13436 = vpow2.f32 %v9791_v32  ;;  %v4523_v30 = vmul.f32 %v16920_v48, %v4462_v27  ;;  %12402 = vmatmul.mubr.f32.gmra.mxu0 %v17309_v2  ;;  %v5380_v33 = vrot.slane %v17247_v0, 1  ;;  %v21162_v27 = vld [vmem:[#allocation105_spill] sm:$0xff] }
 0x364   : > { %v13415_v23 = vpop.eup %13414  ;;  %5058 = vst [vmem:[#allocation2 + $0x89] sm:$0x1] %v17155_v62  ;;  %v17319_v51 = vmul.f32 %v13413_v8, %v17137_v50  ;;  %13438 = vrcp.f32 %v4790_v41  ;;  %v5381_v60 = vrot.slane %v17183_v16, 1  ;;  %v17323_v26 = vld [vmem:[#allocation2 + $0x60] sm:$0xff]  ;;  %v17326_v49 = vadd.f32 %v16939_v13, %v4520_v21  ;;  %v12133_v6 = vpop.f32.mrf.mxu0 }
 0x365   : > { %v13417_v22 = vpop.eup %13416  ;;  %13440 = vrcp.f32 %v4789_v25  ;;  %v4792_v48 = vadd.f32 1.0, %v13415_v23  ;;  %v17329_v5 = vadd.f32 %v16939_v13, %v4523_v30  ;;  %12205 = vmatprep.mubr.f32.mxu1 %v17323_v26  ;;  %v4461_v11 = vadd.f32 %v4328_v31, %v17061_v44  ;;  %v17349_v44 = vld [vmem:[%s16872_s15] ss:$0 sm:$0xff]  ;;  %v21163_v25 = vld [vmem:[#allocation76_spill] sm:$0xff] }
 0x366   : > { %v13419_v50 = vpop.eup %13418  ;;  %4997 = vst [vmem:[#allocation2 + $0x80] sm:$0xff] %v17319_v51  ;;  %v17334_v16 = vmul.f32 %v13417_v22, %v17144_v15  ;;  %13442 = vpow2.f32 %v9794_v12  ;;  %v17337_v0 = vsel %vm735_vm1, %v5380_v33, %v5381_v60  ;;  %v9793_v58 = vmul.f32 -1.442695, %v17326_v49  ;;  %v17343_v1 = vpop.f32.mrf.mxu0  ;;  %12206 = vmatmul.mubr.f32.gmra.mxu1 %v17251_v40 }
 0x367   : > { %v13421_v32 = vpop.eup %13420  ;;  %13444 = vrcp.f32 %v4792_v48  ;;  %v4791_v13 = vadd.f32 1.0, %v13419_v50  ;;  %v9796_v38 = vmul.f32 -1.442695, %v17329_v5  ;;  %12404 = vmatprep.mubr.f32.mxu0 %v17337_v0  ;;  %v4522_v31 = vmul.f32 %v17349_v44, %v4461_v11 }
 0x368   : > { %v13423_v15 = vpop.eup %13422  ;;  %5000 = vst [vmem:[#allocation2 + $0x98] sm:$0xff] %v17334_v16  ;;  %v4945_v61 = vmul.f32 %v13421_v32, %v17148_v7  ;;  %v4464_v34 = vadd.f32 %v12130_v54, %v21162_v27  ;;  %v5383_v41 = vrot.slane %v17279_v36, 1  ;;  %v4463_v8 = vadd.f32 %v4338_v57, %v17064_v14  ;;  %v17356_v30 = vpop.f32.mrf.mxu0  ;;  %v17361_v7 = vld [vmem:[%s16901_s23] ss:$0 sm:$0xff]  ;;  %v17371_v14 = vld [vmem:[#allocation2 + $0x78] sm:$0xff]  ;;  %s14021_s23 = scalar_lea.vmem %s14020_s11, 12288 }
 0x369   : > { %13446 = vrcp.f32 %v4791_v13  ;;  %v4794_v12 = vadd.f32 1.0, %v13423_v15  ;;  %v4466_v21 = vadd.f32 %v12133_v6, %v21163_v25  ;;  %v17358_v23 = vld [vmem:[#allocation2 + $0x70] sm:$0xff]  ;;  %v17364_v48 = vadd.f32 %v17361_v7, %v4522_v31 }
 0x36a   : > { %v13425_v22 = vpop.eup %13424  ;;  %4999 = vst [vmem:[#allocation2 + $0x90] sm:$0xff] %v4945_v61  ;;  %13448 = vpow2.f32 %v9793_v58  ;;  %v4525_v36 = vmul.f32 %v17349_v44, %v4464_v34  ;;  %v17368_v54 = vsel %vm735_vm1, %v5381_v60, %v5383_v41  ;;  %12208 = vmatprep.mubr.f32.mxu1 %v17358_v23  ;;  %v17377_v50 = vsel %vm735_vm1, %v5383_v41, %v5380_v33  ;;  %v17380_v32 = vpop.f32.mrf.mxu0 }
 0x36b   : > { %v13427_v57 = vpop.eup %13426  ;;  %5041 = vst [vmem:[#allocation2 + $0x90] sm:$0x1] %v17155_v62  ;;  %v4948_v6 = vmul.f32 %v13425_v22, %v17160_v10  ;;  %13450 = vrcp.f32 %v4794_v12  ;;  %12405 = vmatmul.mubr.f32.gmra.mxu0 %v17368_v54  ;;  %21164 = vst [vmem:[#allocation123_spill] sm:$0xff] %v17377_v50  ;;  %v4524_v11 = vmul.f32 %v17349_v44, %v4463_v8  ;;  %12209 = vmatmul.mubr.f32.gmra.mxu1 %v17371_v14  ;;  %v17401_v8 = vld [vmem:[#allocation2 + $0x88] sm:$0xff] }
 0x36c   : > { %v13429_v60 = vpop.eup %13428  ;;  %v4947_v13 = vmul.f32 %v13427_v57, %v17169_v35  ;;  %13452 = vpow2.f32 %v9796_v38  ;;  %v9795_v58 = vmul.f32 -1.442695, %v17364_v48  ;;  %v17386_v10 = vadd.f32 %v17361_v7, %v4525_v36  ;;  %12407 = vmatprep.mubr.f32.mxu0 %v17377_v50  ;;  %12211 = vmatprep.mubr.f32.mxu1 %v17319_v51  ;;  %v17395_v38 = vpop.f32.mrf.mxu0 }
 0x36d   : > { %v13431_v33 = vpop.eup %13430  ;;  %5002 = vst [vmem:[#allocation2 + $0xa8] sm:$0xff] %v4948_v6  ;;  %v4793_v15 = vadd.f32 1.0, %v13429_v60  ;;  %v17391_v61 = vadd.f32 %v17361_v7, %v4524_v11  ;;  %v4527_v31 = vmul.f32 %v17349_v44, %v4466_v21  ;;  %v5385_v35 = vrot.slane %v17286_v4, 1 }
 0x36e   : > { %v13433_v27 = vpop.eup %13432  ;;  %5042 = vst [vmem:[#allocation2 + $0xa8] sm:$0x1] %v17155_v62  ;;  %5001 = vst [vmem:[#allocation2 + $0xa0] sm:$0xff] %v4947_v13  ;;  %v4950_v34 = vmul.f32 %v13431_v33, %v17180_v19  ;;  %13454 = vpow2.f32 %v9795_v58  ;;  %v9798_v41 = vmul.f32 -1.442695, %v17386_v10  ;;  %v5386_v12 = vrot.slane %v17241_v39, 1  ;;  %v17408_v36 = vpop.f32.mrf.mxu0 }
 0x36f   : > { %v13435_v25 = vpop.eup %13434  ;;  %5059 = vst [vmem:[#allocation2 + $0xa1] sm:$0x1] %v17155_v62  ;;  %13456 = vrcp.f32 %v4793_v15  ;;  %v4796_v4 = vadd.f32 1.0, %v13433_v27  ;;  %v9797_v21 = vmul.f32 -1.442695, %v17391_v61  ;;  %v17406_v22 = vadd.f32 %v17361_v7, %v4527_v31  ;;  %12212 = vmatmul.mubr.f32.gmra.mxu1 %v17401_v8  ;;  %v21167_v31 = vld [vmem:[#allocation106_spill] sm:$0xff] }
 0x370   : > { %v13437_v19 = vpop.eup %13436  ;;  %5004 = vst [vmem:[#allocation2 + $0xb8] sm:$0xff] %v4950_v34  ;;  %v17412_v39 = vmul.f32 %v13435_v25, %v17186_v63  ;;  %13458 = vpow2.f32 %v9798_v41  ;;  %v17415_v57 = vsel %vm735_vm1, %v5385_v35, %v5386_v12  ;;  %v5388_v6 = vrot.slane %v17311_v46, 1  ;;  %v17423_v63 = vpop.f32.mrf.mxu0 }
 0x371   : > { %21165 = vst [vmem:[#allocation84_spill] sm:$0xff] %v17415_v57  ;;  %v13439_v11 = vpop.eup %13438  ;;  %5060 = vst [vmem:[#allocation2 + $0xb9] sm:$0x1] %v17155_v62  ;;  %13460 = vrcp.f32 %v4796_v4  ;;  %v4795_v60 = vadd.f32 1.0, %v13437_v19  ;;  %v9800_v13 = vmul.f32 -1.442695, %v17406_v22  ;;  %12408 = vmatmul.mubr.f32.gmra.mxu0 %v17415_v57  ;;  %v4465_v58 = vadd.f32 %v17343_v1, %v17072_v52 }
 0x372   : > { %v13441_v33 = vpop.eup %13440  ;;  %5003 = vst [vmem:[#allocation2 + $0xb0] sm:$0xff] %v17412_v39  ;;  %v17427_v15 = vmul.f32 %v13439_v11, %v17196_v24  ;;  %13462 = vpow2.f32 %v9797_v21  ;;  %v17430_v46 = vsel %vm735_vm1, %v5386_v12, %v5388_v6  ;;  %v4468_v27 = vadd.f32 %v17356_v30, %v21167_v31  ;;  %v17434_v34 = vld [vmem:[#allocation2 + $0x90] sm:$0xff]  ;;  %v17443_v12 = vpop.f32.mrf.mxu0 }
 0x373   : > { %21166 = vst [vmem:[#allocation124_spill] sm:$0xff] %v17430_v46  ;;  %v13443_v41 = vpop.eup %13442  ;;  %v4951_v52 = vmul.f32 %v13441_v33, %v17209_v47  ;;  %13464 = vrcp.f32 %v4795_v60  ;;  %12410 = vmatprep.mubr.f32.mxu0 %v17430_v46  ;;  %v4526_v1 = vmul.f32 %v17349_v44, %v4465_v58  ;;  %v17440_v24 = vsel %vm735_vm1, %v5388_v6, %v5385_v35 }
 0x374   : > { %21168 = vst [vmem:[#allocation85_spill] sm:$0xff] %v17440_v24  ;;  %12214 = vmatprep.mubr.f32.mxu1 %v17434_v34  ;;  %v13445_v25 = vpop.eup %13444  ;;  %5006 = vst [vmem:[#allocation2 + $0xc8] sm:$0xff] %v17427_v15  ;;  %v4798_v30 = vadd.f32 1.0, %v13443_v41  ;;  %13466 = vpow2.f32 %v9800_v13  ;;  %v4529_v4 = vmul.f32 %v17349_v44, %v4468_v27  ;;  %v5390_v47 = vrot.slane %v17323_v26, 1  ;;  %v17457_v11 = vpop.f32.mrf.mxu0 }
 0x375   : > { %12215 = vmatmul.mubr.f32.gmra.mxu1 %v17334_v16  ;;  %5005 = vst [vmem:[#allocation2 + $0xc0] sm:$0xff] %v4951_v52  ;;  %v4954_v21 = vmul.f32 %v13445_v25, %v17222_v43  ;;  %v17451_v35 = vadd.f32 %v17361_v7, %v4526_v1  ;;  %12411 = vmatmul.mubr.f32.gmra.mxu0 %v17440_v24  ;;  %v5391_v19 = vrot.slane %v17251_v40, 1  ;;  %v21169_v43 = vld [vmem:[#allocation77_spill] sm:$0xff]  ;;  %v5393_v58 = vrot.slane %v17358_v23, 1 }
 0x376   : > { %v4467_v6 = vadd.f32 %v17380_v32, %v17085_v42  ;;  %v13447_v60 = vpop.eup %13446  ;;  %5043 = vst [vmem:[#allocation2 + $0xc0] sm:$0x1] %v17155_v62  ;;  %13468 = vrcp.f32 %v4798_v30  ;;  %v17461_v26 = vadd.f32 %v17361_v7, %v4529_v4  ;;  %v4470_v13 = vadd.f32 %v17395_v38, %v21169_v43  ;;  %v17466_v33 = vld [vmem:[#allocation2 + $0xa0] sm:$0xff]  ;;  %v17475_v41 = vpop.f32.mrf.mxu0  ;;  %v17477_v38 = vld [vmem:[#allocation2 + $0xa8] sm:$0xff] }
 0x377   : > { %v13449_v40 = vpop.eup %13448  ;;  %5008 = vst [vmem:[#allocation2 + $0xd8] sm:$0xff] %v4954_v21  ;;  %v4953_v42 = vmul.f32 %v13447_v60, %v17226_v37  ;;  %v9799_v32 = vmul.f32 -1.442695, %v17451_v35  ;;  %v17471_v31 = vsel %vm735_vm1, %v5390_v47, %v5391_v19  ;;  %12217 = vmatprep.mubr.f32.mxu1 %v17466_v33  ;;  %v17484_v25 = vsel %vm735_vm1, %v5391_v19, %v5393_v58 }
 0x378   : > { %21170 = vst [vmem:[#allocation127_spill] sm:$0xff] %v17471_v31  ;;  %v4528_v27 = vmul.f32 %v17349_v44, %v4467_v6  ;;  %v13451_v23 = vpop.eup %13450  ;;  %5044 = vst [vmem:[#allocation2 + $0xd8] sm:$0x1] %v17155_v62  ;;  %v4797_v52 = vadd.f32 1.0, %v13449_v40  ;;  %v9802_v1 = vmul.f32 -1.442695, %v17461_v26  ;;  %12413 = vmatprep.mubr.f32.mxu0 %v17471_v31  ;;  %v4531_v37 = vmul.f32 %v17349_v44, %v4470_v13  ;;  %v17496_v60 = vpop.f32.mrf.mxu0 }
 0x379   : > { %21171 = vst [vmem:[#allocation87_spill] sm:$0xff] %v17484_v25  ;;  %12218 = vmatmul.mubr.f32.gmra.mxu1 %v17477_v38  ;;  %v13453_v30 = vpop.eup %13452  ;;  %5007 = vst [vmem:[#allocation2 + $0xd0] sm:$0xff] %v4953_v42  ;;  %v4956_v4 = vmul.f32 %v13451_v23, %v17235_v3  ;;  %13470 = vpow2.f32 %v9799_v32  ;;  %12414 = vmatmul.mubr.f32.gmra.mxu0 %v17484_v25  ;;  %v17493_v6 = vsel %vm735_vm1, %v5393_v58, %v5390_v47  ;;  %v21173_v58 = vld [vmem:[#allocation109_spill] sm:$0xff]  ;;  %v13804_v31 = vld [vmem:[#allocation2 + $0x78] sm:$0xff] }
 0x37a   : > { %v17489_v21 = vadd.f32 %v17361_v7, %v4528_v27  ;;  %21172 = vst [vmem:[#allocation132_spill] sm:$0xff] %v17493_v6  ;;  %12220 = vmatprep.mubr.f32.mxu1 %v17412_v39  ;;  %5061 = vst [vmem:[#allocation2 + $0xd1] sm:$0x1] %v17155_v62  ;;  %13472 = vrcp.f32 %v4797_v52  ;;  %v4800_v19 = vadd.f32 1.0, %v13453_v30  ;;  %v17500_v43 = vadd.f32 %v17361_v7, %v4531_v37  ;;  %v17509_v32 = vpop.f32.mrf.mxu0  ;;  %v17511_v27 = vld [vmem:[#allocation2 + $0xb8] sm:$0xff] }
 0x37b   : > { %12416 = vmatprep.mubr.f32.mxu0 %v17493_v6  ;;  %v4469_v3 = vadd.f32 %v17408_v36, %v17092_v9  ;;  %v13455_v13 = vpop.eup %13454  ;;  %5010 = vst [vmem:[#allocation2 + $0xe8] sm:$0xff] %v4956_v4  ;;  %13474 = vpow2.f32 %v9802_v1  ;;  %v4472_v40 = vadd.f32 %v17423_v63, %v21173_v58  ;;  %v5395_v42 = vrot.slane %v17371_v14, 1 }
 0x37c   : > { %v9801_v47 = vmul.f32 -1.442695, %v17489_v21  ;;  %v13457_v23 = vpop.eup %13456  ;;  %5062 = vst [vmem:[#allocation2 + $0xe9] sm:$0x1] %v17155_v62  ;;  %13476 = vrcp.f32 %v4800_v19  ;;  %v4799_v52 = vadd.f32 1.0, %v13455_v13  ;;  %v5396_v37 = vrot.slane %v17319_v51, 1  ;;  %v17522_v30 = vpop.f32.mrf.mxu0 }
 0x37d   : > { %v9804_v9 = vmul.f32 -1.442695, %v17500_v43  ;;  %v4530_v36 = vmul.f32 %v17349_v44, %v4469_v3  ;;  %12221 = vmatmul.mubr.f32.gmra.mxu1 %v17511_v27  ;;  %v13459_v1 = vpop.eup %13458  ;;  %v17518_v63 = vmul.f32 %v13457_v23, %v17254_v18  ;;  %v4533_v14 = vmul.f32 %v17349_v44, %v4472_v40  ;;  %v17524_v4 = vld [vmem:[#allocation2 + $0xc0] sm:$0xff] }
 0x37e   : > { %13478 = vpow2.f32 %v9801_v47  ;;  %v13461_v19 = vpop.eup %13460  ;;  %v4802_v13 = vadd.f32 1.0, %v13459_v1  ;;  %v5398_v58 = vrot.slane %v17401_v8, 1  ;;  %12223 = vmatprep.mubr.f32.mxu1 %v17524_v4  ;;  %v17539_v40 = vsel %vm735_vm1, %v5395_v42, %v5396_v37  ;;  %v17541_v23 = vpop.f32.mrf.mxu0 }
 0x37f   : > { %13480 = vrcp.f32 %v4799_v52  ;;  %v17527_v3 = vadd.f32 %v17361_v7, %v4530_v36  ;;  %v13463_v18 = vpop.eup %13462  ;;  %5009 = vst [vmem:[#allocation2 + $0xe0] sm:$0xff] %v17518_v63  ;;  %v17533_v47 = vmul.f32 %v13461_v19, %v17275_v20  ;;  %v17536_v51 = vadd.f32 %v17361_v7, %v4533_v14  ;;  %21174 = vst [vmem:[#allocation88_spill] sm:$0xff] %v17539_v40 }
 0x380   : > { %13482 = vpow2.f32 %v9804_v9  ;;  %v13465_v52 = vpop.eup %13464  ;;  %v4801_v8 = vadd.f32 1.0, %v13463_v18  ;;  %12417 = vmatmul.mubr.f32.gmra.mxu0 %v17539_v40  ;;  %v17546_v1 = vsel %vm735_vm1, %v5396_v37, %v5398_v58  ;;  %v4471_v19 = vadd.f32 %v17443_v12, %v17119_v53  ;;  %v17557_v40 = vpop.f32.mrf.mxu0 }
 0x381   : > { %13484 = vrcp.f32 %v4802_v13  ;;  %v9803_v36 = vmul.f32 -1.442695, %v17527_v3  ;;  %21175 = vst [vmem:[#allocation133_spill] sm:$0xff] %v17546_v1  ;;  %12224 = vmatmul.mubr.f32.gmra.mxu1 %v17427_v15  ;;  %v13467_v20 = vpop.eup %13466  ;;  %5012 = vst [vmem:[#allocation2 + $0xf8] sm:$0xff] %v17533_v47  ;;  %v4957_v9 = vmul.f32 %v13465_v52, %v17282_v29  ;;  %v9806_v14 = vmul.f32 -1.442695, %v17536_v51  ;;  %12419 = vmatprep.mubr.f32.mxu0 %v17546_v1 }
 0x382   : > { %v21176_v13 = vld [vmem:[#allocation78_spill] sm:$0xff]  ;;  %v17559_v37 = vld [vmem:[#allocation2 + $0xd0] sm:$0xff]  ;;  %13486 = vrcp.f32 %v4801_v8  ;;  %v4804_v6 = vadd.f32 1.0, %v13467_v20  ;;  %v17562_v25 = vsel %vm735_vm1, %v5398_v58, %v5395_v42  ;;  %v5400_v29 = vrot.slane %v17434_v34, 1  ;;  %v17569_v1 = vld [vmem:[#allocation2 + $0xd8] sm:$0xff] }
 0x383   : > { %v4474_v18 = vadd.f32 %v17457_v11, %v21176_v13  ;;  %21177 = vst [vmem:[#allocation89_spill] sm:$0xff] %v17562_v25  ;;  %12226 = vmatprep.mubr.f32.mxu1 %v17559_v37  ;;  %v13469_v52 = vpop.eup %13468  ;;  %5011 = vst [vmem:[#allocation2 + $0xf0] sm:$0xff] %v4957_v9  ;;  %13488 = vpow2.f32 %v9803_v36  ;;  %v4532_v53 = vmul.f32 %v17349_v44, %v4471_v19  ;;  %v5401_v11 = vrot.slane %v17334_v16, 1  ;;  %v4418_v13 = vpop.f32.mrf.mxu0  ;;  %v21178_v8 = vld [vmem:[#allocation79_spill] sm:$0xff] }
 0x384   : > { %5045 = vst [vmem:[#allocation2 + $0xf0] sm:$0x1] %v17155_v62  ;;  %v4960_v42 = vmul.f32 %v13469_v52, %v17297_v17  ;;  %13490 = vrcp.f32 %v4804_v6  ;;  %12420 = vmatmul.mubr.f32.gmra.mxu0 %v17562_v25  ;;  %v4473_v58 = vadd.f32 %v17475_v41, %v17128_v56  ;;  %v4476_v36 = vadd.f32 %v17496_v60, %v21178_v8 }
 0x385   : > { %v4535_v12 = vmul.f32 %v17349_v44, %v4474_v18  ;;  %12227 = vmatmul.mubr.f32.gmra.mxu1 %v17569_v1  ;;  %13492 = vpow2.f32 %v9806_v14  ;;  %v17580_v16 = vadd.f32 %v17361_v7, %v4532_v53  ;;  %v17586_v17 = vsel %vm735_vm1, %v5400_v29, %v5401_v11  ;;  %v17595_v14 = vld [vmem:[#allocation2 + $0xe8] sm:$0xff] }
 0x386   : > { %21179 = vst [vmem:[#allocation136_spill] sm:$0xff] %v17586_v17  ;;  %12229 = vmatprep.mubr.f32.mxu1 %v17518_v63  ;;  %v13471_v6 = vpop.eup %13470  ;;  %5014 = vst [vmem:[#allocation2 + $0x108] sm:$0xff] %v4960_v42  ;;  %12422 = vmatprep.mubr.f32.mxu0 %v17586_v17  ;;  %v4534_v56 = vmul.f32 %v17349_v44, %v4473_v58  ;;  %v4537_v41 = vmul.f32 %v17349_v44, %v4476_v36  ;;  %v5403_v60 = vrot.slane %v17466_v33, 1  ;;  %v17602_v42 = vld [vmem:[#allocation8 + $0x378] sm:$0xff] }
 0x387   : > { %v17583_v20 = vadd.f32 %v17361_v7, %v4535_v12  ;;  %v4475_v9 = vadd.f32 %v17509_v32, %v17153_v59  ;;  %v13473_v19 = vpop.eup %13472  ;;  %5046 = vst [vmem:[#allocation2 + $0x108] sm:$0x1] %v17155_v62  ;;  %v4803_v18 = vadd.f32 1.0, %v13471_v6  ;;  %v9805_v52 = vmul.f32 -1.442695, %v17580_v16  ;;  %v21180_v12 = vld [vmem:[#allocation80_spill] sm:$0xff]  ;;  %12779 = vmatprep.subr.mxu0 %v17602_v42 }
 0x388   : > { %v4478_v13 = vadd.f32 %v17522_v30, %v21180_v12  ;;  %v13475_v58 = vpop.eup %13474  ;;  %v4959_v8 = vmul.f32 %v13473_v19, %v17326_v49  ;;  %v17606_v59 = vadd.f32 %v17361_v7, %v4534_v56  ;;  %v17609_v32 = vadd.f32 %v17361_v7, %v4537_v41  ;;  %v17625_v12 = vld [vmem:[#allocation2 + $0x8] sm:$0xff] }
 0x389   : > { %v9808_v53 = vmul.f32 -1.442695, %v17583_v20  ;;  %v17612_v62 = vsel %vm735_vm1, %v5401_v11, %v5403_v60  ;;  %12230 = vmatmul.mubr.f32.gmra.mxu1 %v17595_v14  ;;  %v13477_v36 = vpop.eup %13476  ;;  %13494 = vrcp.f32 %v4803_v18  ;;  %v4806_v6 = vadd.f32 1.0, %v13475_v58 }
 0x38a   : > { %21181 = vst [vmem:[#allocation91_spill] sm:$0xff] %v17612_v62  ;;  %12423 = vmatmul.mubr.f32.gmra.mxu0 %v17612_v62  ;;  %v17617_v30 = vsel %vm735_vm1, %v5403_v60, %v5400_v29  ;;  %v4536_v49 = vmul.f32 %v17349_v44, %v4475_v9  ;;  %5013 = vst [vmem:[#allocation2 + $0x100] sm:$0xff] %v4959_v8  ;;  %v4962_v41 = vmul.f32 %v13477_v36, %v17329_v5 }
 0x38b   : > { %21182 = vst [vmem:[#allocation128_spill] sm:$0xff] %v17617_v30  ;;  %v13479_v56 = vpop.eup %13478  ;;  %13496 = vpow2.f32 %v9805_v52  ;;  %v9807_v11 = vmul.f32 -1.442695, %v17606_v59  ;;  %v9810_v19 = vmul.f32 -1.442695, %v17609_v32  ;;  %12425 = vmatprep.mubr.f32.mxu0 %v17617_v30  ;;  %v4539_v9 = vmul.f32 %v17349_v44, %v4478_v13  ;;  %v17632_v5 = vld [vmem:[#allocation2 + $0xf0] sm:$0xff] }
 0x38c   : > { %v13481_v18 = vpop.eup %13480  ;;  %5063 = vst [vmem:[#allocation2 + $0x101] sm:$0x1] %v17625_v12  ;;  %13498 = vrcp.f32 %v4806_v6  ;;  %v4805_v29 = vadd.f32 1.0, %v13479_v56  ;;  %v17629_v60 = vadd.f32 %v17361_v7, %v4536_v49  ;;  %5016 = vst [vmem:[#allocation2 + $0x118] sm:$0xff] %v4962_v41  ;;  %v5405_v8 = vrot.slane %v17477_v38, 1  ;;  %12232 = vmatprep.mubr.f32.mxu1 %v17632_v5 }
 0x38d   : > { %v13483_v52 = vpop.eup %13482  ;;  %v17635_v58 = vmul.f32 %v13481_v18, %v17364_v48  ;;  %13500 = vpow2.f32 %v9808_v53  ;;  %v5406_v36 = vrot.slane %v17412_v39, 1  ;;  %5064 = vst [vmem:[#allocation2 + $0x119] sm:$0x1] %v17625_v12  ;;  %v4600_v56 = vadd.f32 %v17361_v7, %v4539_v9  ;;  %12233 = vmatmul.mubr.f32.gmra.mxu1 %v17533_v47  ;;  %v21184_v9 = vld [vmem:[#allocation118_spill] sm:$0xff] }
 0x38e   : > { %v13485_v6 = vpop.eup %13484  ;;  %13502 = vrcp.f32 %v4805_v29  ;;  %v4808_v49 = vadd.f32 1.0, %v13483_v52  ;;  %v9809_v13 = vmul.f32 -1.442695, %v17629_v60  ;;  %v5408_v53 = vrot.slane %v17511_v27, 1 }
 0x38f   : > { %5015 = vst [vmem:[#allocation2 + $0x110] sm:$0xff] %v17635_v58  ;;  %v17646_v48 = vmul.f32 %v13485_v6, %v17386_v10  ;;  %13504 = vpow2.f32 %v9807_v11  ;;  %v17649_v39 = vsel %vm735_vm1, %v5405_v8, %v5406_v36  ;;  %v13487_v41 = vpop.eup %13486  ;;  %v9812_v18 = vmul.f32 -1.442695, %v4600_v56 }
 0x390   : > { %21183 = vst [vmem:[#allocation141_spill] sm:$0xff] %v17649_v39  ;;  %13506 = vrcp.f32 %v4808_v49  ;;  %12426 = vmatmul.mubr.f32.gmra.mxu0 %v17649_v39  ;;  %v4477_v29 = vadd.f32 %v17541_v23, %v17238_v28  ;;  %v4480_v52 = vadd.f32 %v17557_v40, %v21184_v9  ;;  %v13489_v30 = vpop.eup %13488  ;;  %v4963_v10 = vmul.f32 %v13487_v41, %v17391_v61 }
 0x391   : > { %5018 = vst [vmem:[#allocation2 + $0x128] sm:$0xff] %v17646_v48  ;;  %13508 = vpow2.f32 %v9810_v19  ;;  %v17660_v11 = vsel %vm735_vm1, %v5406_v36, %v5408_v53  ;;  %v17663_v6 = vsel %vm735_vm1, %v5408_v53, %v5405_v8  ;;  %v13491_v49 = vpop.eup %13490  ;;  %v4807_v56 = vadd.f32 1.0, %v13489_v30 }
 0x392   : > { %21185 = vst [vmem:[#allocation93_spill] sm:$0xff] %v17660_v11  ;;  %21186 = vst [vmem:[#allocation130_spill] sm:$0xff] %v17663_v6  ;;  %13510 = vpow2.f32 %v9809_v13  ;;  %12428 = vmatprep.mubr.f32.mxu0 %v17660_v11  ;;  %v4538_v28 = vmul.f32 %v17349_v44, %v4477_v29  ;;  %v4541_v40 = vmul.f32 %v17349_v44, %v4480_v52  ;;  %v13493_v23 = vpop.eup %13492  ;;  %v5410_v19 = vrot.slane %v17524_v4, 1  ;;  %v6573_v11 = vld [vmem:[#allocation8 + $0x1c8] sm:$0xff] }
 0x393   : > { %5017 = vst [vmem:[#allocation2 + $0x120] sm:$0xff] %v4963_v10  ;;  %v4966_v61 = vmul.f32 %v13491_v49, %v17406_v22  ;;  %13512 = vpow2.f32 %v9812_v18  ;;  %v5411_v36 = vrot.slane %v17427_v15, 1  ;;  %v17671_v8 = vld [vmem:[#allocation2 + $0x100] sm:$0xff]  ;;  %v4810_v30 = vadd.f32 1.0, %v13493_v23  ;;  %v17680_v22 = vld [vmem:[#allocation2 + $0x108] sm:$0xff] }
 0x394   : > { %5047 = vst [vmem:[#allocation2 + $0x120] sm:$0x1] %v17625_v12  ;;  %13514 = vrcp.f32 %v4807_v56  ;;  %v17675_v13 = vadd.f32 %v17361_v7, %v4538_v28  ;;  %v4602_v44 = vadd.f32 %v17361_v7, %v4541_v40  ;;  %12429 = vmatmul.mubr.f32.gmra.mxu0 %v17663_v6  ;;  %12235 = vmatprep.mubr.f32.mxu1 %v17671_v8  ;;  %v5413_v53 = vrot.slane %v17559_v37, 1  ;;  %v17701_v28 = vld [vmem:[#allocation2 + $0x118] sm:$0xff] }
 0x395   : > { %5020 = vst [vmem:[#allocation2 + $0x138] sm:$0xff] %v4966_v61  ;;  %v17683_v15 = vsel %vm735_vm1, %v5410_v19, %v5411_v36  ;;  %12236 = vmatmul.mubr.f32.gmra.mxu1 %v17680_v22  ;;  %13516 = vrcp.f32 %v4810_v30  ;;  %v5415_v52 = vrot.slane %v17569_v1, 1  ;;  %v5418_v56 = vrot.slane %v17595_v14, 1 }
 0x396   : > { %21187 = vst [vmem:[#allocation142_spill] sm:$0xff] %v17683_v15  ;;  %5048 = vst [vmem:[#allocation2 + $0x138] sm:$0x1] %v17625_v12  ;;  %v9811_v41 = vmul.f32 -1.442695, %v17675_v13  ;;  %12431 = vmatprep.mubr.f32.mxu0 %v17683_v15  ;;  %12238 = vmatprep.mubr.f32.mxu1 %v17635_v58  ;;  %v13495_v18 = vpop.eup %13494  ;;  %v17692_v29 = vsel %vm735_vm1, %v5411_v36, %v5413_v53  ;;  %v17695_v9 = vsel %vm735_vm1, %v5413_v53, %v5410_v19  ;;  %v13798_v15 = vld [vmem:[#allocation2 + $0x48] sm:$0xff] }
 0x397   : > { %v9814_v7 = vmul.f32 -1.442695, %v4602_v44  ;;  %21188 = vst [vmem:[#allocation95_spill] sm:$0xff] %v17692_v29  ;;  %21189 = vst [vmem:[#allocation134_spill] sm:$0xff] %v17695_v9  ;;  %v4965_v49 = vmul.f32 %v13495_v18, %v17451_v35  ;;  %v5416_v61 = vrot.slane %v17518_v63, 1  ;;  %v5420_v36 = vrot.slane %v17632_v5, 1 }
 0x398   : > { %v13497_v10 = vpop.eup %13496  ;;  %13518 = vpow2.f32 %v9811_v41  ;;  %12432 = vmatmul.mubr.f32.gmra.mxu0 %v17692_v29  ;;  %v5238_v6 = vrot.slane %v13798_v15, 7  ;;  %v5246_v24 = vrot.slane %v13804_v31, 7 }
 0x399   : > { %v13499_v40 = vpop.eup %13498  ;;  %v4809_v23 = vadd.f32 1.0, %v13497_v10  ;;  %13520 = vpow2.f32 %v9814_v7  ;;  %12434 = vmatprep.mubr.f32.mxu0 %v17695_v9  ;;  %12239 = vmatmul.mubr.f32.gmra.mxu1 %v17701_v28  ;;  %5019 = vst [vmem:[#allocation2 + $0x130] sm:$0xff] %v4965_v49  ;;  %v17710_v53 = vsel %vm735_vm1, %v5415_v52, %v5416_v61  ;;  %v5421_v10 = vrot.slane %v17533_v47, 1 }
 0x39a   : > { %v13501_v19 = vpop.eup %13500  ;;  %v4968_v35 = vmul.f32 %v13499_v40, %v17461_v26  ;;  %5065 = vst [vmem:[#allocation2 + $0x131] sm:$0x1] %v17625_v12  ;;  %21190 = vst [vmem:[#allocation90_spill] sm:$0xff] %v17710_v53  ;;  %v17719_v26 = vsel %vm735_vm1, %v5416_v61, %v5418_v56 }
 0x39b   : > { %v13503_v30 = vpop.eup %13502  ;;  %13522 = vrcp.f32 %v4809_v23  ;;  %v4812_v44 = vadd.f32 1.0, %v13501_v19  ;;  %v17712_v41 = vld [vmem:[#allocation2 + $0x120] sm:$0xff]  ;;  %21191 = vst [vmem:[#allocation166_spill] sm:$0xff] %v17719_v26  ;;  %v5423_v23 = vrot.slane %v17671_v8, 1  ;;  %v17732_v19 = vsel %vm735_vm1, %v5420_v36, %v5421_v10 }
 0x39c   : > { %v13505_v7 = vpop.eup %13504  ;;  %5022 = vst [vmem:[#allocation2 + $0x148] sm:$0xff] %v4968_v35  ;;  %v17715_v18 = vmul.f32 %v13503_v30, %v17489_v21  ;;  %12435 = vmatmul.mubr.f32.gmra.mxu0 %v17710_v53  ;;  %12241 = vmatprep.mubr.f32.mxu1 %v17712_v41  ;;  %21192 = vst [vmem:[#allocation99_spill] sm:$0xff] %v17732_v19 }
 0x39d   : > { %v13507_v49 = vpop.eup %13506  ;;  %5066 = vst [vmem:[#allocation2 + $0x149] sm:$0x1] %v17625_v12  ;;  %13524 = vrcp.f32 %v4812_v44  ;;  %v4811_v40 = vadd.f32 1.0, %v13505_v7  ;;  %12437 = vmatprep.mubr.f32.mxu0 %v17719_v26  ;;  %12242 = vmatmul.mubr.f32.gmra.mxu1 %v17646_v48  ;;  %v17735_v44 = vsel %vm735_vm1, %v5418_v56, %v5415_v52  ;;  %v17745_v52 = vsel %vm735_vm1, %v5423_v23, %v5420_v36 }
 0x39e   : > { %v13509_v21 = vpop.eup %13508  ;;  %5021 = vst [vmem:[#allocation2 + $0x140] sm:$0xff] %v17715_v18  ;;  %v17729_v61 = vmul.f32 %v13507_v49, %v17500_v43  ;;  %21193 = vst [vmem:[#allocation61_spill] sm:$0xff] %v17735_v44  ;;  %v17741_v43 = vsel %vm735_vm1, %v5421_v10, %v5423_v23 }
 0x39f   : > { %v13511_v35 = vpop.eup %13510  ;;  %13526 = vrcp.f32 %v4811_v40  ;;  %v4814_v30 = vadd.f32 1.0, %v13509_v21  ;;  %21194 = vst [vmem:[#allocation145_spill] sm:$0xff] %v17741_v43  ;;  %21195 = vst [vmem:[#allocation102_spill] sm:$0xff] %v17745_v52  ;;  %v5425_v21 = vrot.slane %v17680_v22, 1 }
 0x3a0   : > { %v13513_v7 = vpop.eup %13512  ;;  %5024 = vst [vmem:[#allocation2 + $0x158] sm:$0xff] %v17729_v61  ;;  %v4813_v26 = vadd.f32 1.0, %v13511_v35  ;;  %12438 = vmatmul.mubr.f32.gmra.mxu0 %v17735_v44  ;;  %v17751_v35 = vld [vmem:[#allocation2 + $0x138] sm:$0xff]  ;;  %v6576_v44 = vld [vmem:[#allocation8 + $0x1e0] sm:$0xff] }
 0x3a1   : > { %v13515_v53 = vpop.eup %13514  ;;  %13528 = vrcp.f32 %v4814_v30  ;;  %v4816_v9 = vadd.f32 1.0, %v13513_v7  ;;  %12440 = vmatprep.mubr.f32.mxu0 %v17732_v19  ;;  %v17747_v56 = vld [vmem:[#allocation2 + $0x130] sm:$0xff] }
 0x3a2   : > { %v4969_v49 = vmul.f32 %v13515_v53, %v17527_v3  ;;  %13530 = vrcp.f32 %v4813_v26  ;;  %v13517_v40 = vpop.eup %13516  ;;  %12244 = vmatprep.mubr.f32.mxu1 %v17747_v56  ;;  %v5428_v3 = vrot.slane %v17701_v28, 1 }
 0x3a3   : > { %13532 = vrcp.f32 %v4816_v9  ;;  %v4972_v10 = vmul.f32 %v13517_v40, %v17536_v51  ;;  %12245 = vmatmul.mubr.f32.gmra.mxu1 %v17751_v35  ;;  %v5426_v9 = vrot.slane %v17635_v58, 1  ;;  %v5430_v51 = vrot.slane %v17712_v41, 1 }
 0x3a4   : > { %5023 = vst [vmem:[#allocation2 + $0x150] sm:$0xff] %v4969_v49  ;;  %12441 = vmatmul.mubr.f32.gmra.mxu0 %v17741_v43  ;;  %12247 = vmatprep.mubr.f32.mxu1 %v17715_v18  ;;  %v17766_v7 = vld [vmem:[#allocation2 + $0x148] sm:$0xff] }
 0x3a5   : > { %v13519_v36 = vpop.eup %13518  ;;  %5049 = vst [vmem:[#allocation2 + $0x150] sm:$0x1] %v17625_v12  ;;  %12443 = vmatprep.mubr.f32.mxu0 %v17745_v52  ;;  %5026 = vst [vmem:[#allocation2 + $0x168] sm:$0xff] %v4972_v10  ;;  %v17764_v30 = vsel %vm735_vm1, %v5425_v21, %v5426_v9  ;;  %v17770_v40 = vsel %vm735_vm1, %v5426_v9, %v5428_v3  ;;  %v5431_v10 = vrot.slane %v17646_v48, 1 }
 0x3a6   : > { %v13521_v53 = vpop.eup %13520  ;;  %v4815_v26 = vadd.f32 1.0, %v13519_v36  ;;  %5050 = vst [vmem:[#allocation2 + $0x168] sm:$0x1] %v17625_v12  ;;  %21196 = vst [vmem:[#allocation62_spill] sm:$0xff] %v17764_v30  ;;  %v17782_v9 = vsel %vm735_vm1, %v5428_v3, %v5425_v21  ;;  %v5435_v3 = vrot.slane %v17751_v35, 1 }
 0x3a7   : > { %v4818_v23 = vadd.f32 1.0, %v13521_v53  ;;  %21197 = vst [vmem:[#allocation92_spill] sm:$0xff] %v17770_v40  ;;  %12248 = vmatmul.mubr.f32.gmra.mxu1 %v17766_v7  ;;  %v5433_v53 = vrot.slane %v17747_v56, 1  ;;  %v17778_v43 = vsel %vm735_vm1, %v5430_v51, %v5431_v10  ;;  %21199 = vst [vmem:[#allocation139_spill] sm:$0xff] %v17782_v9 }
 0x3a8   : > { %v13523_v49 = vpop.eup %13522  ;;  %13534 = vrcp.f32 %v4815_v26  ;;  %12444 = vmatmul.mubr.f32.gmra.mxu0 %v17764_v30  ;;  %21198 = vst [vmem:[#allocation104_spill] sm:$0xff] %v17778_v43 }
 0x3a9   : > { %v4971_v36 = vmul.f32 %v13523_v49, %v17580_v16  ;;  %13536 = vrcp.f32 %v4818_v23  ;;  %12446 = vmatprep.mubr.f32.mxu0 %v17770_v40  ;;  %v17793_v49 = vsel %vm735_vm1, %v5431_v10, %v5433_v53 }
 0x3aa   : > { %v13525_v52 = vpop.eup %13524  ;;  %21200 = vst [vmem:[#allocation149_spill] sm:$0xff] %v17793_v49 }
 0x3ab   : > { %5025 = vst [vmem:[#allocation2 + $0x160] sm:$0xff] %v4971_v36  ;;  %v4974_v26 = vmul.f32 %v13525_v52, %v17583_v20  ;;  %v17798_v52 = vsel %vm735_vm1, %v5433_v53, %v5430_v51  ;;  %v5438_v36 = vrot.slane %v17766_v7, 1  ;;  %v5436_v51 = vrot.slane %v17715_v18, 1 }
 0x3ac   : > { %v13527_v30 = vpop.eup %13526  ;;  %5067 = vst [vmem:[#allocation2 + $0x161] sm:$0x1] %v17625_v12  ;;  %12447 = vmatmul.mubr.f32.gmra.mxu0 %v17782_v9  ;;  %v17786_v16 = vld [vmem:[#allocation2 + $0x150] sm:$0xff]  ;;  %21201 = vst [vmem:[#allocation108_spill] sm:$0xff] %v17798_v52 }
 0x3ad   : > { %5028 = vst [vmem:[#allocation2 + $0x178] sm:$0xff] %v4974_v26  ;;  %v17789_v23 = vmul.f32 %v13527_v30, %v17606_v59  ;;  %12449 = vmatprep.mubr.f32.mxu0 %v17778_v43  ;;  %12250 = vmatprep.mubr.f32.mxu1 %v17786_v16  ;;  %v5440_v53 = vrot.slane %v17786_v16, 1  ;;  %v5226_v26 = vrot.slane %v17625_v12, 7 }
 0x3ae   : > { %v13529_v20 = vpop.eup %13528  ;;  %5068 = vst [vmem:[#allocation2 + $0x179] sm:$0x1] %v17625_v12  ;;  %12251 = vmatmul.mubr.f32.gmra.mxu1 %v17729_v61 }
 0x3af   : > { %v13531_v21 = vpop.eup %13530  ;;  %5027 = vst [vmem:[#allocation2 + $0x170] sm:$0xff] %v17789_v23  ;;  %v4976_v59 = vmul.f32 %v13529_v20, %v17609_v32  ;;  %v17813_v32 = vsel %vm735_vm1, %v5435_v3, %v5436_v51  ;;  %v17819_v20 = vsel %vm735_vm1, %v5436_v51, %v5438_v36  ;;  %v17834_v51 = vsel %vm735_vm1, %v5438_v36, %v5435_v3 }
 0x3b0   : > { %v13533_v30 = vpop.eup %13532  ;;  %v4975_v10 = vmul.f32 %v13531_v21, %v17629_v60  ;;  %12450 = vmatmul.mubr.f32.gmra.mxu0 %v17793_v49  ;;  %21202 = vst [vmem:[#allocation143_spill] sm:$0xff] %v17813_v32  ;;  %21203 = vst [vmem:[#allocation94_spill] sm:$0xff] %v17819_v20  ;;  %v5441_v21 = vrot.slane %v17729_v61, 1 }
 0x3b1   : > { %5030 = vst [vmem:[#allocation2 + $0x188] sm:$0xff] %v4976_v59  ;;  %12452 = vmatprep.mubr.f32.mxu0 %v17798_v52  ;;  %v17823_v59 = vld [vmem:[#allocation2 + $0x168] sm:$0xff]  ;;  %21205 = vst [vmem:[#allocation64_spill] sm:$0xff] %v17834_v51 }
 0x3b2   : > { %5029 = vst [vmem:[#allocation2 + $0x180] sm:$0xff] %v4975_v10  ;;  %v5445_v3 = vrot.slane %v17823_v59, 1 }
 0x3b3   : > { %5051 = vst [vmem:[#allocation2 + $0x180] sm:$0x1] %v17625_v12  ;;  %v17815_v60 = vld [vmem:[#allocation2 + $0x160] sm:$0xff] }
 0x3b4   : > { %12453 = vmatmul.mubr.f32.gmra.mxu0 %v17813_v32  ;;  %12253 = vmatprep.mubr.f32.mxu1 %v17815_v60  ;;  %v5443_v10 = vrot.slane %v17815_v60, 1  ;;  %v17830_v32 = vsel %vm735_vm1, %v5440_v53, %v5441_v21 }
 0x3b5   : > { %v13535_v30 = vpop.eup %13534  ;;  %12455 = vmatprep.mubr.f32.mxu0 %v17819_v20  ;;  %12254 = vmatmul.mubr.f32.gmra.mxu1 %v17823_v59  ;;  %21204 = vst [vmem:[#allocation111_spill] sm:$0xff] %v17830_v32  ;;  %v17837_v43 = vld [vmem:[#allocation2 + $0x178] sm:$0xff]  ;;  %v13792_v20 = vld [vmem:[#allocation8 + $0x1f8] sm:$0xff] }
 0x3b6   : > { %v13537_v52 = vpop.eup %13536  ;;  %v4977_v49 = vmul.f32 %v13535_v30, %v17675_v13  ;;  %12256 = vmatprep.mubr.f32.mxu1 %v17789_v23  ;;  %v17846_v13 = vsel %vm735_vm1, %v5443_v10, %v5440_v53  ;;  %v5448_v30 = vrot.slane %v17837_v43, 1 }
 0x3b7   : > { %v17842_v52 = vsel %vm735_vm1, %v5441_v21, %v5443_v10  ;;  %21207 = vst [vmem:[#allocation113_spill] sm:$0xff] %v17846_v13  ;;  %v5446_v21 = vrot.slane %v17789_v23, 1  ;;  %v13793_v10 = vld [vmem:[#allocation2 + $0x20] sm:$0xff] }
 0x3b8   : > { %5031 = vst [vmem:[#allocation2 + $0x190] sm:$0xff] %v4977_v49  ;;  %12456 = vmatmul.mubr.f32.gmra.mxu0 %v17834_v51  ;;  %21206 = vst [vmem:[#allocation98_spill] sm:$0xff] %v17842_v52  ;;  %v13790_v49 = vld [vmem:[#allocation2 + $0x28] sm:$0xff]  ;;  %v13791_v51 = vld [vmem:[#allocation2 + $0x18] sm:$0xff]  ;;  %v5231_v9 = vrot.slane %v13793_v10, 7 }
 0x3b9   : > { %5069 = vst [vmem:[#allocation2 + $0x191] sm:$0x1] %v17625_v12  ;;  %12458 = vmatprep.mubr.f32.mxu0 %v17830_v32  ;;  %12257 = vmatmul.mubr.f32.gmra.mxu1 %v17837_v43  ;;  %v5155_v36 = vrot.slane %v13790_v49, 7  ;;  %v6578_v12 = vld [vmem:[#allocation8 + $0x1f0] sm:$0xff]  ;;  %v5230_v32 = vrot.slane %v13791_v51, 7  ;;  %v17854_v53 = vsel %vm735_vm1, %v5445_v3, %v5446_v21  ;;  %v17858_v40 = vsel %vm735_vm1, %v5446_v21, %v5448_v30 }
 0x3ba   : > { %12291 = vmatprep.mubr.f32.mxu1 %v5226_v26  ;;  %21208 = vst [vmem:[#allocation146_spill] sm:$0xff] %v17854_v53  ;;  %21209 = vst [vmem:[#allocation153_spill] sm:$0xff] %v17858_v40  ;;  %v17870_v21 = vsel %vm735_vm1, %v5448_v30, %v5445_v3  ;;  %v13796_v3 = vld [vmem:[#allocation2 + $0x38] sm:$0xff] }
 0x3bb   : > { %21210 = vst [vmem:[#allocation117_spill] sm:$0xff] %v17870_v21  ;;  %v5235_v30 = vrot.slane %v13796_v3, 7 }
 0x3bc   : > { %12459 = vmatmul.mubr.f32.gmra.mxu0 %v17842_v52  ;;  %v6577_v52 = vld [vmem:[#allocation8 + $0x1e8] sm:$0xff] }
 0x3bd   : > { %12461 = vmatprep.mubr.f32.mxu0 %v17846_v13  ;;  %12292 = vmatmul.mubr.f32.vlgmr.msra.gmra.mxu1 %v5226_v26  ;;  %v17861_v13 = vsel %vm574_vm0, %v5155_v36, %v5230_v32 }
 0x3be   : > { %12468 = vmatpush3.msra.mxu1 %v13792_v20  ;;  %12294 = vmatprep.mubr.f32.mxu1 %v5226_v26  ;;  %v17866_v26 = vsel %vm574_vm0, %v5230_v32, %v5231_v9  ;;  %v13794_v20 = vld [vmem:[#allocation2 + $0x40] sm:$0xff]  ;;  %v6575_v32 = vld [vmem:[#allocation8 + $0x1d8] sm:$0xff] }
 0x3bf   : > { %12469 = vmatprep.subr.mxu1 %v6578_v12  ;;  %v5156_v19 = vrot.slane %v13794_v20, 7 }
 0x3c0   : > { %12462 = vmatmul.mubr.f32.gmra.mxu0 %v17854_v53  ;;  %12470 = vmatpush3.msra.mxu1 %v6578_v12  ;;  %v13795_v53 = vld [vmem:[#allocation2 + $0x30] sm:$0xff]  ;;  %v17874_v12 = vsel %vm574_vm0, %v5231_v9, %v5155_v36  ;;  %v13797_v9 = vld [vmem:[#allocation2 + $0x58] sm:$0xff] }
 0x3c1   : > { %12464 = vmatprep.mubr.f32.mxu0 %v17858_v40  ;;  %12295 = vmatmul.mubr.f32.gmra.mxu1 %v17861_v13  ;;  %v5234_v29 = vrot.slane %v13795_v53, 7  ;;  %v5157_v36 = vrot.slane %v13797_v9, 7 }
 0x3c2   : > { %12297 = vmatprep.mubr.f32.mxu1 %v17866_v26  ;;  %12471 = vmatprep.subr.mxu1 %v6577_v52 }
 0x3c3   : > { %12472 = vmatpush3.msra.mxu1 %v6577_v52  ;;  %v17878_v40 = vsel %vm574_vm0, %v5156_v19, %v5234_v29  ;;  %v6574_v52 = vld [vmem:[#allocation8 + $0x1d0] sm:$0xff] }
 0x3c4   : > { %12465 = vmatmul.mubr.f32.gmra.mxu0 %v17870_v21  ;;  %12473 = vmatprep.subr.mxu1 %v6576_v44  ;;  %v17882_v21 = vsel %vm574_vm0, %v5234_v29, %v5235_v30  ;;  %v17891_v29 = vsel %vm574_vm0, %v5157_v36, %v5238_v6 }
 0x3c5   : > { %12603 = vmatprep.mubr.f32.mxu0 %v13791_v51  ;;  %12298 = vmatmul.mubr.f32.gmra.mxu1 %v17874_v12  ;;  %v17886_v51 = vsel %vm574_vm0, %v5235_v30, %v5156_v19  ;;  %v13800_v30 = vld [vmem:[#allocation2 + $0x70] sm:$0xff] }
 0x3c6   : > { %12300 = vmatprep.mubr.f32.mxu1 %v17878_v40  ;;  %12474 = vmatpush3.msra.mxu1 %v6576_v44  ;;  %v13799_v44 = vld [vmem:[#allocation2 + $0x50] sm:$0xff]  ;;  %v5158_v39 = vrot.slane %v13800_v30, 7 }
 0x3c7   : > { %12475 = vmatprep.subr.mxu1 %v6575_v32 }
 0x3c8   : > { %12604 = vmatmul.mubr.f32.vlgmr.msra.gmra.mxu0 %v13793_v10  ;;  %12476 = vmatpush3.msra.mxu1 %v6575_v32  ;;  %v5239_v10 = vrot.slane %v13799_v44, 7  ;;  %v7688_v32 = vld [vmem:[#allocation8 + $0x370] sm:$0xff] }
 0x3c9   : > { %12606 = vmatprep.mubr.f32.mxu0 %v13790_v49  ;;  %12301 = vmatmul.mubr.f32.gmra.mxu1 %v17882_v21  ;;  %v6572_v49 = vld [vmem:[#allocation8 + $0x1c0] sm:$0xff] }
 0x3ca   : > { %12303 = vmatprep.mubr.f32.mxu1 %v17886_v51  ;;  %12477 = vmatprep.subr.mxu1 %v6574_v52  ;;  %v17895_v19 = vsel %vm574_vm0, %v5238_v6, %v5239_v10  ;;  %v17899_v62 = vsel %vm574_vm0, %v5239_v10, %v5157_v36  ;;  %v13803_v36 = vld [vmem:[#allocation2 + $0x88] sm:$0xff] }
 0x3cb   : > { %12478 = vmatpush3.msra.mxu1 %v6574_v52  ;;  %12780 = vmatpush3.msra.mxu0 %v17602_v42  ;;  %v13801_v52 = vld [vmem:[#allocation2 + $0x60] sm:$0xff]  ;;  %v5159_v10 = vrot.slane %v13803_v36, 7 }
 0x3cc   : > { %12607 = vmatmul.mubr.f32.gmra.mxu0 %v13795_v53  ;;  %12479 = vmatprep.subr.mxu1 %v6573_v11  ;;  %v5242_v42 = vrot.slane %v13801_v52, 7  ;;  %v6571_v53 = vld [vmem:[#allocation8 + $0x1b8] sm:$0xff] }
 0x3cd   : > { %12609 = vmatprep.mubr.f32.mxu0 %v13796_v3  ;;  %12304 = vmatmul.mubr.f32.gmra.mxu1 %v17891_v29  ;;  %v6570_v3 = vld [vmem:[#allocation8 + $0x1b0] sm:$0xff] }
 0x3ce   : > { %12306 = vmatprep.mubr.f32.mxu1 %v17895_v19  ;;  %12480 = vmatpush3.msra.mxu1 %v6573_v11  ;;  %v17903_v6 = vsel %vm574_vm0, %v5158_v39, %v5242_v42  ;;  %v13802_v11 = vld [vmem:[#allocation2 + $0x68] sm:$0xff] }
 0x3cf   : > { %12481 = vmatprep.subr.mxu1 %v6572_v49  ;;  %12781 = vmatprep.subr.mxu0 %v7688_v32  ;;  %v5243_v17 = vrot.slane %v13802_v11, 7 }
 0x3d0   : > { %12610 = vmatmul.mubr.f32.gmra.mxu0 %v13794_v20  ;;  %12482 = vmatpush3.msra.mxu1 %v6572_v49  ;;  %v7687_v49 = vld [vmem:[#allocation8 + $0x368] sm:$0xff] }
 0x3d1   : > { %12612 = vmatprep.mubr.f32.mxu0 %v13798_v15  ;;  %12307 = vmatmul.mubr.f32.gmra.mxu1 %v17899_v62  ;;  %v17907_v20 = vsel %vm574_vm0, %v5242_v42, %v5243_v17  ;;  %v6569_v15 = vld [vmem:[#allocation8 + $0x1a8] sm:$0xff]  ;;  %v17911_v25 = vsel %vm574_vm0, %v5243_v17, %v5158_v39  ;;  %v6568_v42 = vld [vmem:[#allocation8 + $0x1a0] sm:$0xff]  ;;  %v5160_v39 = vrot.slane %v17466_v33, 7 }
 0x3d2   : > { %12309 = vmatprep.mubr.f32.mxu1 %v17903_v6  ;;  %12483 = vmatprep.subr.mxu1 %v6571_v53  ;;  %v13806_v33 = vld [vmem:[#allocation2 + $0x98] sm:$0xff] }
 0x3d3   : > { %12484 = vmatpush3.msra.mxu1 %v6571_v53  ;;  %12782 = vmatpush3.msra.mxu0 %v7688_v32  ;;  %v17915_v53 = vsel %vm574_vm0, %v5159_v10, %v5246_v24  ;;  %v5251_v46 = vrot.slane %v13806_v33, 7 }
 0x3d4   : > { %12613 = vmatmul.mubr.f32.gmra.mxu0 %v13799_v44  ;;  %12485 = vmatprep.subr.mxu1 %v6570_v3  ;;  %v13805_v44 = vld [vmem:[#allocation2 + $0x80] sm:$0xff] }
 0x3d5   : > { %12615 = vmatprep.mubr.f32.mxu0 %v13797_v9  ;;  %12310 = vmatmul.mubr.f32.gmra.mxu1 %v17907_v20  ;;  %v5247_v32 = vrot.slane %v13805_v44, 7  ;;  %v6567_v9 = vld [vmem:[#allocation8 + $0x198] sm:$0xff] }
 0x3d6   : > { %12312 = vmatprep.mubr.f32.mxu1 %v17911_v25  ;;  %12486 = vmatpush3.msra.mxu1 %v6570_v3  ;;  %v5250_v3 = vrot.slane %v17434_v34, 7 }
 0x3d7   : > { %12487 = vmatprep.subr.mxu1 %v6569_v15  ;;  %12783 = vmatprep.subr.mxu0 %v7687_v49  ;;  %v17919_v17 = vsel %vm574_vm0, %v5246_v24, %v5247_v32 }
 0x3d8   : > { %12616 = vmatmul.mubr.f32.gmra.mxu0 %v13801_v52  ;;  %12488 = vmatpush3.msra.mxu1 %v6569_v15  ;;  %v17925_v52 = vsel %vm574_vm0, %v5247_v32, %v5159_v10  ;;  %v6566_v15 = vld [vmem:[#allocation8 + $0x190] sm:$0xff]  ;;  %v17929_v24 = vsel %vm574_vm0, %v5160_v39, %v5250_v3  ;;  %v17933_v34 = vsel %vm574_vm0, %v5250_v3, %v5251_v46  ;;  %v7685_v10 = vld [vmem:[#allocation8 + $0x358] sm:$0xff]  ;;  %v5254_v32 = vrot.slane %v17477_v38, 7 }
 0x3d9   : > { %12618 = vmatprep.mubr.f32.mxu0 %v13802_v11  ;;  %12313 = vmatmul.mubr.f32.gmra.mxu1 %v17915_v53  ;;  %v7686_v11 = vld [vmem:[#allocation8 + $0x360] sm:$0xff]  ;;  %v5162_v38 = vrot.slane %v17559_v37, 7 }
 0x3da   : > { %12315 = vmatprep.mubr.f32.mxu1 %v17919_v17  ;;  %12489 = vmatprep.subr.mxu1 %v6568_v42 }
 0x3db   : > { %12490 = vmatpush3.msra.mxu1 %v6568_v42  ;;  %12784 = vmatpush3.msra.mxu0 %v7687_v49  ;;  %v17938_v49 = vsel %vm574_vm0, %v5251_v46, %v5160_v39  ;;  %v5258_v39 = vrot.slane %v17524_v4, 7 }
 0x3dc   : > { %12619 = vmatmul.mubr.f32.gmra.mxu0 %v13800_v30  ;;  %12491 = vmatprep.subr.mxu1 %v6567_v9  ;;  %v5161_v30 = vrot.slane %v17511_v27, 7 }
 0x3dd   : > { %12621 = vmatprep.mubr.f32.mxu0 %v13804_v31  ;;  %12316 = vmatmul.mubr.f32.gmra.mxu1 %v17925_v52  ;;  %v6565_v31 = vld [vmem:[#allocation8 + $0x188] sm:$0xff]  ;;  %v17959_v57 = vsel %vm574_vm0, %v5162_v38, %v5258_v39 }
 0x3de   : > { %12318 = vmatprep.mubr.f32.mxu1 %v17929_v24  ;;  %12492 = vmatpush3.msra.mxu1 %v6567_v9  ;;  %v13808_v9 = vld [vmem:[#allocation2 + $0x90] sm:$0xff]  ;;  %v17943_v3 = vsel %vm574_vm0, %v5161_v30, %v5254_v32 }
 0x3df   : > { %12785 = vmatprep.subr.mxu0 %v7686_v11  ;;  %12493 = vmatprep.subr.mxu1 %v6566_v15 }
 0x3e0   : > { %12622 = vmatmul.mubr.f32.gmra.mxu0 %v13805_v44  ;;  %12494 = vmatpush3.msra.mxu1 %v6566_v15  ;;  %v13807_v44 = vld [vmem:[#allocation2 + $0xb0] sm:$0xff] }
 0x3e1   : > { %12624 = vmatprep.mubr.f32.mxu0 %v13803_v36  ;;  %12319 = vmatmul.mubr.f32.gmra.mxu1 %v17933_v34  ;;  %v5255_v42 = vrot.slane %v13807_v44, 7  ;;  %v7684_v36 = vld [vmem:[#allocation8 + $0x350] sm:$0xff]  ;;  %v6564_v15 = vld [vmem:[#allocation8 + $0x180] sm:$0xff] }
 0x3e2   : > { %12321 = vmatprep.mubr.f32.mxu1 %v17938_v49  ;;  %12786 = vmatpush3.msra.mxu0 %v7686_v11  ;;  %v13809_v11 = vld [vmem:[#allocation2 + $0xa0] sm:$0xff] }
 0x3e3   : > { %12787 = vmatprep.subr.mxu0 %v7685_v10  ;;  %12495 = vmatprep.subr.mxu1 %v6565_v31  ;;  %v17947_v46 = vsel %vm574_vm0, %v5254_v32, %v5255_v42  ;;  %v13810_v32 = vld [vmem:[#allocation2 + $0xa8] sm:$0xff] }
 0x3e4   : > { %12625 = vmatmul.mubr.f32.gmra.mxu0 %v13808_v9  ;;  %12496 = vmatpush3.msra.mxu1 %v6565_v31  ;;  %v17953_v31 = vsel %vm574_vm0, %v5255_v42, %v5161_v30  ;;  %v17955_v9 = vld [vmem:[#allocation8 + $0x2f8] sm:$0xff]  ;;  %v5163_v42 = vrot.slane %v17595_v14, 7 }
 0x3e5   : > { %12627 = vmatprep.mubr.f32.mxu0 %v13806_v33  ;;  %12322 = vmatmul.mubr.f32.gmra.mxu1 %v17943_v3  ;;  %v7683_v33 = vld [vmem:[#allocation8 + $0x348] sm:$0xff] }
 0x3e6   : > { %12324 = vmatprep.mubr.f32.mxu1 %v17947_v46  ;;  %12788 = vmatpush3.msra.mxu0 %v7685_v10  ;;  %v13811_v10 = vld [vmem:[#allocation2 + $0xc8] sm:$0xff] }
 0x3e7   : > { %12789 = vmatprep.subr.mxu0 %v7684_v36  ;;  %12497 = vmatprep.subr.mxu1 %v6564_v15  ;;  %v5259_v50 = vrot.slane %v13811_v10, 7 }
 0x3e8   : > { %12628 = vmatmul.mubr.f32.gmra.mxu0 %v13809_v11  ;;  %12498 = vmatpush3.msra.mxu1 %v6564_v15  ;;  %v7682_v15 = vld [vmem:[#allocation8 + $0x340] sm:$0xff] }
 0x3e9   : > { %12630 = vmatprep.mubr.f32.mxu0 %v13810_v32  ;;  %12325 = vmatmul.mubr.f32.gmra.mxu1 %v17953_v31  ;;  %v17964_v30 = vsel %vm574_vm0, %v5258_v39, %v5259_v50  ;;  %v17970_v11 = vsel %vm574_vm0, %v5259_v50, %v5162_v38  ;;  %v5262_v32 = vrot.slane %v17569_v1, 7  ;;  %v7681_v39 = vld [vmem:[#allocation8 + $0x338] sm:$0xff]  ;;  %v5266_v38 = vrot.slane %v17632_v5, 7 }
 0x3ea   : > { %12327 = vmatprep.mubr.f32.mxu1 %v17959_v57  ;;  %12790 = vmatpush3.msra.mxu0 %v7684_v36 }
 0x3eb   : > { %12791 = vmatprep.subr.mxu0 %v7683_v33  ;;  %12675 = vmatprep.subr.mxu1 %v17955_v9  ;;  %v17977_v36 = vsel %vm574_vm0, %v5163_v42, %v5262_v32 }
 0x3ec   : > { %12631 = vmatmul.mubr.f32.gmra.mxu0 %v13807_v44  ;;  %v5263_v44 = vrot.slane %v17518_v63, 7 }
 0x3ed   : > { %12633 = vmatprep.mubr.f32.mxu0 %v17511_v27  ;;  %12328 = vmatmul.mubr.f32.gmra.mxu1 %v17964_v30  ;;  %v5164_v27 = vrot.slane %v17671_v8, 7 }
 0x3ee   : > { %12330 = vmatprep.mubr.f32.mxu1 %v17970_v11  ;;  %12792 = vmatpush3.msra.mxu0 %v7683_v33  ;;  %v17981_v50 = vsel %vm574_vm0, %v5262_v32, %v5263_v44  ;;  %v7680_v33 = vld [vmem:[#allocation8 + $0x330] sm:$0xff]  ;;  %v7679_v32 = vld [vmem:[#allocation8 + $0x328] sm:$0xff] }
 0x3ef   : > { %12793 = vmatprep.subr.mxu0 %v7682_v15 }
 0x3f0   : > { %12634 = vmatmul.mubr.f32.gmra.mxu0 %v17524_v4  ;;  %v17988_v4 = vsel %vm574_vm0, %v5263_v44, %v5163_v42  ;;  %v5165_v42 = vrot.slane %v17701_v28, 7  ;;  %v5270_v44 = vrot.slane %v17680_v22, 7 }
 0x3f1   : > { %12636 = vmatprep.mubr.f32.mxu0 %v13811_v10  ;;  %12331 = vmatmul.mubr.f32.gmra.mxu1 %v17977_v36  ;;  %v17993_v10 = vsel %vm574_vm0, %v5164_v27, %v5266_v38 }
 0x3f2   : > { %12333 = vmatprep.mubr.f32.mxu1 %v17981_v50  ;;  %12794 = vmatpush3.msra.mxu0 %v7682_v15  ;;  %v5267_v15 = vrot.slane %v17533_v47, 7  ;;  %v18012_v47 = vsel %vm574_vm0, %v5165_v42, %v5270_v44 }
 0x3f3   : > { %12795 = vmatprep.subr.mxu0 %v7681_v39 }
 0x3f4   : > { %12637 = vmatmul.mubr.f32.gmra.mxu0 %v17559_v37  ;;  %v17999_v37 = vsel %vm574_vm0, %v5266_v38, %v5267_v15  ;;  %v5166_v38 = vrot.slane %v17747_v56, 7 }
 0x3f5   : > { %12639 = vmatprep.mubr.f32.mxu0 %v17569_v1  ;;  %12334 = vmatmul.mubr.f32.gmra.mxu1 %v17988_v4  ;;  %v18005_v1 = vsel %vm574_vm0, %v5267_v15, %v5164_v27  ;;  %v7677_v15 = vld [vmem:[#allocation8 + $0x318] sm:$0xff] }
 0x3f6   : > { %12336 = vmatprep.mubr.f32.mxu1 %v17993_v10  ;;  %12796 = vmatpush3.msra.mxu0 %v7681_v39  ;;  %v7678_v39 = vld [vmem:[#allocation8 + $0x320] sm:$0xff] }
 0x3f7   : > { %12797 = vmatprep.subr.mxu0 %v7680_v33 }
 0x3f8   : > { %12640 = vmatmul.mubr.f32.gmra.mxu0 %v17518_v63  ;;  %v5271_v63 = vrot.slane %v17635_v58, 7 }
 0x3f9   : > { %12642 = vmatprep.mubr.f32.mxu0 %v17595_v14  ;;  %12337 = vmatmul.mubr.f32.gmra.mxu1 %v17999_v37  ;;  %v13812_v14 = vld [vmem:[#allocation2 + $0xf8] sm:$0xff] }
 0x3fa   : > { %12339 = vmatprep.mubr.f32.mxu1 %v18005_v1  ;;  %12798 = vmatpush3.msra.mxu0 %v7680_v33  ;;  %v18016_v27 = vsel %vm574_vm0, %v5270_v44, %v5271_v63  ;;  %v5274_v33 = vrot.slane %v17712_v41, 7 }
 0x3fb   : > { %12799 = vmatprep.subr.mxu0 %v7679_v32 }
 0x3fc   : > { %12643 = vmatmul.mubr.f32.gmra.mxu0 %v17632_v5  ;;  %v18023_v5 = vsel %vm574_vm0, %v5271_v63, %v5165_v42  ;;  %v18028_v44 = vsel %vm574_vm0, %v5166_v38, %v5274_v33  ;;  %v5167_v42 = vrot.slane %v17766_v7, 7  ;;  %v7676_v63 = vld [vmem:[#allocation8 + $0x310] sm:$0xff] }
 0x3fd   : > { %12645 = vmatprep.mubr.f32.mxu0 %v13812_v14  ;;  %12340 = vmatmul.mubr.f32.gmra.mxu1 %v18012_v47  ;;  %v5278_v14 = vrot.slane %v17751_v35, 7 }
 0x3fe   : > { %12342 = vmatprep.mubr.f32.mxu1 %v18016_v27  ;;  %12800 = vmatpush3.msra.mxu0 %v7679_v32  ;;  %v5275_v32 = vrot.slane %v17646_v48, 7 }
 0x3ff   : > { %12801 = vmatprep.subr.mxu0 %v7678_v39 }
 0x400   : > { %12646 = vmatmul.mubr.f32.gmra.mxu0 %v17671_v8  ;;  %v18034_v8 = vsel %vm574_vm0, %v5274_v33, %v5275_v32  ;;  %v18049_v33 = vpop.f32.mrf.mxu1 }
 0x401   : > { %12648 = vmatprep.mubr.f32.mxu0 %v17680_v22  ;;  %12343 = vmatmul.mubr.f32.gmra.mxu1 %v18023_v5  ;;  %v18040_v22 = vsel %vm574_vm0, %v5275_v32, %v5166_v38  ;;  %21211 = vst [vmem:[#allocation66_spill] sm:$0xff] %v18049_v33 }
 0x402   : > { %12345 = vmatprep.mubr.f32.mxu1 %v18028_v44  ;;  %12802 = vmatpush3.msra.mxu0 %v7678_v39  ;;  %v18047_v39 = vsel %vm574_vm0, %v5167_v42, %v5278_v14  ;;  %v18063_v33 = vpop.f32.mrf.mxu1 }
 0x403   : > { %12803 = vmatprep.subr.mxu0 %v7677_v15  ;;  %21212 = vst [vmem:[#allocation101_spill] sm:$0xff] %v18063_v33 }
 0x404   : > { %12649 = vmatmul.mubr.f32.gmra.mxu0 %v17635_v58  ;;  %v5279_v58 = vrot.slane %v17715_v18, 7 }
 0x405   : > { %12651 = vmatprep.mubr.f32.mxu0 %v17701_v28  ;;  %12346 = vmatmul.mubr.f32.gmra.mxu1 %v18034_v8  ;;  %v7675_v28 = vld [vmem:[#allocation8 + $0x308] sm:$0xff] }
 0x406   : > { %12348 = vmatprep.mubr.f32.mxu1 %v18040_v22  ;;  %12804 = vmatpush3.msra.mxu0 %v7677_v15  ;;  %v18054_v38 = vsel %vm574_vm0, %v5278_v14, %v5279_v58  ;;  %v5168_v15 = vrot.slane %v17815_v60, 7  ;;  %v18061_v32 = vsel %vm574_vm0, %v5279_v58, %v5167_v42  ;;  %v5169_v42 = vrot.slane %v17837_v43, 7 }
 0x407   : > { %12805 = vmatprep.subr.mxu0 %v7676_v63 }
 0x408   : > { %12652 = vmatmul.mubr.f32.gmra.mxu0 %v17712_v41  ;;  %v5282_v41 = vrot.slane %v17786_v16, 7 }
 0x409   : > { %12654 = vmatprep.mubr.f32.mxu0 %v17646_v48  ;;  %12349 = vmatmul.mubr.f32.gmra.mxu1 %v18047_v39  ;;  %v7674_v48 = vld [vmem:[#allocation8 + $0x300] sm:$0xff] }
 0x40a   : > { %12351 = vmatprep.mubr.f32.mxu1 %v18054_v38  ;;  %12806 = vmatpush3.msra.mxu0 %v7676_v63  ;;  %v18068_v14 = vsel %vm574_vm0, %v5168_v15, %v5282_v41  ;;  %v5283_v63 = vrot.slane %v17729_v61, 7 }
 0x40b   : > { %12807 = vmatprep.subr.mxu0 %v7675_v28 }
 0x40c   : > { %12655 = vmatmul.mubr.f32.gmra.mxu0 %v17747_v56  ;;  %v18074_v56 = vsel %vm574_vm0, %v5282_v41, %v5283_v63  ;;  %v18084_v33 = vsel %vm574_vm0, %v5283_v63, %v5168_v15  ;;  %v5287_v41 = vrot.slane %v17789_v23, 7 }
 0x40d   : > { %12657 = vmatprep.mubr.f32.mxu0 %v17751_v35  ;;  %12352 = vmatmul.mubr.f32.gmra.mxu1 %v18061_v32  ;;  %v18079_v35 = vld [vmem:[#allocation8 + $0x478] sm:$0xff] }
 0x40e   : > { %12354 = vmatprep.mubr.f32.mxu1 %v18068_v14  ;;  %12808 = vmatpush3.msra.mxu0 %v7675_v28  ;;  %v5286_v28 = vrot.slane %v17823_v59, 7 }
 0x40f   : > { %12809 = vmatprep.subr.mxu0 %v7674_v48  ;;  %v18077_v58 = vpop.f32.mrf.mxu1 }
 0x410   : > { %12658 = vmatmul.mubr.f32.gmra.mxu0 %v17715_v18  ;;  %v18099_v15 = vsel %vm574_vm0, %v5286_v28, %v5287_v41 }
 0x411   : > { %12660 = vmatprep.mubr.f32.mxu0 %v17766_v7  ;;  %12355 = vmatmul.mubr.f32.gmra.mxu1 %v18074_v56  ;;  %v18088_v18 = vpop.f32.mrf.mxu1  ;;  %v18094_v7 = vsel %vm574_vm0, %v5169_v42, %v5286_v28 }
 0x412   : > { %12357 = vmatprep.mubr.f32.mxu1 %v18084_v33  ;;  %12810 = vmatpush3.msra.mxu0 %v7674_v48  ;;  %21213 = vst [vmem:[#allocation120_spill] sm:$0xff] %v18088_v18  ;;  %v18104_v48 = vpop.f32.mrf.mxu0  ;;  %v7318_v18 = vld [vmem:[#allocation8 + $0x2f0] sm:$0xff] }
 0x413   : > { %12987 = vmatprep.subr.mxu0 %v18079_v35  ;;  %v18101_v63 = vpop.f32.mrf.mxu1 }
 0x414   : > { %12661 = vmatmul.mubr.f32.gmra.mxu0 %v17786_v16  ;;  %21214 = vst [vmem:[#allocation67_spill] sm:$0xff] %v18101_v63  ;;  %v18108_v16 = vsel %vm574_vm0, %v5287_v41, %v5169_v42  ;;  %v18115_v28 = vpop.f32.mrf.mxu0  ;;  %v7317_v42 = vld [vmem:[#allocation8 + $0x2e8] sm:$0xff]  ;;  %v18142_v41 = vld [vmem:[#allocation2 + $0x190] sm:$0xff] }
 0x415   : > { %12663 = vmatprep.mubr.f32.mxu0 %v17729_v61  ;;  %12358 = vmatmul.mubr.f32.gmra.mxu1 %v18094_v7  ;;  %v18112_v61 = vpop.f32.mrf.mxu1 }
 0x416   : > { %12360 = vmatprep.mubr.f32.mxu1 %v18099_v15 }
 0x418   : > { %12664 = vmatmul.mubr.f32.gmra.mxu0 %v17815_v60 }
 0x419   : > { %12666 = vmatprep.mubr.f32.mxu0 %v17823_v59  ;;  %12361 = vmatmul.mubr.f32.gmra.mxu1 %v18108_v16 }
 0x41a   : > { %12499 = vmatprep.mubr.f32.mxu1 %v17861_v13  ;;  %v18117_v63 = vpop.f32.mrf.mxu1  ;;  %v18128_v13 = vld [vmem:[#allocation2 + $0x180] sm:$0xff] }
 0x41b   : > { %21215 = vst [vmem:[#allocation158_spill] sm:$0xff] %v18117_v63 }
 0x41c   : > { %12667 = vmatmul.mubr.f32.gmra.mxu0 %v17789_v23  ;;  %v18122_v60 = vpop.f32.mrf.mxu1  ;;  %v18131_v23 = vld [vmem:[#allocation2 + $0x188] sm:$0xff] }
 0x41d   : > { %12669 = vmatprep.mubr.f32.mxu0 %v17837_v43  ;;  %12500 = vmatmul.mubr.f32.vlgmr.msra.gmra.mxu1 %v17866_v26  ;;  %21216 = vst [vmem:[#allocation122_spill] sm:$0xff] %v18122_v60  ;;  %v18126_v59 = vpop.f32.mrf.mxu0  ;;  %v7316_v26 = vld [vmem:[#allocation8 + $0x2e0] sm:$0xff] }
 0x41e   : > { %12502 = vmatprep.mubr.f32.mxu1 %v17874_v12  ;;  %12676 = vmatpush3.msra.mxu1 %v17955_v9  ;;  %v18133_v43 = vpop.f32.mrf.mxu1 }
 0x41f   : > { %12677 = vmatprep.subr.mxu1 %v7318_v18  ;;  %21217 = vst [vmem:[#allocation151_spill] sm:$0xff] %v18133_v43  ;;  %v18138_v12 = vpop.f32.mrf.mxu0  ;;  %v7315_v43 = vld [vmem:[#allocation8 + $0x2d8] sm:$0xff] }
 0x420   : > { %12670 = vmatmul.mubr.f32.gmra.mxu0 %v18128_v13  ;;  %12678 = vmatpush3.msra.mxu1 %v7318_v18  ;;  %v18140_v9 = vpop.f32.mrf.mxu1 }
 0x421   : > { %12672 = vmatprep.mubr.f32.mxu0 %v18131_v23  ;;  %12503 = vmatmul.mubr.f32.gmra.mxu1 %v17878_v40  ;;  %21218 = vst [vmem:[#allocation103_spill] sm:$0xff] %v18140_v9  ;;  %v7314_v9 = vld [vmem:[#allocation8 + $0x2d0] sm:$0xff] }
 0x422   : > { %12505 = vmatprep.mubr.f32.mxu1 %v17882_v21  ;;  %12679 = vmatprep.subr.mxu1 %v7317_v42  ;;  %v18145_v18 = vpop.f32.mrf.mxu1 }
 0x423   : > { %12680 = vmatpush3.msra.mxu1 %v7317_v42  ;;  %21219 = vst [vmem:[#allocation126_spill] sm:$0xff] %v18145_v18  ;;  %v18150_v60 = vpop.f32.mrf.mxu0 }
 0x424   : > { %12673 = vmatmul.mubr.f32.gmra.mxu0 %v18142_v41  ;;  %12681 = vmatprep.subr.mxu1 %v7316_v26  ;;  %21220 = vst [vmem:[#allocation155_spill] sm:$0xff] %v18150_v60  ;;  %v18152_v63 = vpop.f32.mrf.mxu1 }
 0x425   : > { %12811 = vmatprep.mubr.f32.mxu0 %v17878_v40  ;;  %12506 = vmatmul.mubr.f32.gmra.mxu1 %v17886_v51  ;;  %v7313_v40 = vld [vmem:[#allocation8 + $0x2c8] sm:$0xff]  ;;  %v18160_v18 = vpop.f32.mrf.mxu0 }
 0x426   : > { %12508 = vmatprep.mubr.f32.mxu1 %v17891_v29  ;;  %12682 = vmatpush3.msra.mxu1 %v7316_v26  ;;  %v18155_v42 = vpop.f32.mrf.mxu1  ;;  %v8428_v26 = vld [vmem:[#allocation8 + $0x470] sm:$0xff] }
 0x427   : > { %12683 = vmatprep.subr.mxu1 %v7315_v43  ;;  %21221 = vst [vmem:[#allocation159_spill] sm:$0xff] %v18155_v42 }
 0x428   : > { %12812 = vmatmul.mubr.f32.vlgmr.msra.gmra.mxu0 %v17882_v21  ;;  %12684 = vmatpush3.msra.mxu1 %v7315_v43  ;;  %v18162_v60 = vpop.f32.mrf.mxu1 }
 0x429   : > { %12814 = vmatprep.mubr.f32.mxu0 %v17886_v51  ;;  %12509 = vmatmul.mubr.f32.gmra.mxu1 %v17895_v19  ;;  %21222 = vst [vmem:[#allocation129_spill] sm:$0xff] %v18162_v60  ;;  %v7312_v51 = vld [vmem:[#allocation8 + $0x2c0] sm:$0xff] }
 0x42a   : > { %12511 = vmatprep.mubr.f32.mxu1 %v17899_v62  ;;  %12685 = vmatprep.subr.mxu1 %v7314_v9 }
 0x42b   : > { %12686 = vmatpush3.msra.mxu1 %v7314_v9  ;;  %12988 = vmatpush3.msra.mxu0 %v18079_v35  ;;  %v18166_v21 = vpop.f32.mrf.mxu0  ;;  %v18168_v43 = vpop.f32.mrf.mxu1 }
 0x42c   : > { %12815 = vmatmul.mubr.f32.gmra.mxu0 %v17891_v29  ;;  %21223 = vst [vmem:[#allocation69_spill] sm:$0xff] %v18168_v43  ;;  %12687 = vmatprep.subr.mxu1 %v7313_v40  ;;  %v7311_v29 = vld [vmem:[#allocation8 + $0x2b8] sm:$0xff] }
 0x42d   : > { %12817 = vmatprep.mubr.f32.mxu0 %v17895_v19  ;;  %12512 = vmatmul.mubr.f32.gmra.mxu1 %v17903_v6  ;;  %v18173_v60 = vpop.f32.mrf.mxu0  ;;  %v18175_v9 = vpop.f32.mrf.mxu1  ;;  %v7310_v19 = vld [vmem:[#allocation8 + $0x2b0] sm:$0xff] }
 0x42e   : > { %12514 = vmatprep.mubr.f32.mxu1 %v17907_v20  ;;  %12688 = vmatpush3.msra.mxu1 %v7313_v40  ;;  %v7309_v40 = vld [vmem:[#allocation8 + $0x2a8] sm:$0xff] }
 0x42f   : > { %12689 = vmatprep.subr.mxu1 %v7312_v51  ;;  %12989 = vmatprep.subr.mxu0 %v8428_v26  ;;  %v18178_v35 = vpop.f32.mrf.mxu1 }
 0x430   : > { %12818 = vmatmul.mubr.f32.gmra.mxu0 %v17899_v62  ;;  %21224 = vst [vmem:[#allocation107_spill] sm:$0xff] %v18178_v35  ;;  %12690 = vmatpush3.msra.mxu1 %v7312_v51  ;;  %v8427_v51 = vld [vmem:[#allocation8 + $0x468] sm:$0xff] }
 0x431   : > { %12820 = vmatprep.mubr.f32.mxu0 %v17903_v6  ;;  %12515 = vmatmul.mubr.f32.gmra.mxu1 %v17911_v25  ;;  %v18183_v43 = vpop.f32.mrf.mxu0  ;;  %v18185_v42 = vpop.f32.mrf.mxu1 }
 0x432   : > { %12517 = vmatprep.mubr.f32.mxu1 %v17915_v53  ;;  %21225 = vst [vmem:[#allocation131_spill] sm:$0xff] %v18185_v42  ;;  %12691 = vmatprep.subr.mxu1 %v7311_v29 }
 0x433   : > { %12692 = vmatpush3.msra.mxu1 %v7311_v29  ;;  %12990 = vmatpush3.msra.mxu0 %v8428_v26  ;;  %v18188_v62 = vpop.f32.mrf.mxu0 }
 0x434   : > { %12821 = vmatmul.mubr.f32.gmra.mxu0 %v17907_v20  ;;  %12693 = vmatprep.subr.mxu1 %v7310_v19  ;;  %v7308_v20 = vld [vmem:[#allocation8 + $0x2a0] sm:$0xff] }
 0x435   : > { %12823 = vmatprep.mubr.f32.mxu0 %v17911_v25  ;;  %12518 = vmatmul.mubr.f32.gmra.mxu1 %v17919_v17  ;;  %v18192_v6 = vpop.f32.mrf.mxu1  ;;  %v18195_v35 = vpop.f32.mrf.mxu0 }
 0x436   : > { %21226 = vst [vmem:[#allocation19_spill] sm:$0xff] %v18192_v6  ;;  %12520 = vmatprep.mubr.f32.mxu1 %v17925_v52  ;;  %12694 = vmatpush3.msra.mxu1 %v7310_v19  ;;  %v7307_v6 = vld [vmem:[#allocation8 + $0x298] sm:$0xff] }
 0x437   : > { %v18197_v29 = vpop.f32.mrf.mxu1  ;;  %12695 = vmatprep.subr.mxu1 %v7309_v40  ;;  %12991 = vmatprep.subr.mxu0 %v8427_v51  ;;  %v18200_v26 = vpop.f32.mrf.mxu0 }
 0x438   : > { %21227 = vst [vmem:[#allocation110_spill] sm:$0xff] %v18197_v29  ;;  %12824 = vmatmul.mubr.f32.gmra.mxu0 %v17915_v53  ;;  %12696 = vmatpush3.msra.mxu1 %v7309_v40  ;;  %v8426_v53 = vld [vmem:[#allocation8 + $0x460] sm:$0xff]  ;;  %v7306_v40 = vld [vmem:[#allocation8 + $0x290] sm:$0xff] }
 0x439   : > { %12826 = vmatprep.mubr.f32.mxu0 %v17919_v17  ;;  %12521 = vmatmul.mubr.f32.gmra.mxu1 %v17929_v24  ;;  %v18204_v25 = vpop.f32.mrf.mxu1  ;;  %v18207_v19 = vpop.f32.mrf.mxu0 }
 0x43a   : > { %21228 = vst [vmem:[#allocation135_spill] sm:$0xff] %v18204_v25  ;;  %12523 = vmatprep.mubr.f32.mxu1 %v17933_v34  ;;  %12697 = vmatprep.subr.mxu1 %v7308_v20 }
 0x43b   : > { %v18209_v29 = vpop.f32.mrf.mxu1  ;;  %12698 = vmatpush3.msra.mxu1 %v7308_v20  ;;  %12992 = vmatpush3.msra.mxu0 %v8427_v51  ;;  %v18213_v17 = vpop.f32.mrf.mxu0  ;;  %v7305_v51 = vld [vmem:[#allocation8 + $0x288] sm:$0xff] }
 0x43c   : > { %12827 = vmatmul.mubr.f32.gmra.mxu0 %v17925_v52  ;;  %12699 = vmatprep.subr.mxu1 %v7307_v6  ;;  %v8425_v52 = vld [vmem:[#allocation8 + $0x458] sm:$0xff] }
 0x43d   : > { %12829 = vmatprep.mubr.f32.mxu0 %v17929_v24  ;;  %12524 = vmatmul.mubr.f32.gmra.mxu1 %v17938_v49  ;;  %v18216_v25 = vpop.f32.mrf.mxu1 }
 0x43e   : > { %12526 = vmatprep.mubr.f32.mxu1 %v17943_v3  ;;  %12700 = vmatpush3.msra.mxu1 %v7307_v6 }
 0x43f   : > { %v18219_v42 = vpop.f32.mrf.mxu1  ;;  %12993 = vmatprep.subr.mxu0 %v8426_v53  ;;  %12701 = vmatprep.subr.mxu1 %v7306_v40 }
 0x440   : > { %21229 = vst [vmem:[#allocation20_spill] sm:$0xff] %v18219_v42  ;;  %12830 = vmatmul.mubr.f32.gmra.mxu0 %v17933_v34  ;;  %12702 = vmatpush3.msra.mxu1 %v7306_v40  ;;  %v18223_v24 = vpop.f32.mrf.mxu0  ;;  %v8424_v34 = vld [vmem:[#allocation8 + $0x450] sm:$0xff] }
 0x441   : > { %12832 = vmatprep.mubr.f32.mxu0 %v17938_v49  ;;  %12527 = vmatmul.mubr.f32.gmra.mxu1 %v17947_v46  ;;  %v18226_v20 = vpop.f32.mrf.mxu1  ;;  %v7304_v49 = vld [vmem:[#allocation8 + $0x280] sm:$0xff] }
 0x442   : > { %21230 = vst [vmem:[#allocation112_spill] sm:$0xff] %v18226_v20  ;;  %12529 = vmatprep.mubr.f32.mxu1 %v17953_v31  ;;  %12994 = vmatpush3.msra.mxu0 %v8426_v53  ;;  %v18229_v6 = vpop.f32.mrf.mxu0 }
 0x443   : > { %v18231_v42 = vpop.f32.mrf.mxu1  ;;  %12995 = vmatprep.subr.mxu0 %v8425_v52  ;;  %12703 = vmatprep.subr.mxu1 %v7305_v51 }
 0x444   : > { %21231 = vst [vmem:[#allocation138_spill] sm:$0xff] %v18231_v42  ;;  %12833 = vmatmul.mubr.f32.gmra.mxu0 %v17943_v3  ;;  %12704 = vmatpush3.msra.mxu1 %v7305_v51  ;;  %v18235_v40 = vpop.f32.mrf.mxu0  ;;  %v8423_v3 = vld [vmem:[#allocation8 + $0x448] sm:$0xff] }
 0x445   : > { %12835 = vmatprep.mubr.f32.mxu0 %v17947_v46  ;;  %12530 = vmatmul.mubr.f32.gmra.mxu1 %v17959_v57  ;;  %v18238_v20 = vpop.f32.mrf.mxu1  ;;  %v18246_v46 = vld [vmem:[#allocation8 + $0x3f8] sm:$0xff] }
 0x446   : > { %21232 = vst [vmem:[#allocation22_spill] sm:$0xff] %v18238_v20  ;;  %12532 = vmatprep.mubr.f32.mxu1 %v17964_v30  ;;  %12996 = vmatpush3.msra.mxu0 %v8425_v52  ;;  %v18241_v53 = vpop.f32.mrf.mxu0 }
 0x447   : > { %v18243_v42 = vpop.f32.mrf.mxu1  ;;  %12997 = vmatprep.subr.mxu0 %v8424_v34  ;;  %12705 = vmatprep.subr.mxu1 %v7304_v49 }
 0x448   : > { %21233 = vst [vmem:[#allocation116_spill] sm:$0xff] %v18243_v42  ;;  %12836 = vmatmul.mubr.f32.gmra.mxu0 %v17953_v31  ;;  %12706 = vmatpush3.msra.mxu1 %v7304_v49  ;;  %v8422_v49 = vld [vmem:[#allocation8 + $0x440] sm:$0xff]  ;;  %v21311_v42 = vld [vmem:[#allocation130_spill] sm:$0xff] }
 0x449   : > { %12838 = vmatprep.mubr.f32.mxu0 %v17959_v57  ;;  %12533 = vmatmul.mubr.f32.gmra.mxu1 %v17970_v11  ;;  %v18250_v51 = vpop.f32.mrf.mxu1 }
 0x44a   : > { %21234 = vst [vmem:[#allocation140_spill] sm:$0xff] %v18250_v51  ;;  %v18252_v20 = vpop.f32.mrf.mxu0  ;;  %12535 = vmatprep.mubr.f32.mxu1 %v17977_v36  ;;  %12998 = vmatpush3.msra.mxu0 %v8424_v34 }
 0x44b   : > { %v18255_v52 = vpop.f32.mrf.mxu1  ;;  %12999 = vmatprep.subr.mxu0 %v8423_v3  ;;  %12883 = vmatprep.subr.mxu1 %v18246_v46 }
 0x44c   : > { %21235 = vst [vmem:[#allocation144_spill] sm:$0xff] %v18255_v52  ;;  %12839 = vmatmul.mubr.f32.gmra.mxu0 %v17964_v30  ;;  %v18259_v31 = vpop.f32.mrf.mxu0  ;;  %v8421_v52 = vld [vmem:[#allocation8 + $0x438] sm:$0xff] }
 0x44d   : > { %12841 = vmatprep.mubr.f32.mxu0 %v17970_v11  ;;  %12536 = vmatmul.mubr.f32.gmra.mxu1 %v17981_v50  ;;  %v18264_v57 = vpop.f32.mrf.mxu1 }
 0x44e   : > { %12538 = vmatprep.mubr.f32.mxu1 %v17988_v4  ;;  %21236 = vst [vmem:[#allocation23_spill] sm:$0xff] %v18264_v57  ;;  %13000 = vmatpush3.msra.mxu0 %v8423_v3  ;;  %v8420_v3 = vld [vmem:[#allocation8 + $0x430] sm:$0xff] }
 0x44f   : > { %13001 = vmatprep.subr.mxu0 %v8422_v49  ;;  %v18271_v30 = vpop.f32.mrf.mxu1 }
 0x450   : > { %v18266_v34 = vpop.f32.mrf.mxu0  ;;  %12842 = vmatmul.mubr.f32.gmra.mxu0 %v17977_v36  ;;  %21238 = vst [vmem:[#allocation165_spill] sm:$0xff] %v18271_v30 }
 0x451   : > { %21237 = vst [vmem:[#allocation147_spill] sm:$0xff] %v18266_v34  ;;  %12844 = vmatprep.mubr.f32.mxu0 %v17981_v50  ;;  %12539 = vmatmul.mubr.f32.gmra.mxu1 %v17993_v10 }
 0x452   : > { %v18273_v11 = vpop.f32.mrf.mxu0  ;;  %12541 = vmatprep.mubr.f32.mxu1 %v17999_v37  ;;  %13002 = vmatpush3.msra.mxu0 %v8422_v49 }
 0x453   : > { %21239 = vst [vmem:[#allocation119_spill] sm:$0xff] %v18273_v11  ;;  %13003 = vmatprep.subr.mxu0 %v8421_v52  ;;  %v21326_v11 = vld [vmem:[#allocation61_spill] sm:$0xff] }
 0x454   : > { %v18276_v57 = vpop.f32.mrf.mxu0  ;;  %12845 = vmatmul.mubr.f32.gmra.mxu0 %v17988_v4  ;;  %v8419_v4 = vld [vmem:[#allocation8 + $0x428] sm:$0xff] }
 0x455   : > { %21240 = vst [vmem:[#allocation26_spill] sm:$0xff] %v18276_v57  ;;  %12847 = vmatprep.mubr.f32.mxu0 %v17993_v10  ;;  %12542 = vmatmul.mubr.f32.gmra.mxu1 %v18005_v1  ;;  %v18281_v36 = vpop.f32.mrf.mxu1 }
 0x456   : > { %21241 = vst [vmem:[#allocation148_spill] sm:$0xff] %v18281_v36  ;;  %v18283_v50 = vpop.f32.mrf.mxu0  ;;  %12544 = vmatprep.mubr.f32.mxu1 %v18012_v47  ;;  %13004 = vmatpush3.msra.mxu0 %v8421_v52 }
 0x457   : > { %21242 = vst [vmem:[#allocation152_spill] sm:$0xff] %v18283_v50  ;;  %v18286_v30 = vpop.f32.mrf.mxu1  ;;  %13005 = vmatprep.subr.mxu0 %v8420_v3 }
 0x458   : > { %21243 = vst [vmem:[#allocation29_spill] sm:$0xff] %v18286_v30  ;;  %v18288_v49 = vpop.f32.mrf.mxu0  ;;  %12848 = vmatmul.mubr.f32.gmra.mxu0 %v17999_v37  ;;  %v8418_v37 = vld [vmem:[#allocation8 + $0x420] sm:$0xff] }
 0x459   : > { %21244 = vst [vmem:[#allocation154_spill] sm:$0xff] %v18288_v49  ;;  %12850 = vmatprep.mubr.f32.mxu0 %v18005_v1  ;;  %12545 = vmatmul.mubr.f32.gmra.mxu1 %v18016_v27  ;;  %v18293_v10 = vpop.f32.mrf.mxu1 }
 0x45a   : > { %21245 = vst [vmem:[#allocation157_spill] sm:$0xff] %v18293_v10  ;;  %v18295_v36 = vpop.f32.mrf.mxu0  ;;  %12547 = vmatprep.mubr.f32.mxu1 %v18023_v5  ;;  %13006 = vmatpush3.msra.mxu0 %v8420_v3 }
 0x45b   : > { %21246 = vst [vmem:[#allocation160_spill] sm:$0xff] %v18295_v36  ;;  %v18298_v52 = vpop.f32.mrf.mxu1  ;;  %13007 = vmatprep.subr.mxu0 %v8419_v4  ;;  %v8044_v36 = vld [vmem:[#allocation8 + $0x380] sm:$0xff] }
 0x45c   : > { %21247 = vst [vmem:[#allocation161_spill] sm:$0xff] %v18298_v52  ;;  %v18300_v30 = vpop.f32.mrf.mxu0  ;;  %12851 = vmatmul.mubr.f32.gmra.mxu0 %v18012_v47  ;;  %v8417_v47 = vld [vmem:[#allocation8 + $0x418] sm:$0xff] }
 0x45d   : > { %21248 = vst [vmem:[#allocation162_spill] sm:$0xff] %v18300_v30  ;;  %12853 = vmatprep.mubr.f32.mxu0 %v18016_v27  ;;  %12548 = vmatmul.mubr.f32.gmra.mxu1 %v18028_v44  ;;  %v18305_v1 = vpop.f32.mrf.mxu1 }
 0x45e   : > { %21249 = vst [vmem:[#allocation164_spill] sm:$0xff] %v18305_v1  ;;  %v18307_v10 = vpop.f32.mrf.mxu0  ;;  %12550 = vmatprep.mubr.f32.mxu1 %v18034_v8  ;;  %13008 = vmatpush3.msra.mxu0 %v8419_v4 }
 0x45f   : > { %21250 = vst [vmem:[#allocation187_spill] sm:$0xff] %v18307_v10  ;;  %13009 = vmatprep.subr.mxu0 %v8418_v37  ;;  %v18313_v52 = vpop.f32.mrf.mxu1  ;;  %v21303_v10 = vld [vmem:[#allocation91_spill] sm:$0xff] }
 0x460   : > { %v18310_v3 = vpop.f32.mrf.mxu0  ;;  %12854 = vmatmul.mubr.f32.gmra.mxu0 %v18023_v5  ;;  %21252 = vst [vmem:[#allocation189_spill] sm:$0xff] %v18313_v52  ;;  %v8416_v5 = vld [vmem:[#allocation8 + $0x410] sm:$0xff] }
 0x461   : > { %21251 = vst [vmem:[#allocation59_spill] sm:$0xff] %v18310_v3  ;;  %12856 = vmatprep.mubr.f32.mxu0 %v18028_v44  ;;  %12551 = vmatmul.mubr.f32.gmra.mxu1 %v18040_v22  ;;  %v8047_v3 = vld [vmem:[#allocation8 + $0x398] sm:$0xff] }
 0x462   : > { %v18317_v27 = vpop.f32.mrf.mxu0  ;;  %12553 = vmatprep.mubr.f32.mxu1 %v18047_v39  ;;  %13010 = vmatpush3.msra.mxu0 %v8418_v37 }
 0x463   : > { %21253 = vst [vmem:[#allocation193_spill] sm:$0xff] %v18317_v27  ;;  %13011 = vmatprep.subr.mxu0 %v8417_v47  ;;  %v18323_v4 = vpop.f32.mrf.mxu1 }
 0x464   : > { %v18320_v1 = vpop.f32.mrf.mxu0  ;;  %12857 = vmatmul.mubr.f32.gmra.mxu0 %v18034_v8  ;;  %21255 = vst [vmem:[#allocation56_spill] sm:$0xff] %v18323_v4  ;;  %v8415_v4 = vld [vmem:[#allocation8 + $0x408] sm:$0xff] }
 0x465   : > { %21254 = vst [vmem:[#allocation31_spill] sm:$0xff] %v18320_v1  ;;  %12859 = vmatprep.mubr.f32.mxu0 %v18040_v22  ;;  %12554 = vmatmul.mubr.f32.gmra.mxu1 %v18054_v38  ;;  %v18330_v52 = vpop.f32.mrf.mxu1 }
 0x466   : > { %v18327_v44 = vpop.f32.mrf.mxu0  ;;  %12556 = vmatprep.mubr.f32.mxu1 %v18061_v32  ;;  %21257 = vst [vmem:[#allocation121_spill] sm:$0xff] %v18330_v52  ;;  %13012 = vmatpush3.msra.mxu0 %v8417_v47 }
 0x467   : > { %21256 = vst [vmem:[#allocation32_spill] sm:$0xff] %v18327_v44  ;;  %13013 = vmatprep.subr.mxu0 %v8416_v5  ;;  %v18335_v8 = vpop.f32.mrf.mxu1 }
 0x468   : > { %v18332_v37 = vpop.f32.mrf.mxu0  ;;  %12860 = vmatmul.mubr.f32.gmra.mxu0 %v18047_v39  ;;  %21259 = vst [vmem:[#allocation125_spill] sm:$0xff] %v18335_v8  ;;  %v8414_v39 = vld [vmem:[#allocation8 + $0x400] sm:$0xff] }
 0x469   : > { %21258 = vst [vmem:[#allocation57_spill] sm:$0xff] %v18332_v37  ;;  %12862 = vmatprep.mubr.f32.mxu0 %v18054_v38  ;;  %12557 = vmatmul.mubr.f32.gmra.mxu1 %v18068_v14  ;;  %v18342_v44 = vpop.f32.mrf.mxu1  ;;  %v21295_v37 = vld [vmem:[#allocation88_spill] sm:$0xff] }
 0x46a   : > { %v18339_v22 = vpop.f32.mrf.mxu0  ;;  %12559 = vmatprep.mubr.f32.mxu1 %v18074_v56  ;;  %21261 = vst [vmem:[#allocation60_spill] sm:$0xff] %v18342_v44  ;;  %13014 = vmatpush3.msra.mxu0 %v8416_v5  ;;  %v5170_v5 = vrot.slane %v18142_v41, 7 }
 0x46b   : > { %21260 = vst [vmem:[#allocation58_spill] sm:$0xff] %v18339_v22  ;;  %13015 = vmatprep.subr.mxu0 %v8415_v4  ;;  %v8050_v22 = vld [vmem:[#allocation8 + $0x3b0] sm:$0xff] }
 0x46c   : > { %v18344_v47 = vpop.f32.mrf.mxu0  ;;  %12863 = vmatmul.mubr.f32.gmra.mxu0 %v18061_v32 }
 0x46d   : > { %21262 = vst [vmem:[#allocation137_spill] sm:$0xff] %v18344_v47  ;;  %12865 = vmatprep.mubr.f32.mxu0 %v18068_v14  ;;  %12560 = vmatmul.mubr.f32.gmra.mxu1 %v18084_v33  ;;  %v5290_v14 = vrot.slane %v18128_v13, 7 }
 0x46e   : > { %v18349_v38 = vpop.f32.mrf.mxu0  ;;  %12562 = vmatprep.mubr.f32.mxu1 %v18094_v7  ;;  %v18352_v8 = vpop.f32.mrf.mxu1  ;;  %13016 = vmatpush3.msra.mxu0 %v8415_v4  ;;  %v5291_v4 = vrot.slane %v18131_v23, 7 }
 0x46f   : > { %21263 = vst [vmem:[#allocation63_spill] sm:$0xff] %v18349_v38  ;;  %21264 = vst [vmem:[#allocation65_spill] sm:$0xff] %v18352_v8  ;;  %13017 = vmatprep.subr.mxu0 %v8414_v39 }
 0x470   : > { %v18354_v44 = vpop.f32.mrf.mxu0  ;;  %12866 = vmatmul.mubr.f32.gmra.mxu0 %v18074_v56  ;;  %v18360_v32 = vpop.f32.mrf.mxu1  ;;  %v5368_v56 = vsel %vm574_vm0, %v5170_v5, %v5290_v14 }
 0x471   : > { %21265 = vst [vmem:[#allocation37_spill] sm:$0xff] %v18354_v44  ;;  %12868 = vmatprep.mubr.f32.mxu0 %v18084_v33  ;;  %12563 = vmatmul.mubr.f32.gmra.mxu1 %v18099_v15  ;;  %21266 = vst [vmem:[#allocation150_spill] sm:$0xff] %v18360_v32  ;;  %v5292_v32 = vsel %vm574_vm0, %v5290_v14, %v5291_v4 }
 0x472   : > { %v18363_v52 = vpop.f32.mrf.mxu0  ;;  %12565 = vmatprep.mubr.f32.mxu1 %v18108_v16  ;;  %13018 = vmatpush3.msra.mxu0 %v8414_v39 }
 0x473   : > { %21267 = vst [vmem:[#allocation39_spill] sm:$0xff] %v18363_v52 }
 0x474   : > { %v18367_v8 = vpop.f32.mrf.mxu0  ;;  %12869 = vmatmul.mubr.f32.gmra.mxu0 %v18094_v7  ;;  %v5293_v7 = vsel %vm574_vm0, %v5291_v4, %v5170_v5 }
 0x475   : > { %21268 = vst [vmem:[#allocation68_spill] sm:$0xff] %v18367_v8  ;;  %12871 = vmatprep.mubr.f32.mxu0 %v18099_v15  ;;  %v18372_v33 = vpop.f32.mrf.mxu1  ;;  %12566 = vmatmul.mubr.f32.gmra.mxu1 %v5368_v56  ;;  %v18385_v15 = vld [vmem:[#allocation2 + $0x8] sm:$0xff] }
 0x476   : > { %21269 = vst [vmem:[#allocation40_spill] sm:$0xff] %v18372_v33  ;;  %v18375_v44 = vpop.f32.mrf.mxu0  ;;  %12568 = vmatprep.mubr.f32.mxu1 %v5292_v32  ;;  %v5171_v33 = vrot.slane %v18385_v15, 7 }
 0x477   : > { %21270 = vst [vmem:[#allocation156_spill] sm:$0xff] %v18375_v44  ;;  %v18377_v52 = vpop.f32.mrf.mxu1 }
 0x478   : > { %21271 = vst [vmem:[#allocation41_spill] sm:$0xff] %v18377_v52  ;;  %v18379_v39 = vpop.f32.mrf.mxu0  ;;  %12872 = vmatmul.mubr.f32.gmra.mxu0 %v18108_v16  ;;  %v8058_v16 = vld [vmem:[#allocation8 + $0x3f0] sm:$0xff] }
 0x479   : > { %21272 = vst [vmem:[#allocation21_spill] sm:$0xff] %v18379_v39  ;;  %12874 = vmatprep.mubr.f32.mxu0 %v5368_v56  ;;  %v18383_v8 = vpop.f32.mrf.mxu1  ;;  %12569 = vmatmul.mubr.f32.gmra.mxu1 %v5293_v7  ;;  %v21287_v39 = vld [vmem:[#allocation85_spill] sm:$0xff] }
 0x47a   : > { %21273 = vst [vmem:[#allocation42_spill] sm:$0xff] %v18383_v8  ;;  %v18388_v14 = vpop.f32.mrf.mxu0  ;;  %12707 = vmatprep.mubr.f32.mxu1 %v17270_v55  ;;  %v8057_v55 = vld [vmem:[#allocation8 + $0x3e8] sm:$0xff]  ;;  %v21281_v8 = vld [vmem:[#allocation123_spill] sm:$0xff] }
 0x47b   : > { %21274 = vst [vmem:[#allocation163_spill] sm:$0xff] %v18388_v14  ;;  %v18391_v44 = vpop.f32.mrf.mxu1 }
 0x47c   : > { %21275 = vst [vmem:[#allocation43_spill] sm:$0xff] %v18391_v44  ;;  %v18393_v52 = vpop.f32.mrf.mxu0  ;;  %12875 = vmatmul.mubr.f32.gmra.mxu0 %v5292_v32 }
 0x47d   : > { %21276 = vst [vmem:[#allocation27_spill] sm:$0xff] %v18393_v52  ;;  %12877 = vmatprep.mubr.f32.mxu0 %v5293_v7  ;;  %v18395_v5 = vpop.f32.mrf.mxu1  ;;  %12708 = vmatmul.mubr.f32.vlgmr.msra.gmra.mxu1 %v17291_v45  ;;  %v8056_v45 = vld [vmem:[#allocation8 + $0x3e0] sm:$0xff] }
 0x47e   : > { %v18398_v4 = vpop.f32.mrf.mxu0  ;;  %12710 = vmatprep.mubr.f32.mxu1 %v17309_v2  ;;  %12884 = vmatpush3.msra.mxu1 %v18246_v46 }
 0x47f   : > { %21277 = vst [vmem:[#allocation44_spill] sm:$0xff] %v18398_v4  ;;  %v18402_v56 = vpop.f32.mrf.mxu1  ;;  %12885 = vmatprep.subr.mxu1 %v8058_v16 }
 0x480   : > { %v18404_v44 = vpop.f32.mrf.mxu0  ;;  %12878 = vmatmul.mubr.f32.gmra.mxu0 %v5171_v33  ;;  %12886 = vmatpush3.msra.mxu1 %v8058_v16 }
 0x481   : > { %21278 = vst [vmem:[#allocation30_spill] sm:$0xff] %v18404_v44  ;;  %12880 = vmatprep.mubr.f32.mxu0 %v5171_v33  ;;  %v18406_v32 = vpop.f32.mrf.mxu1  ;;  %12711 = vmatmul.mubr.f32.gmra.mxu1 %v17337_v0  ;;  %v8055_v44 = vld [vmem:[#allocation8 + $0x3d8] sm:$0xff] }
 0x482   : > { %v18409_v7 = vpop.f32.mrf.mxu0  ;;  %12713 = vmatprep.mubr.f32.mxu1 %v17368_v54  ;;  %12887 = vmatprep.subr.mxu1 %v8057_v55 }
 0x483   : > { %21279 = vst [vmem:[#allocation174_spill] sm:$0xff] %v18409_v7  ;;  %v18412_v2 = vpop.f32.mrf.mxu1  ;;  %12888 = vmatpush3.msra.mxu1 %v8057_v55  ;;  %v21283_v7 = vld [vmem:[#allocation84_spill] sm:$0xff]  ;;  %v8054_v55 = vld [vmem:[#allocation8 + $0x3d0] sm:$0xff] }
 0x484   : > { %v18414_v46 = vpop.f32.mrf.mxu0  ;;  %12881 = vmatmul.mubr.f32.gmra.mxu0 %v5171_v33  ;;  %12889 = vmatprep.subr.mxu1 %v8056_v45  ;;  %v21285_v33 = vld [vmem:[#allocation124_spill] sm:$0xff] }
 0x485   : > { %21280 = vst [vmem:[#allocation181_spill] sm:$0xff] %v18414_v46  ;;  %13019 = vmatprep.mubr.f32.mxu0 %v17337_v0  ;;  %v18417_v16 = vpop.f32.mrf.mxu1  ;;  %12714 = vmatmul.mubr.f32.gmra.mxu1 %v21281_v8  ;;  %v8053_v46 = vld [vmem:[#allocation8 + $0x3c8] sm:$0xff] }
 0x486   : > { %v18420_v4 = vpop.f32.mrf.mxu0  ;;  %12716 = vmatprep.mubr.f32.mxu1 %v21283_v7  ;;  %12890 = vmatpush3.msra.mxu1 %v8056_v45 }
 0x487   : > { %21282 = vst [vmem:[#allocation45_spill] sm:$0xff] %v18420_v4  ;;  %v18423_v52 = vpop.f32.mrf.mxu1  ;;  %12891 = vmatprep.subr.mxu1 %v8055_v44 }
 0x488   : > { %v18425_v14 = vpop.f32.mrf.mxu0  ;;  %13020 = vmatmul.mubr.f32.vlgmr.msra.gmra.mxu0 %v17368_v54  ;;  %12892 = vmatpush3.msra.mxu1 %v8055_v44  ;;  %v8052_v54 = vld [vmem:[#allocation8 + $0x3c0] sm:$0xff] }
 0x489   : > { %21284 = vst [vmem:[#allocation167_spill] sm:$0xff] %v18425_v14  ;;  %13022 = vmatprep.mubr.f32.mxu0 %v21281_v8  ;;  %v18429_v0 = vpop.f32.mrf.mxu1  ;;  %12717 = vmatmul.mubr.f32.gmra.mxu1 %v21285_v33  ;;  %v21289_v8 = vld [vmem:[#allocation127_spill] sm:$0xff] }
 0x48a   : > { %v18432_v4 = vpop.f32.mrf.mxu0  ;;  %12719 = vmatprep.mubr.f32.mxu1 %v21287_v39  ;;  %12893 = vmatprep.subr.mxu1 %v8054_v55 }
 0x48b   : > { %21286 = vst [vmem:[#allocation46_spill] sm:$0xff] %v18432_v4  ;;  %v18435_v45 = vpop.f32.mrf.mxu1  ;;  %12894 = vmatpush3.msra.mxu1 %v8054_v55  ;;  %v21291_v4 = vld [vmem:[#allocation87_spill] sm:$0xff]  ;;  %v8051_v55 = vld [vmem:[#allocation8 + $0x3b8] sm:$0xff] }
 0x48c   : > { %v18437_v38 = vpop.f32.mrf.mxu0  ;;  %13023 = vmatmul.mubr.f32.gmra.mxu0 %v21283_v7  ;;  %12895 = vmatprep.subr.mxu1 %v8053_v46 }
 0x48d   : > { %21288 = vst [vmem:[#allocation168_spill] sm:$0xff] %v18437_v38  ;;  %13025 = vmatprep.mubr.f32.mxu0 %v21285_v33  ;;  %v18441_v44 = vpop.f32.mrf.mxu1  ;;  %12720 = vmatmul.mubr.f32.gmra.mxu1 %v21289_v8  ;;  %v21293_v33 = vld [vmem:[#allocation132_spill] sm:$0xff] }
 0x48e   : > { %v18444_v14 = vpop.f32.mrf.mxu0  ;;  %12722 = vmatprep.mubr.f32.mxu1 %v21291_v4  ;;  %12896 = vmatpush3.msra.mxu1 %v8053_v46 }
 0x48f   : > { %21290 = vst [vmem:[#allocation47_spill] sm:$0xff] %v18444_v14  ;;  %v18447_v47 = vpop.f32.mrf.mxu1  ;;  %12897 = vmatprep.subr.mxu1 %v8052_v54 }
 0x490   : > { %v18449_v38 = vpop.f32.mrf.mxu0  ;;  %13026 = vmatmul.mubr.f32.gmra.mxu0 %v21287_v39  ;;  %12898 = vmatpush3.msra.mxu1 %v8052_v54  ;;  %v8049_v39 = vld [vmem:[#allocation8 + $0x3a8] sm:$0xff] }
 0x491   : > { %21292 = vst [vmem:[#allocation33_spill] sm:$0xff] %v18449_v38  ;;  %13028 = vmatprep.mubr.f32.mxu0 %v21289_v8  ;;  %v18453_v7 = vpop.f32.mrf.mxu1  ;;  %12723 = vmatmul.mubr.f32.gmra.mxu1 %v21293_v33  ;;  %v21297_v8 = vld [vmem:[#allocation133_spill] sm:$0xff] }
 0x492   : > { %v18456_v14 = vpop.f32.mrf.mxu0  ;;  %12725 = vmatprep.mubr.f32.mxu1 %v21295_v37  ;;  %12899 = vmatprep.subr.mxu1 %v8051_v55 }
 0x493   : > { %21294 = vst [vmem:[#allocation48_spill] sm:$0xff] %v18456_v14  ;;  %v18459_v46 = vpop.f32.mrf.mxu1  ;;  %12900 = vmatpush3.msra.mxu1 %v8051_v55  ;;  %v21299_v14 = vld [vmem:[#allocation89_spill] sm:$0xff]  ;;  %v8048_v55 = vld [vmem:[#allocation8 + $0x3a0] sm:$0xff] }
 0x494   : > { %v18461_v1 = vpop.f32.mrf.mxu0  ;;  %13029 = vmatmul.mubr.f32.gmra.mxu0 %v21291_v4  ;;  %12901 = vmatprep.subr.mxu1 %v8050_v22 }
 0x495   : > { %21296 = vst [vmem:[#allocation169_spill] sm:$0xff] %v18461_v1  ;;  %13031 = vmatprep.mubr.f32.mxu0 %v21293_v33  ;;  %v18465_v54 = vpop.f32.mrf.mxu1  ;;  %12726 = vmatmul.mubr.f32.gmra.mxu1 %v21297_v8  ;;  %v21301_v33 = vld [vmem:[#allocation136_spill] sm:$0xff] }
 0x496   : > { %v18468_v38 = vpop.f32.mrf.mxu0  ;;  %12728 = vmatprep.mubr.f32.mxu1 %v21299_v14  ;;  %12902 = vmatpush3.msra.mxu1 %v8050_v22 }
 0x497   : > { %21298 = vst [vmem:[#allocation49_spill] sm:$0xff] %v18468_v38  ;;  %v18471_v27 = vpop.f32.mrf.mxu1  ;;  %12903 = vmatprep.subr.mxu1 %v8049_v39 }
 0x498   : > { %v18473_v1 = vpop.f32.mrf.mxu0  ;;  %13032 = vmatmul.mubr.f32.gmra.mxu0 %v21295_v37  ;;  %12904 = vmatpush3.msra.mxu1 %v8049_v39  ;;  %v8046_v37 = vld [vmem:[#allocation8 + $0x390] sm:$0xff] }
 0x499   : > { %21300 = vst [vmem:[#allocation34_spill] sm:$0xff] %v18473_v1  ;;  %13034 = vmatprep.mubr.f32.mxu0 %v21297_v8  ;;  %v18477_v4 = vpop.f32.mrf.mxu1  ;;  %12729 = vmatmul.mubr.f32.gmra.mxu1 %v21301_v33  ;;  %v21305_v8 = vld [vmem:[#allocation128_spill] sm:$0xff] }
 0x49a   : > { %v18480_v38 = vpop.f32.mrf.mxu0  ;;  %12731 = vmatprep.mubr.f32.mxu1 %v21303_v10  ;;  %12905 = vmatprep.subr.mxu1 %v8048_v55 }
 0x49b   : > { %21302 = vst [vmem:[#allocation50_spill] sm:$0xff] %v18480_v38  ;;  %v18483_v22 = vpop.f32.mrf.mxu1  ;;  %12906 = vmatpush3.msra.mxu1 %v8048_v55  ;;  %v21307_v38 = vld [vmem:[#allocation141_spill] sm:$0xff]  ;;  %v8045_v55 = vld [vmem:[#allocation8 + $0x388] sm:$0xff] }
 0x49c   : > { %v18485_v30 = vpop.f32.mrf.mxu0  ;;  %13035 = vmatmul.mubr.f32.gmra.mxu0 %v21299_v14  ;;  %12907 = vmatprep.subr.mxu1 %v8047_v3 }
 0x49d   : > { %21304 = vst [vmem:[#allocation170_spill] sm:$0xff] %v18485_v30  ;;  %13037 = vmatprep.mubr.f32.mxu0 %v21301_v33  ;;  %v18489_v39 = vpop.f32.mrf.mxu1  ;;  %12732 = vmatmul.mubr.f32.gmra.mxu1 %v21305_v8  ;;  %v21309_v33 = vld [vmem:[#allocation93_spill] sm:$0xff] }
 0x49e   : > { %v18492_v1 = vpop.f32.mrf.mxu0  ;;  %12734 = vmatprep.mubr.f32.mxu1 %v21307_v38  ;;  %12908 = vmatpush3.msra.mxu1 %v8047_v3 }
 0x49f   : > { %21306 = vst [vmem:[#allocation86_spill] sm:$0xff] %v18492_v1  ;;  %v18495_v51 = vpop.f32.mrf.mxu1  ;;  %12909 = vmatprep.subr.mxu1 %v8046_v37 }
 0x4a0   : > { %v18497_v30 = vpop.f32.mrf.mxu0  ;;  %13038 = vmatmul.mubr.f32.gmra.mxu0 %v21303_v10  ;;  %12910 = vmatpush3.msra.mxu1 %v8046_v37  ;;  %v18512_v10 = vld [vmem:[#allocation9 + $0x78] sm:$0xff] }
 0x4a1   : > { %21308 = vst [vmem:[#allocation172_spill] sm:$0xff] %v18497_v30  ;;  %13040 = vmatprep.mubr.f32.mxu0 %v21305_v8  ;;  %v18501_v14 = vpop.f32.mrf.mxu1  ;;  %12735 = vmatmul.mubr.f32.gmra.mxu1 %v21309_v33  ;;  %v21313_v8 = vld [vmem:[#allocation142_spill] sm:$0xff]  ;;  %v21315_v30 = vld [vmem:[#allocation95_spill] sm:$0xff] }
 0x4a2   : > { %v18504_v1 = vpop.f32.mrf.mxu0  ;;  %12737 = vmatprep.mubr.f32.mxu1 %v21311_v42  ;;  %12911 = vmatprep.subr.mxu1 %v8045_v55 }
 0x4a3   : > { %21310 = vst [vmem:[#allocation35_spill] sm:$0xff] %v18504_v1  ;;  %v18507_v3 = vpop.f32.mrf.mxu1  ;;  %12912 = vmatpush3.msra.mxu1 %v8045_v55 }
 0x4a4   : > { %v18509_v49 = vpop.f32.mrf.mxu0  ;;  %13041 = vmatmul.mubr.f32.gmra.mxu0 %v21307_v38  ;;  %12913 = vmatprep.subr.mxu1 %v8044_v36 }
 0x4a5   : > { %21312 = vst [vmem:[#allocation173_spill] sm:$0xff] %v18509_v49  ;;  %13043 = vmatprep.mubr.f32.mxu0 %v21309_v33  ;;  %v18515_v37 = vpop.f32.mrf.mxu1  ;;  %12738 = vmatmul.mubr.f32.gmra.mxu1 %v21313_v8  ;;  %v21318_v33 = vld [vmem:[#allocation134_spill] sm:$0xff] }
 0x4a6   : > { %v18518_v1 = vpop.f32.mrf.mxu0  ;;  %12740 = vmatprep.mubr.f32.mxu1 %v21315_v30  ;;  %12914 = vmatpush3.msra.mxu1 %v8044_v36 }
 0x4a7   : > { %21314 = vst [vmem:[#allocation171_spill] sm:$0xff] %v18518_v1  ;;  %v18521_v50 = vpop.f32.mrf.mxu1  ;;  %13091 = vmatprep.subr.mxu1 %v18512_v10  ;;  %v21320_v1 = vld [vmem:[#allocation90_spill] sm:$0xff] }
 0x4a8   : > { %v18524_v55 = vpop.f32.mrf.mxu0  ;;  %13044 = vmatmul.mubr.f32.gmra.mxu0 %v21311_v42  ;;  %v21324_v42 = vld [vmem:[#allocation166_spill] sm:$0xff] }
 0x4a9   : > { %21316 = vst [vmem:[#allocation176_spill] sm:$0xff] %v18524_v55  ;;  %13046 = vmatprep.mubr.f32.mxu0 %v21313_v8  ;;  %v18528_v38 = vpop.f32.mrf.mxu1  ;;  %12741 = vmatmul.mubr.f32.gmra.mxu1 %v21318_v33 }
 0x4aa   : > { %21317 = vst [vmem:[#allocation83_spill] sm:$0xff] %v18528_v38  ;;  %v18531_v49 = vpop.f32.mrf.mxu0  ;;  %12743 = vmatprep.mubr.f32.mxu1 %v21320_v1 }
 0x4ab   : > { %21319 = vst [vmem:[#allocation175_spill] sm:$0xff] %v18531_v49  ;;  %v18534_v57 = vpop.f32.mrf.mxu1 }
 0x4ac   : > { %21321 = vst [vmem:[#allocation36_spill] sm:$0xff] %v18534_v57  ;;  %v18536_v36 = vpop.f32.mrf.mxu0  ;;  %13047 = vmatmul.mubr.f32.gmra.mxu0 %v21315_v30  ;;  %v21330_v30 = vld [vmem:[#allocation99_spill] sm:$0xff] }
 0x4ad   : > { %21322 = vst [vmem:[#allocation177_spill] sm:$0xff] %v18536_v36  ;;  %13049 = vmatprep.mubr.f32.mxu0 %v21318_v33  ;;  %v18540_v55 = vpop.f32.mrf.mxu1  ;;  %12744 = vmatmul.mubr.f32.gmra.mxu1 %v21324_v42 }
 0x4ae   : > { %21323 = vst [vmem:[#allocation38_spill] sm:$0xff] %v18540_v55  ;;  %v18543_v8 = vpop.f32.mrf.mxu0  ;;  %12746 = vmatprep.mubr.f32.mxu1 %v21326_v11  ;;  %v21332_v55 = vld [vmem:[#allocation145_spill] sm:$0xff] }
 0x4af   : > { %21325 = vst [vmem:[#allocation178_spill] sm:$0xff] %v18543_v8  ;;  %v18546_v34 = vpop.f32.mrf.mxu1 }
 0x4b0   : > { %21327 = vst [vmem:[#allocation180_spill] sm:$0xff] %v18546_v34  ;;  %v18548_v49 = vpop.f32.mrf.mxu0  ;;  %13050 = vmatmul.mubr.f32.gmra.mxu0 %v21320_v1  ;;  %v21336_v1 = vld [vmem:[#allocation102_spill] sm:$0xff] }
 0x4b1   : > { %21328 = vst [vmem:[#allocation182_spill] sm:$0xff] %v18548_v49  ;;  %13052 = vmatprep.mubr.f32.mxu0 %v21324_v42  ;;  %v18552_v36 = vpop.f32.mrf.mxu1  ;;  %12747 = vmatmul.mubr.f32.gmra.mxu1 %v21330_v30 }
 0x4b2   : > { %21329 = vst [vmem:[#allocation184_spill] sm:$0xff] %v18552_v36  ;;  %v18555_v33 = vpop.f32.mrf.mxu0  ;;  %12749 = vmatprep.mubr.f32.mxu1 %v21332_v55  ;;  %v21338_v36 = vld [vmem:[#allocation62_spill] sm:$0xff] }
 0x4b3   : > { %21331 = vst [vmem:[#allocation185_spill] sm:$0xff] %v18555_v33  ;;  %v18558_v57 = vpop.f32.mrf.mxu1 }
 0x4b4   : > { %21333 = vst [vmem:[#allocation186_spill] sm:$0xff] %v18558_v57  ;;  %v18560_v8 = vpop.f32.mrf.mxu0  ;;  %13053 = vmatmul.mubr.f32.gmra.mxu0 %v21326_v11  ;;  %v21342_v11 = vld [vmem:[#allocation92_spill] sm:$0xff] }
 0x4b5   : > { %21334 = vst [vmem:[#allocation190_spill] sm:$0xff] %v18560_v8  ;;  %13055 = vmatprep.mubr.f32.mxu0 %v21330_v30  ;;  %v18564_v49 = vpop.f32.mrf.mxu1  ;;  %12750 = vmatmul.mubr.f32.gmra.mxu1 %v21336_v1 }
 0x4b6   : > { %21335 = vst [vmem:[#allocation192_spill] sm:$0xff] %v18564_v49  ;;  %v18567_v42 = vpop.f32.mrf.mxu0  ;;  %12752 = vmatprep.mubr.f32.mxu1 %v21338_v36  ;;  %v21344_v49 = vld [vmem:[#allocation139_spill] sm:$0xff] }
 0x4b7   : > { %21337 = vst [vmem:[#allocation195_spill] sm:$0xff] %v18567_v42  ;;  %v18570_v34 = vpop.f32.mrf.mxu1 }
 0x4b8   : > { %21339 = vst [vmem:[#allocation51_spill] sm:$0xff] %v18570_v34  ;;  %v18572_v33 = vpop.f32.mrf.mxu0  ;;  %13056 = vmatmul.mubr.f32.gmra.mxu0 %v21332_v55  ;;  %v21348_v55 = vld [vmem:[#allocation104_spill] sm:$0xff] }
 0x4b9   : > { %21340 = vst [vmem:[#allocation52_spill] sm:$0xff] %v18572_v33  ;;  %13058 = vmatprep.mubr.f32.mxu0 %v21336_v1  ;;  %v18576_v8 = vpop.f32.mrf.mxu1  ;;  %12753 = vmatmul.mubr.f32.gmra.mxu1 %v21342_v11 }
 0x4ba   : > { %21341 = vst [vmem:[#allocation53_spill] sm:$0xff] %v18576_v8  ;;  %v18579_v30 = vpop.f32.mrf.mxu0  ;;  %12755 = vmatprep.mubr.f32.mxu1 %v21344_v49  ;;  %v21350_v8 = vld [vmem:[#allocation149_spill] sm:$0xff] }
 0x4bb   : > { %21343 = vst [vmem:[#allocation54_spill] sm:$0xff] %v18579_v30  ;;  %v18582_v57 = vpop.f32.mrf.mxu1 }
 0x4bc   : > { %21345 = vst [vmem:[#allocation55_spill] sm:$0xff] %v18582_v57  ;;  %v18584_v42 = vpop.f32.mrf.mxu0  ;;  %13059 = vmatmul.mubr.f32.gmra.mxu0 %v21338_v36  ;;  %v21354_v36 = vld [vmem:[#allocation108_spill] sm:$0xff] }
 0x4bd   : > { %21346 = vst [vmem:[#allocation179_spill] sm:$0xff] %v18584_v42  ;;  %13061 = vmatprep.mubr.f32.mxu0 %v21342_v11  ;;  %v18588_v33 = vpop.f32.mrf.mxu1  ;;  %12756 = vmatmul.mubr.f32.gmra.mxu1 %v21348_v55 }
 0x4be   : > { %21347 = vst [vmem:[#allocation82_spill] sm:$0xff] %v18588_v33  ;;  %v18591_v1 = vpop.f32.mrf.mxu0  ;;  %12758 = vmatprep.mubr.f32.mxu1 %v21350_v8  ;;  %v21356_v33 = vld [vmem:[#allocation143_spill] sm:$0xff] }
 0x4bf   : > { %21349 = vst [vmem:[#allocation24_spill] sm:$0xff] %v18591_v1  ;;  %v18594_v34 = vpop.f32.mrf.mxu1 }
 0x4c0   : > { %21351 = vst [vmem:[#allocation183_spill] sm:$0xff] %v18594_v34  ;;  %v18596_v30 = vpop.f32.mrf.mxu0  ;;  %13062 = vmatmul.mubr.f32.gmra.mxu0 %v21344_v49  ;;  %v21360_v49 = vld [vmem:[#allocation94_spill] sm:$0xff] }
 0x4c1   : > { %21352 = vst [vmem:[#allocation188_spill] sm:$0xff] %v18596_v30  ;;  %13064 = vmatprep.mubr.f32.mxu0 %v21348_v55  ;;  %v18600_v42 = vpop.f32.mrf.mxu1  ;;  %12759 = vmatmul.mubr.f32.gmra.mxu1 %v21354_v36 }
 0x4c2   : > { %21353 = vst [vmem:[#allocation191_spill] sm:$0xff] %v18600_v42  ;;  %v18603_v11 = vpop.f32.mrf.mxu0  ;;  %12761 = vmatprep.mubr.f32.mxu1 %v21356_v33  ;;  %v21362_v42 = vld [vmem:[#allocation64_spill] sm:$0xff] }
 0x4c3   : > { %21355 = vst [vmem:[#allocation25_spill] sm:$0xff] %v18603_v11  ;;  %v18606_v57 = vpop.f32.mrf.mxu1 }
 0x4c4   : > { %21357 = vst [vmem:[#allocation194_spill] sm:$0xff] %v18606_v57  ;;  %v18608_v1 = vpop.f32.mrf.mxu0  ;;  %13065 = vmatmul.mubr.f32.gmra.mxu0 %v21350_v8  ;;  %v21366_v8 = vld [vmem:[#allocation111_spill] sm:$0xff] }
 0x4c5   : > { %21358 = vst [vmem:[#allocation196_spill] sm:$0xff] %v18608_v1  ;;  %13067 = vmatprep.mubr.f32.mxu0 %v21354_v36  ;;  %v18612_v30 = vpop.f32.mrf.mxu1  ;;  %12762 = vmatmul.mubr.f32.gmra.mxu1 %v21360_v49 }
 0x4c6   : > { %21359 = vst [vmem:[#allocation28_spill] sm:$0xff] %v18612_v30  ;;  %v18615_v55 = vpop.f32.mrf.mxu0  ;;  %12764 = vmatprep.mubr.f32.mxu1 %v21362_v42  ;;  %v21368_v30 = vld [vmem:[#allocation98_spill] sm:$0xff] }
 0x4c7   : > { %21361 = vst [vmem:[#allocation70_spill] sm:$0xff] %v18615_v55  ;;  %v18618_v34 = vpop.f32.mrf.mxu1 }
 0x4c8   : > { %21363 = vst [vmem:[#allocation197_spill] sm:$0xff] %v18618_v34  ;;  %v18620_v11 = vpop.f32.mrf.mxu0  ;;  %13068 = vmatmul.mubr.f32.gmra.mxu0 %v21356_v33  ;;  %v21372_v33 = vld [vmem:[#allocation113_spill] sm:$0xff] }
 0x4c9   : > { %21364 = vst [vmem:[#allocation198_spill] sm:$0xff] %v18620_v11  ;;  %13070 = vmatprep.mubr.f32.mxu0 %v21360_v49  ;;  %v18624_v1 = vpop.f32.mrf.mxu1  ;;  %12765 = vmatmul.mubr.f32.gmra.mxu1 %v21366_v8 }
 0x4ca   : > { %21365 = vst [vmem:[#allocation81_spill] sm:$0xff] %v18624_v1  ;;  %v18627_v36 = vpop.f32.mrf.mxu0  ;;  %12767 = vmatprep.mubr.f32.mxu1 %v21368_v30  ;;  %v21374_v1 = vld [vmem:[#allocation146_spill] sm:$0xff] }
 0x4cb   : > { %21367 = vst [vmem:[#allocation114_spill] sm:$0xff] %v18627_v36  ;;  %v18630_v57 = vpop.f32.mrf.mxu1 }
 0x4cc   : > { %21369 = vst [vmem:[#allocation200_spill] sm:$0xff] %v18630_v57  ;;  %v18632_v55 = vpop.f32.mrf.mxu0  ;;  %13071 = vmatmul.mubr.f32.gmra.mxu0 %v21362_v42 }
 0x4cd   : > { %21370 = vst [vmem:[#allocation199_spill] sm:$0xff] %v18632_v55  ;;  %13073 = vmatprep.mubr.f32.mxu0 %v21366_v8  ;;  %v18636_v11 = vpop.f32.mrf.mxu1  ;;  %12768 = vmatmul.mubr.f32.gmra.mxu1 %v21372_v33  ;;  %v5450_v55 = vrot.slane %v18128_v13, 1  ;;  %v21378_v8 = vld [vmem:[#allocation153_spill] sm:$0xff] }
 0x4ce   : > { %21371 = vst [vmem:[#allocation72_spill] sm:$0xff] %v18636_v11  ;;  %v18639_v49 = vpop.f32.mrf.mxu0  ;;  %12770 = vmatprep.mubr.f32.mxu1 %v21374_v1  ;;  %v5453_v11 = vrot.slane %v18142_v41, 1 }
 0x4cf   : > { %21373 = vst [vmem:[#allocation96_spill] sm:$0xff] %v18639_v49  ;;  %v18642_v34 = vpop.f32.mrf.mxu1  ;;  %v21380_v49 = vld [vmem:[#allocation117_spill] sm:$0xff] }
 0x4d0   : > { %21375 = vst [vmem:[#allocation73_spill] sm:$0xff] %v18642_v34  ;;  %v18644_v36 = vpop.f32.mrf.mxu0  ;;  %13074 = vmatmul.mubr.f32.gmra.mxu0 %v21368_v30  ;;  %v5451_v34 = vrot.slane %v18131_v23, 1  ;;  %v21386_v23 = vld [vmem:[#allocation66_spill] sm:$0xff] }
 0x4d1   : > { %21376 = vst [vmem:[#allocation115_spill] sm:$0xff] %v18644_v36  ;;  %13076 = vmatprep.mubr.f32.mxu0 %v21372_v33  ;;  %v18649_v42 = vpop.f32.mrf.mxu1  ;;  %12771 = vmatmul.mubr.f32.gmra.mxu1 %v21378_v8 }
 0x4d2   : > { %21377 = vst [vmem:[#allocation97_spill] sm:$0xff] %v18649_v42  ;;  %v18653_v57 = vpop.f32.mrf.mxu0  ;;  %12773 = vmatprep.mubr.f32.mxu1 %v21380_v49  ;;  %v5452_v13 = vsel %vm735_vm1, %v5450_v55, %v5451_v34  ;;  %v5454_v41 = vsel %vm735_vm1, %v5451_v34, %v5453_v11  ;;  %v5455_v34 = vrot.slane %v18385_v15, 1 }
 0x4d3   : > { %21379 = vst [vmem:[#allocation71_spill] sm:$0xff] %v18653_v57  ;;  %v18657_v38 = vpop.f32.mrf.mxu1 }
 0x4d4   : > { %21381 = vst [vmem:[#allocation74_spill] sm:$0xff] %v18657_v38  ;;  %v18659_v36 = vpop.f32.mrf.mxu0  ;;  %13077 = vmatmul.mubr.f32.gmra.mxu0 %v21374_v1  ;;  %v5960_v38 = vadd.f32 %v18395_v5, %v21386_v23  ;;  %v5548_v1 = vsel %vm735_vm1, %v5453_v11, %v5450_v55  ;;  %v9188_v55 = vld [vmem:[#allocation9 + $0x70] sm:$0xff] }
 0x4d5   : > { %21382 = vst [vmem:[#allocation100_spill] sm:$0xff] %v18659_v36  ;;  %13079 = vmatprep.mubr.f32.mxu0 %v21378_v8  ;;  %v18664_v30 = vpop.f32.mrf.mxu1  ;;  %12774 = vmatmul.mubr.f32.gmra.mxu1 %v5452_v13 }
 0x4d6   : > { %21383 = vst [vmem:[#allocation75_spill] sm:$0xff] %v18664_v30  ;;  %v18667_v33 = vpop.f32.mrf.mxu0  ;;  %12776 = vmatprep.mubr.f32.mxu1 %v5454_v41  ;;  %v21388_v30 = vld [vmem:[#allocation101_spill] sm:$0xff]  ;;  %v6516_v11 = vadd.f32 %v18104_v48, %v5960_v38  ;;  %v21393_v38 = vld [vmem:[#allocation67_spill] sm:$0xff] }
 0x4d7   : > { %21384 = vst [vmem:[#allocation105_spill] sm:$0xff] %v18667_v33  ;;  %v18669_v57 = vpop.f32.mrf.mxu1  ;;  %v5955_v33 = vadd.f32 %v18402_v56, %v21388_v30  ;;  %v21391_v56 = vld [vmem:[#allocation120_spill] sm:$0xff] }
 0x4d8   : > { %21385 = vst [vmem:[#allocation76_spill] sm:$0xff] %v18669_v57  ;;  %v18673_v36 = vpop.f32.mrf.mxu0  ;;  %13080 = vmatmul.mubr.f32.gmra.mxu0 %v21380_v49  ;;  %v13814_v57 = vld [vmem:[#allocation2 + $0x30] sm:$0xff]  ;;  %v5970_v49 = vadd.f32 %v18406_v32, %v18077_v58  ;;  %v5965_v30 = vadd.f32 %v18412_v2, %v21391_v56  ;;  %v9187_v32 = vld [vmem:[#allocation9 + $0x68] sm:$0xff] }
 0x4d9   : > { %21387 = vst [vmem:[#allocation106_spill] sm:$0xff] %v18673_v36  ;;  %13082 = vmatprep.mubr.f32.mxu0 %v5452_v13  ;;  %v18677_v8 = vpop.f32.mrf.mxu1  ;;  %12777 = vmatmul.mubr.f32.gmra.mxu1 %v5548_v1  ;;  %v13815_v13 = vld [vmem:[#allocation2 + $0x38] sm:$0xff]  ;;  %v13816_v36 = vld [vmem:[#allocation2 + $0x40] sm:$0xff]  ;;  %v6515_v58 = vadd.f32 %v18115_v28, %v5955_v33  ;;  %v5975_v28 = vadd.f32 %v18423_v52, %v18112_v61  ;;  %v21398_v61 = vld [vmem:[#allocation155_spill] sm:$0xff] }
 0x4da   : > { %v18682_v42 = vpop.f32.mrf.mxu0  ;;  %12915 = vmatprep.mubr.f32.mxu1 %v13814_v57  ;;  %v6518_v2 = vadd.f32 %v18126_v59, %v5970_v49  ;;  %v6517_v56 = vadd.f32 %v18138_v12, %v5965_v30  ;;  %v9185_v59 = vld [vmem:[#allocation9 + $0x58] sm:$0xff] }
 0x4db   : > { %21389 = vst [vmem:[#allocation77_spill] sm:$0xff] %v18682_v42  ;;  %v18684_v5 = vpop.f32.mrf.mxu1  ;;  %v21399_v12 = vld [vmem:[#allocation122_spill] sm:$0xff] }
 0x4dc   : > { %v18688_v23 = vpop.f32.mrf.mxu0  ;;  %13083 = vmatmul.mubr.f32.gmra.mxu0 %v5454_v41  ;;  %v5980_v41 = vadd.f32 %v18417_v16, %v21393_v38  ;;  %v13818_v16 = vld [vmem:[#allocation2 + $0x50] sm:$0xff]  ;;  %v5985_v30 = vadd.f32 %v18435_v45, %v21399_v12 }
 0x4dd   : > { %21390 = vst [vmem:[#allocation109_spill] sm:$0xff] %v18688_v23  ;;  %13085 = vmatprep.mubr.f32.mxu0 %v5548_v1  ;;  %v12501_v15 = vpop.f32.mrf.mxu1  ;;  %12916 = vmatmul.mubr.f32.vlgmr.msra.gmra.mxu1 %v13815_v13 }
 0x4de   : > { %v18693_v42 = vpop.f32.mrf.mxu0  ;;  %v18695_v57 = vadd.f32 %v12501_v15, %v6516_v11  ;;  %12918 = vmatprep.mubr.f32.mxu1 %v13816_v36  ;;  %13092 = vmatpush3.msra.mxu1 %v18512_v10  ;;  %v9186_v11 = vld [vmem:[#allocation9 + $0x60] sm:$0xff]  ;;  %v13817_v15 = vld [vmem:[#allocation2 + $0x48] sm:$0xff]  ;;  %v6520_v52 = vadd.f32 %v21398_v61, %v5980_v41  ;;  %v9183_v41 = vld [vmem:[#allocation9 + $0x48] sm:$0xff] }
 0x4df   : > { %21392 = vst [vmem:[#allocation78_spill] sm:$0xff] %v18693_v42  ;;  %v6646_v48 = vpop.f32.mrf.mxu1  ;;  %13093 = vmatprep.subr.mxu1 %v9188_v55  ;;  %v13857_v42 = vld [vmem:[#allocation2 + $0x188] sm:$0xff] }
 0x4e0   : > { %v18701_v1 = vpop.f32.mrf.mxu0  ;;  %v18703_v13 = vadd.f32 %v6646_v48, %v6515_v58  ;;  %13094 = vmatpush3.msra.mxu1 %v9188_v55  ;;  %13086 = vmatmul.mubr.f32.gmra.mxu0 %v5455_v34  ;;  %v21396_v55 = vld [vmem:[#allocation158_spill] sm:$0xff] }
 0x4e1   : > { %21394 = vst [vmem:[#allocation79_spill] sm:$0xff] %v18701_v1  ;;  %v12504_v36 = vpop.f32.mrf.mxu1  ;;  %12919 = vmatmul.mubr.f32.gmra.mxu1 %v13817_v15  ;;  %13095 = vmatprep.subr.mxu1 %v9187_v32  ;;  %v5990_v58 = vadd.f32 %v18429_v0, %v21396_v55  ;;  %v13819_v15 = vld [vmem:[#allocation2 + $0x58] sm:$0xff]  ;;  %v13820_v0 = vld [vmem:[#allocation2 + $0x60] sm:$0xff] }
 0x4e2   : > { %v18708_v10 = vpop.f32.mrf.mxu0  ;;  %v18710_v33 = vadd.f32 %v12504_v36, %v6518_v2  ;;  %12921 = vmatprep.mubr.f32.mxu1 %v13818_v16  ;;  %13096 = vmatpush3.msra.mxu1 %v9187_v32  ;;  %v9184_v2 = vld [vmem:[#allocation9 + $0x50] sm:$0xff] }
 0x4e3   : > { %21395 = vst [vmem:[#allocation80_spill] sm:$0xff] %v18708_v10  ;;  %v6656_v49 = vpop.f32.mrf.mxu1  ;;  %13097 = vmatprep.subr.mxu1 %v9186_v11  ;;  %13088 = vmatprep.mubr.f32.mxu0 %v5455_v34  ;;  %v6522_v45 = vadd.f32 %v18166_v21, %v5990_v58  ;;  %v21405_v58 = vld [vmem:[#allocation126_spill] sm:$0xff]  ;;  %v13855_v10 = vld [vmem:[#allocation2 + $0x178] sm:$0xff] }
 0x4e4   : > { %v18715_v48 = vpop.f32.mrf.mxu0  ;;  %v18717_v38 = vadd.f32 %v6656_v49, %v6517_v56  ;;  %13098 = vmatpush3.msra.mxu1 %v9186_v11  ;;  %13089 = vmatmul.mubr.f32.gmra.mxu0 %v5455_v34  ;;  %v6519_v56 = vadd.f32 %v18160_v18, %v5975_v28  ;;  %v21401_v34 = vld [vmem:[#allocation151_spill] sm:$0xff] }
 0x4e5   : > { %21397 = vst [vmem:[#allocation118_spill] sm:$0xff] %v18715_v48  ;;  %v12507_v36 = vpop.f32.mrf.mxu1  ;;  %12922 = vmatmul.mubr.f32.gmra.mxu1 %v13819_v15  ;;  %13099 = vmatprep.subr.mxu1 %v9185_v59  ;;  %v6000_v49 = vadd.f32 %v18441_v44, %v21401_v34  ;;  %v13821_v15 = vld [vmem:[#allocation2 + $0x68] sm:$0xff]  ;;  %v21403_v18 = vld [vmem:[#allocation103_spill] sm:$0xff] }
 0x4e6   : > { %v18722_v32 = vpop.f32.mrf.mxu0  ;;  %v18724_v16 = vadd.f32 %v12507_v36, %v6520_v52  ;;  %12924 = vmatprep.mubr.f32.mxu1 %v13820_v0  ;;  %13100 = vmatpush3.msra.mxu1 %v9185_v59  ;;  %v9182_v52 = vld [vmem:[#allocation9 + $0x40] sm:$0xff]  ;;  %v5995_v28 = vadd.f32 %v18447_v47, %v21403_v18  ;;  %v6521_v0 = vadd.f32 %v18173_v60, %v5985_v30 }
 0x4e7   : > { %21400 = vst [vmem:[#allocation123_spill] sm:$0xff] %v18722_v32  ;;  %v6666_v11 = vpop.f32.mrf.mxu1  ;;  %13101 = vmatprep.subr.mxu1 %v9184_v2  ;;  %v13822_v44 = vld [vmem:[#allocation2 + $0x70] sm:$0xff]  ;;  %v6524_v47 = vadd.f32 %v18183_v43, %v6000_v49  ;;  %v6005_v60 = vadd.f32 %v18459_v46, %v18152_v63  ;;  %v13853_v32 = vld [vmem:[#allocation2 + $0x168] sm:$0xff] }
 0x4e8   : > { %v18729_v55 = vpop.f32.mrf.mxu0  ;;  %v18731_v61 = vadd.f32 %v6666_v11, %v6519_v56  ;;  %13102 = vmatpush3.msra.mxu1 %v9184_v2  ;;  %v9181_v56 = vld [vmem:[#allocation9 + $0x38] sm:$0xff]  ;;  %v6010_v2 = vadd.f32 %v18453_v7, %v21405_v58  ;;  %v13824_v7 = vld [vmem:[#allocation2 + $0x80] sm:$0xff]  ;;  %v6523_v18 = vadd.f32 %v18188_v62, %v5995_v28  ;;  %v21408_v49 = vld [vmem:[#allocation159_spill] sm:$0xff] }
 0x4e9   : > { %21402 = vst [vmem:[#allocation84_spill] sm:$0xff] %v18729_v55  ;;  %v12510_v36 = vpop.f32.mrf.mxu1  ;;  %12925 = vmatmul.mubr.f32.gmra.mxu1 %v13821_v15  ;;  %13103 = vmatprep.subr.mxu1 %v9183_v41  ;;  %v13823_v15 = vld [vmem:[#allocation2 + $0x78] sm:$0xff]  ;;  %v9178_v46 = vld [vmem:[#allocation9 + $0x20] sm:$0xff]  ;;  %v21410_v62 = vld [vmem:[#allocation129_spill] sm:$0xff] }
 0x4ea   : > { %v18736_v59 = vpop.f32.mrf.mxu0  ;;  %v18738_v12 = vadd.f32 %v12510_v36, %v6522_v45  ;;  %12927 = vmatprep.mubr.f32.mxu1 %v13822_v44  ;;  %13104 = vmatpush3.msra.mxu1 %v9183_v41  ;;  %v9180_v45 = vld [vmem:[#allocation9 + $0x30] sm:$0xff]  ;;  %v9179_v44 = vld [vmem:[#allocation9 + $0x28] sm:$0xff]  ;;  %v6526_v63 = vadd.f32 %v18195_v35, %v6010_v2  ;;  %v6015_v28 = vadd.f32 %v18471_v27, %v21410_v62 }
 0x4eb   : > { %21404 = vst [vmem:[#allocation124_spill] sm:$0xff] %v18736_v59  ;;  %v6676_v21 = vpop.f32.mrf.mxu1  ;;  %13105 = vmatprep.subr.mxu1 %v9182_v52  ;;  %v21412_v2 = vld [vmem:[#allocation69_spill] sm:$0xff]  ;;  %v9175_v62 = vld [vmem:[#allocation9 + $0x8] sm:$0xff] }
 0x4ec   : > { %v18743_v11 = vpop.f32.mrf.mxu0  ;;  %v18745_v34 = vadd.f32 %v6676_v21, %v6521_v0  ;;  %13106 = vmatpush3.msra.mxu1 %v9182_v52  ;;  %v6020_v52 = vadd.f32 %v18465_v54, %v21408_v49  ;;  %v13826_v54 = vld [vmem:[#allocation2 + $0x90] sm:$0xff]  ;;  %v9176_v49 = vld [vmem:[#allocation9 + $0x10] sm:$0xff]  ;;  %v13851_v59 = vld [vmem:[#allocation2 + $0x158] sm:$0xff] }
 0x4ed   : > { %21406 = vst [vmem:[#allocation85_spill] sm:$0xff] %v18743_v11  ;;  %v12513_v36 = vpop.f32.mrf.mxu1  ;;  %12928 = vmatmul.mubr.f32.gmra.mxu1 %v13823_v15  ;;  %13107 = vmatprep.subr.mxu1 %v9181_v56  ;;  %v6525_v15 = vadd.f32 %v18200_v26, %v6005_v60  ;;  %v6025_v26 = vadd.f32 %v18483_v22, %v18175_v9  ;;  %v9174_v22 = vld [vmem:[#allocation9] sm:$0xff] }
 0x4ee   : > { %v18750_v30 = vpop.f32.mrf.mxu0  ;;  %v18752_v41 = vadd.f32 %v12513_v36, %v6524_v47  ;;  %12930 = vmatprep.mubr.f32.mxu1 %v13824_v7  ;;  %13108 = vmatpush3.msra.mxu1 %v9181_v56  ;;  %v13825_v47 = vld [vmem:[#allocation2 + $0x88] sm:$0xff]  ;;  %v6528_v27 = vadd.f32 %v18207_v19, %v6020_v52  ;;  %v21415_v52 = vld [vmem:[#allocation107_spill] sm:$0xff] }
 0x4ef   : > { %21407 = vst [vmem:[#allocation127_spill] sm:$0xff] %v18750_v30  ;;  %v6686_v43 = vpop.f32.mrf.mxu1  ;;  %13109 = vmatprep.subr.mxu1 %v9180_v45  ;;  %v9177_v7 = vld [vmem:[#allocation9 + $0x18] sm:$0xff] }
 0x4f0   : > { %v18757_v0 = vpop.f32.mrf.mxu0  ;;  %v18759_v21 = vadd.f32 %v6686_v43, %v6523_v18  ;;  %13110 = vmatpush3.msra.mxu1 %v9180_v45  ;;  %v6030_v45 = vadd.f32 %v18477_v4, %v21412_v2  ;;  %v13828_v4 = vld [vmem:[#allocation2 + $0xa0] sm:$0xff]  ;;  %v13829_v2 = vld [vmem:[#allocation2 + $0xa8] sm:$0xff] }
 0x4f1   : > { %21409 = vst [vmem:[#allocation87_spill] sm:$0xff] %v18757_v0  ;;  %v12516_v58 = vpop.f32.mrf.mxu1  ;;  %12931 = vmatmul.mubr.f32.gmra.mxu1 %v13825_v47  ;;  %13111 = vmatprep.subr.mxu1 %v9179_v44  ;;  %v6527_v47 = vadd.f32 %v18213_v17, %v6015_v28  ;;  %v21417_v17 = vld [vmem:[#allocation131_spill] sm:$0xff] }
 0x4f2   : > { %v18764_v56 = vpop.f32.mrf.mxu0  ;;  %v18766_v36 = vadd.f32 %v12516_v58, %v6526_v63  ;;  %12933 = vmatprep.mubr.f32.mxu1 %v13826_v54  ;;  %13112 = vmatpush3.msra.mxu1 %v9179_v44  ;;  %v13827_v58 = vld [vmem:[#allocation2 + $0x98] sm:$0xff]  ;;  %v6530_v9 = vadd.f32 %v18223_v24, %v6030_v45  ;;  %v6035_v28 = vadd.f32 %v18495_v51, %v21417_v17  ;;  %v21419_v24 = vld [vmem:[#allocation19_spill] sm:$0xff] }
 0x4f3   : > { %21411 = vst [vmem:[#allocation132_spill] sm:$0xff] %v18764_v56  ;;  %v6696_v35 = vpop.f32.mrf.mxu1  ;;  %13113 = vmatprep.subr.mxu1 %v9178_v46  ;;  %v6050_v45 = vadd.f32 %v18501_v14, %v21419_v24 }
 0x4f4   : > { %v18771_v18 = vpop.f32.mrf.mxu0  ;;  %v18773_v43 = vadd.f32 %v6696_v35, %v6525_v15  ;;  %13114 = vmatpush3.msra.mxu1 %v9178_v46  ;;  %v6040_v46 = vadd.f32 %v18489_v39, %v21415_v52  ;;  %v13830_v39 = vld [vmem:[#allocation2 + $0xb0] sm:$0xff]  ;;  %v21421_v52 = vld [vmem:[#allocation110_spill] sm:$0xff]  ;;  %v6531_v14 = vadd.f32 %v18241_v53, %v6035_v28 }
 0x4f5   : > { %21413 = vst [vmem:[#allocation88_spill] sm:$0xff] %v18771_v18  ;;  %v12519_v63 = vpop.f32.mrf.mxu1  ;;  %12934 = vmatmul.mubr.f32.gmra.mxu1 %v13827_v58  ;;  %13115 = vmatprep.subr.mxu1 %v9177_v7  ;;  %v13834_v53 = vld [vmem:[#allocation2 + $0xd0] sm:$0xff] }
 0x4f6   : > { %v18778_v60 = vpop.f32.mrf.mxu0  ;;  %v18780_v44 = vadd.f32 %v12519_v63, %v6528_v27  ;;  %12936 = vmatprep.mubr.f32.mxu1 %v13828_v4  ;;  %13116 = vmatpush3.msra.mxu1 %v9177_v7  ;;  %v6529_v63 = vadd.f32 %v18229_v6, %v6025_v26  ;;  %v6532_v51 = vadd.f32 %v18235_v40, %v6040_v46 }
 0x4f7   : > { %21414 = vst [vmem:[#allocation133_spill] sm:$0xff] %v18778_v60  ;;  %v6706_v19 = vpop.f32.mrf.mxu1  ;;  %13117 = vmatprep.subr.mxu1 %v9176_v49 }
 0x4f8   : > { %v18785_v54 = vpop.f32.mrf.mxu0  ;;  %v18787_v15 = vadd.f32 %v6706_v19, %v6527_v47  ;;  %13118 = vmatpush3.msra.mxu1 %v9176_v49  ;;  %v13831_v19 = vld [vmem:[#allocation2 + $0xb8] sm:$0xff] }
 0x4f9   : > { %21416 = vst [vmem:[#allocation89_spill] sm:$0xff] %v18785_v54  ;;  %v12522_v35 = vpop.f32.mrf.mxu1  ;;  %12937 = vmatmul.mubr.f32.gmra.mxu1 %v13829_v2  ;;  %13119 = vmatprep.subr.mxu1 %v9175_v62  ;;  %v21423_v2 = vld [vmem:[#allocation135_spill] sm:$0xff] }
 0x4fa   : > { %v18792_v7 = vpop.f32.mrf.mxu0  ;;  %v18794_v27 = vadd.f32 %v12522_v35, %v6530_v9  ;;  %12939 = vmatprep.mubr.f32.mxu1 %v13830_v39  ;;  %13120 = vmatpush3.msra.mxu1 %v9175_v62  ;;  %v6045_v9 = vadd.f32 %v18507_v3, %v21421_v52  ;;  %v13832_v62 = vld [vmem:[#allocation2 + $0xc0] sm:$0xff]  ;;  %v6060_v17 = vadd.f32 %v18515_v37, %v21423_v2  ;;  %v13833_v3 = vld [vmem:[#allocation2 + $0xc8] sm:$0xff] }
 0x4fb   : > { %21418 = vst [vmem:[#allocation136_spill] sm:$0xff] %v18792_v7  ;;  %v6716_v58 = vpop.f32.mrf.mxu1  ;;  %13121 = vmatprep.subr.mxu1 %v9174_v22 }
 0x4fc   : > { %v18799_v49 = vpop.f32.mrf.mxu0  ;;  %v18801_v4 = vadd.f32 %v6716_v58, %v6529_v63  ;;  %13122 = vmatpush3.msra.mxu1 %v9174_v22  ;;  %v6534_v22 = vadd.f32 %v18252_v20, %v6050_v45  ;;  %v6055_v63 = vadd.f32 %v18521_v50, %v18209_v29  ;;  %v6533_v37 = vadd.f32 %v18259_v31, %v6045_v9  ;;  %v21428_v45 = vld [vmem:[#allocation147_spill] sm:$0xff]  ;;  %v13835_v29 = vld [vmem:[#allocation2 + $0xd8] sm:$0xff]  ;;  %v13836_v31 = vld [vmem:[#allocation2 + $0xe0] sm:$0xff] }
 0x4fd   : > { %21420 = vst [vmem:[#allocation91_spill] sm:$0xff] %v18799_v49  ;;  %v12525_v47 = vpop.f32.mrf.mxu1  ;;  %12940 = vmatmul.mubr.f32.gmra.mxu1 %v13831_v19  ;;  %v6536_v52 = vadd.f32 %v21428_v45, %v6060_v17  ;;  %v21429_v50 = vld [vmem:[#allocation20_spill] sm:$0xff]  ;;  %v21432_v9 = vld [vmem:[#allocation119_spill] sm:$0xff] }
 0x4fe   : > { %v18806_v6 = vpop.f32.mrf.mxu0  ;;  %v18808_v26 = vadd.f32 %v12525_v47, %v6532_v51  ;;  %12942 = vmatprep.mubr.f32.mxu1 %v13832_v62  ;;  %v21426_v51 = vld [vmem:[#allocation83_spill] sm:$0xff] }
 0x4ff   : > { %21422 = vst [vmem:[#allocation128_spill] sm:$0xff] %v18806_v6  ;;  %v6726_v35 = vpop.f32.mrf.mxu1  ;;  %v6070_v47 = vadd.f32 %v21426_v51, %v18216_v25  ;;  %v6535_v25 = vadd.f32 %v21432_v9, %v6055_v63  ;;  %v21436_v51 = vld [vmem:[#allocation26_spill] sm:$0xff]  ;;  %v13838_v63 = vld [vmem:[#allocation2 + $0xf0] sm:$0xff]  ;;  %v21440_v9 = vld [vmem:[#allocation152_spill] sm:$0xff] }
 0x500   : > { %v18813_v40 = vpop.f32.mrf.mxu0  ;;  %v18815_v46 = vadd.f32 %v6726_v35, %v6531_v14  ;;  %v21430_v14 = vld [vmem:[#allocation36_spill] sm:$0xff] }
 0x501   : > { %21424 = vst [vmem:[#allocation141_spill] sm:$0xff] %v18813_v40  ;;  %v12528_v39 = vpop.f32.mrf.mxu1  ;;  %12943 = vmatmul.mubr.f32.gmra.mxu1 %v13833_v3  ;;  %v6065_v35 = vadd.f32 %v21430_v14, %v21429_v50  ;;  %v21433_v3 = vld [vmem:[#allocation112_spill] sm:$0xff]  ;;  %v6538_v45 = vadd.f32 %v21436_v51, %v6070_v47  ;;  %v13837_v50 = vld [vmem:[#allocation2 + $0xe8] sm:$0xff] }
 0x502   : > { %v18820_v58 = vpop.f32.mrf.mxu0  ;;  %v18822_v24 = vadd.f32 %v12528_v39, %v6534_v22  ;;  %12945 = vmatprep.mubr.f32.mxu1 %v13834_v53  ;;  %v21434_v53 = vld [vmem:[#allocation38_spill] sm:$0xff] }
 0x503   : > { %21425 = vst [vmem:[#allocation93_spill] sm:$0xff] %v18820_v58  ;;  %v6736_v28 = vpop.f32.mrf.mxu1  ;;  %v21437_v14 = vld [vmem:[#allocation138_spill] sm:$0xff] }
 0x504   : > { %v18827_v19 = vpop.f32.mrf.mxu0  ;;  %v18829_v20 = vadd.f32 %v6736_v28, %v6533_v37  ;;  %v6080_v37 = vadd.f32 %v21434_v53, %v21433_v3  ;;  %v6537_v3 = vadd.f32 %v21440_v9, %v6065_v35  ;;  %v21444_v51 = vld [vmem:[#allocation154_spill] sm:$0xff]  ;;  %v13840_v35 = vld [vmem:[#allocation2 + $0x100] sm:$0xff]  ;;  %v21448_v9 = vld [vmem:[#allocation160_spill] sm:$0xff] }
 0x505   : > { %21427 = vst [vmem:[#allocation130_spill] sm:$0xff] %v18827_v19  ;;  %v12531_v62 = vpop.f32.mrf.mxu1  ;;  %12946 = vmatmul.mubr.f32.gmra.mxu1 %v13835_v29 }
 0x506   : > { %v18834_v2 = vpop.f32.mrf.mxu0  ;;  %v18836_v22 = vadd.f32 %v12531_v62, %v6536_v52  ;;  %12948 = vmatprep.mubr.f32.mxu1 %v13836_v31  ;;  %v21438_v52 = vld [vmem:[#allocation180_spill] sm:$0xff] }
 0x507   : > { %21431 = vst [vmem:[#allocation142_spill] sm:$0xff] %v18834_v2  ;;  %v6746_v39 = vpop.f32.mrf.mxu1  ;;  %v6075_v62 = vadd.f32 %v21438_v52, %v21437_v14  ;;  %v13839_v14 = vld [vmem:[#allocation2 + $0xf8] sm:$0xff] }
 0x508   : > { %v18841_v28 = vpop.f32.mrf.mxu0  ;;  %v18843_v17 = vadd.f32 %v6746_v39, %v6535_v25  ;;  %v21442_v25 = vld [vmem:[#allocation184_spill] sm:$0xff] }
 0x509   : > { %21435 = vst [vmem:[#allocation95_spill] sm:$0xff] %v18841_v28  ;;  %v12534_v29 = vpop.f32.mrf.mxu1  ;;  %12949 = vmatmul.mubr.f32.gmra.mxu1 %v13837_v50  ;;  %v21441_v28 = vld [vmem:[#allocation22_spill] sm:$0xff]  ;;  %v6540_v50 = vadd.f32 %v21444_v51, %v6080_v37  ;;  %v21445_v52 = vld [vmem:[#allocation116_spill] sm:$0xff] }
 0x50a   : > { %v18848_v2 = vpop.f32.mrf.mxu0  ;;  %v18850_v31 = vadd.f32 %v12534_v29, %v6538_v45  ;;  %12951 = vmatprep.mubr.f32.mxu1 %v13838_v63  ;;  %v6090_v39 = vadd.f32 %v21442_v25, %v21441_v28  ;;  %v21446_v45 = vld [vmem:[#allocation186_spill] sm:$0xff]  ;;  %v6539_v28 = vadd.f32 %v21448_v9, %v6075_v62  ;;  %v13842_v62 = vld [vmem:[#allocation2 + $0x110] sm:$0xff] }
 0x50b   : > { %21439 = vst [vmem:[#allocation134_spill] sm:$0xff] %v18848_v2  ;;  %v6756_v53 = vpop.f32.mrf.mxu1  ;;  %v6085_v29 = vadd.f32 %v21446_v45, %v21445_v52  ;;  %v21452_v51 = vld [vmem:[#allocation162_spill] sm:$0xff]  ;;  %v21453_v45 = vld [vmem:[#allocation144_spill] sm:$0xff]  ;;  %v21456_v9 = vld [vmem:[#allocation187_spill] sm:$0xff] }
 0x50c   : > { %v18855_v19 = vpop.f32.mrf.mxu0  ;;  %v18857_v47 = vadd.f32 %v6756_v53, %v6537_v3  ;;  %v21450_v3 = vld [vmem:[#allocation192_spill] sm:$0xff]  ;;  %v13841_v52 = vld [vmem:[#allocation2 + $0x108] sm:$0xff] }
 0x50d   : > { %21443 = vst [vmem:[#allocation90_spill] sm:$0xff] %v18855_v19  ;;  %v12537_v58 = vpop.f32.mrf.mxu1  ;;  %12952 = vmatmul.mubr.f32.gmra.mxu1 %v13839_v14  ;;  %v21449_v19 = vld [vmem:[#allocation140_spill] sm:$0xff]  ;;  %v6542_v14 = vadd.f32 %v21452_v51, %v6090_v39  ;;  %v21460_v51 = vld [vmem:[#allocation59_spill] sm:$0xff] }
 0x50e   : > { %v18862_v2 = vpop.f32.mrf.mxu0  ;;  %v18864_v63 = vadd.f32 %v12537_v58, %v6540_v50  ;;  %12954 = vmatprep.mubr.f32.mxu1 %v13840_v35  ;;  %v6100_v53 = vadd.f32 %v21450_v3, %v21449_v19  ;;  %v21454_v58 = vld [vmem:[#allocation51_spill] sm:$0xff]  ;;  %v6541_v19 = vadd.f32 %v21456_v9, %v6085_v29  ;;  %v13844_v29 = vld [vmem:[#allocation2 + $0x120] sm:$0xff] }
 0x50f   : > { %21447 = vst [vmem:[#allocation166_spill] sm:$0xff] %v18862_v2  ;;  %v6766_v25 = vpop.f32.mrf.mxu1  ;;  %v6095_v50 = vadd.f32 %v21454_v58, %v21453_v45  ;;  %v13843_v45 = vld [vmem:[#allocation2 + $0x118] sm:$0xff]  ;;  %v21461_v58 = vld [vmem:[#allocation165_spill] sm:$0xff] }
 0x510   : > { %v18869_v40 = vpop.f32.mrf.mxu0  ;;  %v18871_v37 = vadd.f32 %v6766_v25, %v6539_v28  ;;  %v21458_v28 = vld [vmem:[#allocation53_spill] sm:$0xff] }
 0x511   : > { %21451 = vst [vmem:[#allocation61_spill] sm:$0xff] %v18869_v40  ;;  %v12540_v6 = vpop.f32.mrf.mxu1  ;;  %12955 = vmatmul.mubr.f32.gmra.mxu1 %v13841_v52  ;;  %v21457_v40 = vld [vmem:[#allocation23_spill] sm:$0xff]  ;;  %v6544_v52 = vadd.f32 %v21460_v51, %v6100_v53  ;;  %v21464_v9 = vld [vmem:[#allocation193_spill] sm:$0xff] }
 0x512   : > { %v18876_v2 = vpop.f32.mrf.mxu0  ;;  %v18878_v35 = vadd.f32 %v12540_v6, %v6542_v14  ;;  %12957 = vmatprep.mubr.f32.mxu1 %v13842_v62  ;;  %v6110_v25 = vadd.f32 %v21458_v28, %v21457_v40  ;;  %v21462_v6 = vld [vmem:[#allocation55_spill] sm:$0xff]  ;;  %v6543_v40 = vadd.f32 %v21464_v9, %v6095_v50  ;;  %v21472_v9 = vld [vmem:[#allocation32_spill] sm:$0xff] }
 0x513   : > { %21455 = vst [vmem:[#allocation99_spill] sm:$0xff] %v18876_v2  ;;  %v6776_v3 = vpop.f32.mrf.mxu1  ;;  %v6105_v14 = vadd.f32 %v21462_v6, %v21461_v58  ;;  %v21468_v51 = vld [vmem:[#allocation31_spill] sm:$0xff]  ;;  %v13845_v58 = vld [vmem:[#allocation2 + $0x128] sm:$0xff]  ;;  %v21469_v6 = vld [vmem:[#allocation29_spill] sm:$0xff] }
 0x514   : > { %v18883_v49 = vpop.f32.mrf.mxu0  ;;  %v18885_v39 = vadd.f32 %v6776_v3, %v6541_v19  ;;  %v21466_v19 = vld [vmem:[#allocation82_spill] sm:$0xff]  ;;  %v13846_v50 = vld [vmem:[#allocation2 + $0x130] sm:$0xff] }
 0x515   : > { %21459 = vst [vmem:[#allocation145_spill] sm:$0xff] %v18883_v49  ;;  %v12543_v7 = vpop.f32.mrf.mxu1  ;;  %12958 = vmatmul.mubr.f32.gmra.mxu1 %v13843_v45  ;;  %v21465_v49 = vld [vmem:[#allocation148_spill] sm:$0xff]  ;;  %v6546_v45 = vadd.f32 %v21468_v51, %v6110_v25  ;;  %v21476_v51 = vld [vmem:[#allocation57_spill] sm:$0xff] }
 0x516   : > { %v18890_v2 = vpop.f32.mrf.mxu0  ;;  %v18892_v62 = vadd.f32 %v12543_v7, %v6544_v52  ;;  %12960 = vmatprep.mubr.f32.mxu1 %v13844_v29  ;;  %v6120_v3 = vadd.f32 %v21466_v19, %v21465_v49  ;;  %v21470_v7 = vld [vmem:[#allocation183_spill] sm:$0xff]  ;;  %v6545_v49 = vadd.f32 %v21472_v9, %v6105_v14  ;;  %v13848_v14 = vld [vmem:[#allocation2 + $0x140] sm:$0xff]  ;;  %v21480_v9 = vld [vmem:[#allocation58_spill] sm:$0xff] }
 0x517   : > { %21463 = vst [vmem:[#allocation102_spill] sm:$0xff] %v18890_v2  ;;  %v6786_v28 = vpop.f32.mrf.mxu1  ;;  %v6115_v52 = vadd.f32 %v21470_v7, %v21469_v6  ;;  %v13847_v6 = vld [vmem:[#allocation2 + $0x138] sm:$0xff]  ;;  %v21477_v7 = vld [vmem:[#allocation161_spill] sm:$0xff] }
 0x518   : > { %v18897_v54 = vpop.f32.mrf.mxu0  ;;  %v18899_v53 = vadd.f32 %v6786_v28, %v6543_v40  ;;  %v21474_v40 = vld [vmem:[#allocation191_spill] sm:$0xff] }
 0x519   : > { %21467 = vst [vmem:[#allocation62_spill] sm:$0xff] %v18897_v54  ;;  %v12546_v60 = vpop.f32.mrf.mxu1  ;;  %12961 = vmatmul.mubr.f32.gmra.mxu1 %v13845_v58  ;;  %v21473_v54 = vld [vmem:[#allocation157_spill] sm:$0xff]  ;;  %v6548_v58 = vadd.f32 %v21476_v51, %v6120_v3 }
 0x51a   : > { %v18904_v2 = vpop.f32.mrf.mxu0  ;;  %v18906_v29 = vadd.f32 %v12546_v60, %v6546_v45  ;;  %12963 = vmatprep.mubr.f32.mxu1 %v13846_v50  ;;  %v6130_v28 = vadd.f32 %v21474_v40, %v21473_v54  ;;  %v21478_v60 = vld [vmem:[#allocation194_spill] sm:$0xff]  ;;  %v6547_v54 = vadd.f32 %v21480_v9, %v6115_v52  ;;  %v21484_v51 = vld [vmem:[#allocation137_spill] sm:$0xff]  ;;  %v21487_v52 = vld [vmem:[#allocation63_spill] sm:$0xff] }
 0x51b   : > { %21471 = vst [vmem:[#allocation92_spill] sm:$0xff] %v18904_v2  ;;  %v6796_v19 = vpop.f32.mrf.mxu1  ;;  %v6125_v45 = vadd.f32 %v21478_v60, %v21477_v7  ;;  %v13849_v7 = vld [vmem:[#allocation2 + $0x148] sm:$0xff]  ;;  %v21485_v60 = vld [vmem:[#allocation189_spill] sm:$0xff] }
 0x51c   : > { %v18911_v18 = vpop.f32.mrf.mxu0  ;;  %v18913_v25 = vadd.f32 %v6796_v19, %v6545_v49  ;;  %v21482_v49 = vld [vmem:[#allocation28_spill] sm:$0xff] }
 0x51d   : > { %21475 = vst [vmem:[#allocation139_spill] sm:$0xff] %v18911_v18  ;;  %v12549_v56 = vpop.f32.mrf.mxu1  ;;  %12964 = vmatmul.mubr.f32.gmra.mxu1 %v13847_v6  ;;  %v21481_v18 = vld [vmem:[#allocation164_spill] sm:$0xff]  ;;  %v6550_v6 = vadd.f32 %v21484_v51, %v6130_v28  ;;  %v6549_v9 = vadd.f32 %v21487_v52, %v6125_v45  ;;  %v21491_v28 = vld [vmem:[#allocation37_spill] sm:$0xff]  ;;  %v21494_v45 = vld [vmem:[#allocation39_spill] sm:$0xff] }
 0x51e   : > { %v18918_v2 = vpop.f32.mrf.mxu0  ;;  %v18920_v50 = vadd.f32 %v12549_v56, %v6548_v58  ;;  %12966 = vmatprep.mubr.f32.mxu1 %v13848_v14  ;;  %v6140_v19 = vadd.f32 %v21482_v49, %v21481_v18  ;;  %v21486_v56 = vld [vmem:[#allocation197_spill] sm:$0xff]  ;;  %v13850_v14 = vld [vmem:[#allocation2 + $0x150] sm:$0xff]  ;;  %v21489_v49 = vld [vmem:[#allocation56_spill] sm:$0xff] }
 0x51f   : > { %21479 = vst [vmem:[#allocation104_spill] sm:$0xff] %v18918_v2  ;;  %v6806_v40 = vpop.f32.mrf.mxu1  ;;  %v6135_v58 = vadd.f32 %v21486_v56, %v21485_v60  ;;  %v21492_v60 = vld [vmem:[#allocation121_spill] sm:$0xff] }
 0x520   : > { %v18925_v0 = vpop.f32.mrf.mxu0  ;;  %v18927_v3 = vadd.f32 %v6806_v40, %v6547_v54  ;;  %v21490_v54 = vld [vmem:[#allocation81_spill] sm:$0xff]  ;;  %v6552_v51 = vadd.f32 %v21491_v28, %v6140_v19  ;;  %v21498_v19 = vld [vmem:[#allocation68_spill] sm:$0xff] }
 0x521   : > { %21483 = vst [vmem:[#allocation149_spill] sm:$0xff] %v18925_v0  ;;  %v12552_v30 = vpop.f32.mrf.mxu1  ;;  %12967 = vmatmul.mubr.f32.gmra.mxu1 %v13849_v7  ;;  %v6150_v40 = vadd.f32 %v21490_v54, %v21489_v49  ;;  %v6551_v52 = vadd.f32 %v21494_v45, %v6135_v58  ;;  %v21496_v49 = vld [vmem:[#allocation125_spill] sm:$0xff]  ;;  %v21501_v58 = vld [vmem:[#allocation156_spill] sm:$0xff] }
 0x522   : > { %v18932_v2 = vadd.f32 %v12552_v30, %v6550_v6  ;;  %12969 = vmatprep.mubr.f32.mxu1 %v13850_v14  ;;  %v18935_v11 = vpop.f32.mrf.mxu0  ;;  %v21493_v30 = vld [vmem:[#allocation200_spill] sm:$0xff]  ;;  %v13852_v14 = vld [vmem:[#allocation2 + $0x160] sm:$0xff] }
 0x523   : > { %21488 = vst [vmem:[#allocation108_spill] sm:$0xff] %v18935_v11  ;;  %v6816_v18 = vpop.f32.mrf.mxu1  ;;  %v6145_v6 = vadd.f32 %v21493_v30, %v21492_v60  ;;  %v6554_v28 = vadd.f32 %v21498_v19, %v6150_v40  ;;  %v21499_v60 = vld [vmem:[#allocation60_spill] sm:$0xff]  ;;  %v21505_v40 = vld [vmem:[#allocation21_spill] sm:$0xff] }
 0x524   : > { %v18939_v0 = vadd.f32 %v6816_v18, %v6549_v9  ;;  %v18947_v11 = vpop.f32.mrf.mxu0  ;;  %v21497_v9 = vld [vmem:[#allocation72_spill] sm:$0xff] }
 0x525   : > { %v12555_v7 = vpop.f32.mrf.mxu1  ;;  %12970 = vmatmul.mubr.f32.gmra.mxu1 %v13851_v59  ;;  %21495 = vst [vmem:[#allocation143_spill] sm:$0xff] %v18947_v11  ;;  %v6160_v18 = vadd.f32 %v21497_v9, %v21496_v49  ;;  %v6553_v45 = vadd.f32 %v21501_v58, %v6145_v6  ;;  %v21503_v49 = vld [vmem:[#allocation65_spill] sm:$0xff]  ;;  %v21508_v6 = vld [vmem:[#allocation163_spill] sm:$0xff] }
 0x526   : > { %v18944_v56 = vadd.f32 %v12555_v7, %v6552_v51  ;;  %12972 = vmatprep.mubr.f32.mxu1 %v13852_v14  ;;  %v21500_v51 = vld [vmem:[#allocation73_spill] sm:$0xff]  ;;  %v13854_v14 = vld [vmem:[#allocation2 + $0x170] sm:$0xff]  ;;  %v18959_v11 = vpop.f32.mrf.mxu0 }
 0x527   : > { %v6826_v55 = vpop.f32.mrf.mxu1  ;;  %v6155_v7 = vadd.f32 %v21500_v51, %v21499_v60  ;;  %21502 = vst [vmem:[#allocation94_spill] sm:$0xff] %v18959_v11  ;;  %v6556_v19 = vadd.f32 %v21505_v40, %v6160_v18  ;;  %v21506_v60 = vld [vmem:[#allocation150_spill] sm:$0xff]  ;;  %v21512_v18 = vld [vmem:[#allocation27_spill] sm:$0xff] }
 0x528   : > { %v18951_v54 = vadd.f32 %v6826_v55, %v6551_v52  ;;  %v21504_v55 = vld [vmem:[#allocation97_spill] sm:$0xff]  ;;  %v18971_v11 = vpop.f32.mrf.mxu0 }
 0x529   : > { %v12558_v59 = vpop.f32.mrf.mxu1  ;;  %12973 = vmatmul.mubr.f32.gmra.mxu1 %v13853_v32  ;;  %v6170_v52 = vadd.f32 %v21504_v55, %v21503_v49  ;;  %v6555_v58 = vadd.f32 %v21508_v6, %v6155_v7  ;;  %21509 = vst [vmem:[#allocation64_spill] sm:$0xff] %v18971_v11  ;;  %v21510_v49 = vld [vmem:[#allocation40_spill] sm:$0xff] }
 0x52a   : > { %v18956_v30 = vadd.f32 %v12558_v59, %v6554_v28  ;;  %12975 = vmatprep.mubr.f32.mxu1 %v13854_v14  ;;  %v21507_v28 = vld [vmem:[#allocation74_spill] sm:$0xff]  ;;  %v13856_v14 = vld [vmem:[#allocation2 + $0x180] sm:$0xff]  ;;  %v21515_v7 = vld [vmem:[#allocation44_spill] sm:$0xff]  ;;  %v18983_v11 = vpop.f32.mrf.mxu0 }
 0x52b   : > { %v6836_v48 = vpop.f32.mrf.mxu1  ;;  %v6165_v59 = vadd.f32 %v21507_v28, %v21506_v60  ;;  %v6558_v40 = vadd.f32 %v21512_v18, %v6170_v52  ;;  %v21513_v60 = vld [vmem:[#allocation41_spill] sm:$0xff]  ;;  %21516 = vst [vmem:[#allocation111_spill] sm:$0xff] %v18983_v11  ;;  %v21518_v52 = vld [vmem:[#allocation30_spill] sm:$0xff] }
 0x52c   : > { %v18963_v9 = vadd.f32 %v6836_v48, %v6553_v45  ;;  %v21511_v48 = vld [vmem:[#allocation75_spill] sm:$0xff]  ;;  %v13859_v18 = vld [vmem:[#allocation2 + $0x8] sm:$0xff] }
 0x52d   : > { %v12561_v32 = vpop.f32.mrf.mxu1  ;;  %12976 = vmatmul.mubr.f32.gmra.mxu1 %v13855_v10  ;;  %v6180_v45 = vadd.f32 %v21511_v48, %v21510_v49  ;;  %v6557_v6 = vadd.f32 %v21515_v7, %v6165_v59  ;;  %v21517_v49 = vld [vmem:[#allocation42_spill] sm:$0xff]  ;;  %v21522_v7 = vld [vmem:[#allocation181_spill] sm:$0xff] }
 0x52e   : > { %v18968_v51 = vadd.f32 %v12561_v32, %v6556_v19  ;;  %12978 = vmatprep.mubr.f32.mxu1 %v13856_v14  ;;  %v21514_v19 = vld [vmem:[#allocation76_spill] sm:$0xff]  ;;  %v13858_v14 = vld [vmem:[#allocation2 + $0x190] sm:$0xff]  ;;  %v21520_v59 = vld [vmem:[#allocation174_spill] sm:$0xff] }
 0x52f   : > { %v6846_v1 = vpop.f32.mrf.mxu1  ;;  %v6175_v32 = vadd.f32 %v21514_v19, %v21513_v60  ;;  %v6560_v48 = vadd.f32 %v21518_v52, %v6180_v45  ;;  %v21523_v52 = vld [vmem:[#allocation45_spill] sm:$0xff]  ;;  %v13893_v11 = vld [vmem:[%s14304_s20 + $0x138] sm:$0xff] }
 0x530   : > { %v18975_v55 = vadd.f32 %v6846_v1, %v6555_v58  ;;  %v6190_v1 = vadd.f32 %v18677_v8, %v21517_v49 }
 0x531   : > { %v12564_v10 = vpop.f32.mrf.mxu1  ;;  %12979 = vmatmul.mubr.f32.gmra.mxu1 %v13857_v42  ;;  %v6559_v19 = vadd.f32 %v21520_v59, %v6175_v32  ;;  %v21525_v59 = vld [vmem:[#allocation167_spill] sm:$0xff] }
 0x532   : > { %v18980_v28 = vadd.f32 %v12564_v10, %v6558_v40  ;;  %12981 = vmatprep.mubr.f32.mxu1 %v13858_v14  ;;  %v21519_v40 = vld [vmem:[#allocation43_spill] sm:$0xff]  ;;  %v18995_v14 = vpop.f32.mrf.mxu0  ;;  %v6562_v45 = vadd.f32 %v21522_v7, %v6190_v1  ;;  %v13861_v1 = vld [vmem:[%s14304_s20 + $0x38] sm:$0xff] }
 0x533   : > { %v6856_v23 = vpop.f32.mrf.mxu1  ;;  %v6185_v10 = vadd.f32 %v18684_v5, %v21519_v40  ;;  %21521 = vst [vmem:[#allocation98_spill] sm:$0xff] %v18995_v14  ;;  %v21526_v7 = vld [vmem:[#allocation46_spill] sm:$0xff]  ;;  %v13891_v14 = vld [vmem:[%s14304_s20 + $0x128] sm:$0xff] }
 0x534   : > { %v18987_v58 = vadd.f32 %v6856_v23, %v6557_v6 }
 0x535   : > { %v12567_v42 = vpop.f32.mrf.mxu1  ;;  %12982 = vmatmul.mubr.f32.gmra.mxu1 %v13859_v18  ;;  %v6561_v5 = vadd.f32 %v21523_v52, %v6185_v10  ;;  %v7255_v10 = vadd.f32 %v21526_v7, %v18703_v13 }
 0x536   : > { %v18992_v60 = vadd.f32 %v12567_v42, %v6560_v48  ;;  %12984 = vmatprep.mubr.f32.mxu1 %v13859_v18  ;;  %v13860_v48 = vld [vmem:[%s14304_s20 + $0x30] sm:$0xff]  ;;  %v19004_v42 = vpop.f32.mrf.mxu0 }
 0x537   : > { %v6866_v8 = vpop.f32.mrf.mxu1  ;;  %21524 = vst [vmem:[#allocation113_spill] sm:$0xff] %v19004_v42  ;;  %v13889_v42 = vld [vmem:[%s14304_s20 + $0x118] sm:$0xff] }
 0x538   : > { %v18997_v23 = vadd.f32 %v6866_v8, %v6559_v19  ;;  %v7256_v19 = vadd.f32 %v21525_v59, %v18695_v57  ;;  %v13863_v59 = vld [vmem:[%s14304_s20 + $0x48] sm:$0xff] }
 0x539   : > { %v12570_v6 = vpop.f32.mrf.mxu1  ;;  %12985 = vmatmul.mubr.f32.gmra.mxu1 %v13859_v18 }
 0x53a   : > { %v19000_v49 = vadd.f32 %v12570_v6, %v6562_v45  ;;  %13123 = vmatprep.mubr.f32.mxu1 %v13860_v48  ;;  %v13862_v45 = vld [vmem:[%s14304_s20 + $0x40] sm:$0xff]  ;;  %v19016_v6 = vpop.f32.mrf.mxu0  ;;  %v21528_v48 = vld [vmem:[#allocation168_spill] sm:$0xff] }
 0x53b   : > { %v6876_v32 = vpop.f32.mrf.mxu1  ;;  %21527 = vst [vmem:[#allocation146_spill] sm:$0xff] %v19016_v6  ;;  %v7258_v57 = vadd.f32 %v21528_v48, %v18710_v33  ;;  %v13865_v6 = vld [vmem:[%s14304_s20 + $0x58] sm:$0xff] }
 0x53c   : > { %v19006_v40 = vadd.f32 %v6876_v32, %v6561_v5  ;;  %v19028_v7 = vpop.f32.mrf.mxu0 }
 0x53d   : > { %v12709_v8 = vpop.f32.mrf.mxu1  ;;  %13124 = vmatmul.mubr.f32.vlgmr.msra.gmra.mxu1 %v13861_v1  ;;  %v13864_v1 = vld [vmem:[%s14304_s20 + $0x50] sm:$0xff]  ;;  %21530 = vst [vmem:[#allocation153_spill] sm:$0xff] %v19028_v7  ;;  %v13867_v7 = vld [vmem:[%s14304_s20 + $0x68] sm:$0xff] }
 0x53e   : > { %v19011_v18 = vadd.f32 %v12709_v8, %v7256_v19  ;;  %13126 = vmatprep.mubr.f32.mxu1 %v13862_v45  ;;  %v21529_v8 = vld [vmem:[#allocation47_spill] sm:$0xff] }
 0x53f   : > { %v7386_v52 = vpop.f32.mrf.mxu1  ;;  %v7257_v13 = vadd.f32 %v21529_v8, %v18717_v38  ;;  %v19040_v8 = vpop.f32.mrf.mxu0 }
 0x540   : > { %v19018_v5 = vadd.f32 %v7386_v52, %v7255_v10  ;;  %v21531_v52 = vld [vmem:[#allocation33_spill] sm:$0xff]  ;;  %21533 = vst [vmem:[#allocation117_spill] sm:$0xff] %v19040_v8  ;;  %v13869_v8 = vld [vmem:[%s14304_s20 + $0x78] sm:$0xff] }
 0x541   : > { %v12712_v32 = vpop.f32.mrf.mxu1  ;;  %13127 = vmatmul.mubr.f32.gmra.mxu1 %v13863_v59  ;;  %v7260_v33 = vadd.f32 %v21531_v52, %v18724_v16  ;;  %v13866_v59 = vld [vmem:[%s14304_s20 + $0x60] sm:$0xff] }
 0x542   : > { %v19023_v19 = vadd.f32 %v12712_v32, %v7258_v57  ;;  %13129 = vmatprep.mubr.f32.mxu1 %v13864_v1  ;;  %v21532_v32 = vld [vmem:[#allocation48_spill] sm:$0xff] }
 0x543   : > { %v7396_v45 = vpop.f32.mrf.mxu1  ;;  %v7259_v38 = vadd.f32 %v21532_v32, %v18731_v61  ;;  %v19052_v32 = vpop.f32.mrf.mxu0 }
 0x544   : > { %v19030_v10 = vadd.f32 %v7396_v45, %v7257_v13  ;;  %v21534_v45 = vld [vmem:[#allocation169_spill] sm:$0xff]  ;;  %21536 = vst [vmem:[#allocation66_spill] sm:$0xff] %v19052_v32  ;;  %v13871_v32 = vld [vmem:[%s14304_s20 + $0x88] sm:$0xff] }
 0x545   : > { %v12715_v48 = vpop.f32.mrf.mxu1  ;;  %13130 = vmatmul.mubr.f32.gmra.mxu1 %v13865_v6  ;;  %v7262_v16 = vadd.f32 %v21534_v45, %v18738_v12 }
 0x546   : > { %v19035_v57 = vadd.f32 %v12715_v48, %v7260_v33  ;;  %13132 = vmatprep.mubr.f32.mxu1 %v13866_v59  ;;  %v21535_v33 = vld [vmem:[#allocation49_spill] sm:$0xff] }
 0x547   : > { %v7406_v1 = vpop.f32.mrf.mxu1  ;;  %v7261_v61 = vadd.f32 %v21535_v33, %v18745_v34  ;;  %v13868_v48 = vld [vmem:[%s14304_s20 + $0x70] sm:$0xff]  ;;  %v19064_v33 = vpop.f32.mrf.mxu0 }
 0x548   : > { %v19042_v13 = vadd.f32 %v7406_v1, %v7259_v38  ;;  %v21537_v1 = vld [vmem:[#allocation34_spill] sm:$0xff]  ;;  %21539 = vst [vmem:[#allocation101_spill] sm:$0xff] %v19064_v33 }
 0x549   : > { %v12718_v52 = vpop.f32.mrf.mxu1  ;;  %13133 = vmatmul.mubr.f32.gmra.mxu1 %v13867_v7  ;;  %v7264_v12 = vadd.f32 %v21537_v1, %v18752_v41  ;;  %v13873_v33 = vld [vmem:[%s14304_s20 + $0x98] sm:$0xff] }
 0x54a   : > { %v19047_v6 = vadd.f32 %v12718_v52, %v7262_v16  ;;  %13135 = vmatprep.mubr.f32.mxu1 %v13868_v48  ;;  %v21538_v16 = vld [vmem:[#allocation50_spill] sm:$0xff]  ;;  %v13870_v52 = vld [vmem:[%s14304_s20 + $0x80] sm:$0xff] }
 0x54b   : > { %v7416_v59 = vpop.f32.mrf.mxu1  ;;  %v7263_v34 = vadd.f32 %v21538_v16, %v18759_v21  ;;  %v19076_v16 = vpop.f32.mrf.mxu0 }
 0x54c   : > { %v19054_v38 = vadd.f32 %v7416_v59, %v7261_v61  ;;  %v21540_v59 = vld [vmem:[#allocation170_spill] sm:$0xff]  ;;  %21542 = vst [vmem:[#allocation120_spill] sm:$0xff] %v19076_v16  ;;  %v13875_v16 = vld [vmem:[%s14304_s20 + $0xa8] sm:$0xff] }
 0x54d   : > { %v12721_v45 = vpop.f32.mrf.mxu1  ;;  %13136 = vmatmul.mubr.f32.gmra.mxu1 %v13869_v8  ;;  %v7266_v41 = vadd.f32 %v21540_v59, %v18766_v36 }
 0x54e   : > { %v19059_v7 = vadd.f32 %v12721_v45, %v7264_v12  ;;  %13138 = vmatprep.mubr.f32.mxu1 %v13870_v52  ;;  %v21541_v12 = vld [vmem:[#allocation86_spill] sm:$0xff]  ;;  %v13872_v45 = vld [vmem:[%s14304_s20 + $0x90] sm:$0xff] }
 0x54f   : > { %v7426_v48 = vpop.f32.mrf.mxu1  ;;  %v7265_v21 = vadd.f32 %v21541_v12, %v18773_v43  ;;  %v19088_v12 = vpop.f32.mrf.mxu0 }
 0x550   : > { %v19066_v61 = vadd.f32 %v7426_v48, %v7263_v34  ;;  %v21543_v48 = vld [vmem:[#allocation172_spill] sm:$0xff]  ;;  %21545 = vst [vmem:[#allocation67_spill] sm:$0xff] %v19088_v12  ;;  %v13877_v12 = vld [vmem:[%s14304_s20 + $0xb8] sm:$0xff] }
 0x551   : > { %v12724_v1 = vpop.f32.mrf.mxu1  ;;  %13139 = vmatmul.mubr.f32.gmra.mxu1 %v13871_v32  ;;  %v7268_v36 = vadd.f32 %v21543_v48, %v18780_v44 }
 0x552   : > { %v19071_v8 = vadd.f32 %v12724_v1, %v7266_v41  ;;  %13141 = vmatprep.mubr.f32.mxu1 %v13872_v45  ;;  %v21544_v41 = vld [vmem:[#allocation35_spill] sm:$0xff] }
 0x553   : > { %v7436_v52 = vpop.f32.mrf.mxu1  ;;  %v7267_v43 = vadd.f32 %v21544_v41, %v18787_v15  ;;  %v13874_v1 = vld [vmem:[%s14304_s20 + $0xa0] sm:$0xff]  ;;  %v19100_v41 = vpop.f32.mrf.mxu0 }
 0x554   : > { %v19078_v34 = vadd.f32 %v7436_v52, %v7265_v21  ;;  %v21546_v52 = vld [vmem:[#allocation173_spill] sm:$0xff]  ;;  %21548 = vst [vmem:[#allocation158_spill] sm:$0xff] %v19100_v41  ;;  %v13879_v41 = vld [vmem:[%s14304_s20 + $0xc8] sm:$0xff] }
 0x555   : > { %v12727_v59 = vpop.f32.mrf.mxu1  ;;  %13142 = vmatmul.mubr.f32.gmra.mxu1 %v13873_v33  ;;  %v7270_v44 = vadd.f32 %v21546_v52, %v18794_v27 }
 0x556   : > { %v19083_v32 = vadd.f32 %v12727_v59, %v7268_v36  ;;  %13144 = vmatprep.mubr.f32.mxu1 %v13874_v1  ;;  %v21547_v36 = vld [vmem:[#allocation171_spill] sm:$0xff]  ;;  %v13876_v59 = vld [vmem:[%s14304_s20 + $0xb0] sm:$0xff] }
 0x557   : > { %v7446_v45 = vpop.f32.mrf.mxu1  ;;  %v7269_v15 = vadd.f32 %v21547_v36, %v18801_v4  ;;  %v19112_v36 = vpop.f32.mrf.mxu0 }
 0x558   : > { %v19090_v21 = vadd.f32 %v7446_v45, %v7267_v43  ;;  %v21549_v45 = vld [vmem:[#allocation176_spill] sm:$0xff]  ;;  %21551 = vst [vmem:[#allocation155_spill] sm:$0xff] %v19112_v36  ;;  %v13881_v36 = vld [vmem:[%s14304_s20 + $0xd8] sm:$0xff] }
 0x559   : > { %v12730_v48 = vpop.f32.mrf.mxu1  ;;  %13145 = vmatmul.mubr.f32.gmra.mxu1 %v13875_v16  ;;  %v7272_v27 = vadd.f32 %v21549_v45, %v18808_v26 }
 0x55a   : > { %v19095_v33 = vadd.f32 %v12730_v48, %v7270_v44  ;;  %13147 = vmatprep.mubr.f32.mxu1 %v13876_v59  ;;  %v21550_v44 = vld [vmem:[#allocation175_spill] sm:$0xff] }
 0x55b   : > { %v7456_v1 = vpop.f32.mrf.mxu1  ;;  %v7271_v4 = vadd.f32 %v21550_v44, %v18815_v46  ;;  %v13878_v48 = vld [vmem:[%s14304_s20 + $0xc0] sm:$0xff]  ;;  %v19124_v44 = vpop.f32.mrf.mxu0 }
 0x55c   : > { %v19102_v43 = vadd.f32 %v7456_v1, %v7269_v15  ;;  %v21552_v1 = vld [vmem:[#allocation177_spill] sm:$0xff]  ;;  %21554 = vst [vmem:[#allocation122_spill] sm:$0xff] %v19124_v44  ;;  %v13883_v44 = vld [vmem:[%s14304_s20 + $0xe8] sm:$0xff] }
 0x55d   : > { %v12733_v52 = vpop.f32.mrf.mxu1  ;;  %13148 = vmatmul.mubr.f32.gmra.mxu1 %v13877_v12  ;;  %v7274_v26 = vadd.f32 %v21552_v1, %v18822_v24 }
 0x55e   : > { %v19107_v16 = vadd.f32 %v12733_v52, %v7272_v27  ;;  %13150 = vmatprep.mubr.f32.mxu1 %v13878_v48  ;;  %v21553_v27 = vld [vmem:[#allocation178_spill] sm:$0xff]  ;;  %v13880_v52 = vld [vmem:[%s14304_s20 + $0xd0] sm:$0xff] }
 0x55f   : > { %v7466_v59 = vpop.f32.mrf.mxu1  ;;  %v7273_v46 = vadd.f32 %v21553_v27, %v18829_v20  ;;  %v19136_v27 = vpop.f32.mrf.mxu0 }
 0x560   : > { %v19114_v15 = vadd.f32 %v7466_v59, %v7271_v4  ;;  %v21555_v59 = vld [vmem:[#allocation182_spill] sm:$0xff]  ;;  %21557 = vst [vmem:[#allocation151_spill] sm:$0xff] %v19136_v27 }
 0x561   : > { %v12736_v45 = vpop.f32.mrf.mxu1  ;;  %13151 = vmatmul.mubr.f32.gmra.mxu1 %v13879_v41  ;;  %v7276_v24 = vadd.f32 %v21555_v59, %v18836_v22  ;;  %v13885_v27 = vld [vmem:[%s14304_s20 + $0xf8] sm:$0xff] }
 0x562   : > { %v19119_v12 = vadd.f32 %v12736_v45, %v7274_v26  ;;  %13153 = vmatprep.mubr.f32.mxu1 %v13880_v52  ;;  %v21556_v26 = vld [vmem:[#allocation185_spill] sm:$0xff]  ;;  %v13882_v45 = vld [vmem:[%s14304_s20 + $0xe0] sm:$0xff] }
 0x563   : > { %v7476_v48 = vpop.f32.mrf.mxu1  ;;  %v7275_v20 = vadd.f32 %v21556_v26, %v18843_v17  ;;  %v19148_v26 = vpop.f32.mrf.mxu0 }
 0x564   : > { %v19126_v4 = vadd.f32 %v7476_v48, %v7273_v46  ;;  %v21559_v48 = vld [vmem:[#allocation190_spill] sm:$0xff]  ;;  %21562 = vst [vmem:[#allocation159_spill] sm:$0xff] %v19148_v26  ;;  %v13887_v26 = vld [vmem:[%s14304_s20 + $0x108] sm:$0xff] }
 0x565   : > { %v12739_v1 = vpop.f32.mrf.mxu1  ;;  %13154 = vmatmul.mubr.f32.gmra.mxu1 %v13881_v36  ;;  %v7278_v22 = vadd.f32 %v21559_v48, %v18850_v31 }
 0x566   : > { %v19131_v41 = vadd.f32 %v12739_v1, %v7276_v24  ;;  %13156 = vmatprep.mubr.f32.mxu1 %v13882_v45  ;;  %v21561_v24 = vld [vmem:[#allocation195_spill] sm:$0xff]  ;;  %v13884_v1 = vld [vmem:[%s14304_s20 + $0xf0] sm:$0xff] }
 0x567   : > { %v7486_v52 = vpop.f32.mrf.mxu1  ;;  %v7277_v17 = vadd.f32 %v21561_v24, %v18857_v47  ;;  %v19160_v24 = vpop.f32.mrf.mxu0 }
 0x568   : > { %v19138_v46 = vadd.f32 %v7486_v52, %v7275_v20  ;;  %v21564_v52 = vld [vmem:[#allocation52_spill] sm:$0xff] }
 0x569   : > { %v12742_v59 = vpop.f32.mrf.mxu1  ;;  %13157 = vmatmul.mubr.f32.gmra.mxu1 %v13883_v44  ;;  %v7280_v31 = vadd.f32 %v21564_v52, %v18864_v63 }
 0x56a   : > { %21558 = vst [vmem:[#allocation103_spill] sm:$0xff] %v19138_v46  ;;  %v19143_v36 = vadd.f32 %v12742_v59, %v7278_v22  ;;  %13159 = vmatprep.mubr.f32.mxu1 %v13884_v1  ;;  %v21566_v22 = vld [vmem:[#allocation54_spill] sm:$0xff]  ;;  %v13886_v59 = vld [vmem:[%s14304_s20 + $0x100] sm:$0xff] }
 0x56b   : > { %v7496_v45 = vpop.f32.mrf.mxu1  ;;  %v7279_v47 = vadd.f32 %v21566_v22, %v18871_v37  ;;  %v19172_v22 = vpop.f32.mrf.mxu0 }
 0x56c   : > { %21560 = vst [vmem:[#allocation126_spill] sm:$0xff] %v19143_v36  ;;  %v19150_v20 = vadd.f32 %v7496_v45, %v7277_v17  ;;  %v21568_v45 = vld [vmem:[#allocation179_spill] sm:$0xff] }
 0x56d   : > { %v12745_v48 = vpop.f32.mrf.mxu1  ;;  %13160 = vmatmul.mubr.f32.gmra.mxu1 %v13885_v27  ;;  %v7282_v63 = vadd.f32 %v21568_v45, %v18878_v35 }
 0x56e   : > { %21563 = vst [vmem:[#allocation129_spill] sm:$0xff] %v19150_v20  ;;  %v19155_v44 = vadd.f32 %v12745_v48, %v7280_v31  ;;  %13162 = vmatprep.mubr.f32.mxu1 %v13886_v59  ;;  %v21570_v31 = vld [vmem:[#allocation24_spill] sm:$0xff]  ;;  %v13888_v48 = vld [vmem:[%s14304_s20 + $0x110] sm:$0xff] }
 0x56f   : > { %v7506_v1 = vpop.f32.mrf.mxu1  ;;  %v7281_v37 = vadd.f32 %v21570_v31, %v18885_v39  ;;  %v19184_v31 = vpop.f32.mrf.mxu0 }
 0x570   : > { %21565 = vst [vmem:[#allocation69_spill] sm:$0xff] %v19155_v44  ;;  %v19162_v17 = vadd.f32 %v7506_v1, %v7279_v47  ;;  %v21572_v1 = vld [vmem:[#allocation188_spill] sm:$0xff]  ;;  %v21619_v44 = vld [vmem:[#allocation85_spill] sm:$0xff] }
 0x571   : > { %v12748_v52 = vpop.f32.mrf.mxu1  ;;  %13163 = vmatmul.mubr.f32.gmra.mxu1 %v13887_v26  ;;  %v7284_v35 = vadd.f32 %v21572_v1, %v18892_v62  ;;  %v7998_v20 = vadd.f32 %v21619_v44, %v19023_v19 }
 0x572   : > { %21567 = vst [vmem:[#allocation107_spill] sm:$0xff] %v19162_v17  ;;  %v19167_v27 = vadd.f32 %v12748_v52, %v7282_v63  ;;  %13165 = vmatprep.mubr.f32.mxu1 %v13888_v48  ;;  %v21574_v63 = vld [vmem:[#allocation25_spill] sm:$0xff]  ;;  %v13890_v52 = vld [vmem:[%s14304_s20 + $0x120] sm:$0xff] }
 0x573   : > { %v7516_v59 = vpop.f32.mrf.mxu1  ;;  %v7283_v39 = vadd.f32 %v21574_v63, %v18899_v53  ;;  %v19196_v63 = vpop.f32.mrf.mxu0 }
 0x574   : > { %21569 = vst [vmem:[#allocation131_spill] sm:$0xff] %v19167_v27  ;;  %v19174_v47 = vadd.f32 %v7516_v59, %v7281_v37  ;;  %v21576_v59 = vld [vmem:[#allocation196_spill] sm:$0xff] }
 0x575   : > { %v12751_v45 = vpop.f32.mrf.mxu1  ;;  %13166 = vmatmul.mubr.f32.gmra.mxu1 %v13889_v42  ;;  %v7286_v62 = vadd.f32 %v21576_v59, %v18906_v29  ;;  %v21617_v27 = vld [vmem:[#allocation124_spill] sm:$0xff] }
 0x576   : > { %21571 = vst [vmem:[#allocation19_spill] sm:$0xff] %v19174_v47  ;;  %v19179_v26 = vadd.f32 %v12751_v45, %v7284_v35  ;;  %13168 = vmatprep.mubr.f32.mxu1 %v13890_v52  ;;  %v21578_v35 = vld [vmem:[#allocation70_spill] sm:$0xff]  ;;  %v13892_v45 = vld [vmem:[%s14304_s20 + $0x130] sm:$0xff] }
 0x577   : > { %v7526_v48 = vpop.f32.mrf.mxu1  ;;  %v7285_v53 = vadd.f32 %v21578_v35, %v18913_v25  ;;  %v19208_v35 = vpop.f32.mrf.mxu0 }
 0x578   : > { %21573 = vst [vmem:[#allocation110_spill] sm:$0xff] %v19179_v26  ;;  %v19186_v37 = vadd.f32 %v7526_v48, %v7283_v39  ;;  %v21580_v48 = vld [vmem:[#allocation198_spill] sm:$0xff] }
 0x579   : > { %v12754_v1 = vpop.f32.mrf.mxu1  ;;  %13169 = vmatmul.mubr.f32.gmra.mxu1 %v13891_v14  ;;  %v7288_v29 = vadd.f32 %v21580_v48, %v18920_v50 }
 0x57a   : > { %21575 = vst [vmem:[#allocation135_spill] sm:$0xff] %v19186_v37  ;;  %v19191_v42 = vadd.f32 %v12754_v1, %v7286_v62  ;;  %13171 = vmatprep.mubr.f32.mxu1 %v13892_v45  ;;  %v21582_v62 = vld [vmem:[#allocation114_spill] sm:$0xff]  ;;  %v13894_v1 = vld [vmem:[%s14304_s20 + $0x140] sm:$0xff] }
 0x57b   : > { %v7536_v52 = vpop.f32.mrf.mxu1  ;;  %v7287_v25 = vadd.f32 %v21582_v62, %v18927_v3  ;;  %v19220_v62 = vpop.f32.mrf.mxu0 }
 0x57c   : > { %21577 = vst [vmem:[#allocation83_spill] sm:$0xff] %v19191_v42  ;;  %v19198_v39 = vadd.f32 %v7536_v52, %v7285_v53  ;;  %v21584_v52 = vld [vmem:[#allocation199_spill] sm:$0xff]  ;;  %v21616_v42 = vld [vmem:[#allocation84_spill] sm:$0xff] }
 0x57d   : > { %v12757_v59 = vpop.f32.mrf.mxu1  ;;  %13172 = vmatmul.mubr.f32.gmra.mxu1 %v13893_v11  ;;  %v7290_v50 = vadd.f32 %v21584_v52, %v18932_v2  ;;  %v7996_v37 = vadd.f32 %v21616_v42, %v19011_v18  ;;  %v21620_v18 = vld [vmem:[#allocation127_spill] sm:$0xff] }
 0x57e   : > { %21579 = vst [vmem:[#allocation147_spill] sm:$0xff] %v19198_v39  ;;  %v19203_v14 = vadd.f32 %v12757_v59, %v7288_v29  ;;  %13174 = vmatprep.mubr.f32.mxu1 %v13894_v1  ;;  %v13895_v39 = vld [vmem:[%s14304_s20 + $0x148] sm:$0xff]  ;;  %v13896_v59 = vld [vmem:[%s14304_s20 + $0x150] sm:$0xff]  ;;  %v7997_v42 = vadd.f32 %v21620_v18, %v19030_v10 }
 0x57f   : > { %v7546_v45 = vpop.f32.mrf.mxu1  ;;  %v21586_v29 = vld [vmem:[#allocation96_spill] sm:$0xff] }
 0x580   : > { %21581 = vst [vmem:[#allocation20_spill] sm:$0xff] %v19203_v14  ;;  %v19210_v53 = vadd.f32 %v7546_v45, %v7287_v25  ;;  %v7289_v3 = vadd.f32 %v21586_v29, %v18939_v0  ;;  %v21588_v45 = vld [vmem:[#allocation115_spill] sm:$0xff]  ;;  %v19232_v29 = vpop.f32.mrf.mxu0 }
 0x581   : > { %v12760_v48 = vpop.f32.mrf.mxu1  ;;  %13175 = vmatmul.mubr.f32.gmra.mxu1 %v13895_v39  ;;  %v7292_v2 = vadd.f32 %v21588_v45, %v18944_v56 }
 0x582   : > { %21583 = vst [vmem:[#allocation36_spill] sm:$0xff] %v19210_v53  ;;  %v19215_v11 = vadd.f32 %v12760_v48, %v7290_v50  ;;  %13177 = vmatprep.mubr.f32.mxu1 %v13896_v59  ;;  %v13897_v53 = vld [vmem:[%s14304_s20 + $0x158] sm:$0xff]  ;;  %v21590_v50 = vld [vmem:[#allocation71_spill] sm:$0xff] }
 0x583   : > { %v7556_v1 = vpop.f32.mrf.mxu1  ;;  %v7291_v0 = vadd.f32 %v21590_v50, %v18951_v54  ;;  %v13898_v48 = vld [vmem:[%s14304_s20 + $0x160] sm:$0xff]  ;;  %v19244_v50 = vpop.f32.mrf.mxu0 }
 0x584   : > { %21585 = vst [vmem:[#allocation119_spill] sm:$0xff] %v19215_v11  ;;  %v19222_v25 = vadd.f32 %v7556_v1, %v7289_v3  ;;  %v21592_v1 = vld [vmem:[#allocation100_spill] sm:$0xff] }
 0x585   : > { %v12763_v52 = vpop.f32.mrf.mxu1  ;;  %13178 = vmatmul.mubr.f32.gmra.mxu1 %v13897_v53  ;;  %v7294_v56 = vadd.f32 %v21592_v1, %v18956_v30 }
 0x586   : > { %21587 = vst [vmem:[#allocation112_spill] sm:$0xff] %v19222_v25  ;;  %v19227_v39 = vadd.f32 %v12763_v52, %v7292_v2  ;;  %13180 = vmatprep.mubr.f32.mxu1 %v13898_v48  ;;  %v13899_v25 = vld [vmem:[%s14304_s20 + $0x168] sm:$0xff]  ;;  %v21594_v2 = vld [vmem:[#allocation105_spill] sm:$0xff] }
 0x587   : > { %v7566_v59 = vpop.f32.mrf.mxu1  ;;  %v7293_v54 = vadd.f32 %v21594_v2, %v18963_v9  ;;  %v13900_v52 = vld [vmem:[%s14304_s20 + $0x170] sm:$0xff]  ;;  %v19256_v2 = vpop.f32.mrf.mxu0 }
 0x588   : > { %21589 = vst [vmem:[#allocation38_spill] sm:$0xff] %v19227_v39  ;;  %v19234_v3 = vadd.f32 %v7566_v59, %v7291_v0  ;;  %v21596_v59 = vld [vmem:[#allocation106_spill] sm:$0xff] }
 0x589   : > { %v12766_v45 = vpop.f32.mrf.mxu1  ;;  %13181 = vmatmul.mubr.f32.gmra.mxu1 %v13899_v25  ;;  %v7296_v30 = vadd.f32 %v21596_v59, %v18968_v51 }
 0x58a   : > { %21591 = vst [vmem:[#allocation26_spill] sm:$0xff] %v19234_v3  ;;  %v19239_v53 = vadd.f32 %v12766_v45, %v7294_v56  ;;  %13183 = vmatprep.mubr.f32.mxu1 %v13900_v52  ;;  %v13901_v3 = vld [vmem:[%s14304_s20 + $0x178] sm:$0xff]  ;;  %v21598_v56 = vld [vmem:[#allocation77_spill] sm:$0xff]  ;;  %v13902_v45 = vld [vmem:[%s14304_s20 + $0x180] sm:$0xff] }
 0x58b   : > { %v7576_v48 = vpop.f32.mrf.mxu1  ;;  %v7295_v9 = vadd.f32 %v21598_v56, %v18975_v55  ;;  %v19268_v56 = vpop.f32.mrf.mxu0 }
 0x58c   : > { %21593 = vst [vmem:[#allocation138_spill] sm:$0xff] %v19239_v53  ;;  %v19246_v0 = vadd.f32 %v7576_v48, %v7293_v54  ;;  %v21600_v48 = vld [vmem:[#allocation109_spill] sm:$0xff] }
 0x58d   : > { %v12769_v1 = vpop.f32.mrf.mxu1  ;;  %13184 = vmatmul.mubr.f32.gmra.mxu1 %v13901_v3  ;;  %v7298_v51 = vadd.f32 %v21600_v48, %v18980_v28 }
 0x58e   : > { %21595 = vst [vmem:[#allocation180_spill] sm:$0xff] %v19246_v0  ;;  %v19251_v25 = vadd.f32 %v12769_v1, %v7296_v30  ;;  %13186 = vmatprep.mubr.f32.mxu1 %v13902_v45  ;;  %v13903_v0 = vld [vmem:[%s14304_s20 + $0x188] sm:$0xff]  ;;  %v21602_v30 = vld [vmem:[#allocation78_spill] sm:$0xff]  ;;  %v13904_v1 = vld [vmem:[%s14304_s20 + $0x190] sm:$0xff] }
 0x58f   : > { %v7586_v52 = vpop.f32.mrf.mxu1  ;;  %v7297_v55 = vadd.f32 %v21602_v30, %v18987_v58  ;;  %v13906_v58 = vld [vmem:[%s14304_s20 + $0x1a0] sm:$0xff]  ;;  %v19280_v30 = vpop.f32.mrf.mxu0 }
 0x590   : > { %21597 = vst [vmem:[#allocation152_spill] sm:$0xff] %v19251_v25  ;;  %v19258_v54 = vadd.f32 %v7586_v52, %v7295_v9  ;;  %v21604_v52 = vld [vmem:[#allocation79_spill] sm:$0xff] }
 0x591   : > { %v12772_v59 = vpop.f32.mrf.mxu1  ;;  %13187 = vmatmul.mubr.f32.gmra.mxu1 %v13903_v0  ;;  %v7300_v28 = vadd.f32 %v21604_v52, %v18992_v60  ;;  %v13907_v60 = vld [vmem:[%s14304_s20 + $0x1a8] sm:$0xff] }
 0x592   : > { %21599 = vst [vmem:[#allocation22_spill] sm:$0xff] %v19258_v54  ;;  %v19263_v3 = vadd.f32 %v12772_v59, %v7298_v51  ;;  %13189 = vmatprep.mubr.f32.mxu1 %v13904_v1  ;;  %v13905_v54 = vld [vmem:[%s14304_s20 + $0x198] sm:$0xff]  ;;  %v21606_v51 = vld [vmem:[#allocation80_spill] sm:$0xff]  ;;  %s9614_s20 = sshll.u32 %s19804_s1, 4  ;;  %s20122_s20 = int_to_ptr.vmem [resolvable:$true] %s9614_s20 }
 0x593   : > { %v7596_v45 = vpop.f32.mrf.mxu1  ;;  %v7299_v59 = vadd.f32 %v21606_v51, %v18997_v23  ;;  %s14015_s15 = scalar_lea.vmem %s20122_s20, 6144  ;;  %p14022_p11 = scmp.lt.s32.totalorder %s20122_s20, %s14020_s11 }
 0x594   : > { %21601 = vst [vmem:[#allocation184_spill] sm:$0xff] %v19263_v3  ;;  %v19270_v9 = vadd.f32 %v7596_v45, %v7297_v55  ;;  %v21608_v55 = vld [vmem:[#allocation118_spill] sm:$0xff]  ;;  %p14016_p4 = scmp.ne.s32.totalorder %s20122_s20, %s14015_s15  ;;  %p14023_p2 = scmp.lt.s32.totalorder %s14021_s23, %s14015_s15 }
 0x595   : > { %v12775_v48 = vpop.f32.mrf.mxu1  ;;  %13190 = vmatmul.mubr.f32.gmra.mxu1 %v13905_v54  ;;  %v7302_v45 = vadd.f32 %v21608_v55, %v19000_v49  ;;  %v21610_v54 = vld [vmem:[#allocation123_spill] sm:$0xff] }
 0x596   : > { %21603 = vst [vmem:[#allocation154_spill] sm:$0xff] %v19270_v9  ;;  %v19275_v0 = vadd.f32 %v12775_v48, %v7300_v28  ;;  %13192 = vmatprep.mubr.f32.mxu1 %v13906_v58  ;;  %v7301_v28 = vadd.f32 %v21610_v54, %v19006_v40  ;;  %v19291_v48 = vpop.f32.mrf.mxu0  ;;  %p14017_p8 = pnand %p14016_p4, %p14269_p13  ;;  %p14024_p10 = por %p14023_p2, %p14022_p11 }
 0x597   : > { %v7606_v1 = vpop.f32.mrf.mxu1 }
 0x598   : > { %21605 = vst [vmem:[#allocation116_spill] sm:$0xff] %v19275_v0  ;;  %v19282_v3 = vadd.f32 %v7606_v1, %v7299_v59  ;;  %v19295_v0 = vpop.f32.mrf.mxu0  ;;  %p14018_p5 = pneg %p14017_p8 }
 0x599   : > { %v12778_v9 = vpop.f32.mrf.mxu1  ;;  %13193 = vmatmul.mubr.f32.gmra.mxu1 %v13907_v60 }
 0x59a   : > { %21607 = vst [vmem:[#allocation186_spill] sm:$0xff] %v19282_v3  ;;  %v19287_v52 = vadd.f32 %v12778_v9, %v7302_v45  ;;  %v19297_v3 = vpop.f32.mrf.mxu0  ;;  %p14025_p7 = pnand %p14024_p10, %p14018_p5 }
 0x59b   : > { %v7616_v23 = vpop.f32.mrf.mxu1 }
 0x59c   : > { %21609 = vst [vmem:[#allocation160_spill] sm:$0xff] %v19287_v52  ;;  %v19293_v51 = vadd.f32 %v7616_v23, %v7301_v28  ;;  %v19299_v60 = vpop.f32.mrf.mxu0 }
 0x59d   : > { %v12917_v58 = vpop.f32.mrf.mxu1 }
 0x59e   : > { %21611 = vst [vmem:[#allocation140_spill] sm:$0xff] %v19293_v51  ;;  %v19301_v52 = vpop.f32.mrf.mxu0  ;;  %v8366_v47 = vadd.f32 %v12917_v58, %v7996_v37  ;;  %v21622_v37 = vld [vmem:[#allocation87_spill] sm:$0xff] }
 0x59f   : > { %v8126_v59 = vpop.f32.mrf.mxu1  ;;  %21612 = vst [vmem:[#allocation192_spill] sm:$0xff] %v19301_v52 }
 0x5a0   : > { %v19303_v25 = vpop.f32.mrf.mxu0  ;;  %v8736_v36 = vadd.f32 %v19160_v24, %v8366_v47  ;;  %v21623_v47 = vld [vmem:[#allocation132_spill] sm:$0xff] }
 0x5a1   : > { %v12920_v1 = vpop.f32.mrf.mxu1  ;;  %21613 = vst [vmem:[#allocation162_spill] sm:$0xff] %v19303_v25  ;;  %v7995_v25 = vadd.f32 %v21617_v27, %v19018_v5  ;;  %v19337_v5 = vld [vmem:[%s20177_s6] ss:$0 sm:$0xff]  ;;  %v7999_v10 = vadd.f32 %v21623_v47, %v19042_v13 }
 0x5a2   : > { %v19305_v51 = vpop.f32.mrf.mxu0  ;;  %v8368_v27 = vadd.f32 %v12920_v1, %v7998_v20  ;;  %v19349_v18 = vadd.f32 %v19337_v5, %v8736_v36  ;;  %v21625_v36 = vld [vmem:[#allocation133_spill] sm:$0xff] }
 0x5a3   : > { %v8136_v49 = vpop.f32.mrf.mxu1  ;;  %21614 = vst [vmem:[#allocation144_spill] sm:$0xff] %v19305_v51  ;;  %v8365_v52 = vadd.f32 %v8126_v59, %v7995_v25  ;;  %v8000_v25 = vadd.f32 %v21622_v37, %v19035_v57 }
 0x5a4   : > { %v19311_v11 = vpop.f32.mrf.mxu0  ;;  %v8367_v44 = vadd.f32 %v8136_v49, %v7997_v42  ;;  %v8738_v57 = vadd.f32 %v19184_v31, %v8368_v27 }
 0x5a5   : > { %v12923_v55 = vpop.f32.mrf.mxu1  ;;  %21615 = vst [vmem:[#allocation51_spill] sm:$0xff] %v19311_v11  ;;  %v8735_v19 = vadd.f32 %v19172_v22, %v8365_v52 }
 0x5a6   : > { %v19321_v17 = vpop.f32.mrf.mxu0  ;;  %v8370_v24 = vadd.f32 %v12923_v55, %v8000_v25  ;;  %v8737_v13 = vadd.f32 %v19196_v63, %v8367_v44  ;;  %v8001_v55 = vadd.f32 %v21625_v36, %v19054_v38  ;;  %v19371_v31 = vadd.f32 %v19337_v5, %v8738_v57  ;;  %v21626_v63 = vld [vmem:[#allocation89_spill] sm:$0xff]  ;;  %v21627_v44 = vld [vmem:[#allocation136_spill] sm:$0xff] }
 0x5a7   : > { %v8146_v9 = vpop.f32.mrf.mxu1  ;;  %21618 = vst [vmem:[#allocation187_spill] sm:$0xff] %v19321_v17  ;;  %v19359_v22 = vadd.f32 %v19337_v5, %v8735_v19  ;;  %v21629_v57 = vld [vmem:[#allocation128_spill] sm:$0xff] }
 0x5a8   : > { %v19332_v46 = vpop.f32.mrf.mxu0  ;;  %v8369_v37 = vadd.f32 %v8146_v9, %v7999_v10  ;;  %v8740_v49 = vadd.f32 %v19208_v35, %v8370_v24  ;;  %v19380_v38 = vadd.f32 %v19337_v5, %v8737_v13  ;;  %v8003_v24 = vadd.f32 %v21627_v44, %v19066_v61 }
 0x5a9   : > { %v12926_v45 = vpop.f32.mrf.mxu1  ;;  %21621 = vst [vmem:[#allocation23_spill] sm:$0xff] %v19332_v46  ;;  %v21624_v46 = vld [vmem:[#allocation88_spill] sm:$0xff]  ;;  %v9816_v35 = vmul.f32 -1.442695, %v19359_v22 }
 0x5aa   : > { %v8002_v20 = vadd.f32 %v21624_v46, %v19047_v6  ;;  %v19353_v1 = vpop.f32.mrf.mxu0  ;;  %v9817_v6 = vmul.f32 -1.442695, %v19349_v18  ;;  %v8739_v9 = vadd.f32 %v19220_v62, %v8369_v37  ;;  %v19386_v47 = vadd.f32 %v19337_v5, %v8740_v49 }
 0x5ab   : > { %v8156_v40 = vpop.f32.mrf.mxu1  ;;  %v8005_v37 = vadd.f32 %v21629_v57, %v19078_v34 }
 0x5ac   : > { %v8372_v52 = vadd.f32 %v12926_v45, %v8002_v20  ;;  %v19368_v46 = vpop.f32.mrf.mxu0  ;;  %v8371_v27 = vadd.f32 %v8156_v40, %v8001_v55  ;;  %v8004_v45 = vadd.f32 %v21626_v63, %v19059_v7  ;;  %v21628_v40 = vld [vmem:[#allocation91_spill] sm:$0xff]  ;;  %13538 = vpow2.f32 %v9817_v6 }
 0x5ad   : > { %v12929_v54 = vpop.f32.mrf.mxu1  ;;  %v8006_v10 = vadd.f32 %v21628_v40, %v19071_v8  ;;  %v19398_v61 = vadd.f32 %v19337_v5, %v8739_v9  ;;  %13540 = vpow2.f32 %v9816_v35  ;;  %v9818_v8 = vmul.f32 -1.442695, %v19380_v38 }
 0x5ae   : > { %v8742_v19 = vadd.f32 %v19232_v29, %v8372_v52  ;;  %v8374_v62 = vadd.f32 %v12929_v54, %v8004_v45  ;;  %v19394_v13 = vpop.f32.mrf.mxu0  ;;  %v9819_v29 = vmul.f32 -1.442695, %v19371_v31  ;;  %v8741_v52 = vadd.f32 %v19244_v50, %v8371_v27  ;;  %v21630_v50 = vld [vmem:[#allocation141_spill] sm:$0xff] }
 0x5af   : > { %v8166_v28 = vpop.f32.mrf.mxu1  ;;  %v9821_v34 = vmul.f32 -1.442695, %v19386_v47  ;;  %v9820_v63 = vmul.f32 -1.442695, %v19398_v61 }
 0x5b0   : > { %v8373_v20 = vadd.f32 %v8166_v28, %v8003_v24  ;;  %v19405_v28 = vadd.f32 %v19337_v5, %v8742_v19  ;;  %v8744_v36 = vadd.f32 %v19256_v2, %v8374_v62  ;;  %v19415_v27 = vpop.f32.mrf.mxu0  ;;  %13542 = vpow2.f32 %v9819_v29 }
 0x5b1   : > { %v12932_v23 = vpop.f32.mrf.mxu1  ;;  %v19419_v45 = vadd.f32 %v19337_v5, %v8741_v52  ;;  %13544 = vpow2.f32 %v9818_v8 }
 0x5b2   : > { %v8376_v54 = vadd.f32 %v12932_v23, %v8006_v10  ;;  %v8743_v9 = vadd.f32 %v19268_v56, %v8373_v20  ;;  %v8008_v23 = vadd.f32 %v21630_v50, %v19083_v32  ;;  %v21632_v56 = vld [vmem:[#allocation93_spill] sm:$0xff]  ;;  %13546 = vpow2.f32 %v9821_v34  ;;  %v19438_v10 = vpop.f32.mrf.mxu0 }
 0x5b3   : > { %v19307_v53 = vpop.f32.mrf.mxu1  ;;  %21631 = vst [vmem:[#allocation53_spill] sm:$0xff] %v19419_v45  ;;  %v8007_v19 = vadd.f32 %v21632_v56, %v19090_v21  ;;  %v19428_v32 = vadd.f32 %v19337_v5, %v8744_v36  ;;  %13548 = vpow2.f32 %v9820_v63  ;;  %v9822_v21 = vmul.f32 -1.442695, %v19419_v45  ;;  %v21642_v56 = vld [vmem:[#allocation166_spill] sm:$0xff] }
 0x5b4   : > { %v8375_v55 = vadd.f32 %v19307_v53, %v8005_v37  ;;  %v8746_v35 = vadd.f32 %v19280_v30, %v8376_v54  ;;  %v9823_v53 = vmul.f32 -1.442695, %v19405_v28  ;;  %v19435_v30 = vadd.f32 %v19337_v5, %v8743_v9  ;;  %v21638_v9 = vld [vmem:[#allocation142_spill] sm:$0xff] }
 0x5b5   : > { %v19309_v39 = vpop.f32.mrf.mxu1  ;;  %21633 = vst [vmem:[#allocation59_spill] sm:$0xff] %v19428_v32  ;;  %v9825_v37 = vmul.f32 -1.442695, %v19428_v32  ;;  %v8009_v50 = vadd.f32 %v21638_v9, %v19102_v43  ;;  %v21647_v9 = vld [vmem:[#allocation99_spill] sm:$0xff] }
 0x5b6   : > { %v8745_v44 = vadd.f32 %v19291_v48, %v8375_v55  ;;  %v8378_v24 = vadd.f32 %v19309_v39, %v8008_v23  ;;  %21634 = vst [vmem:[#allocation165_spill] sm:$0xff] %v19435_v30  ;;  %v19442_v20 = vadd.f32 %v19337_v5, %v8746_v35  ;;  %13550 = vpow2.f32 %v9823_v53  ;;  %v21636_v39 = vld [vmem:[#allocation130_spill] sm:$0xff]  ;;  %v19458_v55 = vpop.f32.mrf.mxu0  ;;  %v21639_v23 = vld [vmem:[#allocation95_spill] sm:$0xff] }
 0x5b7   : > { %v19313_v14 = vpop.f32.mrf.mxu1  ;;  %v8010_v48 = vadd.f32 %v21636_v39, %v19095_v33  ;;  %v9824_v54 = vmul.f32 -1.442695, %v19435_v30  ;;  %13552 = vpow2.f32 %v9822_v21  ;;  %v21640_v35 = vld [vmem:[#allocation134_spill] sm:$0xff] }
 0x5b8   : > { %v8377_v40 = vadd.f32 %v19313_v14, %v8007_v19  ;;  %21635 = vst [vmem:[#allocation55_spill] sm:$0xff] %v19442_v20  ;;  %v19450_v29 = vadd.f32 %v19337_v5, %v8745_v44  ;;  %v8748_v14 = vadd.f32 %v19295_v0, %v8378_v24  ;;  %v9827_v33 = vmul.f32 -1.442695, %v19442_v20  ;;  %v21643_v44 = vld [vmem:[#allocation61_spill] sm:$0xff] }
 0x5b9   : > { %v19317_v26 = vpop.f32.mrf.mxu1  ;;  %v13539_v36 = vpop.eup %13538  ;;  %v8012_v0 = vadd.f32 %v21639_v23, %v19107_v16  ;;  %v8011_v53 = vadd.f32 %v21640_v35, %v19114_v15  ;;  %v8013_v19 = vadd.f32 %v21642_v56, %v19126_v4  ;;  %v8016_v24 = vadd.f32 %v21643_v44, %v19131_v41  ;;  %v21648_v23 = vld [vmem:[#allocation126_spill] sm:$0xff]  ;;  %v21649_v35 = vld [vmem:[#allocation145_spill] sm:$0xff] }
 0x5ba   : > { %21637 = vst [vmem:[#allocation193_spill] sm:$0xff] %v19450_v29  ;;  %v8747_v8 = vadd.f32 %v19297_v3, %v8377_v40  ;;  %v8380_v34 = vadd.f32 %v19317_v26, %v8010_v48  ;;  %v21641_v3 = vld [vmem:[#allocation90_spill] sm:$0xff]  ;;  %v13541_v40 = vpop.eup %13540  ;;  %13554 = vpow2.f32 %v9825_v37  ;;  %v9826_v43 = vmul.f32 -1.442695, %v19450_v29  ;;  %v19487_v41 = vpop.f32.mrf.mxu0  ;;  %v21646_v37 = vld [vmem:[#allocation103_spill] sm:$0xff] }
 0x5bb   : > { %v19323_v51 = vpop.f32.mrf.mxu1  ;;  %v8014_v26 = vadd.f32 %v21641_v3, %v19119_v12  ;;  %v19477_v16 = vadd.f32 %v19337_v5, %v8748_v14  ;;  %13556 = vpow2.f32 %v9824_v54  ;;  %v8983_v48 = vadd.f32 1.0, %v13539_v36  ;;  %v21654_v36 = vld [vmem:[#allocation62_spill] sm:$0xff] }
 0x5bc   : > { %v8379_v21 = vadd.f32 %v19323_v51, %v8009_v50  ;;  %v19483_v15 = vadd.f32 %v19337_v5, %v8747_v8  ;;  %v8750_v12 = vadd.f32 %v19299_v60, %v8380_v34  ;;  %13558 = vpow2.f32 %v9827_v33  ;;  %v21651_v60 = vld [vmem:[#allocation129_spill] sm:$0xff]  ;;  %v21652_v34 = vld [vmem:[#allocation102_spill] sm:$0xff] }
 0x5bd   : > { %v19327_v11 = vpop.f32.mrf.mxu1  ;;  %21644 = vst [vmem:[#allocation148_spill] sm:$0xff] %v19477_v16  ;;  %v8015_v14 = vadd.f32 %v21647_v9, %v21646_v37  ;;  %v19493_v51 = vadd.f32 %v21649_v35, %v21648_v23  ;;  %v13543_v54 = vpop.eup %13542  ;;  %v8982_v8 = vadd.f32 1.0, %v13541_v40  ;;  %13560 = vpow2.f32 %v9826_v43  ;;  %v21655_v37 = vld [vmem:[#allocation192_spill] sm:$0xff]  ;;  %v21656_v23 = vld [vmem:[#allocation107_spill] sm:$0xff] }
 0x5be   : > { %21645 = vst [vmem:[#allocation82_spill] sm:$0xff] %v19483_v15  ;;  %v8382_v4 = vadd.f32 %v19327_v11, %v8012_v0  ;;  %v19500_v11 = vadd.f32 %v21652_v34, %v21651_v60  ;;  %v21653_v0 = vld [vmem:[#allocation69_spill] sm:$0xff]  ;;  %v13545_v56 = vpop.eup %13544  ;;  %v9829_v44 = vmul.f32 -1.442695, %v19477_v16  ;;  %v8749_v9 = vadd.f32 %v21655_v37, %v8379_v21  ;;  %v21657_v35 = vld [vmem:[#allocation92_spill] sm:$0xff]  ;;  %v21660_v34 = vld [vmem:[#allocation162_spill] sm:$0xff]  ;;  %v19523_v16 = vpop.f32.mrf.mxu0 }
 0x5bf   : > { %v19341_v58 = vpop.f32.mrf.mxu1  ;;  %v19504_v33 = vadd.f32 %v21654_v36, %v21653_v0  ;;  %v19510_v29 = vadd.f32 %v21657_v35, %v21656_v23  ;;  %v19516_v60 = vadd.f32 %v19337_v5, %v8750_v12  ;;  %v21661_v36 = vld [vmem:[#allocation131_spill] sm:$0xff]  ;;  %13562 = vrcp.f32 %v8983_v48  ;;  %v21664_v23 = vld [vmem:[#allocation104_spill] sm:$0xff] }
 0x5c0   : > { %v8381_v3 = vadd.f32 %v19341_v58, %v8011_v53  ;;  %v13547_v58 = vpop.eup %13546  ;;  %v9828_v53 = vmul.f32 -1.442695, %v19483_v15  ;;  %v8752_v0 = vadd.f32 %v21660_v34, %v8382_v4  ;;  %v21662_v43 = vld [vmem:[#allocation139_spill] sm:$0xff]  ;;  %v8985_v21 = vadd.f32 1.0, %v13543_v54  ;;  %v21667_v34 = vld [vmem:[#allocation144_spill] sm:$0xff] }
 0x5c1   : > { %v19346_v59 = vpop.f32.mrf.mxu1  ;;  %21659 = vst [vmem:[#allocation183_spill] sm:$0xff] %v19516_v60  ;;  %v19521_v20 = vadd.f32 %v21662_v43, %v21661_v36  ;;  %v21663_v37 = vld [vmem:[#allocation19_spill] sm:$0xff]  ;;  %v13549_v30 = vpop.eup %13548  ;;  %13564 = vrcp.f32 %v8982_v8  ;;  %v8984_v4 = vadd.f32 1.0, %v13545_v56  ;;  %v8987_v48 = vadd.f32 1.0, %v13547_v58 }
 0x5c2   : > { %v19527_v35 = vadd.f32 %v21664_v23, %v21663_v37  ;;  %v8751_v36 = vadd.f32 %v21667_v34, %v8381_v3  ;;  %v8384_v43 = vadd.f32 %v19346_v59, %v8014_v26  ;;  %13566 = vpow2.f32 %v9829_v44  ;;  %v21669_v37 = vld [vmem:[#allocation135_spill] sm:$0xff]  ;;  %v21670_v23 = vld [vmem:[#allocation108_spill] sm:$0xff]  ;;  %v19551_v26 = vpop.f32.mrf.mxu0 }
 0x5c3   : > { %v19356_v17 = vpop.f32.mrf.mxu1  ;;  %v13551_v32 = vpop.eup %13550  ;;  %v19538_v54 = vadd.f32 %v19337_v5, %v8749_v9  ;;  %v19542_v45 = vadd.f32 %v21670_v23, %v21669_v37  ;;  %13568 = vpow2.f32 %v9828_v53  ;;  %v9831_v8 = vmul.f32 -1.442695, %v19516_v60  ;;  %v21673_v9 = vld [vmem:[#allocation83_spill] sm:$0xff] }
 0x5c4   : > { %v19548_v56 = vadd.f32 %v19337_v5, %v8752_v0  ;;  %v8383_v59 = vadd.f32 %v19356_v17, %v8013_v19  ;;  %13570 = vrcp.f32 %v8985_v21  ;;  %v8986_v3 = vadd.f32 1.0, %v13549_v30  ;;  %v13553_v53 = vpop.eup %13552  ;;  %v21677_v23 = vld [vmem:[#allocation51_spill] sm:$0xff]  ;;  %v21679_v21 = vld [vmem:[#allocation94_spill] sm:$0xff] }
 0x5c5   : > { %v19365_v42 = vpop.f32.mrf.mxu1  ;;  %21668 = vst [vmem:[#allocation32_spill] sm:$0xff] %v19538_v54  ;;  %13572 = vrcp.f32 %v8984_v4  ;;  %v8989_v37 = vadd.f32 1.0, %v13551_v32  ;;  %v19561_v0 = vadd.f32 %v19337_v5, %v8751_v36  ;;  %v8754_v17 = vadd.f32 %v21677_v23, %v8384_v43  ;;  %v21678_v30 = vld [vmem:[#allocation147_spill] sm:$0xff]  ;;  %v19578_v23 = vpop.f32.mrf.mxu0 }
 0x5c6   : > { %21672 = vst [vmem:[#allocation191_spill] sm:$0xff] %v19548_v56  ;;  %v8386_v44 = vadd.f32 %v19365_v42, %v8016_v24  ;;  %13574 = vrcp.f32 %v8987_v48  ;;  %v9830_v19 = vmul.f32 -1.442695, %v19538_v54  ;;  %v19567_v42 = vadd.f32 %v21679_v21, %v21678_v30  ;;  %v21680_v24 = vld [vmem:[#allocation20_spill] sm:$0xff]  ;;  %v21683_v36 = vld [vmem:[#allocation187_spill] sm:$0xff] }
 0x5c7   : > { %v19376_v25 = vpop.f32.mrf.mxu1  ;;  %21676 = vst [vmem:[#allocation161_spill] sm:$0xff] %v19561_v0  ;;  %v13555_v4 = vpop.eup %13554  ;;  %13576 = vpow2.f32 %v9831_v8  ;;  %v9833_v32 = vmul.f32 -1.442695, %v19548_v56  ;;  %v8988_v30 = vadd.f32 1.0, %v13553_v53  ;;  %v21684_v21 = vld [vmem:[#allocation23_spill] sm:$0xff]  ;;  %v21691_v53 = vld [vmem:[#allocation113_spill] sm:$0xff] }
 0x5c8   : > { %v8385_v43 = vadd.f32 %v19376_v25, %v8015_v14  ;;  %v13557_v48 = vpop.eup %13556  ;;  %13578 = vrcp.f32 %v8986_v3  ;;  %v8756_v54 = vadd.f32 %v21684_v21, %v8386_v44  ;;  %v9832_v56 = vmul.f32 -1.442695, %v19561_v0  ;;  %v21688_v25 = vld [vmem:[#allocation119_spill] sm:$0xff]  ;;  %v21689_v14 = vld [vmem:[#allocation98_spill] sm:$0xff] }
 0x5c9   : > { %v19390_v7 = vpop.f32.mrf.mxu1  ;;  %v13559_v8 = vpop.eup %13558  ;;  %13580 = vrcp.f32 %v8989_v37  ;;  %v8991_v3 = vadd.f32 1.0, %v13555_v4  ;;  %v8990_v0 = vadd.f32 1.0, %v13557_v48 }
 0x5ca   : > { %13582 = vpow2.f32 %v9830_v19  ;;  %v8388_v44 = vadd.f32 %v19390_v7, %v19493_v51  ;;  %v13561_v37 = vpop.eup %13560  ;;  %v8993_v19 = vadd.f32 1.0, %v13559_v8  ;;  %v19610_v7 = vadd.f32 %v19337_v5, %v8756_v54 }
 0x5cb   : > { %v19401_v49 = vpop.f32.mrf.mxu1  ;;  %13584 = vpow2.f32 %v9833_v32  ;;  %v8992_v54 = vadd.f32 1.0, %v13561_v37 }
 0x5cc   : > { %13586 = vrcp.f32 %v8988_v30  ;;  %21694 = vst [vmem:[#allocation137_spill] sm:$0xff] %v19610_v7  ;;  %v8387_v51 = vadd.f32 %v19401_v49, %v19500_v11  ;;  %v8758_v8 = vadd.f32 %v19368_v46, %v8388_v44  ;;  %v21698_v49 = vld [vmem:[#allocation26_spill] sm:$0xff]  ;;  %v21699_v11 = vld [vmem:[#allocation153_spill] sm:$0xff]  ;;  %v9837_v46 = vmul.f32 -1.442695, %v19610_v7 }
 0x5cd   : > { %v19410_v6 = vpop.f32.mrf.mxu1  ;;  %13588 = vpow2.f32 %v9832_v56 }
 0x5ce   : > { %13590 = vrcp.f32 %v8991_v3  ;;  %v8757_v44 = vadd.f32 %v19394_v13, %v8387_v51  ;;  %v19658_v51 = vadd.f32 %v19337_v5, %v8758_v8 }
 0x5cf   : > { %v19422_v2 = vpop.f32.mrf.mxu1  ;;  %13592 = vrcp.f32 %v8990_v0 }
 0x5d0   : > { %v8389_v0 = vadd.f32 %v19422_v2, %v19510_v29  ;;  %21710 = vst [vmem:[#allocation37_spill] sm:$0xff] %v19658_v51  ;;  %v21711_v2 = vld [vmem:[#allocation22_spill] sm:$0xff]  ;;  %v21712_v29 = vld [vmem:[#allocation120_spill] sm:$0xff] }
 0x5d1   : > { %v19432_v62 = vpop.f32.mrf.mxu1 }
 0x5d2   : > { %v8759_v8 = vadd.f32 %v19438_v10, %v8389_v0 }
 0x5d3   : > { %v19444_v57 = vpop.f32.mrf.mxu1 }
 0x5d5   : > { %v19453_v52 = vpop.f32.mrf.mxu1 }
 0x5d7   : > { %v19465_v63 = vpop.f32.mrf.mxu1 }
 0x5d9   : > { %v19480_v39 = vpop.f32.mrf.mxu1 }
 0x5db   : > { %v19495_v50 = vpop.f32.mrf.mxu1 }
 0x5dc   : > { %21650 = vst [vmem:[#allocation31_spill] sm:$0xff] %v19495_v50  ;;  %v21666_v50 = vld [vmem:[#allocation149_spill] sm:$0xff] }
 0x5dd   : > { %v19512_v40 = vpop.f32.mrf.mxu1 }
 0x5de   : > { %21658 = vst [vmem:[#allocation29_spill] sm:$0xff] %v19512_v40  ;;  %v21665_v40 = vld [vmem:[#allocation110_spill] sm:$0xff] }
 0x5df   : > { %v19531_v15 = vadd.f32 %v21666_v50, %v21665_v40  ;;  %v19533_v12 = vpop.f32.mrf.mxu1  ;;  %v21674_v40 = vld [vmem:[#allocation143_spill] sm:$0xff] }
 0x5e0   : > { %v19556_v58 = vadd.f32 %v21674_v40, %v21673_v9  ;;  %v21681_v9 = vld [vmem:[#allocation64_spill] sm:$0xff] }
 0x5e1   : > { %v19544_v50 = vpop.f32.mrf.mxu1  ;;  %v19571_v40 = vadd.f32 %v21681_v9, %v21680_v24  ;;  %v21686_v24 = vld [vmem:[#allocation111_spill] sm:$0xff] }
 0x5e2   : > { %21671 = vst [vmem:[#allocation157_spill] sm:$0xff] %v19544_v50  ;;  %v21685_v50 = vld [vmem:[#allocation36_spill] sm:$0xff] }
 0x5e3   : > { %v19558_v34 = vpop.f32.mrf.mxu1  ;;  %v19583_v9 = vadd.f32 %v21686_v24, %v21685_v50  ;;  %v21690_v50 = vld [vmem:[#allocation112_spill] sm:$0xff] }
 0x5e4   : > { %21675 = vst [vmem:[#allocation57_spill] sm:$0xff] %v19558_v34  ;;  %v8753_v34 = vadd.f32 %v21683_v36, %v8383_v59  ;;  %v19589_v59 = vadd.f32 %v19337_v5, %v8754_v17  ;;  %v19593_v36 = vadd.f32 %v21689_v14, %v21688_v25  ;;  %v19599_v21 = vadd.f32 %v21691_v53, %v21690_v50  ;;  %v19607_v14 = vpop.f32.mrf.mxu0  ;;  %v13563_v50 = vpop.eup %13562 }
 0x5e5   : > { %v19573_v60 = vpop.f32.mrf.mxu1  ;;  %v8755_v25 = vadd.f32 %v19353_v1, %v8385_v43  ;;  %v21696_v1 = vld [vmem:[#allocation38_spill] sm:$0xff]  ;;  %v19623_v30 = vpop.eup %13564  ;;  %v19628_v53 = vadd.f32 %v21699_v11, %v21698_v49  ;;  %13594 = vrcp.f32 %v8993_v19 }
 0x5e6   : > { %21682 = vst [vmem:[#allocation194_spill] sm:$0xff] %v19573_v60  ;;  %21687 = vst [vmem:[#allocation58_spill] sm:$0xff] %v19589_v59  ;;  %v19604_v17 = vadd.f32 %v19337_v5, %v8753_v34  ;;  %v9835_v32 = vmul.f32 -1.442695, %v19589_v59  ;;  %v8390_v34 = vadd.f32 %v19410_v6, %v19504_v33  ;;  %v21697_v43 = vld [vmem:[#allocation146_spill] sm:$0xff]  ;;  %v13567_v59 = vpop.eup %13566  ;;  %v19640_v37 = vpop.f32.mrf.mxu0 }
 0x5e7   : > { %v19585_v60 = vpop.f32.mrf.mxu1  ;;  %v19621_v48 = vadd.f32 %v21697_v43, %v21696_v1  ;;  %v19634_v33 = vadd.f32 %v19337_v5, %v8755_v25  ;;  %v21702_v1 = vld [vmem:[#allocation138_spill] sm:$0xff]  ;;  %v21703_v43 = vld [vmem:[#allocation117_spill] sm:$0xff]  ;;  %v13569_v3 = vpop.eup %13568  ;;  %v8995_v13 = vadd.f32 1.0, %v13567_v59  ;;  %v19672_v59 = vadd.f32 %v19337_v5, %v8757_v44  ;;  %v21721_v44 = vld [vmem:[#allocation116_spill] sm:$0xff] }
 0x5e8   : > { %21693 = vst [vmem:[#allocation28_spill] sm:$0xff] %v19604_v17  ;;  %v9834_v6 = vmul.f32 -1.442695, %v19604_v17  ;;  %v13571_v11 = vpop.eup %13570  ;;  %13596 = vpow2.f32 %v9835_v32  ;;  %v8760_v25 = vadd.f32 %v19415_v27, %v8390_v34  ;;  %v21705_v17 = vld [vmem:[#allocation180_spill] sm:$0xff]  ;;  %v8994_v34 = vadd.f32 1.0, %v13569_v3 }
 0x5e9   : > { %v19601_v24 = vpop.f32.mrf.mxu1  ;;  %21701 = vst [vmem:[#allocation63_spill] sm:$0xff] %v19634_v33  ;;  %v13573_v7 = vpop.eup %13572  ;;  %13598 = vrcp.f32 %v8992_v54 }
 0x5ea   : > { %21692 = vst [vmem:[#allocation164_spill] sm:$0xff] %v19601_v24  ;;  %v21708_v24 = vld [vmem:[#allocation101_spill] sm:$0xff]  ;;  %v13575_v27 = vpop.eup %13574  ;;  %13600 = vpow2.f32 %v9834_v6  ;;  %v19669_v54 = vpop.f32.mrf.mxu0  ;;  %v19680_v3 = vadd.f32 %v19337_v5, %v8760_v25  ;;  %v21724_v25 = vld [vmem:[#allocation186_spill] sm:$0xff] }
 0x5eb   : > { %v19614_v4 = vpop.f32.mrf.mxu1  ;;  %13602 = vpow2.f32 %v9837_v46  ;;  %v21720_v46 = vld [vmem:[#allocation158_spill] sm:$0xff] }
 0x5ec   : > { %21695 = vst [vmem:[#allocation189_spill] sm:$0xff] %v19614_v4  ;;  %v19638_v4 = vadd.f32 %v21703_v43, %v21702_v1  ;;  %v21706_v1 = vld [vmem:[#allocation66_spill] sm:$0xff]  ;;  %13604 = vrcp.f32 %v8995_v13 }
 0x5ed   : > { %v19630_v56 = vpop.f32.mrf.mxu1  ;;  %v19651_v43 = vadd.f32 %v21706_v1, %v21705_v17  ;;  %v9836_v17 = vmul.f32 -1.442695, %v19634_v33  ;;  %v8391_v1 = vadd.f32 %v19444_v57, %v19527_v35  ;;  %v21719_v33 = vld [vmem:[#allocation154_spill] sm:$0xff]  ;;  %v9839_v57 = vmul.f32 -1.442695, %v19658_v51  ;;  %v19709_v51 = vpop.f32.mrf.mxu0 }
 0x5ee   : > { %21700 = vst [vmem:[#allocation197_spill] sm:$0xff] %v19630_v56  ;;  %v21707_v56 = vld [vmem:[#allocation152_spill] sm:$0xff] }
 0x5ef   : > { %v19646_v49 = vpop.f32.mrf.mxu1  ;;  %v19655_v19 = vadd.f32 %v21708_v24, %v21707_v56  ;;  %v8392_v24 = vadd.f32 %v19432_v62, %v19521_v20  ;;  %v13577_v56 = vpop.eup %13576  ;;  %v21717_v62 = vld [vmem:[#allocation67_spill] sm:$0xff]  ;;  %13606 = vpow2.f32 %v9836_v17  ;;  %v9841_v17 = vmul.f32 -1.442695, %v19680_v3 }
 0x5f0   : > { %21704 = vst [vmem:[#allocation56_spill] sm:$0xff] %v19646_v49  ;;  %v19662_v49 = vadd.f32 %v21712_v29, %v21711_v2  ;;  %v13579_v6 = vpop.eup %13578  ;;  %v21716_v29 = vld [vmem:[#allocation184_spill] sm:$0xff]  ;;  %13608 = vrcp.f32 %v8994_v34 }
 0x5f1   : > { %21709 = vst [vmem:[#allocation81_spill] sm:$0xff] %v19655_v19  ;;  %v19664_v32 = vpop.f32.mrf.mxu1  ;;  %v19684_v20 = vadd.f32 %v21717_v62, %v21716_v29  ;;  %v13581_v0 = vpop.eup %13580  ;;  %v21726_v29 = vld [vmem:[#allocation160_spill] sm:$0xff]  ;;  %v21727_v62 = vld [vmem:[#allocation151_spill] sm:$0xff]  ;;  %13610 = vpow2.f32 %v9839_v57 }
 0x5f2   : > { %21713 = vst [vmem:[#allocation121_spill] sm:$0xff] %v19662_v49  ;;  %21714 = vst [vmem:[#allocation200_spill] sm:$0xff] %v19664_v32  ;;  %v19688_v32 = vadd.f32 %v21720_v46, %v21719_v33  ;;  %v21722_v49 = vld [vmem:[#allocation155_spill] sm:$0xff]  ;;  %v13583_v33 = vpop.eup %13582  ;;  %v8997_v46 = vadd.f32 1.0, %v13577_v56 }
 0x5f3   : > { %v19677_v2 = vpop.f32.mrf.mxu1  ;;  %21718 = vst [vmem:[#allocation125_spill] sm:$0xff] %v19684_v20  ;;  %v19692_v10 = vadd.f32 %v21722_v49, %v21721_v44  ;;  %v19703_v20 = vadd.f32 %v21727_v62, %v21726_v29  ;;  %v8762_v49 = vadd.f32 %v19458_v55, %v8392_v24  ;;  %v19707_v44 = vmul.f32 %v13563_v50, %v19349_v18  ;;  %v13585_v13 = vpop.eup %13584 }
 0x5f4   : > { %21715 = vst [vmem:[#allocation39_spill] sm:$0xff] %v19677_v2  ;;  %v21725_v2 = vld [vmem:[#allocation122_spill] sm:$0xff]  ;;  %v13587_v56 = vpop.eup %13586  ;;  %v19721_v18 = vmul.f32 %v19623_v30, %v19359_v22  ;;  %v19724_v55 = vmul.f32 %v13571_v11, %v19371_v31  ;;  %v19727_v50 = vmul.f32 %v13573_v7, %v19380_v38  ;;  %v8996_v24 = vadd.f32 1.0, %v13583_v33  ;;  %v19741_v11 = vpop.f32.mrf.mxu0 }
 0x5f5   : > { %v19695_v35 = vpop.f32.mrf.mxu1  ;;  %v19699_v19 = vadd.f32 %v21725_v2, %v21724_v25  ;;  %v19713_v2 = vadd.f32 %v19337_v5, %v8759_v8  ;;  %v8761_v25 = vadd.f32 %v19487_v41, %v8391_v1  ;;  %v13589_v34 = vpop.eup %13588  ;;  %v8394_v41 = vadd.f32 %v19453_v52, %v19531_v15 }
 0x5f6   : > { %21723 = vst [vmem:[#allocation72_spill] sm:$0xff] %v19695_v35  ;;  %v9838_v35 = vmul.f32 -1.442695, %v19672_v59  ;;  %v8393_v8 = vadd.f32 %v19465_v63, %v19542_v45  ;;  %v13591_v22 = vpop.eup %13590  ;;  %13612 = vrcp.f32 %v8997_v46  ;;  %v8999_v30 = vadd.f32 1.0, %v13585_v13 }
 0x5f7   : > { %v19716_v29 = vpop.f32.mrf.mxu1  ;;  %v19736_v31 = vadd.f32 %v19337_v5, %v8762_v49  ;;  %v19739_v38 = vmul.f32 %v13575_v27, %v19386_v47  ;;  %v13593_v7 = vpop.eup %13592  ;;  %v9840_v52 = vmul.f32 -1.442695, %v19713_v2  ;;  %v19745_v45 = vadd.f32 %v19337_v5, %v8761_v25  ;;  %v19755_v47 = vld [vmem:[%s20178_s7] ss:$0 sm:$0xff] }
 0x5f8   : > { %13614 = vpow2.f32 %v9838_v35  ;;  %v8396_v63 = vadd.f32 %v19480_v39, %v19556_v58  ;;  %v13595_v57 = vpop.eup %13594  ;;  %v8998_v62 = vadd.f32 1.0, %v13589_v34  ;;  %v19758_v27 = vmul.f32 %v13579_v6, %v19398_v61  ;;  %v21729_v49 = vld [vmem:[#allocation53_spill] sm:$0xff]  ;;  %v21730_v34 = vld [vmem:[#allocation59_spill] sm:$0xff] }
 0x5f9   : > { %v19733_v1 = vpop.f32.mrf.mxu1  ;;  %21728 = vst [vmem:[#allocation68_spill] sm:$0xff] %v19745_v45  ;;  %13616 = vpow2.f32 %v9841_v17  ;;  %v19761_v35 = vmul.f32 %v13581_v0, %v19405_v28  ;;  %v13597_v33 = vpop.eup %13596  ;;  %v8764_v39 = vadd.f32 %v19523_v16, %v8394_v41  ;;  %v8763_v58 = vadd.f32 %v19551_v26, %v8393_v8  ;;  %v21731_v6 = vld [vmem:[#allocation165_spill] sm:$0xff] }
 0x5fa   : > { %13618 = vrcp.f32 %v8996_v24  ;;  %v19766_v13 = vmul.f32 %v13587_v56, %v21729_v49  ;;  %v13599_v25 = vpop.eup %13598  ;;  %v9843_v17 = vmul.f32 -1.442695, %v19736_v31  ;;  %v19770_v61 = vmul.f32 %v13591_v22, %v21730_v34  ;;  %v19775_v24 = vpop.f32.mrf.mxu0  ;;  %v21732_v22 = vld [vmem:[#allocation31_spill] sm:$0xff] }
 0x5fb   : > { %v19749_v15 = vpop.f32.mrf.mxu1  ;;  %13620 = vrcp.f32 %v8999_v30  ;;  %v19773_v28 = vmul.f32 %v13593_v7, %v21731_v6  ;;  %v13601_v0 = vpop.eup %13600  ;;  %v9842_v16 = vmul.f32 -1.442695, %v19745_v45  ;;  %v8766_v26 = vadd.f32 %v19578_v23, %v8396_v63  ;;  %v21733_v34 = vld [vmem:[#allocation55_spill] sm:$0xff] }
 0x5fc   : > { %13622 = vpow2.f32 %v9840_v52  ;;  %v13603_v8 = vpop.eup %13602  ;;  %v9001_v30 = vadd.f32 1.0, %v13597_v33  ;;  %v8395_v49 = vadd.f32 %v21732_v22, %v19567_v42  ;;  %v19783_v7 = vmul.f32 %v13595_v57, %v21733_v34  ;;  %v21734_v22 = vld [vmem:[#allocation193_spill] sm:$0xff]  ;;  %v19797_v45 = vpop.f32.mrf.mxu0 }
 0x5fd   : > { %v13125_v46 = vpop.f32.mrf.mxu1  ;;  %13624 = vrcp.f32 %v8998_v62  ;;  %v19786_v6 = vadd.f32 %v19337_v5, %v8764_v39  ;;  %v19789_v52 = vadd.f32 %v19337_v5, %v8763_v58  ;;  %v13605_v62 = vpop.eup %13604  ;;  %v9000_v33 = vadd.f32 1.0, %v13601_v0 }
 0x5fe   : > { %v9269_v56 = vadd.f32 %v13125_v46, %v19755_v47  ;;  %13626 = vpow2.f32 %v9843_v17  ;;  %v19795_v57 = vmul.f32 %v13599_v25, %v21734_v22  ;;  %v13607_v34 = vpop.eup %13606  ;;  %v9003_v39 = vadd.f32 1.0, %v13603_v8 }
 0x5ff   : > { %v9263_v41 = vpop.f32.mrf.mxu1  ;;  %13628 = vpow2.f32 %v9842_v16  ;;  %v19800_v58 = vadd.f32 %v19337_v5, %v8766_v26  ;;  %v13609_v25 = vpop.eup %13608  ;;  %v8765_v0 = vadd.f32 %v19607_v14, %v8395_v49  ;;  %v9845_v8 = vmul.f32 -1.442695, %v19786_v6 }
 0x600   : > { %v9503_v23 = vadd.f32 %v9269_v56, %v19707_v44  ;;  %v9264_v63 = vadd.f32 %v19755_v47, %v9263_v41  ;;  %v21736_v56 = vld [vmem:[#allocation29_spill] sm:$0xff]  ;;  %13630 = vrcp.f32 %v9001_v30  ;;  %v13611_v22 = vpop.eup %13610  ;;  %v9002_v14 = vadd.f32 1.0, %v13607_v34  ;;  %v19822_v30 = vpop.f32.mrf.mxu0 }
 0x601   : > { %v13128_v46 = vpop.f32.mrf.mxu1  ;;  %21735 = vst [vmem:[#allocation60_spill] sm:$0xff] %v19800_v58  ;;  %v8398_v41 = vadd.f32 %v21736_v56, %v19571_v40  ;;  %13632 = vrcp.f32 %v9000_v33  ;;  %v19831_v34 = vadd.f32 %v19337_v5, %v8765_v0  ;;  %v21741_v0 = vld [vmem:[#allocation183_spill] sm:$0xff] }
 0x602   : > { %v9279_v42 = vadd.f32 %v13128_v46, %v19755_v47  ;;  %9551 = vst [vmem:[%s19804_s1 + $0x8] sm:$0xff] %v9503_v23  ;;  %v9502_v44 = vadd.f32 %v9264_v63, %v19721_v18  ;;  %v9844_v46 = vmul.f32 -1.442695, %v19789_v52  ;;  %v21737_v18 = vld [vmem:[#allocation148_spill] sm:$0xff]  ;;  %13634 = vrcp.f32 %v9003_v39 }
 0x603   : > { %v9273_v17 = vpop.f32.mrf.mxu1  ;;  %v19817_v63 = vmul.f32 %v13605_v62, %v21737_v18  ;;  %v13613_v49 = vpop.eup %13612  ;;  %13636 = vpow2.f32 %v9845_v8 }
 0x604   : > { %v9505_v16 = vadd.f32 %v9279_v42, %v19724_v55  ;;  %v9274_v26 = vadd.f32 %v19755_v47, %v9273_v17  ;;  %9550 = vst [vmem:[%s19804_s1] sm:$0xff] %v9502_v44  ;;  %v9847_v42 = vmul.f32 -1.442695, %v19800_v58  ;;  %v8397_v44 = vadd.f32 %v19533_v12, %v19583_v9  ;;  %v21738_v17 = vld [vmem:[#allocation82_spill] sm:$0xff]  ;;  %v21739_v12 = vld [vmem:[#allocation157_spill] sm:$0xff] }
 0x605   : > { %v13131_v23 = vpop.f32.mrf.mxu1  ;;  %v19828_v56 = vmul.f32 %v13609_v25, %v21738_v17  ;;  %v13615_v33 = vpop.eup %13614  ;;  %v8400_v9 = vadd.f32 %v21739_v12, %v19593_v36  ;;  %v21740_v25 = vld [vmem:[#allocation57_spill] sm:$0xff]  ;;  %13638 = vrcp.f32 %v9002_v14 }
 0x606   : > { %9553 = vst [vmem:[%s19804_s1 + $0x18] sm:$0xff] %v9505_v16  ;;  %v9504_v40 = vadd.f32 %v9274_v26, %v19727_v50  ;;  %v9289_v55 = vadd.f32 %v13131_v23, %v19755_v47  ;;  %v8768_v50 = vadd.f32 %v19640_v37, %v8398_v41  ;;  %v13617_v26 = vpop.eup %13616  ;;  %v9005_v23 = vadd.f32 1.0, %v13611_v22  ;;  %v19851_v22 = vpop.f32.mrf.mxu0 }
 0x607   : > { %v9283_v62 = vpop.f32.mrf.mxu1  ;;  %v8399_v18 = vadd.f32 %v21740_v25, %v19599_v21  ;;  %v19841_v58 = vpop.eup %13618  ;;  %v19847_v41 = vmul.f32 %v13613_v49, %v21741_v0  ;;  %v9004_v36 = vadd.f32 1.0, %v13615_v33  ;;  %13640 = vpow2.f32 %v9844_v46 }
 0x608   : > { %9552 = vst [vmem:[%s19804_s1 + $0x10] sm:$0xff] %v9504_v40  ;;  %v9507_v16 = vadd.f32 %v9289_v55, %v19739_v38  ;;  %v9284_v39 = vadd.f32 %v19755_v47, %v9283_v62  ;;  %v19849_v8 = vpop.eup %13620  ;;  %v8767_v21 = vadd.f32 %v19669_v54, %v8397_v44  ;;  %v21742_v40 = vld [vmem:[#allocation194_spill] sm:$0xff]  ;;  %13642 = vrcp.f32 %v9005_v23  ;;  %v13081_v25 = vpop.f32.mrf.mxu0 }
 0x609   : > { %v13134_v17 = vpop.f32.mrf.mxu1  ;;  %v8402_v55 = vadd.f32 %v21742_v40, %v19621_v48  ;;  %v13623_v62 = vpop.eup %13622  ;;  %v9846_v54 = vmul.f32 -1.442695, %v19831_v34  ;;  %v8770_v46 = vadd.f32 %v19709_v51, %v8400_v9  ;;  %v8769_v48 = vadd.f32 %v19741_v11, %v8399_v18 }
 0x60a   : > { %9555 = vst [vmem:[%s19804_s1 + $0x28] sm:$0xff] %v9507_v16  ;;  %v9506_v37 = vadd.f32 %v9284_v39, %v19758_v27  ;;  %v9299_v38 = vadd.f32 %v13134_v17, %v19755_v47  ;;  %v9007_v27 = vadd.f32 1.0, %v13617_v26  ;;  %v19857_v16 = vadd.f32 %v19337_v5, %v8768_v50  ;;  %v19862_v12 = vpop.eup %13624 }
 0x60b   : > { %v9293_v14 = vpop.f32.mrf.mxu1  ;;  %13644 = vpow2.f32 %v9847_v42  ;;  %v8401_v33 = vadd.f32 %v19585_v60, %v19628_v53  ;;  %v13627_v26 = vpop.eup %13626  ;;  %v9006_v23 = vadd.f32 1.0, %v13623_v62  ;;  %v19873_v17 = vadd.f32 %v19337_v5, %v8767_v21 }
 0x60c   : > { %9554 = vst [vmem:[%s19804_s1 + $0x20] sm:$0xff] %v9506_v37  ;;  %v9509_v49 = vadd.f32 %v9299_v38, %v19761_v35  ;;  %v9294_v39 = vadd.f32 %v19755_v47, %v9293_v14  ;;  %13646 = vrcp.f32 %v9004_v36  ;;  %v8772_v51 = vadd.f32 %v19775_v24, %v8402_v55  ;;  %v13629_v42 = vpop.eup %13628  ;;  %v21743_v24 = vld [vmem:[#allocation164_spill] sm:$0xff]  ;;  %v8696_v14 = vpop.f32.mrf.mxu0 }
 0x60d   : > { %v13137_v44 = vpop.f32.mrf.mxu1  ;;  %13648 = vrcp.f32 %v9007_v27  ;;  %v9849_v60 = vmul.f32 -1.442695, %v19857_v16  ;;  %v19881_v9 = vadd.f32 %v19337_v5, %v8770_v46  ;;  %v19884_v18 = vadd.f32 %v19337_v5, %v8769_v48  ;;  %v19888_v0 = vpop.eup %13630  ;;  %v21744_v27 = vld [vmem:[#allocation189_spill] sm:$0xff] }
 0x60e   : > { %9557 = vst [vmem:[%s19804_s1 + $0x38] sm:$0xff] %v9509_v49  ;;  %v9508_v35 = vadd.f32 %v9294_v39, %v19766_v13  ;;  %v9309_v50 = vadd.f32 %v13137_v44, %v19755_v47  ;;  %13650 = vpow2.f32 %v9846_v54  ;;  %v8404_v37 = vadd.f32 %v21743_v24, %v19638_v4  ;;  %v19894_v55 = vpop.eup %13632  ;;  %v21746_v46 = vld [vmem:[#allocation197_spill] sm:$0xff]  ;;  %v21748_v24 = vld [vmem:[#allocation56_spill] sm:$0xff] }
 0x60f   : > { %v9303_v11 = vpop.f32.mrf.mxu1  ;;  %v9009_v36 = vadd.f32 1.0, %v13627_v26  ;;  %v8771_v21 = vadd.f32 %v19797_v45, %v8401_v33  ;;  %13652 = vrcp.f32 %v9006_v23  ;;  %v9848_v62 = vmul.f32 -1.442695, %v19873_v17  ;;  %v19902_v45 = vpop.eup %13634 }
 0x610   : > { %9556 = vst [vmem:[%s19804_s1 + $0x30] sm:$0xff] %v9508_v35  ;;  %v9511_v53 = vadd.f32 %v9309_v50, %v19770_v61  ;;  %v9304_v13 = vadd.f32 %v19755_v47, %v9303_v11  ;;  %v19898_v4 = vadd.f32 %v19337_v5, %v8772_v51  ;;  %v8403_v49 = vadd.f32 %v21744_v27, %v19651_v43  ;;  %v13637_v23 = vpop.eup %13636 }
 0x611   : > { %v13140_v38 = vpop.f32.mrf.mxu1  ;;  %v9008_v54 = vadd.f32 1.0, %v13629_v42  ;;  %13654 = vpow2.f32 %v9849_v60  ;;  %v9851_v35 = vmul.f32 -1.442695, %v19881_v9  ;;  %v9850_v50 = vmul.f32 -1.442695, %v19884_v18  ;;  %v13084_v60 = vpop.f32.mrf.mxu0 }
 0x612   : > { %9559 = vst [vmem:[%s19804_s1 + $0x48] sm:$0xff] %v9511_v53  ;;  %v9510_v61 = vadd.f32 %v9304_v13, %v19773_v28  ;;  %v9319_v40 = vadd.f32 %v13140_v38, %v19755_v47  ;;  %v21745_v28 = vld [vmem:[#allocation81_spill] sm:$0xff]  ;;  %v8774_v43 = vadd.f32 %v19822_v30, %v8404_v37  ;;  %13656 = vrcp.f32 %v9009_v36  ;;  %v19918_v42 = vpop.eup %13638 }
 0x613   : > { %v9313_v39 = vpop.f32.mrf.mxu1  ;;  %v8406_v48 = vadd.f32 %v21746_v46, %v21745_v28  ;;  %v19913_v51 = vadd.f32 %v19337_v5, %v8771_v21  ;;  %13658 = vpow2.f32 %v9848_v62  ;;  %v9853_v53 = vmul.f32 -1.442695, %v19898_v4  ;;  %v21747_v13 = vld [vmem:[#allocation121_spill] sm:$0xff]  ;;  %v8706_v46 = vpop.f32.mrf.mxu0 }
 0x614   : > { %9558 = vst [vmem:[%s19804_s1 + $0x40] sm:$0xff] %v9510_v61  ;;  %v9513_v44 = vadd.f32 %v9319_v40, %v19783_v7  ;;  %v9314_v33 = vadd.f32 %v19755_v47, %v9313_v39  ;;  %v8773_v30 = vadd.f32 %v19851_v22, %v8403_v49  ;;  %v8405_v37 = vadd.f32 %v21748_v24, %v21747_v13  ;;  %v13641_v36 = vpop.eup %13640  ;;  %v21749_v22 = vld [vmem:[#allocation32_spill] sm:$0xff] }
 0x615   : > { %v13143_v26 = vpop.f32.mrf.mxu1  ;;  %13660 = vrcp.f32 %v9008_v54  ;;  %v8776_v21 = vadd.f32 %v13081_v25, %v8406_v48  ;;  %v9011_v40 = vadd.f32 1.0, %v13637_v23  ;;  %v19928_v62 = vadd.f32 %v19337_v5, %v8774_v43  ;;  %v19932_v39 = vpop.eup %13642 }
 0x616   : > { %9561 = vst [vmem:[%s19804_s1 + $0x58] sm:$0xff] %v9513_v44  ;;  %v9512_v11 = vadd.f32 %v9314_v33, %v19795_v57  ;;  %v9329_v7 = vadd.f32 %v13143_v26, %v19755_v47  ;;  %13662 = vpow2.f32 %v9851_v35  ;;  %v9140_v49 = vmul.f32 %v19841_v58, %v21749_v22  ;;  %v21750_v33 = vld [vmem:[#allocation125_spill] sm:$0xff]  ;;  %v21751_v58 = vld [vmem:[#allocation200_spill] sm:$0xff] }
 0x617   : > { %v9323_v38 = vpop.f32.mrf.mxu1  ;;  %13664 = vpow2.f32 %v9850_v50  ;;  %v9852_v25 = vmul.f32 -1.442695, %v19913_v51  ;;  %v19939_v48 = vadd.f32 %v19337_v5, %v8773_v30  ;;  %v8775_v44 = vadd.f32 %v8696_v14, %v8405_v37  ;;  %v21752_v30 = vld [vmem:[#allocation191_spill] sm:$0xff]  ;;  %v21753_v37 = vld [vmem:[#allocation161_spill] sm:$0xff] }
 0x618   : > { %9560 = vst [vmem:[%s19804_s1 + $0x50] sm:$0xff] %v9512_v11  ;;  %v9515_v57 = vadd.f32 %v9329_v7, %v19817_v63  ;;  %v9324_v61 = vadd.f32 %v19755_v47, %v9323_v38  ;;  %v13645_v28 = vpop.eup %13644  ;;  %13666 = vpow2.f32 %v9853_v53  ;;  %v8408_v35 = vadd.f32 %v21751_v58, %v21750_v33  ;;  %v13087_v53 = vpop.f32.mrf.mxu0  ;;  %v21756_v58 = vld [vmem:[#allocation28_spill] sm:$0xff] }
 0x619   : > { %v13146_v27 = vpop.f32.mrf.mxu1  ;;  %v19943_v26 = vpop.eup %13646  ;;  %v9010_v50 = vadd.f32 1.0, %v13641_v36  ;;  %v19946_v23 = vadd.f32 %v19337_v5, %v8776_v21  ;;  %13668 = vrcp.f32 %v9011_v40  ;;  %v9855_v14 = vmul.f32 -1.442695, %v19928_v62 }
 0x61a   : > { %9563 = vst [vmem:[%s19804_s1 + $0x68] sm:$0xff] %v9515_v57  ;;  %v9514_v63 = vadd.f32 %v9324_v61, %v19828_v56  ;;  %v9339_v54 = vadd.f32 %v13146_v27, %v19755_v47  ;;  %v19951_v7 = vpop.eup %13648  ;;  %v9143_v13 = vmul.f32 %v19849_v8, %v21752_v30  ;;  %v9142_v38 = vmul.f32 %v19862_v12, %v21753_v37  ;;  %v21754_v8 = vld [vmem:[#allocation39_spill] sm:$0xff]  ;;  %v8716_v33 = vpop.f32.mrf.mxu0 }
 0x61b   : > { %v9333_v43 = vpop.f32.mrf.mxu1  ;;  %v13651_v36 = vpop.eup %13650  ;;  %v9013_v21 = vadd.f32 1.0, %v13645_v28  ;;  %13670 = vpow2.f32 %v9852_v25  ;;  %v9854_v61 = vmul.f32 -1.442695, %v19939_v48  ;;  %v19962_v40 = vadd.f32 %v19337_v5, %v8775_v44  ;;  %v21755_v5 = vld [vmem:[#allocation58_spill] sm:$0xff] }
 0x61c   : > { %9562 = vst [vmem:[%s19804_s1 + $0x60] sm:$0xff] %v9514_v63  ;;  %v9517_v56 = vadd.f32 %v9339_v54, %v19847_v41  ;;  %v9334_v11 = vadd.f32 %v19755_v47, %v9333_v43  ;;  %v8778_v27 = vadd.f32 %v13084_v60, %v8408_v35  ;;  %v8407_v22 = vadd.f32 %v21754_v8, %v19688_v32  ;;  %v19966_v54 = vpop.eup %13652  ;;  %v21757_v43 = vld [vmem:[#allocation72_spill] sm:$0xff]  ;;  %v13090_v8 = vpop.f32.mrf.mxu0 }
 0x61d   : > { %v13149_v24 = vpop.f32.mrf.mxu1  ;;  %13672 = vrcp.f32 %v9010_v50  ;;  %v9857_v12 = vmul.f32 -1.442695, %v19946_v23  ;;  %v9012_v28 = vadd.f32 1.0, %v13651_v36  ;;  %v9145_v60 = vmul.f32 %v19888_v0, %v21755_v5  ;;  %v19985_v0 = vld [vmem:[%s20177_s6] ss:$0 sm:$0xff] }
 0x61e   : > { %9565 = vst [vmem:[%s19804_s1 + $0x78] sm:$0xff] %v9517_v56  ;;  %v9516_v41 = vadd.f32 %v9334_v11, %v9140_v49  ;;  %v9349_v57 = vadd.f32 %v13149_v24, %v19755_v47  ;;  %13674 = vpow2.f32 %v9855_v14  ;;  %v9144_v32 = vmul.f32 %v19894_v55, %v21756_v58  ;;  %v13655_v35 = vpop.eup %13654 }
 0x61f   : > { %v9343_v63 = vpop.f32.mrf.mxu1  ;;  %13676 = vrcp.f32 %v9013_v21  ;;  %v8410_v50 = vadd.f32 %v21757_v43, %v19692_v10  ;;  %v19979_v30 = vpop.eup %13656  ;;  %v9856_v14 = vmul.f32 -1.442695, %v19962_v40  ;;  %v19988_v55 = vadd.f32 %v19985_v0, %v8778_v27 }
 0x620   : > { %9564 = vst [vmem:[%s19804_s1 + $0x70] sm:$0xff] %v9516_v41  ;;  %v9519_v49 = vadd.f32 %v9349_v57, %v9143_v13  ;;  %v9344_v25 = vadd.f32 %v19755_v47, %v9343_v63  ;;  %13678 = vpow2.f32 %v9854_v61  ;;  %v8777_v13 = vadd.f32 %v8706_v46, %v8407_v22  ;;  %v13659_v10 = vpop.eup %13658  ;;  %v21758_v57 = vld [vmem:[#allocation140_spill] sm:$0xff]  ;;  %v21759_v61 = vld [vmem:[#allocation159_spill] sm:$0xff]  ;;  %v21760_v46 = vld [vmem:[#allocation137_spill] sm:$0xff] }
 0x621   : > { %v13152_v44 = vpop.f32.mrf.mxu1  ;;  %13680 = vpow2.f32 %v9857_v12  ;;  %v8409_v37 = vadd.f32 %v19716_v29, %v19699_v19  ;;  %v9015_v41 = vadd.f32 1.0, %v13655_v35  ;;  %v8041_v27 = vadd.f32 %v21759_v61, %v21758_v57 }
 0x622   : > { %9567 = vst [vmem:[%s19804_s1 + $0x88] sm:$0xff] %v9519_v49  ;;  %v9518_v56 = vadd.f32 %v9344_v25, %v9142_v38  ;;  %v9359_v11 = vadd.f32 %v13152_v44, %v19755_v47  ;;  %v19994_v21 = vpop.eup %13660  ;;  %13682 = vrcp.f32 %v9012_v28  ;;  %v9147_v22 = vmul.f32 %v19902_v45, %v21760_v46  ;;  %v21761_v44 = vld [vmem:[#allocation63_spill] sm:$0xff] }
 0x623   : > { %v9353_v24 = vpop.f32.mrf.mxu1  ;;  %v13663_v12 = vpop.eup %13662  ;;  %v8780_v49 = vadd.f32 %v13087_v53, %v8410_v50  ;;  %v8412_v19 = vadd.f32 %v19733_v1, %v19703_v20  ;;  %13684 = vpow2.f32 %v9856_v14  ;;  %v9859_v5 = vmul.f32 -1.442695, %v19988_v55 }
 0x624   : > { %9566 = vst [vmem:[%s19804_s1 + $0x80] sm:$0xff] %v9518_v56  ;;  %v9521_v38 = vadd.f32 %v9359_v11, %v9145_v60  ;;  %v9354_v36 = vadd.f32 %v19755_v47, %v9353_v24  ;;  %v13665_v28 = vpop.eup %13664  ;;  %v20006_v60 = vadd.f32 %v19985_v0, %v8777_v13  ;;  %v9146_v45 = vmul.f32 %v19918_v42, %v21761_v44  ;;  %v8726_v50 = vpop.f32.mrf.mxu0  ;;  %v21762_v56 = vld [vmem:[#allocation37_spill] sm:$0xff] }
 0x625   : > { %v13155_v63 = vpop.f32.mrf.mxu1  ;;  %v13667_v53 = vpop.eup %13666  ;;  %v8779_v35 = vadd.f32 %v8716_v33, %v8409_v37  ;;  %v8411_v20 = vadd.f32 %v19749_v15, %v8041_v27  ;;  %13686 = vrcp.f32 %v9015_v41  ;;  %v9014_v43 = vadd.f32 1.0, %v13659_v10 }
 0x626   : > { %9569 = vst [vmem:[%s19804_s1 + $0x98] sm:$0xff] %v9521_v38  ;;  %v9520_v29 = vadd.f32 %v9354_v36, %v9144_v32  ;;  %v9369_v25 = vadd.f32 %v13155_v63, %v19755_v47  ;;  %v9149_v11 = vmul.f32 %v19932_v39, %v21762_v56  ;;  %v13669_v13 = vpop.eup %13668  ;;  %v20016_v42 = vadd.f32 %v19985_v0, %v8780_v49 }
 0x627   : > { %v9363_v58 = vpop.f32.mrf.mxu1  ;;  %v8782_v24 = vadd.f32 %v13090_v8, %v8412_v19  ;;  %13688 = vpow2.f32 %v9859_v5  ;;  %v9858_v38 = vmul.f32 -1.442695, %v20006_v60  ;;  %v9148_v10 = vmul.f32 %v19943_v26, %v19672_v59 }
 0x628   : > { %9568 = vst [vmem:[%s19804_s1 + $0x90] sm:$0xff] %v9520_v29  ;;  %v9523_v1 = vadd.f32 %v9369_v25, %v9147_v22  ;;  %v9364_v32 = vadd.f32 %v19755_v47, %v9363_v58  ;;  %v13671_v37 = vpop.eup %13670  ;;  %v20024_v39 = vadd.f32 %v19985_v0, %v8779_v35  ;;  %v8781_v41 = vadd.f32 %v8726_v50, %v8411_v20  ;;  %v21763_v50 = vld [vmem:[#allocation68_spill] sm:$0xff] }
 0x629   : > { %v13158_v14 = vpop.f32.mrf.mxu1  ;;  %13690 = vrcp.f32 %v9014_v43  ;;  %v9017_v8 = vadd.f32 1.0, %v13663_v12  ;;  %v9151_v46 = vmul.f32 %v19951_v7, %v19680_v3  ;;  %v9861_v59 = vmul.f32 -1.442695, %v20016_v42 }
 0x62a   : > { %9571 = vst [vmem:[%s19804_s1 + $0xa8] sm:$0xff] %v9523_v1  ;;  %v9522_v33 = vadd.f32 %v9364_v32, %v9146_v45  ;;  %v9379_v15 = vadd.f32 %v13158_v14, %v19755_v47  ;;  %v13673_v27 = vpop.eup %13672  ;;  %v20032_v26 = vadd.f32 %v19985_v0, %v8782_v24  ;;  %v9016_v25 = vadd.f32 1.0, %v13665_v28 }
 0x62b   : > { %v9373_v36 = vpop.f32.mrf.mxu1  ;;  %v13675_v63 = vpop.eup %13674  ;;  %13692 = vpow2.f32 %v9858_v38  ;;  %v9150_v12 = vmul.f32 %v19966_v54, %v19713_v2  ;;  %v9860_v5 = vmul.f32 -1.442695, %v20024_v39  ;;  %v20040_v44 = vadd.f32 %v19985_v0, %v8781_v41 }
 0x62c   : > { %9570 = vst [vmem:[%s19804_s1 + $0xa0] sm:$0xff] %v9522_v33  ;;  %v9525_v57 = vadd.f32 %v9379_v15, %v9149_v11  ;;  %v9374_v61 = vadd.f32 %v19755_v47, %v9373_v36  ;;  %v13677_v29 = vpop.eup %13676  ;;  %13694 = vrcp.f32 %v9017_v8  ;;  %v9019_v20 = vadd.f32 1.0, %v13667_v53 }
 0x62d   : > { %v13161_v22 = vpop.f32.mrf.mxu1  ;;  %v13679_v7 = vpop.eup %13678  ;;  %v9153_v28 = vmul.f32 %v19979_v30, %v19736_v31  ;;  %13696 = vpow2.f32 %v9861_v59  ;;  %v9863_v1 = vmul.f32 -1.442695, %v20032_v26  ;;  %v9018_v43 = vadd.f32 1.0, %v13671_v37 }
 0x62e   : > { %9573 = vst [vmem:[%s19804_s1 + $0xb8] sm:$0xff] %v9525_v57  ;;  %v9524_v49 = vadd.f32 %v9374_v61, %v9148_v10  ;;  %v9389_v19 = vadd.f32 %v13161_v22, %v19755_v47  ;;  %v13681_v35 = vpop.eup %13680  ;;  %13698 = vrcp.f32 %v9016_v25  ;;  %v9152_v56 = vmul.f32 %v19994_v21, %v21763_v50 }
 0x62f   : > { %v9383_v3 = vpop.f32.mrf.mxu1  ;;  %v13683_v54 = vpop.eup %13682  ;;  %13700 = vpow2.f32 %v9860_v5  ;;  %v9862_v31 = vmul.f32 -1.442695, %v20040_v44  ;;  %v9155_v24 = vmul.f32 %v13669_v13, %v19786_v6  ;;  %v9021_v38 = vadd.f32 1.0, %v13675_v63  ;;  %v21764_v13 = vld [vmem:[#allocation60_spill] sm:$0xff] }
 0x630   : > { %9572 = vst [vmem:[%s19804_s1 + $0xb0] sm:$0xff] %v9524_v49  ;;  %v9527_v45 = vadd.f32 %v9389_v19, %v9151_v46  ;;  %v9384_v58 = vadd.f32 %v19755_v47, %v9383_v3  ;;  %v13685_v11 = vpop.eup %13684  ;;  %13702 = vrcp.f32 %v9019_v20  ;;  %v9020_v10 = vadd.f32 1.0, %v13679_v7 }
 0x631   : > { %v13164_v2 = vpop.f32.mrf.mxu1  ;;  %13704 = vpow2.f32 %v9863_v1  ;;  %v9154_v61 = vmul.f32 %v13673_v27, %v19789_v52  ;;  %v9157_v8 = vmul.f32 %v13677_v29, %v21764_v13  ;;  %v9023_v63 = vadd.f32 1.0, %v13681_v35 }
 0x632   : > { %9575 = vst [vmem:[%s19804_s1 + $0xc8] sm:$0xff] %v9527_v45  ;;  %v9526_v32 = vadd.f32 %v9384_v58, %v9150_v12  ;;  %v9399_v0 = vadd.f32 %v13164_v2, %v19755_v47  ;;  %v13687_v15 = vpop.eup %13686  ;;  %13706 = vrcp.f32 %v9018_v43  ;;  %v9022_v12 = vadd.f32 1.0, %v13685_v11 }
 0x633   : > { %v9393_v53 = vpop.f32.mrf.mxu1  ;;  %13708 = vpow2.f32 %v9862_v31  ;;  %v9156_v52 = vmul.f32 %v13683_v54, %v19831_v34  ;;  %v9159_v58 = vmul.f32 %v13687_v15, %v19857_v16 }
 0x634   : > { %9574 = vst [vmem:[%s19804_s1 + $0xc0] sm:$0xff] %v9526_v32  ;;  %v9529_v30 = vadd.f32 %v9399_v0, %v9153_v28  ;;  %v9394_v14 = vadd.f32 %v19755_v47, %v9393_v53  ;;  %v13689_v41 = vpop.eup %13688  ;;  %13710 = vrcp.f32 %v9021_v38 }
 0x635   : > { %v13167_v33 = vpop.f32.mrf.mxu1  ;;  %13712 = vrcp.f32 %v9020_v10  ;;  %v9025_v29 = vadd.f32 1.0, %v13689_v41 }
 0x636   : > { %9577 = vst [vmem:[%s19804_s1 + $0xd8] sm:$0xff] %v9529_v30  ;;  %v9528_v37 = vadd.f32 %v9394_v14, %v9152_v56  ;;  %v9409_v21 = vadd.f32 %v13167_v33, %v19755_v47  ;;  %v13691_v22 = vpop.eup %13690  ;;  %13714 = vrcp.f32 %v9023_v63 }
 0x637   : > { %v9403_v36 = vpop.f32.mrf.mxu1  ;;  %13716 = vrcp.f32 %v9022_v12  ;;  %v9158_v54 = vmul.f32 %v13691_v22, %v19873_v17 }
 0x638   : > { %9576 = vst [vmem:[%s19804_s1 + $0xd0] sm:$0xff] %v9528_v37  ;;  %v9531_v57 = vadd.f32 %v9409_v21, %v9155_v24  ;;  %v9404_v6 = vadd.f32 %v19755_v47, %v9403_v36  ;;  %v13693_v25 = vpop.eup %13692  ;;  %13718 = vrcp.f32 %v9025_v29 }
 0x639   : > { %v13170_v46 = vpop.f32.mrf.mxu1  ;;  %v13695_v5 = vpop.eup %13694  ;;  %v9024_v28 = vadd.f32 1.0, %v13693_v25 }
 0x63a   : > { %9579 = vst [vmem:[%s19804_s1 + $0xe8] sm:$0xff] %v9531_v57  ;;  %v9530_v59 = vadd.f32 %v9404_v6, %v9154_v61  ;;  %v9419_v49 = vadd.f32 %v13170_v46, %v19755_v47  ;;  %v13697_v20 = vpop.eup %13696  ;;  %v9161_v53 = vmul.f32 %v13695_v5, %v19881_v9 }
 0x63b   : > { %v9413_v19 = vpop.f32.mrf.mxu1  ;;  %v13699_v1 = vpop.eup %13698  ;;  %v9027_v16 = vadd.f32 1.0, %v13697_v20  ;;  %13720 = vrcp.f32 %v9024_v28 }
 0x63c   : > { %9578 = vst [vmem:[%s19804_s1 + $0xe0] sm:$0xff] %v9530_v59  ;;  %v9533_v3 = vadd.f32 %v9419_v49, %v9157_v8  ;;  %v9414_v27 = vadd.f32 %v19755_v47, %v9413_v19  ;;  %v13701_v0 = vpop.eup %13700  ;;  %v9160_v33 = vmul.f32 %v13699_v1, %v19884_v18 }
 0x63d   : > { %v13173_v7 = vpop.f32.mrf.mxu1  ;;  %v13703_v50 = vpop.eup %13702  ;;  %v9026_v17 = vadd.f32 1.0, %v13701_v0  ;;  %13722 = vrcp.f32 %v9027_v16 }
 0x63e   : > { %9581 = vst [vmem:[%s19804_s1 + $0xf8] sm:$0xff] %v9533_v3  ;;  %v9532_v45 = vadd.f32 %v9414_v27, %v9156_v52  ;;  %v9429_v35 = vadd.f32 %v13173_v7, %v19755_v47  ;;  %v13705_v31 = vpop.eup %13704  ;;  %v9163_v37 = vmul.f32 %v13703_v50, %v19898_v4 }
 0x63f   : > { %v9423_v2 = vpop.f32.mrf.mxu1  ;;  %v13707_v14 = vpop.eup %13706  ;;  %v9029_v9 = vadd.f32 1.0, %v13705_v31  ;;  %13724 = vrcp.f32 %v9026_v17 }
 0x640   : > { %9580 = vst [vmem:[%s19804_s1 + $0xf0] sm:$0xff] %v9532_v45  ;;  %v9535_v34 = vadd.f32 %v9429_v35, %v9159_v58  ;;  %v9424_v32 = vadd.f32 %v19755_v47, %v9423_v2  ;;  %v13709_v38 = vpop.eup %13708  ;;  %v9162_v57 = vmul.f32 %v13707_v14, %v19913_v51 }
 0x641   : > { %v13176_v43 = vpop.f32.mrf.mxu1  ;;  %v13711_v41 = vpop.eup %13710  ;;  %v9028_v6 = vadd.f32 1.0, %v13709_v38  ;;  %13726 = vrcp.f32 %v9029_v9 }
 0x642   : > { %9583 = vst [vmem:[%s19804_s1 + $0x108] sm:$0xff] %v9535_v34  ;;  %v9534_v56 = vadd.f32 %v9424_v32, %v9158_v54  ;;  %v9439_v11 = vadd.f32 %v13176_v43, %v19755_v47  ;;  %v13713_v18 = vpop.eup %13712  ;;  %v9165_v22 = vmul.f32 %v13711_v41, %v19928_v62 }
 0x643   : > { %v9433_v30 = vpop.f32.mrf.mxu1  ;;  %v13715_v59 = vpop.eup %13714  ;;  %13728 = vrcp.f32 %v9028_v6  ;;  %v9164_v19 = vmul.f32 %v13713_v18, %v19939_v48 }
 0x644   : > { %9582 = vst [vmem:[%s19804_s1 + $0x100] sm:$0xff] %v9534_v56  ;;  %v9537_v24 = vadd.f32 %v9439_v11, %v9161_v53  ;;  %v9434_v15 = vadd.f32 %v19755_v47, %v9433_v30  ;;  %v13717_v12 = vpop.eup %13716  ;;  %v9167_v62 = vmul.f32 %v13715_v59, %v19946_v23 }
 0x645   : > { %v13179_v21 = vpop.f32.mrf.mxu1  ;;  %v13719_v52 = vpop.eup %13718  ;;  %v9166_v48 = vmul.f32 %v13717_v12, %v19962_v40 }
 0x646   : > { %9585 = vst [vmem:[%s19804_s1 + $0x118] sm:$0xff] %v9537_v24  ;;  %v9536_v10 = vadd.f32 %v9434_v15, %v9160_v33  ;;  %v9449_v36 = vadd.f32 %v13179_v21, %v19755_v47  ;;  %v9169_v28 = vmul.f32 %v13719_v52, %v19988_v55 }
 0x647   : > { %v9443_v61 = vpop.f32.mrf.mxu1 }
 0x648   : > { %9584 = vst [vmem:[%s19804_s1 + $0x110] sm:$0xff] %v9536_v10  ;;  %v9539_v13 = vadd.f32 %v9449_v36, %v9163_v37  ;;  %v9444_v4 = vadd.f32 %v19755_v47, %v9443_v61  ;;  %v13721_v5 = vpop.eup %13720 }
 0x649   : > { %v13182_v8 = vpop.f32.mrf.mxu1  ;;  %v9168_v54 = vmul.f32 %v13721_v5, %v20006_v60 }
 0x64a   : > { %9587 = vst [vmem:[%s19804_s1 + $0x128] sm:$0xff] %v9539_v13  ;;  %v9538_v46 = vadd.f32 %v9444_v4, %v9162_v57  ;;  %v9459_v63 = vadd.f32 %v13182_v8, %v19755_v47  ;;  %v13723_v23 = vpop.eup %13722 }
 0x64b   : > { %v9453_v51 = vpop.f32.mrf.mxu1  ;;  %v9171_v50 = vmul.f32 %v13723_v23, %v20016_v42 }
 0x64c   : > { %9586 = vst [vmem:[%s19804_s1 + $0x120] sm:$0xff] %v9538_v46  ;;  %v9541_v49 = vadd.f32 %v9459_v63, %v9165_v22  ;;  %v9454_v25 = vadd.f32 %v19755_v47, %v9453_v51  ;;  %v13725_v40 = vpop.eup %13724 }
 0x64d   : > { %v13185_v3 = vpop.f32.mrf.mxu1  ;;  %v9170_v60 = vmul.f32 %v13725_v40, %v20024_v39 }
 0x64e   : > { %9589 = vst [vmem:[%s19804_s1 + $0x138] sm:$0xff] %v9541_v49  ;;  %v9540_v27 = vadd.f32 %v9454_v25, %v9164_v19  ;;  %v9469_v29 = vadd.f32 %v13185_v3, %v19755_v47  ;;  %v13727_v16 = vpop.eup %13726 }
 0x64f   : > { %v9463_v7 = vpop.f32.mrf.mxu1  ;;  %v9173_v14 = vmul.f32 %v13727_v16, %v20032_v26 }
 0x650   : > { %9588 = vst [vmem:[%s19804_s1 + $0x130] sm:$0xff] %v9540_v27  ;;  %v9543_v45 = vadd.f32 %v9469_v29, %v9167_v62  ;;  %v9464_v58 = vadd.f32 %v19755_v47, %v9463_v7  ;;  %v13729_v31 = vpop.eup %13728 }
 0x651   : > { %v13188_v35 = vpop.f32.mrf.mxu1  ;;  %v9172_v39 = vmul.f32 %v13729_v31, %v20040_v44 }
 0x652   : > { %9591 = vst [vmem:[%s19804_s1 + $0x148] sm:$0xff] %v9543_v45  ;;  %v9542_v20 = vadd.f32 %v9464_v58, %v9166_v48  ;;  %v9479_v2 = vadd.f32 %v13188_v35, %v19755_v47 }
 0x653   : > { %v9473_v1 = vpop.f32.mrf.mxu1 }
 0x654   : > { %9590 = vst [vmem:[%s19804_s1 + $0x140] sm:$0xff] %v9542_v20  ;;  %v9545_v34 = vadd.f32 %v9479_v2, %v9169_v28  ;;  %v9474_v32 = vadd.f32 %v19755_v47, %v9473_v1 }
 0x655   : > { %v13191_v0 = vpop.f32.mrf.mxu1 }
 0x656   : > { %9593 = vst [vmem:[%s19804_s1 + $0x158] sm:$0xff] %v9545_v34  ;;  %v9544_v43 = vadd.f32 %v9474_v32, %v9168_v54  ;;  %v9489_v55 = vadd.f32 %v13191_v0, %v19755_v47 }
 0x657   : > { %v9483_v56 = vpop.f32.mrf.mxu1 }
 0x658   : > { %9592 = vst [vmem:[%s19804_s1 + $0x150] sm:$0xff] %v9544_v43  ;;  %v9547_v53 = vadd.f32 %v9489_v55, %v9171_v50  ;;  %v9484_v11 = vadd.f32 %v19755_v47, %v9483_v56 }
 0x659   : > { %v13194_v30 = vpop.f32.mrf.mxu1 }
 0x65a   : > { %9595 = vst [vmem:[%s19804_s1 + $0x168] sm:$0xff] %v9547_v53  ;;  %v9546_v42 = vadd.f32 %v9484_v11, %v9170_v60  ;;  %v9499_v17 = vadd.f32 %v13194_v30, %v19755_v47 }
 0x65b   : > { %v9493_v24 = vpop.f32.mrf.mxu1 }
 0x65c   : > { %9594 = vst [vmem:[%s19804_s1 + $0x160] sm:$0xff] %v9546_v42  ;;  %v9549_v33 = vadd.f32 %v9499_v17, %v9173_v14  ;;  %v9494_v15 = vadd.f32 %v19755_v47, %v9493_v24 }
 0x65e   : > { %9597 = vst [vmem:[%s19804_s1 + $0x178] sm:$0xff] %v9549_v33  ;;  %v9548_v38 = vadd.f32 %v9494_v15, %v9172_v39 }
 0x660   : > { %9596 = vst [vmem:[%s19804_s1 + $0x170] sm:$0xff] %v9548_v38 }
 0x661   : > { %14028 = shalt.err (!%p14025_p7)
}
 0x662   : > { %s14029_s24 = scalar_lea.hbm %s20119_s30, 6144  ;;  %s14033_s18 = scalar_lea.hbm %s20179_s8, 12288 }
 0x663   : > { %p14030_p6 = scmp.ne.s32.totalorder %s20119_s30, %s14029_s24  ;;  %p14034_p0 = scmp.lt.s32.totalorder %s20119_s30, %s20179_s8 }
 0x664   : > { %p14035_p3 = scmp.lt.s32.totalorder %s14033_s18, %s14029_s24 }
 0x665   : > { %p14031_p12 = pnand %p14030_p6, %p14269_p13 }
 0x666   : > { %p14036_p1 = por %p14035_p3, %p14034_p0 }
 0x667   : > { %p14032_p9 = pneg %p14031_p12 }
 0x669   : > { %p14037_p4 = pnand %p14036_p1, %p14032_p9 }
 0x66b   : > { %14040 = shalt.err (!%p14037_p4)
}
 0x66c   : > { %s14113_s26 = smov 128   ;;  %s14114_s9 = smov 8  }
 0x66d   : > { %13246 = dma.vmem_to_hbm [thread:$0]  (%p14269_p13), %s20122_s20, 6144, %s20119_s30, %s9599_s13, %s14113_s26, %s14113_s26, %s14114_s9  }
 0x66e PF: > { %s21765_s10 = sld [smem:[#allocation17_spill]]  ;;  %s9629_s2 = sand.u32 1, %s14083_s27  }
 0x66f   : > { %p21766_p8 = scmp.ne.s32.totalorder %s20460_s16, 0  ;;  %s9630_s3 = scalar_lea.sflag [#allocation5], %s9629_s2 }
 0x674   : > { %p21767_p5 = scmp.ge.s32.totalorder %s21765_s10, 2 }
 0x676   : > { %p13263_p11 = pnand %p21767_p5, %p21766_p8 }
 0x678   : > { %p13264_p2 = pneg %p13263_p11 }
 0x67a   : > { %14078 = dma.done.wait (%p13264_p2), %s9630_s3, 6144  }
 0x67b   : > { %14080 = vsyncadd (%p13264_p2), %s9630_s3, 4294961152  ;;  %s26_s10 = sadd.s32 1, %s21765_s10   ;;  %s21768_s30 = sld [smem:[#allocation16_spill]] }
 0x67c   : > { %p23_p10 = scmp.ge.s32.totalorder %s26_s10, 4   ;;  %s21769_s9 = sld [smem:[#allocation18_spill]] }
 0x67d   : > { %s21770_s27 = smov %s14087_s28  ;;  %s21771_s28 = smov %s14091_s29 }
 0x67e   : > { %s21772_s29 = smov %s14285_s14  ;;  %25 = sbr.rel (!%p23_p10) target bundleno = 12 (0xc), region = 137 }
 0x683   :  { %9635 = vsyncpa [#allocation4], 1 }
 0x684   :  { %9637 = vsyncpa [#allocation4 + $0x1], 1 }
 0x685   :  { %9638 = vsyncpa [#allocation7], 1 }
 0x686   :  { %9639 = vsyncpa [#allocation10], 1 }
 0x687   :  { %9640 = vsyncpa [#allocation5], 1 }
 0x688   :  { %9642 = vsyncpa [#allocation5 + $0x1], 1 }

</bundles_post_ra>
